<compile_context>
chip_gen: v7x
topology: tpu7x:2x2x1
jax: 0.10.0
libtpu: 0.0.40
codegen_flags: <defaults>
</compile_context>

<pallas_src>
import jax
import jax.numpy as jnp
from jax.experimental import pallas as pl
from jax.experimental.pallas import tpu as pltpu

C_IN = 512
C_OUT = 512
KH = KW = 3
NUM_ANCHOR = 9                  # configer.get('rpn', 'num_anchor_list') == [9]
LOC_CH = NUM_ANCHOR * 4         # 36
SCO_CH = NUM_ANCHOR * 2         # 18
HEAD_CH = 64                    # loc(36) + score(18) + zero pad(10)


def _make_rpn_kernel(w_pad, rows_out):
    """w_pad = W + 2 ; rows_out = TH * (W + 2) accumulator rows per tile."""

    def kernel(xt_ref, w1_ref, b1_ref, wh_ref, bh_ref, h_ref, head_ref):
        # xt_ref  : ((TH+3)*(W+2), Cin)  bf16  flattened padded row band
        # w1_ref  : (9*Cin, Cout)        bf16  rows ordered (ky, kx, ci)
        # b1_ref  : (1, Cout)            f32
        # wh_ref  : (Cin, 64)            bf16  fused loc|score|pad head weight
        # bh_ref  : (1, 64)              f32
        # h_ref   : (TH*(W+2), Cout)     relu(conv1) in padded-width row space
        # head_ref: (TH*(W+2), 64)
        c_in = w1_ref.shape[0] // (KH * KW)

        # 3x3 conv as 9 row-offset matmuls on the flattened tile (f32 acc).
        acc = jnp.zeros((rows_out, C_OUT), jnp.float32)
        for ky in range(KH):
            for kx in range(KW):
                k = ky * KW + kx
                lhs = xt_ref[pl.ds(ky * w_pad + kx, rows_out), :]
                rhs = w1_ref[pl.ds(k * c_in, c_in), :]
                acc = acc + jnp.dot(lhs, rhs, preferred_element_type=jnp.float32)

        h = jnp.maximum(acc + b1_ref[...], 0.0)          # bias + ReLU
        h_ref[...] = h.astype(h_ref.dtype)

        # Fused 1x1 detection heads (single matmul, split in the wrapper).
        head = jnp.dot(h.astype(jnp.bfloat16), wh_ref[...],
                       preferred_element_type=jnp.float32) + bh_ref[...]
        head_ref[...] = head.astype(head_ref.dtype)

    return kernel


def naive_rpn_forward(x_nchw, params, tile_rows=None):
    N, C, H, W = x_nchw.shape
    assert C == C_IN
    w_pad = W + 2

    # Row-tile size: target >= 512 matmul rows per tile (MXU friendly), >= 8.
    if tile_rows is None:
        tile_rows = max(8, 512 // max(W, 1))
    th = min(tile_rows, H)
    n_tiles = pl.cdiv(H, th)
    rows_out = th * w_pad                  # accumulator rows per tile
    rows_in = (th + 3) * w_pad             # flattened input rows per tile

    # ---- wrapper prep: NCHW->NHWC, bf16, zero pad, overlapped halo row-tiles.
    x_nhwc = jnp.transpose(x_nchw, (0, 2, 3, 1)).astype(jnp.bfloat16)
    pad_bottom = n_tiles * th - H + 2      # 1 halo row + tile alignment + 1 slack
    x_padded = jnp.pad(x_nhwc, ((0, 0), (1, pad_bottom), (1, 1), (0, 0)))
    x_tiles = jnp.stack(
        [x_padded[:, i * th:i * th + th + 3] for i in range(n_tiles)], axis=1)
    x_tiles = x_tiles.reshape(N, n_tiles, rows_in, C_IN)

    # conv1 weight (Cout, Cin, 3, 3) -> (ky, kx, Cin, Cout) -> (9*Cin, Cout)
    w1 = jnp.transpose(params['conv1_w'], (2, 3, 1, 0))
    w1 = w1.reshape(KH * KW * C_IN, C_OUT).astype(jnp.bfloat16)
    b1 = params['conv1_b'].reshape(1, C_OUT).astype(jnp.float32)
    # Fused 1x1 heads: (Cin, 64) = [loc(36) | score(18) | zeros(10)]
    w_head = jnp.concatenate(
        [params['loc_w'].reshape(LOC_CH, C_IN),
         params['score_w'].reshape(SCO_CH, C_IN),
         jnp.zeros((HEAD_CH - LOC_CH - SCO_CH, C_IN), jnp.float32)],
        axis=0).T.astype(jnp.bfloat16)
    b_head = jnp.concatenate(
        [params['loc_b'], params['score_b'],
         jnp.zeros((HEAD_CH - LOC_CH - SCO_CH,), jnp.float32)]
    ).reshape(1, HEAD_CH).astype(jnp.float32)

    out_dtype = x_nchw.dtype
    out_shapes = (
        jax.ShapeDtypeStruct((N, n_tiles, rows_out, C_OUT), out_dtype),
        jax.ShapeDtypeStruct((N, n_tiles, rows_out, HEAD_CH), out_dtype),
    )
    grid_spec = pltpu.PrefetchScalarGridSpec(
        num_scalar_prefetch=0,
        grid=(N, n_tiles),
        in_specs=[
            pl.BlockSpec((None, None, rows_in, C_IN), lambda n, i: (n, i, 0, 0)),
            pl.BlockSpec((KH * KW * C_IN, C_OUT), lambda n, i: (0, 0)),
            pl.BlockSpec((1, C_OUT), lambda n, i: (0, 0)),
            pl.BlockSpec((C_IN, HEAD_CH), lambda n, i: (0, 0)),
            pl.BlockSpec((1, HEAD_CH), lambda n, i: (0, 0)),
        ],
        out_specs=[
            pl.BlockSpec((None, None, rows_out, C_OUT), lambda n, i: (n, i, 0, 0)),
            pl.BlockSpec((None, None, rows_out, HEAD_CH), lambda n, i: (n, i, 0, 0)),
        ],
    )
    h_flat, head_flat = pl.pallas_call(
        _make_rpn_kernel(w_pad, rows_out),
        out_shape=out_shapes,
        grid_spec=grid_spec,
        compiler_params=pltpu.CompilerParams(
            dimension_semantics=("parallel", "parallel"),
            vmem_limit_bytes=48 << 20),
    )(x_tiles, w1, b1, w_head, b_head)

    # ---- wrapper post: crop pad rows/cols, split heads, PyTorch-style views.
    h_nhwc = h_flat.reshape(N, n_tiles * th, w_pad, C_OUT)[:, :H, :W, :]
    h_nchw = jnp.transpose(h_nhwc, (0, 3, 1, 2))
    head = head_flat.reshape(N, n_tiles * th, w_pad, HEAD_CH)[:, :H, :W, :]
    rpn_locs = head[..., :LOC_CH].reshape(N, H * W * NUM_ANCHOR, 4)
    rpn_scores = head[..., LOC_CH:LOC_CH + SCO_CH].reshape(N, H * W * NUM_ANCHOR, 2)
    return [h_nchw], rpn_locs, rpn_scores


def _reference_forward(x_nchw, params):
    """Pure-JAX f32 reference (mirrors the PyTorch module) for validation."""
    dn = jax.lax.conv_dimension_numbers(x_nchw.shape, params['conv1_w'].shape,
                                        ('NCHW', 'OIHW', 'NCHW'))
    h = jax.lax.conv_general_dilated(x_nchw, params['conv1_w'], (1, 1),
                                     ((1, 1), (1, 1)), dimension_numbers=dn)
    h = jax.nn.relu(h + params['conv1_b'][None, :, None, None])
    loc = jax.lax.conv_general_dilated(h, params['loc_w'], (1, 1), ((0, 0), (0, 0)),
                                       dimension_numbers=dn)
    loc = loc + params['loc_b'][None, :, None, None]
    sco = jax.lax.conv_general_dilated(h, params['score_w'], (1, 1), ((0, 0), (0, 0)),
                                       dimension_numbers=dn)
    sco = sco + params['score_b'][None, :, None, None]
    N = x_nchw.shape[0]
    rpn_locs = jnp.transpose(loc, (0, 2, 3, 1)).reshape(N, -1, 4)
    rpn_scores = jnp.transpose(sco, (0, 2, 3, 1)).reshape(N, -1, 2)
    return [h], rpn_locs, rpn_scores


def _check(x, params, tol, tile_rows=None):
    fwd = jax.jit(lambda a, p: naive_rpn_forward(a, p, tile_rows=tile_rows))
    h_list, locs, scores = fwd(x, params)
    jax.block_until_ready((h_list[0], locs, scores))
    h_ref_list, locs_ref, scores_ref = _reference_forward(x, params)
    N, _, H, W = x.shape
    assert h_list[0].shape == (N, C_OUT, H, W)
    assert locs.shape == (N, H * W * NUM_ANCHOR, 4)
    assert scores.shape == (N, H * W * NUM_ANCHOR, 2)
    # bf16 MXU inputs with f32 accumulation -> small deviation from f32 ref.
    assert jnp.allclose(h_list[0], h_ref_list[0], rtol=tol, atol=tol)
    assert jnp.allclose(locs, locs_ref, rtol=tol, atol=tol)
    assert jnp.allclose(scores, scores_ref, rtol=tol, atol=tol)


if __name__ == "__main__":
    key = jax.random.PRNGKey(0)
    k_x, k1, k2, k3, k_x2 = jax.random.split(key, 5)

    # Channel count 512 is fixed by the module; spatial/batch kept small.
    N, H, W = 2, 8, 8
    x = jax.random.normal(k_x, (N, C_IN, H, W), jnp.float32)

    # m.weight.data.normal_(0, 0.01); m.bias.data.zero_()
    params = {
        'conv1_w': 0.01 * jax.random.normal(k1, (C_OUT, C_IN, KH, KW), jnp.float32),
        'conv1_b': jnp.zeros((C_OUT,), jnp.float32),
        'loc_w':   0.01 * jax.random.normal(k2, (LOC_CH, C_IN, 1, 1), jnp.float32),
        'loc_b':   jnp.zeros((LOC_CH,), jnp.float32),
        'score_w': 0.01 * jax.random.normal(k3, (SCO_CH, C_IN, 1, 1), jnp.float32),
        'score_b': jnp.zeros((SCO_CH,), jnp.float32),
    }

    # Single-tile path (whole 8x8 map in one row band).
    _check(x, params, tol=2e-2)

    # Multi-tile path: H=16 with tile_rows=8 -> grid (1, 2) row tiles + halos.
    x2 = jax.random.normal(k_x2, (1, C_IN, 16, W), jnp.float32)
    _check(x2, params, tol=2e-2, tile_rows=8)

    print("KERNEL_OK")
</pallas_src>

<mosaic_0001>
module attributes {stable_mosaic.version = 11 : i64} {
  func.func @kernel(%arg0: i32, %arg1: i32, %arg2: memref<1x1x110x512xbf16, #tpu.memory_space<vmem>>, %arg3: memref<4608x512xbf16, #tpu.memory_space<vmem>>, %arg4: memref<1x512xf32, #tpu.memory_space<vmem>>, %arg5: memref<512x64xbf16, #tpu.memory_space<vmem>>, %arg6: memref<1x64xf32, #tpu.memory_space<vmem>>, %arg7: memref<1x1x80x512xf32, #tpu.memory_space<vmem>>, %arg8: memref<1x1x80x64xf32, #tpu.memory_space<vmem>>) attributes {dimension_semantics = [#tpu.dimension_semantics<parallel>, #tpu.dimension_semantics<parallel>], iteration_bounds = array<i64: 2, 1>, scalar_prefetch = 0 : i64, scratch_operands = 0 : i64, tpu.core_type = #tpu.core_type<tc>, window_params = [{transform_indices = @transform_0, window_bounds = array<i64: 1, 1, 110, 512>}, {pipeline_mode = #tpu.pipeline_mode<synchronous>, transform_indices = @transform_1, window_bounds = array<i64: 4608, 512>}, {pipeline_mode = #tpu.pipeline_mode<synchronous>, transform_indices = @transform_2, window_bounds = array<i64: 1, 512>}, {pipeline_mode = #tpu.pipeline_mode<synchronous>, transform_indices = @transform_3, window_bounds = array<i64: 512, 64>}, {pipeline_mode = #tpu.pipeline_mode<synchronous>, transform_indices = @transform_4, window_bounds = array<i64: 1, 64>}, {transform_indices = @transform_5, window_bounds = array<i64: 1, 1, 80, 512>}, {transform_indices = @transform_6, window_bounds = array<i64: 1, 1, 80, 64>}]} {
    %cst = arith.constant 0.000000e+00 : f32
    %0 = vector.broadcast %cst : f32 to vector<80x512xf32>
    %c0 = arith.constant 0 : index
    %c0_0 = arith.constant 0 : index
    %c0_1 = arith.constant 0 : index
    %c0_2 = arith.constant 0 : index
    %1 = vector.load %arg2[%c0, %c0_0, %c0_1, %c0_2] : memref<1x1x110x512xbf16, #tpu.memory_space<vmem>>, vector<1x1x80x512xbf16>
    %2 = vector.shape_cast %1 : vector<1x1x80x512xbf16> to vector<80x512xbf16>
    %c0_3 = arith.constant 0 : index
    %c0_4 = arith.constant 0 : index
    %3 = vector.load %arg3[%c0_3, %c0_4] : memref<4608x512xbf16, #tpu.memory_space<vmem>>, vector<512x512xbf16>
    %cst_5 = arith.constant dense<0.000000e+00> : vector<80x512xf32>
    %4 = tpu.matmul %2, %3, %cst_5 {dimension_numbers = #tpu.dot_dimension_numbers<[1], [0], [0], [1], [0, 0, 1, 1], [], []>} : vector<80x512xbf16>, vector<512x512xbf16>, vector<80x512xf32> -> vector<80x512xf32>
    %5 = arith.addf %0, %4 : vector<80x512xf32>
    %c0_6 = arith.constant 0 : index
    %c0_7 = arith.constant 0 : index
    %c1 = arith.constant 1 : index
    %c0_8 = arith.constant 0 : index
    %6 = vector.load %arg2[%c0_6, %c0_7, %c1, %c0_8] : memref<1x1x110x512xbf16, #tpu.memory_space<vmem>>, vector<1x1x80x512xbf16>
    %7 = vector.shape_cast %6 : vector<1x1x80x512xbf16> to vector<80x512xbf16>
    %c512 = arith.constant 512 : index
    %c0_9 = arith.constant 0 : index
    %8 = vector.load %arg3[%c512, %c0_9] : memref<4608x512xbf16, #tpu.memory_space<vmem>>, vector<512x512xbf16>
    %cst_10 = arith.constant dense<0.000000e+00> : vector<80x512xf32>
    %9 = tpu.matmul %7, %8, %cst_10 {dimension_numbers = #tpu.dot_dimension_numbers<[1], [0], [0], [1], [0, 0, 1, 1], [], []>} : vector<80x512xbf16>, vector<512x512xbf16>, vector<80x512xf32> -> vector<80x512xf32>
    %10 = arith.addf %5, %9 : vector<80x512xf32>
    %c0_11 = arith.constant 0 : index
    %c0_12 = arith.constant 0 : index
    %c2 = arith.constant 2 : index
    %c0_13 = arith.constant 0 : index
    %11 = vector.load %arg2[%c0_11, %c0_12, %c2, %c0_13] : memref<1x1x110x512xbf16, #tpu.memory_space<vmem>>, vector<1x1x80x512xbf16>
    %12 = vector.shape_cast %11 : vector<1x1x80x512xbf16> to vector<80x512xbf16>
    %c1024 = arith.constant 1024 : index
    %c0_14 = arith.constant 0 : index
    %13 = vector.load %arg3[%c1024, %c0_14] : memref<4608x512xbf16, #tpu.memory_space<vmem>>, vector<512x512xbf16>
    %cst_15 = arith.constant dense<0.000000e+00> : vector<80x512xf32>
    %14 = tpu.matmul %12, %13, %cst_15 {dimension_numbers = #tpu.dot_dimension_numbers<[1], [0], [0], [1], [0, 0, 1, 1], [], []>} : vector<80x512xbf16>, vector<512x512xbf16>, vector<80x512xf32> -> vector<80x512xf32>
    %15 = arith.addf %10, %14 : vector<80x512xf32>
    %c0_16 = arith.constant 0 : index
    %c0_17 = arith.constant 0 : index
    %c10 = arith.constant 10 : index
    %c0_18 = arith.constant 0 : index
    %16 = vector.load %arg2[%c0_16, %c0_17, %c10, %c0_18] : memref<1x1x110x512xbf16, #tpu.memory_space<vmem>>, vector<1x1x80x512xbf16>
    %17 = vector.shape_cast %16 : vector<1x1x80x512xbf16> to vector<80x512xbf16>
    %c1536 = arith.constant 1536 : index
    %c0_19 = arith.constant 0 : index
    %18 = vector.load %arg3[%c1536, %c0_19] : memref<4608x512xbf16, #tpu.memory_space<vmem>>, vector<512x512xbf16>
    %cst_20 = arith.constant dense<0.000000e+00> : vector<80x512xf32>
    %19 = tpu.matmul %17, %18, %cst_20 {dimension_numbers = #tpu.dot_dimension_numbers<[1], [0], [0], [1], [0, 0, 1, 1], [], []>} : vector<80x512xbf16>, vector<512x512xbf16>, vector<80x512xf32> -> vector<80x512xf32>
    %20 = arith.addf %15, %19 : vector<80x512xf32>
    %c0_21 = arith.constant 0 : index
    %c0_22 = arith.constant 0 : index
    %c11 = arith.constant 11 : index
    %c0_23 = arith.constant 0 : index
    %21 = vector.load %arg2[%c0_21, %c0_22, %c11, %c0_23] : memref<1x1x110x512xbf16, #tpu.memory_space<vmem>>, vector<1x1x80x512xbf16>
    %22 = vector.shape_cast %21 : vector<1x1x80x512xbf16> to vector<80x512xbf16>
    %c2048 = arith.constant 2048 : index
    %c0_24 = arith.constant 0 : index
    %23 = vector.load %arg3[%c2048, %c0_24] : memref<4608x512xbf16, #tpu.memory_space<vmem>>, vector<512x512xbf16>
    %cst_25 = arith.constant dense<0.000000e+00> : vector<80x512xf32>
    %24 = tpu.matmul %22, %23, %cst_25 {dimension_numbers = #tpu.dot_dimension_numbers<[1], [0], [0], [1], [0, 0, 1, 1], [], []>} : vector<80x512xbf16>, vector<512x512xbf16>, vector<80x512xf32> -> vector<80x512xf32>
    %25 = arith.addf %20, %24 : vector<80x512xf32>
    %c0_26 = arith.constant 0 : index
    %c0_27 = arith.constant 0 : index
    %c12 = arith.constant 12 : index
    %c0_28 = arith.constant 0 : index
    %26 = vector.load %arg2[%c0_26, %c0_27, %c12, %c0_28] : memref<1x1x110x512xbf16, #tpu.memory_space<vmem>>, vector<1x1x80x512xbf16>
    %27 = vector.shape_cast %26 : vector<1x1x80x512xbf16> to vector<80x512xbf16>
    %c2560 = arith.constant 2560 : index
    %c0_29 = arith.constant 0 : index
    %28 = vector.load %arg3[%c2560, %c0_29] : memref<4608x512xbf16, #tpu.memory_space<vmem>>, vector<512x512xbf16>
    %cst_30 = arith.constant dense<0.000000e+00> : vector<80x512xf32>
    %29 = tpu.matmul %27, %28, %cst_30 {dimension_numbers = #tpu.dot_dimension_numbers<[1], [0], [0], [1], [0, 0, 1, 1], [], []>} : vector<80x512xbf16>, vector<512x512xbf16>, vector<80x512xf32> -> vector<80x512xf32>
    %30 = arith.addf %25, %29 : vector<80x512xf32>
    %c0_31 = arith.constant 0 : index
    %c0_32 = arith.constant 0 : index
    %c20 = arith.constant 20 : index
    %c0_33 = arith.constant 0 : index
    %31 = vector.load %arg2[%c0_31, %c0_32, %c20, %c0_33] : memref<1x1x110x512xbf16, #tpu.memory_space<vmem>>, vector<1x1x80x512xbf16>
    %32 = vector.shape_cast %31 : vector<1x1x80x512xbf16> to vector<80x512xbf16>
    %c3072 = arith.constant 3072 : index
    %c0_34 = arith.constant 0 : index
    %33 = vector.load %arg3[%c3072, %c0_34] : memref<4608x512xbf16, #tpu.memory_space<vmem>>, vector<512x512xbf16>
    %cst_35 = arith.constant dense<0.000000e+00> : vector<80x512xf32>
    %34 = tpu.matmul %32, %33, %cst_35 {dimension_numbers = #tpu.dot_dimension_numbers<[1], [0], [0], [1], [0, 0, 1, 1], [], []>} : vector<80x512xbf16>, vector<512x512xbf16>, vector<80x512xf32> -> vector<80x512xf32>
    %35 = arith.addf %30, %34 : vector<80x512xf32>
    %c0_36 = arith.constant 0 : index
    %c0_37 = arith.constant 0 : index
    %c21 = arith.constant 21 : index
    %c0_38 = arith.constant 0 : index
    %36 = vector.load %arg2[%c0_36, %c0_37, %c21, %c0_38] : memref<1x1x110x512xbf16, #tpu.memory_space<vmem>>, vector<1x1x80x512xbf16>
    %37 = vector.shape_cast %36 : vector<1x1x80x512xbf16> to vector<80x512xbf16>
    %c3584 = arith.constant 3584 : index
    %c0_39 = arith.constant 0 : index
    %38 = vector.load %arg3[%c3584, %c0_39] : memref<4608x512xbf16, #tpu.memory_space<vmem>>, vector<512x512xbf16>
    %cst_40 = arith.constant dense<0.000000e+00> : vector<80x512xf32>
    %39 = tpu.matmul %37, %38, %cst_40 {dimension_numbers = #tpu.dot_dimension_numbers<[1], [0], [0], [1], [0, 0, 1, 1], [], []>} : vector<80x512xbf16>, vector<512x512xbf16>, vector<80x512xf32> -> vector<80x512xf32>
    %40 = arith.addf %35, %39 : vector<80x512xf32>
    %c0_41 = arith.constant 0 : index
    %c0_42 = arith.constant 0 : index
    %c22 = arith.constant 22 : index
    %c0_43 = arith.constant 0 : index
    %41 = vector.load %arg2[%c0_41, %c0_42, %c22, %c0_43] : memref<1x1x110x512xbf16, #tpu.memory_space<vmem>>, vector<1x1x80x512xbf16>
    %42 = vector.shape_cast %41 : vector<1x1x80x512xbf16> to vector<80x512xbf16>
    %c4096 = arith.constant 4096 : index
    %c0_44 = arith.constant 0 : index
    %43 = vector.load %arg3[%c4096, %c0_44] : memref<4608x512xbf16, #tpu.memory_space<vmem>>, vector<512x512xbf16>
    %cst_45 = arith.constant dense<0.000000e+00> : vector<80x512xf32>
    %44 = tpu.matmul %42, %43, %cst_45 {dimension_numbers = #tpu.dot_dimension_numbers<[1], [0], [0], [1], [0, 0, 1, 1], [], []>} : vector<80x512xbf16>, vector<512x512xbf16>, vector<80x512xf32> -> vector<80x512xf32>
    %45 = arith.addf %40, %44 : vector<80x512xf32>
    %c0_46 = arith.constant 0 : index
    %c0_47 = arith.constant 0 : index
    %46 = vector.load %arg4[%c0_46, %c0_47] : memref<1x512xf32, #tpu.memory_space<vmem>>, vector<1x512xf32>
    %47 = vector.broadcast %46 : vector<1x512xf32> to vector<80x512xf32>
    %48 = arith.addf %45, %47 : vector<80x512xf32>
    %cst_48 = arith.constant 0.000000e+00 : f32
    %49 = vector.broadcast %cst_48 : f32 to vector<80x512xf32>
    %50 = arith.maximumf %48, %49 : vector<80x512xf32>
    %c0_49 = arith.constant 0 : index
    %c0_50 = arith.constant 0 : index
    %c0_51 = arith.constant 0 : index
    %c0_52 = arith.constant 0 : index
    %51 = vector.load %arg7[%c0_49, %c0_50, %c0_51, %c0_52] : memref<1x1x80x512xf32, #tpu.memory_space<vmem>>, vector<1x1x80x512xf32>
    %52 = vector.shape_cast %51 : vector<1x1x80x512xf32> to vector<80x512xf32>
    %53 = vector.shape_cast %50 : vector<80x512xf32> to vector<1x1x80x512xf32>
    tpu.vector_store %arg7[%c0_49, %c0_50, %c0_51, %c0_52], %53 {strides = array<i32>} : memref<1x1x80x512xf32, #tpu.memory_space<vmem>>, vector<1x1x80x512xf32>,
    %54 = arith.truncf %50 : vector<80x512xf32> to vector<80x512xbf16>
    %c0_53 = arith.constant 0 : index
    %c0_54 = arith.constant 0 : index
    %55 = vector.load %arg5[%c0_53, %c0_54] : memref<512x64xbf16, #tpu.memory_space<vmem>>, vector<512x64xbf16>
    %cst_55 = arith.constant dense<0.000000e+00> : vector<80x64xf32>
    %56 = tpu.matmul %54, %55, %cst_55 {dimension_numbers = #tpu.dot_dimension_numbers<[1], [0], [0], [1], [0, 0, 1, 1], [], []>} : vector<80x512xbf16>, vector<512x64xbf16>, vector<80x64xf32> -> vector<80x64xf32>
    %c0_56 = arith.constant 0 : index
    %c0_57 = arith.constant 0 : index
    %57 = vector.load %arg6[%c0_56, %c0_57] : memref<1x64xf32, #tpu.memory_space<vmem>>, vector<1x64xf32>
    %58 = vector.broadcast %57 : vector<1x64xf32> to vector<80x64xf32>
    %59 = arith.addf %56, %58 : vector<80x64xf32>
    %c0_58 = arith.constant 0 : index
    %c0_59 = arith.constant 0 : index
    %c0_60 = arith.constant 0 : index
    %c0_61 = arith.constant 0 : index
    %60 = vector.load %arg8[%c0_58, %c0_59, %c0_60, %c0_61] : memref<1x1x80x64xf32, #tpu.memory_space<vmem>>, vector<1x1x80x64xf32>
    %61 = vector.shape_cast %60 : vector<1x1x80x64xf32> to vector<80x64xf32>
    %62 = vector.shape_cast %59 : vector<80x64xf32> to vector<1x1x80x64xf32>
    tpu.vector_store %arg8[%c0_58, %c0_59, %c0_60, %c0_61], %62 {strides = array<i32>} : memref<1x1x80x64xf32, #tpu.memory_space<vmem>>, vector<1x1x80x64xf32>,
    return
  }
  func.func @transform_0(%arg0: i32, %arg1: i32) -> (i32, i32, i32, i32) {
    %c0_i32 = arith.constant 0 : i32
    %c0_i32_0 = arith.constant 0 : i32
    %c0_i32_1 = arith.constant 0 : i32
    return %arg0, %arg1, %c0_i32, %c0_i32_0 : i32, i32, i32, i32
  }
  func.func @transform_1(%arg0: i32, %arg1: i32) -> (i32, i32) {
    %c0_i32 = arith.constant 0 : i32
    %c0_i32_0 = arith.constant 0 : i32
    %c0_i32_1 = arith.constant 0 : i32
    return %c0_i32, %c0_i32_0 : i32, i32
  }
  func.func @transform_2(%arg0: i32, %arg1: i32) -> (i32, i32) {
    %c0_i32 = arith.constant 0 : i32
    %c0_i32_0 = arith.constant 0 : i32
    %c0_i32_1 = arith.constant 0 : i32
    return %c0_i32, %c0_i32_0 : i32, i32
  }
  func.func @transform_3(%arg0: i32, %arg1: i32) -> (i32, i32) {
    %c0_i32 = arith.constant 0 : i32
    %c0_i32_0 = arith.constant 0 : i32
    %c0_i32_1 = arith.constant 0 : i32
    return %c0_i32, %c0_i32_0 : i32, i32
  }
  func.func @transform_4(%arg0: i32, %arg1: i32) -> (i32, i32) {
    %c0_i32 = arith.constant 0 : i32
    %c0_i32_0 = arith.constant 0 : i32
    %c0_i32_1 = arith.constant 0 : i32
    return %c0_i32, %c0_i32_0 : i32, i32
  }
  func.func @transform_5(%arg0: i32, %arg1: i32) -> (i32, i32, i32, i32) {
    %c0_i32 = arith.constant 0 : i32
    %c0_i32_0 = arith.constant 0 : i32
    %c0_i32_1 = arith.constant 0 : i32
    return %arg0, %arg1, %c0_i32, %c0_i32_0 : i32, i32, i32, i32
  }
  func.func @transform_6(%arg0: i32, %arg1: i32) -> (i32, i32, i32, i32) {
    %c0_i32 = arith.constant 0 : i32
    %c0_i32_0 = arith.constant 0 : i32
    %c0_i32_1 = arith.constant 0 : i32
    return %arg0, %arg1, %c0_i32, %c0_i32_0 : i32, i32, i32, i32
  }
}

</mosaic_0001>

<bundles_post_ra>
// kernel: _lambda_.1
= control target key start
LH: loop header
LB: loop body
LE: loop exit
PB: predicated region body
PF: predicated region fallthrough
CT: control target
= control target key end

     0   :  { %s16712_s21 = smov 0   ;;  %s16714_s22 = smov 0   ;;  %s21220_s0 = inlined_call_operand.vmem [shape: bf16[2,1,110,512], index: 0, kind: input, shape index: {}]   ;;  %s21221_s1 = inlined_call_operand.vmem [shape: bf16[4608,512], index: 1, kind: input, shape index: {}]   ;;  %s21222_s2 = inlined_call_operand.vmem [shape: f32[1,512], index: 2, kind: input, shape index: {}]   ;;  %s21223_s3 = inlined_call_operand.vmem [shape: bf16[512,64], index: 3, kind: input, shape index: {}]   ;;  %s21224_s4 = inlined_call_operand.vmem [shape: f32[1,64], index: 4, kind: input, shape index: {}]   ;;  %s21225_s5 = inlined_call_operand.vmem [shape: f32[2,1,80,512], index: 5, kind: output, shape index: {0}]   ;;  %s21226_s6 = inlined_call_operand.vmem [shape: f32[2,1,80,64], index: 6, kind: output, shape index: {1}]  }
   0x1   :  { %s16716_s23 = smov 0  }
   0x2 LB: > { %s29_s24 = sadd.s32 1, %s16671_s22  ;;  %p12625_p0 = scmp.ge.s32.totalorder %s16675_s23, 1  ;;  %s16675_s23 = sphi %s16716_s23, %s17_s23   ;;  %s16671_s22 = sphi %s16714_s22, %s21228_s22   ;;  %s16667_s21 = sphi %s16712_s21, %s21227_s21  }
   0x3   : > { %p31_p1 = scmp.ge.s32.totalorder %s29_s24, 2  ;;  %p237_p2 = scmp.lt.s32.totalorder %s16675_s23, 3 }
   0x5   : > { %s21230_s24 = smov (%p31_p1, %s29_s24), 0  ;;  %p238_p3 = pnand %p12625_p0, %p237_p2 }
   0x6   : > { %v14707_v0 = vld [vmem:[%s21221_s1 + $0x404] ss:$16 sps:$4 sm:$0xff] (!%p238_p3)   ;;  %v14709_v1 = vld [vmem:[%s21221_s1 + $0x40c] ss:$16 sps:$4 sm:$0xff] (!%p238_p3)   ;;  %v14711_v2 = vld [vmem:[%s21221_s1 + $0x400] ss:$16 sps:$4 sm:$0xff] (!%p238_p3)  }
   0x7   : > { %241 = sbr.rel (%p238_p3) target bundleno = 1635 (0x663), region = 40  ;;  %1517 = vmatprep.subr.bf16.mxu0 (!%p238_p3), %v14707_v0  ;;  %v14712_v3 = vld [vmem:[%s21221_s1 + $0x408] ss:$16 sps:$4 sm:$0xff] (!%p238_p3)   ;;  %1683 = vmatprep.subr.bf16.mxu1 (!%p238_p3), %v14709_v1  ;;  %v14713_v4 = vld [vmem:[%s21221_s1 + $0x424] ss:$16 sps:$4 sm:$0xff] (!%p238_p3)   ;;  %p284_p4 = scmp.lt.s32.totalorder (!%p238_p3), %s16667_s21, 1 }
   0x8   : > { %1518 = vmatpush1.bf16.msra.mxu0 (!%p238_p3), %v14711_v2  ;;  %1684 = vmatpush1.bf16.msra.mxu1 (!%p238_p3), %v14712_v3  ;;  %v14715_v5 = vld [vmem:[%s21221_s1 + $0x42c] ss:$16 sps:$4 sm:$0xff] (!%p238_p3)   ;;  %v14717_v6 = vld [vmem:[%s21221_s1 + $0x420] ss:$16 sps:$4 sm:$0xff] (!%p238_p3)   ;;  %v14718_v7 = vld [vmem:[%s21221_s1 + $0x428] ss:$16 sps:$4 sm:$0xff] (!%p238_p3)  }
   0x9   : > { %1519 = vmatprep.subr.bf16.mxu0 (!%p238_p3), %v14713_v4  ;;  %1685 = vmatprep.subr.bf16.mxu1 (!%p238_p3), %v14715_v5  ;;  %v14719_v8 = vld [vmem:[%s21221_s1 + $0x444] ss:$16 sps:$4 sm:$0xff] (!%p238_p3)   ;;  %v14721_v9 = vld [vmem:[%s21221_s1 + $0x44c] ss:$16 sps:$4 sm:$0xff] (!%p238_p3)   ;;  %v14723_v10 = vld [vmem:[%s21221_s1 + $0x440] ss:$16 sps:$4 sm:$0xff] (!%p238_p3)  }
   0xa   : > { %v14724_v11 = vld [vmem:[%s21221_s1 + $0x448] ss:$16 sps:$4 sm:$0xff] (!%p238_p3)   ;;  %v14725_v12 = vld [vmem:[%s21221_s1 + $0x464] ss:$16 sps:$4 sm:$0xff] (!%p238_p3)   ;;  %v14727_v13 = vld [vmem:[%s21221_s1 + $0x46c] ss:$16 sps:$4 sm:$0xff] (!%p238_p3)  }
   0xb   : > { %v14729_v14 = vld [vmem:[%s21221_s1 + $0x460] ss:$16 sps:$4 sm:$0xff] (!%p238_p3)   ;;  %v14730_v15 = vld [vmem:[%s21221_s1 + $0x468] ss:$16 sps:$4 sm:$0xff] (!%p238_p3)   ;;  %v14731_v16 = vld [vmem:[%s21221_s1 + $0x484] ss:$16 sps:$4 sm:$0xff] (!%p238_p3)  }
   0xc   : > { %1520 = vmatpush1.bf16.msra.mxu0 (!%p238_p3), %v14717_v6  ;;  %1686 = vmatpush1.bf16.msra.mxu1 (!%p238_p3), %v14718_v7  ;;  %v14733_v17 = vld [vmem:[%s21221_s1 + $0x48c] ss:$16 sps:$4 sm:$0xff] (!%p238_p3)   ;;  %v14735_v18 = vld [vmem:[%s21221_s1 + $0x480] ss:$16 sps:$4 sm:$0xff] (!%p238_p3)   ;;  %v14736_v19 = vld [vmem:[%s21221_s1 + $0x488] ss:$16 sps:$4 sm:$0xff] (!%p238_p3)  }
   0xd   : > { %1521 = vmatprep.subr.bf16.mxu0 (!%p238_p3), %v14719_v8  ;;  %1687 = vmatprep.subr.bf16.mxu1 (!%p238_p3), %v14721_v9  ;;  %v14737_v20 = vld [vmem:[%s21221_s1 + $0x4a4] ss:$16 sps:$4 sm:$0xff] (!%p238_p3)   ;;  %v14739_v21 = vld [vmem:[%s21221_s1 + $0x4ac] ss:$16 sps:$4 sm:$0xff] (!%p238_p3)   ;;  %v14741_v22 = vld [vmem:[%s21221_s1 + $0x4a0] ss:$16 sps:$4 sm:$0xff] (!%p238_p3)  }
   0xe   : > { %v14742_v23 = vld [vmem:[%s21221_s1 + $0x4a8] ss:$16 sps:$4 sm:$0xff]   ;;  %v14743_v24 = vld [vmem:[%s21221_s1 + $0x4c4] ss:$16 sps:$4 sm:$0xff]   ;;  %v14745_v25 = vld [vmem:[%s21221_s1 + $0x4cc] ss:$16 sps:$4 sm:$0xff]  }
   0xf   : > { %v14747_v26 = vld [vmem:[%s21221_s1 + $0x4c0] ss:$16 sps:$4 sm:$0xff]   ;;  %v14748_v27 = vld [vmem:[%s21221_s1 + $0x4c8] ss:$16 sps:$4 sm:$0xff]   ;;  %v14749_v28 = vld [vmem:[%s21221_s1 + $0x4e4] ss:$16 sps:$4 sm:$0xff]  }
  0x10   : > { %1522 = vmatpush1.bf16.msra.mxu0 %v14723_v10  ;;  %1688 = vmatpush1.bf16.msra.mxu1 %v14724_v11  ;;  %v14751_v29 = vld [vmem:[%s21221_s1 + $0x4ec] ss:$16 sps:$4 sm:$0xff]   ;;  %v14753_v30 = vld [vmem:[%s21221_s1 + $0x4e0] ss:$16 sps:$4 sm:$0xff]   ;;  %v14754_v31 = vld [vmem:[%s21221_s1 + $0x4e8] ss:$16 sps:$4 sm:$0xff]  }
  0x11   : > { %1523 = vmatprep.subr.bf16.mxu0 %v14725_v12  ;;  %1689 = vmatprep.subr.bf16.mxu1 %v14727_v13  ;;  %v14755_v32 = vld [vmem:[%s21221_s1 + $0x504] ss:$16 sps:$4 sm:$0xff]   ;;  %v14757_v33 = vld [vmem:[%s21221_s1 + $0x50c] ss:$16 sps:$4 sm:$0xff]   ;;  %v14759_v34 = vld [vmem:[%s21221_s1 + $0x500] ss:$16 sps:$4 sm:$0xff]  }
  0x12   : > { %v14760_v35 = vld [vmem:[%s21221_s1 + $0x508] ss:$16 sps:$4 sm:$0xff]   ;;  %s21232_s21 = smov (!%p284_p4, %s16667_s21), 1  ;;  %v14761_v36 = vld [vmem:[%s21221_s1 + $0x524] ss:$16 sps:$4 sm:$0xff]   ;;  %vm2981_vm1 = vcmask 1046528  }
  0x13   : > { %v14763_v37 = vld [vmem:[%s21221_s1 + $0x52c] ss:$16 sps:$4 sm:$0xff]   ;;  %v14765_v38 = vld [vmem:[%s21221_s1 + $0x520] ss:$16 sps:$4 sm:$0xff]   ;;  %s14680_s19 = smul.u32 224, %s21232_s21  ;;  %vm6899_vm3 = vcmask 1045504  }
  0x14   : > { %1524 = vmatpush1.bf16.msra.mxu0 %v14729_v14  ;;  %1690 = vmatpush1.bf16.msra.mxu1 %v14730_v15  ;;  %v14766_v39 = vld [vmem:[%s21221_s1 + $0x528] ss:$16 sps:$4 sm:$0xff]   ;;  %v14767_v40 = vld [vmem:[%s21221_s1 + $0x544] ss:$16 sps:$4 sm:$0xff]   ;;  %v14769_v41 = vld [vmem:[%s21221_s1 + $0x54c] ss:$16 sps:$4 sm:$0xff]  }
  0x15   : > { %1525 = vmatprep.subr.bf16.mxu0 %v14731_v16  ;;  %1691 = vmatprep.subr.bf16.mxu1 %v14733_v17  ;;  %v14771_v42 = vld [vmem:[%s21221_s1 + $0x540] ss:$16 sps:$4 sm:$0xff]   ;;  %v14772_v43 = vld [vmem:[%s21221_s1 + $0x548] ss:$16 sps:$4 sm:$0xff]   ;;  %s16872_s12 = scalar_lea.vmem %s21220_s0, %s14680_s19  ;;  %v14773_v44 = vld [vmem:[%s21221_s1 + $0x564] ss:$16 sps:$4 sm:$0xff]  }
  0x16   : > { %v14775_v45 = vld [vmem:[%s21221_s1 + $0x56c] ss:$16 sps:$4 sm:$0xff]   ;;  %v14777_v46 = vld [vmem:[%s21221_s1 + $0x560] ss:$16 sps:$4 sm:$0xff]   ;;  %v14778_v47 = vld [vmem:[%s21221_s1 + $0x568] ss:$16 sps:$4 sm:$0xff]  }
  0x17   : > { %v312_v48 = vld [vmem:[%s16872_s12] sm:$0xff]  ;;  %v314_v49 = vld [vmem:[%s16872_s12 + $0x10] sm:$0xff]  ;;  %v14781_v53 = vld [vmem:[%s21221_s1 + $0x58c] ss:$16 sps:$4 sm:$0xff]   ;;  %vm680_vm0 = vsmask.f32 7424 }
  0x18   : > { %1526 = vmatpush1.bf16.msra.mxu0 %v14735_v18  ;;  %1692 = vmatpush1.bf16.msra.mxu1 %v14736_v19  ;;  %v16888_v50 = vcombine.high %v312_v48, %v314_v49  ;;  %v16891_v51 = vld [vmem:[%s16872_s12 + $0x24] ss:$16 sps:$4 sm:$0xff]   ;;  %v14783_v57 = vld [vmem:[%s21221_s1 + $0x580] ss:$16 sps:$4 sm:$0xff]   ;;  %v14784_v58 = vld [vmem:[%s21221_s1 + $0x588] ss:$16 sps:$4 sm:$0xff]   ;;  %v16913_v62 = vcombine.low %v312_v48, %v314_v49 }
  0x19   : > { %1527 = vmatprep.subr.bf16.mxu0 %v14737_v20  ;;  %1693 = vmatprep.subr.bf16.mxu1 %v14739_v21  ;;  %v14779_v52 = vld [vmem:[%s21221_s1 + $0x584] ss:$16 sps:$4 sm:$0xff]   ;;  %v701_v56 = vshll.u32 %v16891_v51, 16  ;;  %v14787_v63 = vld [vmem:[%s21221_s1 + $0x5ac] ss:$16 sps:$4 sm:$0xff]   ;;  %vm10817_vm5 = vcmask 1044480  }
  0x1a   : > { %v694_v54 = vshrl.u32 %v16888_v50, 16  ;;  %v696_v55 = vshll.u32 %v16888_v50, 16  ;;  %v14785_v59 = vld [vmem:[%s21221_s1 + $0x5a4] ss:$16 sps:$4 sm:$0xff]   ;;  %v14789_v0 = vld [vmem:[%s21221_s1 + $0x5a0] ss:$16 sps:$4 sm:$0xff]  }
  0x1b   : > { %v16911_v61 = vrot.slane %v701_v56, 1  ;;  %v14790_v2 = vld [vmem:[%s21221_s1 + $0x5a8] ss:$16 sps:$4 sm:$0xff]   ;;  %v14791_v3 = vld [vmem:[%s21221_s1 + $0x5c4] ss:$16 sps:$4 sm:$0xff]   ;;  %v684_v6 = vshll.u32 %v16913_v62, 16 }
  0x1c   : > { %1528 = vmatpush1.bf16.msra.mxu0 %v14741_v22  ;;  %1694 = vmatpush1.bf16.msra.mxu1 %v14742_v23  ;;  %v698_v60 = vrot.slane %v696_v55, 1  ;;  %v14813_v5 = vld [vmem:[%s16872_s12 + $0x20] ss:$16 sps:$4 sm:$0xff]   ;;  %v14793_v7 = vld [vmem:[%s21221_s1 + $0x5cc] ss:$16 sps:$4 sm:$0xff]   ;;  %v682_v11 = vshrl.u32 %v16913_v62, 16 }
  0x1d   : > { %1529 = vmatprep.subr.bf16.mxu0 %v14743_v24  ;;  %1695 = vmatprep.subr.bf16.mxu1 %v14745_v25  ;;  %v14795_v8 = vld [vmem:[%s21221_s1 + $0x5c0] ss:$16 sps:$4 sm:$0xff]   ;;  %v14796_v9 = vld [vmem:[%s21221_s1 + $0x5c8] ss:$16 sps:$4 sm:$0xff]   ;;  %v14797_v10 = vld [vmem:[%s21221_s1 + $0x5e4] ss:$16 sps:$4 sm:$0xff]  }
  0x1e   : > { %v699_v1 = vor.u32 %v698_v60, %v694_v54  ;;  %v686_v12 = vrot.slane %v684_v6, 1  ;;  %v689_v13 = vshll.u32 %v14813_v5, 16  ;;  %v14799_v14 = vld [vmem:[%s21221_s1 + $0x5ec] ss:$16 sps:$4 sm:$0xff]   ;;  %v14801_v15 = vld [vmem:[%s21221_s1 + $0x5e0] ss:$16 sps:$4 sm:$0xff]  }
  0x1f   : > { %v14802_v16 = vld [vmem:[%s21221_s1 + $0x5e8] ss:$16 sps:$4 sm:$0xff]   ;;  %v14808_v17 = vld [vmem:[%s21221_s1 + $0x604] ss:$16 sps:$4 sm:$0xff]   ;;  %v14811_v20 = vld [vmem:[%s21221_s1 + $0x60c] ss:$16 sps:$4 sm:$0xff]  }
  0x20   : > { %1530 = vmatpush1.bf16.msra.mxu0 %v14747_v26  ;;  %1696 = vmatpush1.bf16.msra.mxu1 %v14748_v27  ;;  %v704_v4 = vsel %vm680_vm0, %v699_v1, %v16911_v61  ;;  %v687_v18 = vor.u32 %v686_v12, %v682_v11  ;;  %v691_v19 = vrot.slane %v689_v13, 1  ;;  %v14806_v21 = vld [vmem:[%s21221_s1 + $0x600] ss:$16 sps:$4 sm:$0xff]   ;;  %v14809_v22 = vld [vmem:[%s21221_s1 + $0x608] ss:$16 sps:$4 sm:$0xff]   ;;  %v737_v26 = vshrl.u32 %v16891_v51, 16 }
  0x21   : > { %1531 = vmatprep.subr.bf16.mxu0 %v14749_v28  ;;  %1697 = vmatprep.subr.bf16.mxu1 %v14751_v29  ;;  %v14816_v24 = vld [vmem:[%s21221_s1 + $0x624] ss:$16 sps:$4 sm:$0xff]   ;;  %v14819_v25 = vld [vmem:[%s21221_s1 + $0x62c] ss:$16 sps:$4 sm:$0xff]   ;;  %v14814_v27 = vld [vmem:[%s21221_s1 + $0x620] ss:$16 sps:$4 sm:$0xff]  }
  0x22   : > { %1549 = vmatprep.mubr.bf16.mxu0 %v704_v4  ;;  %1715 = vmatprep.mubr.bf16.mxu1 %v704_v4  ;;  %v692_v23 = vsel %vm680_vm0, %v687_v18, %v691_v19  ;;  %v14856_v28 = vld [vmem:[%s16872_s12 + $0x44] ss:$16 sps:$4 sm:$0xff]   ;;  %v14817_v29 = vld [vmem:[%s21221_s1 + $0x628] ss:$16 sps:$4 sm:$0xff]   ;;  %v14879_v56 = vld [vmem:[%s16872_s12 + $0x60] ss:$16 sps:$4 sm:$0xff]  }
  0x23   : > { %v14829_v48 = vld [vmem:[%s21221_s1 + $0x668] ss:$16 sps:$4 sm:$0xff]   ;;  %v14834_v51 = vld [vmem:[%s21221_s1 + $0x684] ss:$16 sps:$4 sm:$0xff]   ;;  %v793_v11 = vshrl.u32 %v14879_v56, 16  ;;  %s14681_s14 = smul.u32 320, %s21232_s21 }
  0x24   : > { %1532 = vmatpush1.bf16.msra.mxu0 %v14753_v30  ;;  %1698 = vmatpush1.bf16.msra.mxu1 %v14754_v31  ;;  %v14822_v30 = vld [vmem:[%s21221_s1 + $0x644] ss:$16 sps:$4 sm:$0xff]   ;;  %v729_v31 = vshrl.u32 %v14813_v5, 16  ;;  %v14835_v60 = vld [vmem:[%s21221_s1 + $0x688] ss:$16 sps:$4 sm:$0xff]   ;;  %s14682_s19 = smul.u32 80, %s21232_s21 }
  0x25   : > { %1533 = vmatprep.subr.bf16.mxu0 %v14755_v32  ;;  %1699 = vmatprep.subr.bf16.mxu1 %v14757_v33  ;;  %v14825_v32 = vld [vmem:[%s21221_s1 + $0x64c] ss:$16 sps:$4 sm:$0xff]   ;;  %v739_v33 = vor.u32 %v737_v26, %v16911_v61  ;;  %v14840_v61 = vld [vmem:[%s21221_s1 + $0x6a4] ss:$16 sps:$4 sm:$0xff]   ;;  %v14838_v5 = vld [vmem:[%s21221_s1 + $0x6a0] ss:$16 sps:$4 sm:$0xff]   ;;  %s21090_s16 = scalar_lea.vmem %s21225_s5, %s14681_s14 }
  0x26   : > { %v14846_v12 = vld [vmem:[%s21221_s1 + $0x6c4] ss:$16 sps:$4 sm:$0xff]   ;;  %v14855_v26 = vld [vmem:[%s21221_s1 + $0x6ec] ss:$16 sps:$4 sm:$0xff]   ;;  %vm5514_vm2 = vsmask.f32 6400  ;;  %s21180_s26 = scalar_lea.vmem %s21226_s6, %s14682_s19 }
  0x27   : > { %v460_v18 = vld [vmem:[%s16872_s12 + $0xa0] sm:$0x11]  ;;  %vm9432_vm4 = vsmask.f32 5376  ;;  %vm12465_vm6 = vcmask 523264  }
  0x28   : > { %1534 = vmatpush1.bf16.msra.mxu0 %v14759_v34  ;;  %1700 = vmatpush1.bf16.msra.mxu1 %v14760_v35  ;;  %v741_v34 = vshll.u32 %v14856_v28, 16  ;;  %v14864_v35 = vld [vmem:[%s16872_s12 + $0x40] ss:$16 sps:$4 sm:$0xff]  }
  0x29   : > { %1535 = vmatprep.subr.bf16.mxu0 %v14761_v36  ;;  %1701 = vmatprep.subr.bf16.mxu1 %v14763_v37  ;;  %v14820_v36 = vld [vmem:[%s21221_s1 + $0x640] ss:$16 sps:$4 sm:$0xff]   ;;  %v14823_v37 = vld [vmem:[%s21221_s1 + $0x648] ss:$16 sps:$4 sm:$0xff]   ;;  %v761_v49 = vshrl.u32 %v14864_v35, 16 }
  0x2c   : > { %1536 = vmatpush1.bf16.msra.mxu0 %v14765_v38  ;;  %1702 = vmatpush1.bf16.msra.mxu1 %v14766_v39  ;;  %v743_v38 = vrot.slane %v741_v34, 1  ;;  %v14828_v39 = vld [vmem:[%s21221_s1 + $0x664] ss:$16 sps:$4 sm:$0xff]  }
  0x2d   : > { %1537 = vmatprep.subr.bf16.mxu0 %v14767_v40  ;;  %1703 = vmatprep.subr.bf16.mxu1 %v14769_v41  ;;  %v731_v40 = vor.u32 %v729_v31, %v691_v19  ;;  %v733_v41 = vshll.u32 %v14864_v35, 16  ;;  %v14844_v19 = vld [vmem:[%s21221_s1 + $0x6c0] ss:$16 sps:$4 sm:$0xff]   ;;  %v14860_v35 = vld [vmem:[%s21221_s1 + $0x704] ss:$16 sps:$4 sm:$0xff]  }
  0x30   : > { %1538 = vmatpush1.bf16.msra.mxu0 %v14771_v42  ;;  %1704 = vmatpush1.bf16.msra.mxu1 %v14772_v43  ;;  %v769_v42 = vshrl.u32 %v14856_v28, 16  ;;  %v14831_v43 = vld [vmem:[%s21221_s1 + $0x66c] ss:$16 sps:$4 sm:$0xff]  }
  0x31   : > { %1539 = vmatprep.subr.bf16.mxu0 %v14773_v44  ;;  %1705 = vmatprep.subr.bf16.mxu1 %v14775_v45  ;;  %v744_v44 = vsel %vm680_vm0, %v739_v33, %v743_v38  ;;  %v735_v45 = vrot.slane %v733_v41, 1  ;;  %v17083_v41 = vld [vmem:[%s16872_s12 + $0x2c] ss:$16 sps:$4 sm:$0xff]  }
  0x32   : > { %v771_v54 = vor.u32 %v769_v42, %v743_v38  ;;  %v14858_v42 = vld [vmem:[%s21221_s1 + $0x700] ss:$16 sps:$4 sm:$0xff]  }
  0x34   : > { %1540 = vmatpush1.bf16.msra.mxu0 %v14777_v46  ;;  %1706 = vmatpush1.bf16.msra.mxu1 %v14778_v47  ;;  %v14871_v46 = vld [vmem:[%s16872_s12 + $0x64] ss:$16 sps:$4 sm:$0xff]   ;;  %v14826_v47 = vld [vmem:[%s21221_s1 + $0x660] ss:$16 sps:$4 sm:$0xff]  }
  0x35   : > { %1541 = vmatprep.subr.bf16.mxu0 %v14779_v52  ;;  %1707 = vmatprep.subr.bf16.mxu1 %v14781_v53  ;;  %v14837_v52 = vld [vmem:[%s21221_s1 + $0x68c] ss:$16 sps:$4 sm:$0xff]   ;;  %v736_v53 = vsel %vm680_vm0, %v731_v40, %v735_v45  ;;  %v773_v55 = vshll.u32 %v14871_v46, 16 }
  0x38   : > { %1542 = vmatpush1.bf16.msra.mxu0 %v14783_v57  ;;  %1708 = vmatpush1.bf16.msra.mxu1 %v14784_v58  ;;  %v14832_v57 = vld [vmem:[%s21221_s1 + $0x680] ss:$16 sps:$4 sm:$0xff]   ;;  %v775_v58 = vrot.slane %v773_v55, 1 }
  0x39   : > { %1543 = vmatprep.subr.bf16.mxu0 %v14785_v59  ;;  %1709 = vmatprep.subr.bf16.mxu1 %v14787_v63  ;;  %v801_v59 = vshrl.u32 %v14871_v46, 16  ;;  %v763_v63 = vor.u32 %v761_v49, %v735_v45  ;;  %v14867_v49 = vld [vmem:[%s21221_s1 + $0x724] ss:$16 sps:$4 sm:$0xff]   ;;  %v14865_v55 = vld [vmem:[%s21221_s1 + $0x720] ss:$16 sps:$4 sm:$0xff]  }
  0x3a   : > { %v776_v1 = vsel %vm680_vm0, %v771_v54, %v775_v58 }
  0x3b   : > { %v803_v6 = vor.u32 %v801_v59, %v775_v58  ;;  %v14875_v58 = vld [vmem:[%s21221_s1 + $0x744] ss:$16 sps:$4 sm:$0xff]   ;;  %v14878_v59 = vld [vmem:[%s21221_s1 + $0x74c] ss:$16 sps:$4 sm:$0xff]  }
  0x3c   : > { %1544 = vmatpush1.bf16.msra.mxu0 %v14789_v0  ;;  %1710 = vmatpush1.bf16.msra.mxu1 %v14790_v2  ;;  %v765_v0 = vshll.u32 %v14879_v56, 16  ;;  %v14886_v2 = vld [vmem:[%s16872_s12 + $0x84] ss:$16 sps:$4 sm:$0xff]   ;;  %v14868_v56 = vld [vmem:[%s21221_s1 + $0x728] ss:$16 sps:$4 sm:$0xff]  }
  0x3d   : > { %1545 = vmatprep.subr.bf16.mxu0 %v14791_v3  ;;  %1711 = vmatprep.subr.bf16.mxu1 %v14793_v7  ;;  %v14843_v3 = vld [vmem:[%s21221_s1 + $0x6ac] ss:$16 sps:$4 sm:$0xff]   ;;  %v805_v7 = vshll.u32 %v14886_v2, 16 }
  0x3e   : > { %v767_v4 = vrot.slane %v765_v0, 1  ;;  %v14882_v0 = vld [vmem:[%s21221_s1 + $0x764] ss:$16 sps:$4 sm:$0xff]  }
  0x3f   : > { %v807_v13 = vrot.slane %v805_v7, 1  ;;  %v14891_v7 = vld [vmem:[%s21221_s1 + $0x788] ss:$16 sps:$4 sm:$0xff]  }
  0x40   : > { %1546 = vmatpush1.bf16.msra.mxu0 %v14795_v8  ;;  %1712 = vmatpush1.bf16.msra.mxu1 %v14796_v9  ;;  %v14841_v8 = vld [vmem:[%s21221_s1 + $0x6a8] ss:$16 sps:$4 sm:$0xff]   ;;  %v768_v9 = vsel %vm680_vm0, %v763_v63, %v767_v4 }
  0x41   : > { %1547 = vmatprep.subr.bf16.mxu0 %v14797_v10  ;;  %1713 = vmatprep.subr.bf16.mxu1 %v14799_v14  ;;  %v14894_v10 = vld [vmem:[%s16872_s12 + $0x80] ss:$16 sps:$4 sm:$0xff]   ;;  %v14849_v14 = vld [vmem:[%s21221_s1 + $0x6cc] ss:$16 sps:$4 sm:$0xff]   ;;  %v14876_v63 = vld [vmem:[%s21221_s1 + $0x748] ss:$16 sps:$4 sm:$0xff]  }
  0x42   : > { %v825_v33 = vshrl.u32 %v14894_v10, 16 }
  0x44   : > { %1548 = vmatpush1.bf16.msra.mxu0 %v14801_v15  ;;  %1714 = vmatpush1.bf16.msra.mxu1 %v14802_v16  ;;  %v797_v15 = vshll.u32 %v14894_v10, 16  ;;  %v833_v16 = vshrl.u32 %v14886_v2, 16  ;;  %v14880_v2 = vld [vmem:[%s21221_s1 + $0x760] ss:$16 sps:$4 sm:$0xff]   ;;  %v14900_v10 = vld [vmem:[%s21221_s1 + $0x7ac] ss:$16 sps:$4 sm:$0xff]  }
  0x45   : > { %1600 = vmatprep.subr.bf16.mxu0 %v14808_v17  ;;  %1766 = vmatprep.subr.bf16.mxu1 %v14811_v20  ;;  %v808_v17 = vsel %vm680_vm0, %v803_v6, %v807_v13  ;;  %v795_v20 = vor.u32 %v793_v11, %v767_v4  ;;  %v14890_v4 = vld [vmem:[%s21221_s1 + $0x784] ss:$16 sps:$4 sm:$0xff]   ;;  %v14888_v6 = vld [vmem:[%s21221_s1 + $0x780] ss:$16 sps:$4 sm:$0xff]  }
  0x46   : > { %v14895_v11 = vld [vmem:[%s21221_s1 + $0x7a0] ss:$16 sps:$4 sm:$0xff]  }
  0x47   : > { %1550 = vmatmul.mubr.bf16.vlgmr.msra.gmra.mrb[0].mxu0 %v692_v23  ;;  %1716 = vmatmul.mubr.bf16.vlgmr.msra.gmra.mrb[0].mxu1 %v692_v23  ;;  %v17051_v23 = vcombine.low %v460_v18, %v460_v18 }
  0x48   : > { %1601 = vmatpush1.bf16.msra.mxu0 %v14806_v21  ;;  %1767 = vmatpush1.bf16.msra.mxu1 %v14809_v22  ;;  %v799_v21 = vrot.slane %v797_v15, 1  ;;  %v17049_v22 = vcombine.high %v460_v18, %v460_v18  ;;  %v14968_v18 = vld [vmem:[%s16872_s12 + $0x4c] ss:$16 sps:$4 sm:$0xff]  }
  0x49   : > { %1602 = vmatprep.subr.bf16.mxu0 %v14816_v24  ;;  %1768 = vmatprep.subr.bf16.mxu1 %v14819_v25  ;;  %v14847_v24 = vld [vmem:[%s21221_s1 + $0x6c8] ss:$16 sps:$4 sm:$0xff]   ;;  %v14852_v25 = vld [vmem:[%s21221_s1 + $0x6e4] ss:$16 sps:$4 sm:$0xff]   ;;  %v829_v34 = vshll.u32 %v17051_v23, 16 }
  0x4a   : > { %1559 = vmatprep.mubr.bf16.mxu0 %v744_v44  ;;  %1725 = vmatprep.mubr.bf16.mxu1 %v744_v44  ;;  %v837_v28 = vshll.u32 %v17049_v22, 16  ;;  %v800_v31 = vsel %vm680_vm0, %v795_v20, %v799_v21  ;;  %v827_v44 = vor.u32 %v825_v33, %v799_v21  ;;  %v17191_v33 = vld [vmem:[%s16872_s12 + $0x48] ss:$16 sps:$4 sm:$0xff]  }
  0x4b   : > { %v831_v45 = vrot.slane %v829_v34, 1  ;;  %v14922_v34 = vld [vmem:[%s21221_s1 + $0x4] ss:$16 sps:$4 sm:$0xff]  }
  0x4c   : > { %1603 = vmatpush1.bf16.msra.mxu0 %v14814_v27  ;;  %1769 = vmatpush1.bf16.msra.mxu1 %v14817_v29  ;;  %v835_v27 = vor.u32 %v833_v16, %v807_v13  ;;  %v14850_v29 = vld [vmem:[%s21221_s1 + $0x6e0] ss:$16 sps:$4 sm:$0xff]   ;;  %v14904_v13 = vld [vmem:[%s21221_s1 + $0x7c4] ss:$16 sps:$4 sm:$0xff]   ;;  %v14907_v16 = vld [vmem:[%s21221_s1 + $0x7cc] ss:$16 sps:$4 sm:$0xff]  }
  0x4d   : > { %1604 = vmatprep.subr.bf16.mxu0 %v14822_v30  ;;  %1770 = vmatprep.subr.bf16.mxu1 %v14825_v32  ;;  %v14853_v30 = vld [vmem:[%s21221_s1 + $0x6e8] ss:$16 sps:$4 sm:$0xff]   ;;  %v839_v32 = vrot.slane %v837_v28, 1  ;;  %v832_v54 = vsel %vm680_vm0, %v827_v44, %v831_v45  ;;  %v749_v44 = vshll.u32 %v17191_v33, 16  ;;  %v14928_v45 = vld [vmem:[%s21221_s1 + $0x24] ss:$16 sps:$4 sm:$0xff]  }
  0x4e   : > { %v14912_v28 = vld [vmem:[%s21221_s1 + $0x7e8] ss:$16 sps:$4 sm:$0xff]  }
  0x4f   : > { %1560 = vmatmul.mubr.bf16.gmra.mrb[4].mxu0 %v736_v53  ;;  %1726 = vmatmul.mubr.bf16.gmra.mrb[4].mxu1 %v736_v53  ;;  %v840_v38 = vsel %vm680_vm0, %v835_v27, %v839_v32  ;;  %v14909_v27 = vld [vmem:[%s21221_s1 + $0x7e0] ss:$16 sps:$4 sm:$0xff]  }
  0x50   : > { %1605 = vmatpush1.bf16.msra.mxu0 %v14820_v36  ;;  %1771 = vmatpush1.bf16.msra.mxu1 %v14823_v37  ;;  %v14863_v36 = vld [vmem:[%s21221_s1 + $0x70c] ss:$16 sps:$4 sm:$0xff]  }
  0x51   : > { %1606 = vmatprep.subr.bf16.mxu0 %v14828_v39  ;;  %1772 = vmatprep.subr.bf16.mxu1 %v14831_v43  ;;  %v313_v37 = vld [vmem:[%s16872_s12 + $0x8] sm:$0xff]  ;;  %v315_v39 = vld [vmem:[%s16872_s12 + $0x18] sm:$0xff] }
  0x52   : > { %1569 = vmatprep.mubr.bf16.mxu0 %v776_v1  ;;  %1735 = vmatprep.mubr.bf16.mxu1 %v776_v1  ;;  %v17080_v40 = vcombine.high %v313_v37, %v315_v39  ;;  %v14861_v43 = vld [vmem:[%s21221_s1 + $0x708] ss:$16 sps:$4 sm:$0xff]   ;;  %v14885_v1 = vld [vmem:[%s21221_s1 + $0x76c] ss:$16 sps:$4 sm:$0xff]  }
  0x54   : > { %1607 = vmatpush1.bf16.msra.mxu0 %v14826_v47  ;;  %1773 = vmatpush1.bf16.msra.mxu1 %v14829_v48  ;;  %v718_v46 = vshrl.u32 %v17080_v40, 16  ;;  %v720_v47 = vshll.u32 %v17080_v40, 16  ;;  %v725_v48 = vshll.u32 %v17083_v41, 16 }
  0x55   : > { %1608 = vmatprep.subr.bf16.mxu0 %v14834_v51  ;;  %1774 = vmatprep.subr.bf16.mxu1 %v14837_v52  ;;  %v14870_v51 = vld [vmem:[%s21221_s1 + $0x72c] ss:$16 sps:$4 sm:$0xff]  }
  0x56   : > { %v722_v52 = vrot.slane %v720_v47, 1  ;;  %v17100_v53 = vrot.slane %v725_v48, 1  ;;  %v14926_v47 = vld [vmem:[%s21221_s1 + $0x20] ss:$16 sps:$4 sm:$0xff]   ;;  %v14929_v48 = vld [vmem:[%s21221_s1 + $0x28] ss:$16 sps:$4 sm:$0xff]  }
  0x57   : > { %1570 = vmatmul.mubr.bf16.gmra.mrb[8].mxu0 %v768_v9  ;;  %1736 = vmatmul.mubr.bf16.gmra.mrb[8].mxu1 %v768_v9  ;;  %v14897_v9 = vld [vmem:[%s21221_s1 + $0x7a4] ss:$16 sps:$4 sm:$0xff]  }
  0x58   : > { %1609 = vmatpush1.bf16.msra.mxu0 %v14832_v57  ;;  %1775 = vmatpush1.bf16.msra.mxu1 %v14835_v60  ;;  %v723_v57 = vor.u32 %v722_v52, %v718_v46  ;;  %v14931_v46 = vld [vmem:[%s21221_s1 + $0x2c] ss:$16 sps:$4 sm:$0xff]  }
  0x59   : > { %1610 = vmatprep.subr.bf16.mxu0 %v14840_v61  ;;  %1776 = vmatprep.subr.bf16.mxu1 %v14843_v3  ;;  %v14873_v61 = vld [vmem:[%s21221_s1 + $0x740] ss:$16 sps:$4 sm:$0xff]   ;;  %v14883_v3 = vld [vmem:[%s21221_s1 + $0x768] ss:$16 sps:$4 sm:$0xff]  }
  0x5a   : > { %1579 = vmatprep.mubr.bf16.mxu0 %v808_v17  ;;  %1745 = vmatprep.mubr.bf16.mxu1 %v808_v17  ;;  %v728_v60 = vsel %vm680_vm0, %v723_v57, %v17100_v53  ;;  %v14902_v17 = vld [vmem:[%s21221_s1 + $0x7c0] ss:$16 sps:$4 sm:$0xff]   ;;  %v14937_v57 = vld [vmem:[%s21221_s1 + $0x4c] ss:$16 sps:$4 sm:$0xff]  }
  0x5c   : > { %1611 = vmatpush1.bf16.msra.mxu0 %v14838_v5  ;;  %1777 = vmatpush1.bf16.msra.mxu1 %v14841_v8  ;;  %v14893_v5 = vld [vmem:[%s21221_s1 + $0x78c] ss:$16 sps:$4 sm:$0xff]   ;;  %v17147_v8 = vcombine.low %v313_v37, %v315_v39 }
  0x5d   : > { %1612 = vmatprep.subr.bf16.mxu0 %v14846_v12  ;;  %1778 = vmatprep.subr.bf16.mxu1 %v14849_v14  ;;  %v14898_v12 = vld [vmem:[%s21221_s1 + $0x7a8] ss:$16 sps:$4 sm:$0xff]   ;;  %v17204_v39 = vld [vmem:[%s16872_s12 + $0x6c] ss:$16 sps:$4 sm:$0xff]  }
  0x5e   : > { %v14917_v14 = vld [vmem:[%s16872_s12 + $0x28] ss:$16 sps:$4 sm:$0xff]   ;;  %v708_v15 = vshll.u32 %v17147_v8, 16  ;;  %v706_v20 = vshrl.u32 %v17147_v8, 16  ;;  %v789_v52 = vshll.u32 %v17204_v39, 16 }
  0x5f   : > { %1580 = vmatmul.mubr.bf16.gmra.mrb[12].mxu0 %v800_v31  ;;  %1746 = vmatmul.mubr.bf16.gmra.mrb[12].mxu1 %v800_v31 }
  0x60   : > { %1613 = vmatpush1.bf16.msra.mxu0 %v14844_v19  ;;  %1779 = vmatpush1.bf16.msra.mxu1 %v14847_v24  ;;  %v14905_v19 = vld [vmem:[%s21221_s1 + $0x7c8] ss:$16 sps:$4 sm:$0xff]   ;;  %v710_v21 = vrot.slane %v708_v15, 1  ;;  %v713_v24 = vshll.u32 %v14917_v14, 16 }
  0x61   : > { %1614 = vmatprep.subr.bf16.mxu0 %v14852_v25  ;;  %1780 = vmatprep.subr.bf16.mxu1 %v14855_v26  ;;  %v14911_v25 = vld [vmem:[%s21221_s1 + $0x7e4] ss:$16 sps:$4 sm:$0xff]   ;;  %v14914_v26 = vld [vmem:[%s21221_s1 + $0x7ec] ss:$16 sps:$4 sm:$0xff]  }
  0x62   : > { %1589 = vmatprep.mubr.bf16.mxu0 %v840_v38  ;;  %1755 = vmatprep.mubr.bf16.mxu1 %v840_v38  ;;  %v711_v31 = vor.u32 %v710_v21, %v706_v20  ;;  %v715_v32 = vrot.slane %v713_v24, 1  ;;  %v461_v15 = vld [vmem:[%s16872_s12 + $0xa8] sm:$0x11]  ;;  %v14952_v24 = vld [vmem:[%s21221_s1 + $0xa4] ss:$16 sps:$4 sm:$0xff]  }
  0x63   : > { %v17277_v21 = vcombine.high %v461_v15, %v461_v15 }
  0x64   : > { %1615 = vmatpush1.bf16.msra.mxu0 %v14850_v29  ;;  %1781 = vmatpush1.bf16.msra.mxu1 %v14853_v30  ;;  %v753_v29 = vshrl.u32 %v17083_v41, 16  ;;  %v757_v30 = vshll.u32 %v14968_v18, 16  ;;  %v14923_v41 = vld [vmem:[%s21221_s1 + $0x8] ss:$16 sps:$4 sm:$0xff]  }
  0x65   : > { %1616 = vmatprep.subr.bf16.mxu0 %v14860_v35  ;;  %1782 = vmatprep.subr.bf16.mxu1 %v14863_v36  ;;  %v14925_v35 = vld [vmem:[%s21221_s1 + $0xc] ss:$16 sps:$4 sm:$0xff]   ;;  %v14920_v36 = vld [vmem:[%s21221_s1] ss:$16 sps:$4 sm:$0xff]  }
  0x66   : > { %v755_v37 = vor.u32 %v753_v29, %v17100_v53  ;;  %v759_v38 = vrot.slane %v757_v30, 1  ;;  %v14950_v29 = vld [vmem:[%s21221_s1 + $0xa0] ss:$16 sps:$4 sm:$0xff]   ;;  %v14953_v30 = vld [vmem:[%s21221_s1 + $0xa8] ss:$16 sps:$4 sm:$0xff]  }
  0x67   : > { %1590 = vmatmul.mubr.bf16.gmra.mrb[16].mxu0 %v832_v54  ;;  %1756 = vmatmul.mubr.bf16.gmra.mrb[16].mxu1 %v832_v54  ;;  %v751_v54 = vrot.slane %v749_v44, 1  ;;  %v14964_v44 = vld [vmem:[%s21221_s1 + $0xe4] ss:$16 sps:$4 sm:$0xff]  }
  0x68   : > { %1617 = vmatpush1.bf16.msra.mxu0 %v14858_v42  ;;  %1783 = vmatpush1.bf16.msra.mxu1 %v14861_v43  ;;  %v716_v42 = vsel %vm680_vm0, %v711_v31, %v715_v32  ;;  %v745_v43 = vshrl.u32 %v14917_v14, 16 }
  0x69   : > { %1618 = vmatprep.subr.bf16.mxu0 %v14867_v49  ;;  %1784 = vmatprep.subr.bf16.mxu1 %v14870_v51  ;;  %v760_v49 = vsel %vm680_vm0, %v755_v37, %v759_v38  ;;  %v785_v51 = vshrl.u32 %v14968_v18, 16  ;;  %v14947_v18 = vld [vmem:[%s21221_s1 + $0x88] ss:$16 sps:$4 sm:$0xff]   ;;  %v17300_v37 = vcombine.low %v461_v15, %v461_v15  ;;  %v15007_v15 = vld [vmem:[%s21221_s1 + $0x1a0] ss:$16 sps:$4 sm:$0xff]  }
  0x6a   : > { %1632 = vmatprep.mubr.bf16.mxu0 %v728_v60  ;;  %1798 = vmatprep.mubr.bf16.mxu1 %v728_v60  ;;  %v747_v53 = vor.u32 %v745_v43, %v715_v32  ;;  %v791_v60 = vrot.slane %v789_v52, 1 }
  0x6c   : > { %1619 = vmatpush1.bf16.msra.mxu0 %v14865_v55  ;;  %1785 = vmatpush1.bf16.msra.mxu1 %v14868_v56  ;;  %v17226_v55 = vld [vmem:[%s16872_s12 + $0x68] ss:$16 sps:$4 sm:$0xff]   ;;  %v14934_v56 = vld [vmem:[%s21221_s1 + $0x44] ss:$16 sps:$4 sm:$0xff]  }
  0x6d   : > { %1620 = vmatprep.subr.bf16.mxu0 %v14875_v58  ;;  %1786 = vmatprep.subr.bf16.mxu1 %v14878_v59  ;;  %v14932_v58 = vld [vmem:[%s21221_s1 + $0x40] ss:$16 sps:$4 sm:$0xff]   ;;  %v787_v59 = vor.u32 %v785_v51, %v759_v38  ;;  %v14961_v38 = vld [vmem:[%s21221_s1 + $0xcc] ss:$16 sps:$4 sm:$0xff]   ;;  %v14965_v51 = vld [vmem:[%s21221_s1 + $0xe8] ss:$16 sps:$4 sm:$0xff]  }
  0x70   : > { %1621 = vmatpush1.bf16.msra.mxu0 %v14873_v61  ;;  %1787 = vmatpush1.bf16.msra.mxu1 %v14876_v63  ;;  %v17238_v61 = vld [vmem:[%s16872_s12 + $0x8c] ss:$16 sps:$4 sm:$0xff]   ;;  %v14935_v63 = vld [vmem:[%s21221_s1 + $0x48] ss:$16 sps:$4 sm:$0xff]  }
  0x71   : > { %1622 = vmatprep.subr.bf16.mxu0 %v14882_v0  ;;  %1788 = vmatprep.subr.bf16.mxu1 %v14885_v1  ;;  %v14940_v0 = vld [vmem:[%s21221_s1 + $0x64] ss:$16 sps:$4 sm:$0xff]   ;;  %v752_v1 = vsel %vm680_vm0, %v747_v53, %v751_v54  ;;  %v849_v32 = vshrl.u32 %v17238_v61, 16 }
  0x72   : > { %v14972_v53 = vld [vmem:[%s21221_s1 + $0x104] ss:$16 sps:$4 sm:$0xff]  }
  0x74   : > { %1623 = vmatpush1.bf16.msra.mxu0 %v14880_v2  ;;  %1789 = vmatpush1.bf16.msra.mxu1 %v14883_v3  ;;  %v777_v2 = vshrl.u32 %v17191_v33, 16  ;;  %v781_v3 = vshll.u32 %v17226_v55, 16  ;;  %v853_v33 = vshll.u32 %v17277_v21, 16 }
  0x75   : > { %1624 = vmatprep.subr.bf16.mxu0 %v14890_v4  ;;  %1790 = vmatprep.subr.bf16.mxu1 %v14893_v5  ;;  %v14943_v4 = vld [vmem:[%s21221_s1 + $0x6c] ss:$16 sps:$4 sm:$0xff]   ;;  %v14938_v5 = vld [vmem:[%s21221_s1 + $0x60] ss:$16 sps:$4 sm:$0xff]  }
  0x76   : > { %v783_v14 = vrot.slane %v781_v3, 1  ;;  %v855_v43 = vrot.slane %v853_v33, 1  ;;  %v14985_v3 = vld [vmem:[%s21221_s1 + $0x140] ss:$16 sps:$4 sm:$0xff]   ;;  %v15038_v33 = vld [vmem:[%s21221_s1 + $0x22c] ss:$16 sps:$4 sm:$0xff]  }
  0x78   : > { %1625 = vmatpush1.bf16.msra.mxu0 %v14888_v6  ;;  %1791 = vmatpush1.bf16.msra.mxu1 %v14891_v7  ;;  %v14941_v6 = vld [vmem:[%s21221_s1 + $0x68] ss:$16 sps:$4 sm:$0xff]   ;;  %v14946_v7 = vld [vmem:[%s21221_s1 + $0x84] ss:$16 sps:$4 sm:$0xff]  }
  0x79   : > { %1626 = vmatprep.subr.bf16.mxu0 %v14897_v9  ;;  %1792 = vmatprep.subr.bf16.mxu1 %v14900_v10  ;;  %v792_v9 = vsel %vm680_vm0, %v787_v59, %v791_v60  ;;  %v817_v10 = vshrl.u32 %v17204_v39, 16  ;;  %v14956_v39 = vld [vmem:[%s21221_s1 + $0xc0] ss:$16 sps:$4 sm:$0xff]   ;;  %v14979_v59 = vld [vmem:[%s21221_s1 + $0x124] ss:$16 sps:$4 sm:$0xff]  }
  0x7c   : > { %1627 = vmatpush1.bf16.msra.mxu0 %v14895_v11  ;;  %1793 = vmatpush1.bf16.msra.mxu1 %v14898_v12  ;;  %v821_v11 = vshll.u32 %v17238_v61, 16  ;;  %v17265_v12 = vld [vmem:[%s16872_s12 + $0x88] ss:$16 sps:$4 sm:$0xff]   ;;  %v14982_v61 = vld [vmem:[%s21221_s1 + $0x12c] ss:$16 sps:$4 sm:$0xff]  }
  0x7d   : > { %1628 = vmatprep.subr.bf16.mxu0 %v14904_v13  ;;  %1794 = vmatprep.subr.bf16.mxu1 %v14907_v16  ;;  %v779_v13 = vor.u32 %v777_v2, %v751_v54  ;;  %v14949_v16 = vld [vmem:[%s21221_s1 + $0x8c] ss:$16 sps:$4 sm:$0xff]  }
  0x7e   : > { %v823_v20 = vrot.slane %v821_v11, 1  ;;  %v14990_v2 = vld [vmem:[%s21221_s1 + $0x14c] ss:$16 sps:$4 sm:$0xff]   ;;  %v15000_v11 = vld [vmem:[%s21221_s1 + $0x180] ss:$16 sps:$4 sm:$0xff]  }
  0x80   : > { %1629 = vmatpush1.bf16.msra.mxu0 %v14902_v17  ;;  %1795 = vmatpush1.bf16.msra.mxu1 %v14905_v19  ;;  %v14944_v17 = vld [vmem:[%s21221_s1 + $0x80] ss:$16 sps:$4 sm:$0xff]   ;;  %v819_v19 = vor.u32 %v817_v10, %v791_v60  ;;  %v15005_v10 = vld [vmem:[%s21221_s1 + $0x18c] ss:$16 sps:$4 sm:$0xff]  }
  0x81   : > { %1630 = vmatprep.subr.bf16.mxu0 %v14911_v25  ;;  %1796 = vmatprep.subr.bf16.mxu1 %v14914_v26  ;;  %v784_v25 = vsel %vm680_vm0, %v779_v13, %v783_v14  ;;  %v809_v26 = vshrl.u32 %v17226_v55, 16  ;;  %v15009_v13 = vld [vmem:[%s21221_s1 + $0x1a4] ss:$16 sps:$4 sm:$0xff]  }
  0x82   : > { %v824_v31 = vsel %vm680_vm0, %v819_v19, %v823_v20  ;;  %v15014_v19 = vld [vmem:[%s21221_s1 + $0x1c0] ss:$16 sps:$4 sm:$0xff]  }
  0x84   : > { %1631 = vmatpush1.bf16.msra.mxu0 %v14909_v27  ;;  %1797 = vmatpush1.bf16.msra.mxu1 %v14912_v28  ;;  %v813_v27 = vshll.u32 %v17265_v12, 16  ;;  %v14955_v28 = vld [vmem:[%s21221_s1 + $0xac] ss:$16 sps:$4 sm:$0xff]  }
  0x85   : > { %2509 = vmatprep.subr.bf16.mxu0 %v14922_v34  ;;  %2675 = vmatprep.subr.bf16.mxu1 %v14925_v35  ;;  %v14958_v34 = vld [vmem:[%s21221_s1 + $0xc4] ss:$16 sps:$4 sm:$0xff]   ;;  %v811_v35 = vor.u32 %v809_v26, %v783_v14  ;;  %v15012_v14 = vld [vmem:[%s21221_s1 + $0x1ac] ss:$16 sps:$4 sm:$0xff]   ;;  %v15021_v26 = vld [vmem:[%s21221_s1 + $0x1e0] ss:$16 sps:$4 sm:$0xff]  }
  0x87   : > { %1633 = vmatmul.mubr.bf16.vlgmr.msra.gmra.mrb[0].mxu0 %v716_v42  ;;  %1799 = vmatmul.mubr.bf16.vlgmr.msra.gmra.mrb[0].mxu1 %v716_v42  ;;  %v851_v42 = vor.u32 %v849_v32, %v823_v20  ;;  %v15017_v20 = vld [vmem:[%s21221_s1 + $0x1c8] ss:$16 sps:$4 sm:$0xff]   ;;  %v15035_v32 = vld [vmem:[%s21221_s1 + $0x224] ss:$16 sps:$4 sm:$0xff]  }
  0x88   : > { %2510 = vmatpush1.bf16.msra.mxu0 %v14920_v36  ;;  %2676 = vmatpush1.bf16.msra.mxu1 %v14923_v41  ;;  %v815_v36 = vrot.slane %v813_v27, 1  ;;  %v14959_v41 = vld [vmem:[%s21221_s1 + $0xc8] ss:$16 sps:$4 sm:$0xff]  }
  0x89   : > { %2511 = vmatprep.subr.bf16.mxu0 %v14928_v45  ;;  %2677 = vmatprep.subr.bf16.mxu1 %v14931_v46  ;;  %v841_v46 = vshrl.u32 %v17265_v12, 16  ;;  %v856_v52 = vsel %vm680_vm0, %v851_v42, %v855_v43  ;;  %v15003_v12 = vld [vmem:[%s21221_s1 + $0x188] ss:$16 sps:$4 sm:$0xff]   ;;  %v15047_v42 = vld [vmem:[%s21221_s1 + $0x264] ss:$16 sps:$4 sm:$0xff]  }
  0x8a   : > { %1642 = vmatprep.mubr.bf16.mxu0 %v760_v49  ;;  %1808 = vmatprep.mubr.bf16.mxu1 %v760_v49  ;;  %v816_v45 = vsel %vm680_vm0, %v811_v35, %v815_v36  ;;  %v14962_v49 = vld [vmem:[%s21221_s1 + $0xe0] ss:$16 sps:$4 sm:$0xff]   ;;  %v15024_v27 = vld [vmem:[%s21221_s1 + $0x1e8] ss:$16 sps:$4 sm:$0xff]   ;;  %v15050_v43 = vld [vmem:[%s21221_s1 + $0x26c] ss:$16 sps:$4 sm:$0xff]  }
  0x8b   : > { %v843_v54 = vor.u32 %v841_v46, %v815_v36  ;;  %v15036_v35 = vld [vmem:[%s21221_s1 + $0x228] ss:$16 sps:$4 sm:$0xff]   ;;  %v15041_v36 = vld [vmem:[%s21221_s1 + $0x244] ss:$16 sps:$4 sm:$0xff]   ;;  %v17482_v46 = vld [vmem:[%s16872_s12 + $0x20] ss:$16 sps:$4 sm:$0xff]  }
  0x8c   : > { %2512 = vmatpush1.bf16.msra.mxu0 %v14926_v47  ;;  %2678 = vmatpush1.bf16.msra.mxu1 %v14929_v48  ;;  %v845_v47 = vshll.u32 %v17300_v37, 16  ;;  %v14967_v48 = vld [vmem:[%s21221_s1 + $0xec] ss:$16 sps:$4 sm:$0xff]  }
  0x8d   : > { %2513 = vmatprep.subr.bf16.mxu0 %v14934_v56  ;;  %2679 = vmatprep.subr.bf16.mxu1 %v14937_v57  ;;  %v14975_v56 = vld [vmem:[%s21221_s1 + $0x10c] ss:$16 sps:$4 sm:$0xff]   ;;  %v14970_v57 = vld [vmem:[%s21221_s1 + $0x100] ss:$16 sps:$4 sm:$0xff]  }
  0x8e   : > { %v847_v55 = vrot.slane %v845_v47, 1  ;;  %v15053_v47 = vld [vmem:[%s21221_s1 + $0x284] ss:$16 sps:$4 sm:$0xff]  }
  0x8f   : > { %1643 = vmatmul.mubr.bf16.gmra.mrb[4].mxu0 %v752_v1  ;;  %1809 = vmatmul.mubr.bf16.gmra.mrb[4].mxu1 %v752_v1  ;;  %v14987_v1 = vld [vmem:[%s21221_s1 + $0x144] ss:$16 sps:$4 sm:$0xff]  }
  0x90   : > { %2514 = vmatpush1.bf16.msra.mxu0 %v14932_v58  ;;  %2680 = vmatpush1.bf16.msra.mxu1 %v14935_v63  ;;  %v14973_v58 = vld [vmem:[%s21221_s1 + $0x108] ss:$16 sps:$4 sm:$0xff]   ;;  %v848_v60 = vsel %vm680_vm0, %v843_v54, %v847_v55  ;;  %v14977_v63 = vld [vmem:[%s21221_s1 + $0x120] ss:$16 sps:$4 sm:$0xff]   ;;  %v15062_v54 = vld [vmem:[%s21221_s1 + $0x2ac] ss:$16 sps:$4 sm:$0xff]  }
  0x91   : > { %2515 = vmatprep.subr.bf16.mxu0 %v14940_v0  ;;  %2681 = vmatprep.subr.bf16.mxu1 %v14943_v4  ;;  %v14980_v0 = vld [vmem:[%s21221_s1 + $0x128] ss:$16 sps:$4 sm:$0xff]   ;;  %v15057_v55 = vld [vmem:[%s21221_s1 + $0x2a0] ss:$16 sps:$4 sm:$0xff]  }
  0x92   : > { %1652 = vmatprep.mubr.bf16.mxu0 %v792_v9  ;;  %1818 = vmatprep.mubr.bf16.mxu1 %v792_v9  ;;  %v14988_v4 = vld [vmem:[%s21221_s1 + $0x148] ss:$16 sps:$4 sm:$0xff]   ;;  %v15002_v9 = vld [vmem:[%s21221_s1 + $0x184] ss:$16 sps:$4 sm:$0xff]  }
  0x94   : > { %2516 = vmatpush1.bf16.msra.mxu0 %v14938_v5  ;;  %2682 = vmatpush1.bf16.msra.mxu1 %v14941_v6  ;;  %v14994_v5 = vld [vmem:[%s21221_s1 + $0x164] ss:$16 sps:$4 sm:$0xff]   ;;  %v14992_v6 = vld [vmem:[%s21221_s1 + $0x160] ss:$16 sps:$4 sm:$0xff]  }
  0x95   : > { %2517 = vmatprep.subr.bf16.mxu0 %v14946_v7  ;;  %2683 = vmatprep.subr.bf16.mxu1 %v14949_v16  ;;  %v14995_v7 = vld [vmem:[%s21221_s1 + $0x168] ss:$16 sps:$4 sm:$0xff]  }
  0x96   : > { %v15010_v16 = vld [vmem:[%s21221_s1 + $0x1a8] ss:$16 sps:$4 sm:$0xff]  }
  0x97   : > { %1653 = vmatmul.mubr.bf16.gmra.mrb[8].mxu0 %v784_v25  ;;  %1819 = vmatmul.mubr.bf16.gmra.mrb[8].mxu1 %v784_v25  ;;  %v15026_v25 = vld [vmem:[%s21221_s1 + $0x1ec] ss:$16 sps:$4 sm:$0xff]  }
  0x98   : > { %2518 = vmatpush1.bf16.msra.mxu0 %v14944_v17  ;;  %2684 = vmatpush1.bf16.msra.mxu1 %v14947_v18  ;;  %v15016_v17 = vld [vmem:[%s21221_s1 + $0x1c4] ss:$16 sps:$4 sm:$0xff]   ;;  %v15019_v18 = vld [vmem:[%s21221_s1 + $0x1cc] ss:$16 sps:$4 sm:$0xff]  }
  0x99   : > { %2519 = vmatprep.subr.bf16.mxu0 %v14952_v24  ;;  %2685 = vmatprep.subr.bf16.mxu1 %v14955_v28  ;;  %v15023_v24 = vld [vmem:[%s21221_s1 + $0x1e4] ss:$16 sps:$4 sm:$0xff]  }
  0x9a   : > { %1662 = vmatprep.mubr.bf16.mxu0 %v824_v31  ;;  %1828 = vmatprep.mubr.bf16.mxu1 %v824_v31  ;;  %v15029_v28 = vld [vmem:[%s21221_s1 + $0x204] ss:$16 sps:$4 sm:$0xff]   ;;  %v15030_v31 = vld [vmem:[%s21221_s1 + $0x208] ss:$16 sps:$4 sm:$0xff]  }
  0x9c   : > { %2520 = vmatpush1.bf16.msra.mxu0 %v14950_v29  ;;  %2686 = vmatpush1.bf16.msra.mxu1 %v14953_v30  ;;  %v15032_v29 = vld [vmem:[%s21221_s1 + $0x20c] ss:$16 sps:$4 sm:$0xff]   ;;  %v15027_v30 = vld [vmem:[%s21221_s1 + $0x200] ss:$16 sps:$4 sm:$0xff]  }
  0x9d   : > { %2521 = vmatprep.subr.bf16.mxu0 %v14958_v34  ;;  %2687 = vmatprep.subr.bf16.mxu1 %v14961_v38  ;;  %v15033_v34 = vld [vmem:[%s21221_s1 + $0x220] ss:$16 sps:$4 sm:$0xff]   ;;  %v17459_v38 = vld [vmem:[%s16872_s12 + $0x24] ss:$16 sps:$4 sm:$0xff]  }
  0x9f   : > { %1663 = vmatmul.mubr.bf16.gmra.mrb[12].mxu0 %v816_v45  ;;  %1829 = vmatmul.mubr.bf16.gmra.mrb[12].mxu1 %v816_v45  ;;  %v15048_v45 = vld [vmem:[%s21221_s1 + $0x268] ss:$16 sps:$4 sm:$0xff]  }
  0xa0   : > { %2522 = vmatpush1.bf16.msra.mxu0 %v14956_v39  ;;  %2688 = vmatpush1.bf16.msra.mxu1 %v14959_v41  ;;  %v15039_v39 = vld [vmem:[%s21221_s1 + $0x240] ss:$16 sps:$4 sm:$0xff]   ;;  %v15042_v41 = vld [vmem:[%s21221_s1 + $0x248] ss:$16 sps:$4 sm:$0xff]  }
  0xa1   : > { %2523 = vmatprep.subr.bf16.mxu0 %v14964_v44  ;;  %2689 = vmatprep.subr.bf16.mxu1 %v14967_v48  ;;  %v15045_v44 = vld [vmem:[%s21221_s1 + $0x260] ss:$16 sps:$4 sm:$0xff]   ;;  %v15056_v48 = vld [vmem:[%s21221_s1 + $0x28c] ss:$16 sps:$4 sm:$0xff]  }
  0xa2   : > { %1672 = vmatprep.mubr.bf16.mxu0 %v856_v52  ;;  %1838 = vmatprep.mubr.bf16.mxu1 %v856_v52  ;;  %v15054_v52 = vld [vmem:[%s21221_s1 + $0x288] ss:$16 sps:$4 sm:$0xff]  }
  0xa4   : > { %2524 = vmatpush1.bf16.msra.mxu0 %v14962_v49  ;;  %2690 = vmatpush1.bf16.msra.mxu1 %v14965_v51  ;;  %v17493_v49 = vld [vmem:[%s16872_s12 + $0x44] ss:$16 sps:$4 sm:$0xff]   ;;  %v15051_v51 = vld [vmem:[%s21221_s1 + $0x280] ss:$16 sps:$4 sm:$0xff]  }
  0xa5   : > { %2525 = vmatprep.subr.bf16.mxu0 %v14972_v53  ;;  %2691 = vmatprep.subr.bf16.mxu1 %v14975_v56  ;;  %v15059_v53 = vld [vmem:[%s21221_s1 + $0x2a4] ss:$16 sps:$4 sm:$0xff]   ;;  %v15060_v56 = vld [vmem:[%s21221_s1 + $0x2a8] ss:$16 sps:$4 sm:$0xff]  }
  0xa7   : > { %1673 = vmatmul.mubr.bf16.gmra.mrb[16].mxu0 %v848_v60  ;;  %1839 = vmatmul.mubr.bf16.gmra.mrb[16].mxu1 %v848_v60  ;;  %v17527_v60 = vld [vmem:[%s16872_s12 + $0x64] ss:$16 sps:$4 sm:$0xff]  }
  0xa8   : > { %2526 = vmatpush1.bf16.msra.mxu0 %v14970_v57  ;;  %2692 = vmatpush1.bf16.msra.mxu1 %v14973_v58  ;;  %v17516_v57 = vld [vmem:[%s16872_s12 + $0x40] ss:$16 sps:$4 sm:$0xff]   ;;  %v15065_v58 = vld [vmem:[%s21221_s1 + $0x2c4] ss:$16 sps:$4 sm:$0xff]  }
  0xa9   : > { %2527 = vmatprep.subr.bf16.mxu0 %v14979_v59  ;;  %2693 = vmatprep.subr.bf16.mxu1 %v14982_v61  ;;  %v15068_v59 = vld [vmem:[%s21221_s1 + $0x2cc] ss:$16 sps:$4 sm:$0xff]   ;;  %v15063_v61 = vld [vmem:[%s21221_s1 + $0x2c0] ss:$16 sps:$4 sm:$0xff]  }
  0xaa   : > { %2541 = vmatprep.mubr.bf16.mxu0 %v16888_v50  ;;  %2707 = vmatprep.mubr.bf16.mxu1 %v16888_v50  ;;  %v14997_v50 = vld [vmem:[%s21221_s1 + $0x16c] ss:$16 sps:$4 sm:$0xff]  }
  0xac   : > { %2528 = vmatpush1.bf16.msra.mxu0 %v14977_v63  ;;  %2694 = vmatpush1.bf16.msra.mxu1 %v14980_v0  ;;  %v15066_v63 = vld [vmem:[%s21221_s1 + $0x2c8] ss:$16 sps:$4 sm:$0xff]   ;;  %v15071_v0 = vld [vmem:[%s21221_s1 + $0x2e4] ss:$16 sps:$4 sm:$0xff]  }
  0xad   : > { %2529 = vmatprep.subr.bf16.mxu0 %v14987_v1  ;;  %2695 = vmatprep.subr.bf16.mxu1 %v14990_v2  ;;  %v15074_v1 = vld [vmem:[%s21221_s1 + $0x2ec] ss:$16 sps:$4 sm:$0xff]   ;;  %v15069_v2 = vld [vmem:[%s21221_s1 + $0x2e0] ss:$16 sps:$4 sm:$0xff]  }
  0xb0   : > { %2530 = vmatpush1.bf16.msra.mxu0 %v14985_v3  ;;  %2696 = vmatpush1.bf16.msra.mxu1 %v14988_v4  ;;  %v15072_v3 = vld [vmem:[%s21221_s1 + $0x2e8] ss:$16 sps:$4 sm:$0xff]   ;;  %v17550_v4 = vld [vmem:[%s16872_s12 + $0x60] ss:$16 sps:$4 sm:$0xff]  }
  0xb1   : > { %2531 = vmatprep.subr.bf16.mxu0 %v14994_v5  ;;  %2697 = vmatprep.subr.bf16.mxu1 %v14997_v50  ;;  %v15077_v5 = vld [vmem:[%s21221_s1 + $0x304] ss:$16 sps:$4 sm:$0xff]   ;;  %v15080_v50 = vld [vmem:[%s21221_s1 + $0x30c] ss:$16 sps:$4 sm:$0xff]  }
  0xb4   : > { %2532 = vmatpush1.bf16.msra.mxu0 %v14992_v6  ;;  %2698 = vmatpush1.bf16.msra.mxu1 %v14995_v7  ;;  %v17561_v6 = vld [vmem:[%s16872_s12 + $0x84] ss:$16 sps:$4 sm:$0xff]   ;;  %v15075_v7 = vld [vmem:[%s21221_s1 + $0x300] ss:$16 sps:$4 sm:$0xff]  }
  0xb5   : > { %2533 = vmatprep.subr.bf16.mxu0 %v15002_v9  ;;  %2699 = vmatprep.subr.bf16.mxu1 %v15005_v10  ;;  %v15078_v9 = vld [vmem:[%s21221_s1 + $0x308] ss:$16 sps:$4 sm:$0xff]   ;;  %v15083_v10 = vld [vmem:[%s21221_s1 + $0x324] ss:$16 sps:$4 sm:$0xff]  }
  0xb8   : > { %2534 = vmatpush1.bf16.msra.mxu0 %v15000_v11  ;;  %2700 = vmatpush1.bf16.msra.mxu1 %v15003_v12  ;;  %v15086_v11 = vld [vmem:[%s21221_s1 + $0x32c] ss:$16 sps:$4 sm:$0xff]   ;;  %v15081_v12 = vld [vmem:[%s21221_s1 + $0x320] ss:$16 sps:$4 sm:$0xff]  }
  0xb9   : > { %2535 = vmatprep.subr.bf16.mxu0 %v15009_v13  ;;  %2701 = vmatprep.subr.bf16.mxu1 %v15012_v14  ;;  %v17581_v13 = vld [vmem:[%s16872_s12 + $0x80] ss:$16 sps:$4 sm:$0xff]   ;;  %v15084_v14 = vld [vmem:[%s21221_s1 + $0x328] ss:$16 sps:$4 sm:$0xff]  }
  0xbc   : > { %2536 = vmatpush1.bf16.msra.mxu0 %v15007_v15  ;;  %2702 = vmatpush1.bf16.msra.mxu1 %v15010_v16  ;;  %v15089_v15 = vld [vmem:[%s21221_s1 + $0x344] ss:$16 sps:$4 sm:$0xff]   ;;  %v15092_v16 = vld [vmem:[%s21221_s1 + $0x34c] ss:$16 sps:$4 sm:$0xff]  }
  0xbd   : > { %2537 = vmatprep.subr.bf16.mxu0 %v15016_v17  ;;  %2703 = vmatprep.subr.bf16.mxu1 %v15019_v18  ;;  %v15087_v17 = vld [vmem:[%s21221_s1 + $0x340] ss:$16 sps:$4 sm:$0xff]   ;;  %v15090_v18 = vld [vmem:[%s21221_s1 + $0x348] ss:$16 sps:$4 sm:$0xff]  }
  0xc0   : > { %2538 = vmatpush1.bf16.msra.mxu0 %v15014_v19  ;;  %2704 = vmatpush1.bf16.msra.mxu1 %v15017_v20  ;;  %v15095_v19 = vld [vmem:[%s21221_s1 + $0x364] ss:$16 sps:$4 sm:$0xff]   ;;  %v15093_v20 = vld [vmem:[%s21221_s1 + $0x360] ss:$16 sps:$4 sm:$0xff]  }
  0xc1   : > { %2539 = vmatprep.subr.bf16.mxu0 %v15023_v24  ;;  %2705 = vmatprep.subr.bf16.mxu1 %v15026_v25  ;;  %v15096_v24 = vld [vmem:[%s21221_s1 + $0x368] ss:$16 sps:$4 sm:$0xff]   ;;  %v15101_v25 = vld [vmem:[%s21221_s1 + $0x384] ss:$16 sps:$4 sm:$0xff]  }
  0xc4   : > { %2540 = vmatpush1.bf16.msra.mxu0 %v15021_v26  ;;  %2706 = vmatpush1.bf16.msra.mxu1 %v15024_v27  ;;  %v15104_v26 = vld [vmem:[%s21221_s1 + $0x38c] ss:$16 sps:$4 sm:$0xff]   ;;  %v15099_v27 = vld [vmem:[%s21221_s1 + $0x380] ss:$16 sps:$4 sm:$0xff]  }
  0xc5   : > { %2592 = vmatprep.subr.bf16.mxu0 %v15029_v28  ;;  %2758 = vmatprep.subr.bf16.mxu1 %v15032_v29  ;;  %v15102_v28 = vld [vmem:[%s21221_s1 + $0x388] ss:$16 sps:$4 sm:$0xff]   ;;  %v15107_v29 = vld [vmem:[%s21221_s1 + $0x3a4] ss:$16 sps:$4 sm:$0xff]  }
  0xc7   : > { %2542 = vmatmul.mubr.bf16.vlgmr.msra.gmra.mrb[0].mxu0 %v16913_v62  ;;  %2708 = vmatmul.mubr.bf16.vlgmr.msra.gmra.mrb[0].mxu1 %v16913_v62  ;;  %v15044_v62 = vld [vmem:[%s21221_s1 + $0x24c] ss:$16 sps:$4 sm:$0xff]  }
  0xc8   : > { %2593 = vmatpush1.bf16.msra.mxu0 %v15027_v30  ;;  %2759 = vmatpush1.bf16.msra.mxu1 %v15030_v31  ;;  %v15110_v30 = vld [vmem:[%s21221_s1 + $0x3ac] ss:$16 sps:$4 sm:$0xff]   ;;  %v15105_v31 = vld [vmem:[%s21221_s1 + $0x3a0] ss:$16 sps:$4 sm:$0xff]  }
  0xc9   : > { %2594 = vmatprep.subr.bf16.mxu0 %v15035_v32  ;;  %2760 = vmatprep.subr.bf16.mxu1 %v15038_v33  ;;  %v15108_v32 = vld [vmem:[%s21221_s1 + $0x3a8] ss:$16 sps:$4 sm:$0xff]   ;;  %v15113_v33 = vld [vmem:[%s21221_s1 + $0x3c4] ss:$16 sps:$4 sm:$0xff]  }
  0xca   : > { %2551 = vmatprep.mubr.bf16.mxu0 %v17459_v38  ;;  %2717 = vmatprep.mubr.bf16.mxu1 %v17459_v38 }
  0xcc   : > { %2595 = vmatpush1.bf16.msra.mxu0 %v15033_v34  ;;  %2761 = vmatpush1.bf16.msra.mxu1 %v15036_v35  ;;  %v15116_v34 = vld [vmem:[%s21221_s1 + $0x3cc] ss:$16 sps:$4 sm:$0xff]   ;;  %v15111_v35 = vld [vmem:[%s21221_s1 + $0x3c0] ss:$16 sps:$4 sm:$0xff]  }
  0xcd   : > { %2596 = vmatprep.subr.bf16.mxu0 %v15041_v36  ;;  %2762 = vmatprep.subr.bf16.mxu1 %v15044_v62  ;;  %v15114_v36 = vld [vmem:[%s21221_s1 + $0x3c8] ss:$16 sps:$4 sm:$0xff]   ;;  %v15119_v62 = vld [vmem:[%s21221_s1 + $0x3e4] ss:$16 sps:$4 sm:$0xff]  }
  0xcf   : > { %2552 = vmatmul.mubr.bf16.gmra.mrb[4].mxu0 %v17482_v46  ;;  %2718 = vmatmul.mubr.bf16.gmra.mrb[4].mxu1 %v17482_v46 }
  0xd0   : > { %2597 = vmatpush1.bf16.msra.mxu0 %v15039_v39  ;;  %2763 = vmatpush1.bf16.msra.mxu1 %v15042_v41  ;;  %v15122_v39 = vld [vmem:[%s21221_s1 + $0x3ec] ss:$16 sps:$4 sm:$0xff]   ;;  %v15117_v41 = vld [vmem:[%s21221_s1 + $0x3e0] ss:$16 sps:$4 sm:$0xff]  }
  0xd1   : > { %2598 = vmatprep.subr.bf16.mxu0 %v15047_v42  ;;  %2764 = vmatprep.subr.bf16.mxu1 %v15050_v43  ;;  %v15120_v42 = vld [vmem:[%s21221_s1 + $0x3e8] ss:$16 sps:$4 sm:$0xff]   ;;  %v15125_v43 = vld [vmem:[%s21221_s1 + $0x804] ss:$16 sps:$4 sm:$0xff]  }
  0xd2   : > { %2561 = vmatprep.mubr.bf16.mxu0 %v17493_v49  ;;  %2727 = vmatprep.mubr.bf16.mxu1 %v17493_v49 }
  0xd4   : > { %2599 = vmatpush1.bf16.msra.mxu0 %v15045_v44  ;;  %2765 = vmatpush1.bf16.msra.mxu1 %v15048_v45  ;;  %v15128_v44 = vld [vmem:[%s21221_s1 + $0x80c] ss:$16 sps:$4 sm:$0xff]   ;;  %v15123_v45 = vld [vmem:[%s21221_s1 + $0x800] ss:$16 sps:$4 sm:$0xff]  }
  0xd5   : > { %2600 = vmatprep.subr.bf16.mxu0 %v15053_v47  ;;  %2766 = vmatprep.subr.bf16.mxu1 %v15056_v48  ;;  %v15126_v47 = vld [vmem:[%s21221_s1 + $0x808] ss:$16 sps:$4 sm:$0xff]   ;;  %v15131_v48 = vld [vmem:[%s21221_s1 + $0x824] ss:$16 sps:$4 sm:$0xff]  }
  0xd7   : > { %2562 = vmatmul.mubr.bf16.gmra.mrb[8].mxu0 %v17516_v57  ;;  %2728 = vmatmul.mubr.bf16.gmra.mrb[8].mxu1 %v17516_v57 }
  0xd8   : > { %2601 = vmatpush1.bf16.msra.mxu0 %v15051_v51  ;;  %2767 = vmatpush1.bf16.msra.mxu1 %v15054_v52  ;;  %v15134_v51 = vld [vmem:[%s21221_s1 + $0x82c] ss:$16 sps:$4 sm:$0xff]   ;;  %v15129_v52 = vld [vmem:[%s21221_s1 + $0x820] ss:$16 sps:$4 sm:$0xff]  }
  0xd9   : > { %2602 = vmatprep.subr.bf16.mxu0 %v15059_v53  ;;  %2768 = vmatprep.subr.bf16.mxu1 %v15062_v54  ;;  %v15132_v53 = vld [vmem:[%s21221_s1 + $0x828] ss:$16 sps:$4 sm:$0xff]   ;;  %v15137_v54 = vld [vmem:[%s21221_s1 + $0x844] ss:$16 sps:$4 sm:$0xff]  }
  0xda   : > { %2571 = vmatprep.mubr.bf16.mxu0 %v17527_v60  ;;  %2737 = vmatprep.mubr.bf16.mxu1 %v17527_v60 }
  0xdc   : > { %2603 = vmatpush1.bf16.msra.mxu0 %v15057_v55  ;;  %2769 = vmatpush1.bf16.msra.mxu1 %v15060_v56  ;;  %v17695_v55 = vld [vmem:[%s16872_s12 + $0x2c] ss:$16 sps:$4 sm:$0xff]   ;;  %v15135_v56 = vld [vmem:[%s21221_s1 + $0x840] ss:$16 sps:$4 sm:$0xff]  }
  0xdd   : > { %2604 = vmatprep.subr.bf16.mxu0 %v15065_v58  ;;  %2770 = vmatprep.subr.bf16.mxu1 %v15068_v59  ;;  %v15138_v58 = vld [vmem:[%s21221_s1 + $0x848] ss:$16 sps:$4 sm:$0xff]   ;;  %v15143_v59 = vld [vmem:[%s21221_s1 + $0x864] ss:$16 sps:$4 sm:$0xff]  }
  0xdf   : > { %2572 = vmatmul.mubr.bf16.gmra.mrb[12].mxu0 %v17550_v4  ;;  %2738 = vmatmul.mubr.bf16.gmra.mrb[12].mxu1 %v17550_v4 }
  0xe0   : > { %2605 = vmatpush1.bf16.msra.mxu0 %v15063_v61  ;;  %2771 = vmatpush1.bf16.msra.mxu1 %v15066_v63  ;;  %v15146_v61 = vld [vmem:[%s21221_s1 + $0x86c] ss:$16 sps:$4 sm:$0xff]   ;;  %v15141_v63 = vld [vmem:[%s21221_s1 + $0x860] ss:$16 sps:$4 sm:$0xff]  }
  0xe1   : > { %2606 = vmatprep.subr.bf16.mxu0 %v15071_v0  ;;  %2772 = vmatprep.subr.bf16.mxu1 %v15074_v1  ;;  %v17715_v0 = vld [vmem:[%s16872_s12 + $0x28] ss:$16 sps:$4 sm:$0xff]  }
  0xe2   : > { %2581 = vmatprep.mubr.bf16.mxu0 %v17561_v6  ;;  %2747 = vmatprep.mubr.bf16.mxu1 %v17561_v6  ;;  %v15144_v1 = vld [vmem:[%s21221_s1 + $0x868] ss:$16 sps:$4 sm:$0xff]  }
  0xe4   : > { %2607 = vmatpush1.bf16.msra.mxu0 %v15069_v2  ;;  %2773 = vmatpush1.bf16.msra.mxu1 %v15072_v3  ;;  %v15149_v2 = vld [vmem:[%s21221_s1 + $0x884] ss:$16 sps:$4 sm:$0xff]   ;;  %v15152_v3 = vld [vmem:[%s21221_s1 + $0x88c] ss:$16 sps:$4 sm:$0xff]  }
  0xe5   : > { %2608 = vmatprep.subr.bf16.mxu0 %v15077_v5  ;;  %2774 = vmatprep.subr.bf16.mxu1 %v15080_v50  ;;  %v17729_v5 = vld [vmem:[%s16872_s12 + $0x4c] ss:$16 sps:$4 sm:$0xff]   ;;  %v15147_v50 = vld [vmem:[%s21221_s1 + $0x880] ss:$16 sps:$4 sm:$0xff]  }
  0xe7   : > { %2582 = vmatmul.mubr.bf16.gmra.mrb[16].mxu0 %v17581_v13  ;;  %2748 = vmatmul.mubr.bf16.gmra.mrb[16].mxu1 %v17581_v13 }
  0xe8   : > { %2609 = vmatpush1.bf16.msra.mxu0 %v15075_v7  ;;  %2775 = vmatpush1.bf16.msra.mxu1 %v15078_v9  ;;  %v15150_v7 = vld [vmem:[%s21221_s1 + $0x888] ss:$16 sps:$4 sm:$0xff]   ;;  %v15155_v9 = vld [vmem:[%s21221_s1 + $0x8a4] ss:$16 sps:$4 sm:$0xff]  }
  0xe9   : > { %2610 = vmatprep.subr.bf16.mxu0 %v15083_v10  ;;  %2776 = vmatprep.subr.bf16.mxu1 %v15086_v11  ;;  %v15158_v10 = vld [vmem:[%s21221_s1 + $0x8ac] ss:$16 sps:$4 sm:$0xff]   ;;  %v17746_v11 = vld [vmem:[%s16872_s12 + $0x48] ss:$16 sps:$4 sm:$0xff]  }
  0xea   : > { %2624 = vmatprep.mubr.bf16.mxu0 %v17080_v40  ;;  %2790 = vmatprep.mubr.bf16.mxu1 %v17080_v40  ;;  %v15098_v40 = vld [vmem:[%s21221_s1 + $0x36c] ss:$16 sps:$4 sm:$0xff]  }
  0xec   : > { %2611 = vmatpush1.bf16.msra.mxu0 %v15081_v12  ;;  %2777 = vmatpush1.bf16.msra.mxu1 %v15084_v14  ;;  %v15153_v12 = vld [vmem:[%s21221_s1 + $0x8a0] ss:$16 sps:$4 sm:$0xff]   ;;  %v15156_v14 = vld [vmem:[%s21221_s1 + $0x8a8] ss:$16 sps:$4 sm:$0xff]  }
  0xed   : > { %2612 = vmatprep.subr.bf16.mxu0 %v15089_v15  ;;  %2778 = vmatprep.subr.bf16.mxu1 %v15092_v16  ;;  %v15161_v15 = vld [vmem:[%s21221_s1 + $0x8c4] ss:$16 sps:$4 sm:$0xff]   ;;  %v15164_v16 = vld [vmem:[%s21221_s1 + $0x8cc] ss:$16 sps:$4 sm:$0xff]  }
  0xf0   : > { %2613 = vmatpush1.bf16.msra.mxu0 %v15087_v17  ;;  %2779 = vmatpush1.bf16.msra.mxu1 %v15090_v18  ;;  %v17763_v17 = vld [vmem:[%s16872_s12 + $0x6c] ss:$16 sps:$4 sm:$0xff]   ;;  %v15159_v18 = vld [vmem:[%s21221_s1 + $0x8c0] ss:$16 sps:$4 sm:$0xff]  }
  0xf1   : > { %2614 = vmatprep.subr.bf16.mxu0 %v15095_v19  ;;  %2780 = vmatprep.subr.bf16.mxu1 %v15098_v40  ;;  %v15162_v19 = vld [vmem:[%s21221_s1 + $0x8c8] ss:$16 sps:$4 sm:$0xff]   ;;  %v17774_v40 = vld [vmem:[%s16872_s12] sm:$0xee] }
  0xf4   : > { %2615 = vmatpush1.bf16.msra.mxu0 %v15093_v20  ;;  %2781 = vmatpush1.bf16.msra.mxu1 %v15096_v24  ;;  %v15167_v20 = vld [vmem:[%s21221_s1 + $0x8e4] ss:$16 sps:$4 sm:$0xff]   ;;  %v15170_v24 = vld [vmem:[%s21221_s1 + $0x8ec] ss:$16 sps:$4 sm:$0xff]  }
  0xf5   : > { %2616 = vmatprep.subr.bf16.mxu0 %v15101_v25  ;;  %2782 = vmatprep.subr.bf16.mxu1 %v15104_v26  ;;  %v17783_v25 = vld [vmem:[%s16872_s12 + $0x68] ss:$16 sps:$4 sm:$0xff]   ;;  %v17788_v26 = vld [vmem:[%s16872_s12 + $0x10] sm:$0xff] }
  0xf8   : > { %2617 = vmatpush1.bf16.msra.mxu0 %v15099_v27  ;;  %2783 = vmatpush1.bf16.msra.mxu1 %v15102_v28  ;;  %v12910_v27 = vcombine.high %v17774_v40, %v17788_v26  ;;  %v15165_v28 = vld [vmem:[%s21221_s1 + $0x8e0] ss:$16 sps:$4 sm:$0xff]  }
  0xf9   : > { %2618 = vmatprep.subr.bf16.mxu0 %v15107_v29  ;;  %2784 = vmatprep.subr.bf16.mxu1 %v15110_v30  ;;  %v15168_v29 = vld [vmem:[%s21221_s1 + $0x8e8] ss:$16 sps:$4 sm:$0xff]   ;;  %v15173_v30 = vld [vmem:[%s21221_s1 + $0x904] ss:$16 sps:$4 sm:$0xff]  }
  0xfc   : > { %2619 = vmatpush1.bf16.msra.mxu0 %v15105_v31  ;;  %2785 = vmatpush1.bf16.msra.mxu1 %v15108_v32  ;;  %v15176_v31 = vld [vmem:[%s21221_s1 + $0x90c] ss:$16 sps:$4 sm:$0xff]  }
  0xfd   : > { %2620 = vmatprep.subr.bf16.mxu0 %v15113_v33  ;;  %2786 = vmatprep.subr.bf16.mxu1 %v15116_v34  ;;  %v17805_v32 = vld [vmem:[%s16872_s12 + $0x8c] ss:$16 sps:$4 sm:$0xff]   ;;  %v2985_v33 = vrot.slane %v12910_v27, 1  ;;  %v2986_v34 = vrot.slane %v17459_v38, 1  ;;  %v15224_v27 = vld [vmem:[%s21221_s1 + $0xa08] ss:$16 sps:$4 sm:$0xff]  }
  0xfe   : > { %v15235_v38 = vld [vmem:[%s21221_s1 + $0xa44] ss:$16 sps:$4 sm:$0xff]  }
 0x100   : > { %2621 = vmatpush1.bf16.msra.mxu0 %v15111_v35  ;;  %2787 = vmatpush1.bf16.msra.mxu1 %v15114_v36  ;;  %v15171_v35 = vld [vmem:[%s21221_s1 + $0x900] ss:$16 sps:$4 sm:$0xff]   ;;  %v15174_v36 = vld [vmem:[%s21221_s1 + $0x908] ss:$16 sps:$4 sm:$0xff]  }
 0x101   : > { %2622 = vmatprep.subr.bf16.mxu0 %v15119_v62  ;;  %2788 = vmatprep.subr.bf16.mxu1 %v15122_v39  ;;  %v15179_v62 = vld [vmem:[%s21221_s1 + $0x924] ss:$16 sps:$4 sm:$0xff]   ;;  %v15182_v39 = vld [vmem:[%s21221_s1 + $0x92c] ss:$16 sps:$4 sm:$0xff]  }
 0x104   : > { %2623 = vmatpush1.bf16.msra.mxu0 %v15117_v41  ;;  %2789 = vmatpush1.bf16.msra.mxu1 %v15120_v42  ;;  %v17823_v41 = vld [vmem:[%s16872_s12 + $0x88] ss:$16 sps:$4 sm:$0xff]   ;;  %v2987_v42 = vsel %vm2981_vm1, %v2985_v33, %v2986_v34 }
 0x105   : > { %3686 = vmatprep.subr.bf16.mxu0 %v15125_v43  ;;  %3852 = vmatprep.subr.bf16.mxu1 %v15128_v44  ;;  %v15177_v43 = vld [vmem:[%s21221_s1 + $0x920] ss:$16 sps:$4 sm:$0xff]   ;;  %v15180_v44 = vld [vmem:[%s21221_s1 + $0x928] ss:$16 sps:$4 sm:$0xff]  }
 0x106   : > { %v15230_v33 = vld [vmem:[%s21221_s1 + $0xa28] ss:$16 sps:$4 sm:$0xff]  }
 0x107   : > { %2625 = vmatmul.mubr.bf16.vlgmr.msra.gmra.mrb[0].mxu0 %v17147_v8  ;;  %2791 = vmatmul.mubr.bf16.vlgmr.msra.gmra.mrb[0].mxu1 %v17147_v8  ;;  %v15140_v8 = vld [vmem:[%s21221_s1 + $0x84c] ss:$16 sps:$4 sm:$0xff]  }
 0x108   : > { %3687 = vmatpush1.bf16.msra.mxu0 %v15123_v45  ;;  %3853 = vmatpush1.bf16.msra.mxu1 %v15126_v47  ;;  %v15185_v45 = vld [vmem:[%s21221_s1 + $0x944] ss:$16 sps:$4 sm:$0xff]   ;;  %v15188_v47 = vld [vmem:[%s21221_s1 + $0x94c] ss:$16 sps:$4 sm:$0xff]  }
 0x109   : > { %3688 = vmatprep.subr.bf16.mxu0 %v15131_v48  ;;  %3854 = vmatprep.subr.bf16.mxu1 %v15134_v51  ;;  %v15183_v48 = vld [vmem:[%s21221_s1 + $0x940] ss:$16 sps:$4 sm:$0xff]   ;;  %v15186_v51 = vld [vmem:[%s21221_s1 + $0x948] ss:$16 sps:$4 sm:$0xff]  }
 0x10a   : > { %2634 = vmatprep.mubr.bf16.mxu0 %v17695_v55  ;;  %2800 = vmatprep.mubr.bf16.mxu1 %v17695_v55 }
 0x10c   : > { %3689 = vmatpush1.bf16.msra.mxu0 %v15129_v52  ;;  %3855 = vmatpush1.bf16.msra.mxu1 %v15132_v53  ;;  %v15191_v52 = vld [vmem:[%s21221_s1 + $0x964] ss:$16 sps:$4 sm:$0xff]   ;;  %v15194_v53 = vld [vmem:[%s21221_s1 + $0x96c] ss:$16 sps:$4 sm:$0xff]  }
 0x10d   : > { %3690 = vmatprep.subr.bf16.mxu0 %v15137_v54  ;;  %3856 = vmatprep.subr.bf16.mxu1 %v15140_v8  ;;  %v15189_v54 = vld [vmem:[%s21221_s1 + $0x960] ss:$16 sps:$4 sm:$0xff]   ;;  %v15192_v8 = vld [vmem:[%s21221_s1 + $0x968] ss:$16 sps:$4 sm:$0xff]  }
 0x10f   : > { %2635 = vmatmul.mubr.bf16.gmra.mrb[4].mxu0 %v17715_v0  ;;  %2801 = vmatmul.mubr.bf16.gmra.mrb[4].mxu1 %v17715_v0 }
 0x110   : > { %3691 = vmatpush1.bf16.msra.mxu0 %v15135_v56  ;;  %3857 = vmatpush1.bf16.msra.mxu1 %v15138_v58  ;;  %v15197_v56 = vld [vmem:[%s21221_s1 + $0x984] ss:$16 sps:$4 sm:$0xff]   ;;  %v15200_v58 = vld [vmem:[%s21221_s1 + $0x98c] ss:$16 sps:$4 sm:$0xff]  }
 0x111   : > { %3692 = vmatprep.subr.bf16.mxu0 %v15143_v59  ;;  %3858 = vmatprep.subr.bf16.mxu1 %v15146_v61  ;;  %v15195_v59 = vld [vmem:[%s21221_s1 + $0x980] ss:$16 sps:$4 sm:$0xff]   ;;  %v15198_v61 = vld [vmem:[%s21221_s1 + $0x988] ss:$16 sps:$4 sm:$0xff]  }
 0x112   : > { %2644 = vmatprep.mubr.bf16.mxu0 %v17729_v5  ;;  %2810 = vmatprep.mubr.bf16.mxu1 %v17729_v5 }
 0x114   : > { %3693 = vmatpush1.bf16.msra.mxu0 %v15141_v63  ;;  %3859 = vmatpush1.bf16.msra.mxu1 %v15144_v1  ;;  %v15203_v63 = vld [vmem:[%s21221_s1 + $0x9a4] ss:$16 sps:$4 sm:$0xff]   ;;  %v15206_v1 = vld [vmem:[%s21221_s1 + $0x9ac] ss:$16 sps:$4 sm:$0xff]  }
 0x115   : > { %3694 = vmatprep.subr.bf16.mxu0 %v15149_v2  ;;  %3860 = vmatprep.subr.bf16.mxu1 %v15152_v3  ;;  %v15201_v2 = vld [vmem:[%s21221_s1 + $0x9a0] ss:$16 sps:$4 sm:$0xff]   ;;  %v15204_v3 = vld [vmem:[%s21221_s1 + $0x9a8] ss:$16 sps:$4 sm:$0xff]  }
 0x117   : > { %2645 = vmatmul.mubr.bf16.gmra.mrb[8].mxu0 %v17746_v11  ;;  %2811 = vmatmul.mubr.bf16.gmra.mrb[8].mxu1 %v17746_v11 }
 0x118   : > { %3695 = vmatpush1.bf16.msra.mxu0 %v15147_v50  ;;  %3861 = vmatpush1.bf16.msra.mxu1 %v15150_v7  ;;  %v15209_v50 = vld [vmem:[%s21221_s1 + $0x9c4] ss:$16 sps:$4 sm:$0xff]   ;;  %v15212_v7 = vld [vmem:[%s21221_s1 + $0x9cc] ss:$16 sps:$4 sm:$0xff]  }
 0x119   : > { %3696 = vmatprep.subr.bf16.mxu0 %v15155_v9  ;;  %3862 = vmatprep.subr.bf16.mxu1 %v15158_v10  ;;  %v15207_v9 = vld [vmem:[%s21221_s1 + $0x9c0] ss:$16 sps:$4 sm:$0xff]   ;;  %v15210_v10 = vld [vmem:[%s21221_s1 + $0x9c8] ss:$16 sps:$4 sm:$0xff]  }
 0x11a   : > { %2654 = vmatprep.mubr.bf16.mxu0 %v17763_v17  ;;  %2820 = vmatprep.mubr.bf16.mxu1 %v17763_v17 }
 0x11c   : > { %3697 = vmatpush1.bf16.msra.mxu0 %v15153_v12  ;;  %3863 = vmatpush1.bf16.msra.mxu1 %v15156_v14  ;;  %v12909_v12 = vcombine.low %v17774_v40, %v17788_v26  ;;  %v15215_v14 = vld [vmem:[%s21221_s1 + $0x9e4] ss:$16 sps:$4 sm:$0xff]   ;;  %v15221_v26 = vld [vmem:[%s21221_s1 + $0xa00] ss:$16 sps:$4 sm:$0xff]  }
 0x11d   : > { %3698 = vmatprep.subr.bf16.mxu0 %v15161_v15  ;;  %3864 = vmatprep.subr.bf16.mxu1 %v15164_v16  ;;  %v15218_v15 = vld [vmem:[%s21221_s1 + $0x9ec] ss:$16 sps:$4 sm:$0xff]   ;;  %v2983_v16 = vrot.slane %v17482_v46, 1 }
 0x11e   : > { %v2982_v40 = vrot.slane %v12909_v12, 1  ;;  %v15226_v46 = vld [vmem:[%s21221_s1 + $0xa0c] ss:$16 sps:$4 sm:$0xff]  }
 0x11f   : > { %2655 = vmatmul.mubr.bf16.gmra.mrb[12].mxu0 %v17783_v25  ;;  %2821 = vmatmul.mubr.bf16.gmra.mrb[12].mxu1 %v17783_v25  ;;  %v18022_v12 = vld [vmem:[%s16872_s12 + $0x18] sm:$0xff] }
 0x120   : > { %3699 = vmatpush1.bf16.msra.mxu0 %v15159_v18  ;;  %3865 = vmatpush1.bf16.msra.mxu1 %v15162_v19  ;;  %v15213_v18 = vld [vmem:[%s21221_s1 + $0x9e0] ss:$16 sps:$4 sm:$0xff]   ;;  %v15216_v19 = vld [vmem:[%s21221_s1 + $0x9e8] ss:$16 sps:$4 sm:$0xff]  }
 0x121   : > { %3700 = vmatprep.subr.bf16.mxu0 %v15167_v20  ;;  %3866 = vmatprep.subr.bf16.mxu1 %v15170_v24  ;;  %v15223_v20 = vld [vmem:[%s21221_s1 + $0xa04] ss:$16 sps:$4 sm:$0xff]   ;;  %v2996_v24 = vrot.slane %v17493_v49, 1  ;;  %v15232_v49 = vld [vmem:[%s21221_s1 + $0xa2c] ss:$16 sps:$4 sm:$0xff]  }
 0x122   : > { %2664 = vmatprep.mubr.bf16.mxu0 %v17805_v32  ;;  %2830 = vmatprep.mubr.bf16.mxu1 %v17805_v32 }
 0x124   : > { %3701 = vmatpush1.bf16.msra.mxu0 %v15165_v28  ;;  %3867 = vmatpush1.bf16.msra.mxu1 %v15168_v29  ;;  %v2984_v28 = vsel %vm2981_vm1, %v2982_v40, %v2983_v16  ;;  %v15229_v29 = vld [vmem:[%s21221_s1 + $0xa24] ss:$16 sps:$4 sm:$0xff]   ;;  %v15274_v40 = vld [vmem:[%s21221_s1 + $0xb0c] ss:$16 sps:$4 sm:$0xff]  }
 0x125   : > { %3702 = vmatprep.subr.bf16.mxu0 %v15173_v30  ;;  %3868 = vmatprep.subr.bf16.mxu1 %v15176_v31  ;;  %v2997_v30 = vsel %vm2981_vm1, %v2986_v34, %v2996_v24  ;;  %v15227_v31 = vld [vmem:[%s21221_s1 + $0xa20] ss:$16 sps:$4 sm:$0xff]   ;;  %v15238_v34 = vld [vmem:[%s21221_s1 + $0xa4c] ss:$16 sps:$4 sm:$0xff]  }
 0x127   : > { %2665 = vmatmul.mubr.bf16.gmra.mrb[16].mxu0 %v17823_v41  ;;  %2831 = vmatmul.mubr.bf16.gmra.mrb[16].mxu1 %v17823_v41 }
 0x128   : > { %3703 = vmatpush1.bf16.msra.mxu0 %v15171_v35  ;;  %3869 = vmatpush1.bf16.msra.mxu1 %v15174_v36  ;;  %v2994_v35 = vrot.slane %v17516_v57, 1  ;;  %v3004_v36 = vrot.slane %v17527_v60, 1  ;;  %v15233_v57 = vld [vmem:[%s21221_s1 + $0xa40] ss:$16 sps:$4 sm:$0xff]   ;;  %v15244_v60 = vld [vmem:[%s21221_s1 + $0xa6c] ss:$16 sps:$4 sm:$0xff]  }
 0x129   : > { %3704 = vmatprep.subr.bf16.mxu0 %v15179_v62  ;;  %3870 = vmatprep.subr.bf16.mxu1 %v15182_v39  ;;  %v15236_v62 = vld [vmem:[%s21221_s1 + $0xa48] ss:$16 sps:$4 sm:$0xff]  }
 0x12a   : > { %3718 = vmatprep.mubr.bf16.mxu0 %v2987_v42  ;;  %3884 = vmatprep.mubr.bf16.mxu1 %v2987_v42  ;;  %v2995_v39 = vsel %vm2981_vm1, %v2983_v16, %v2994_v35  ;;  %v15241_v42 = vld [vmem:[%s21221_s1 + $0xa64] ss:$16 sps:$4 sm:$0xff]   ;;  %v15266_v16 = vld [vmem:[%s21221_s1 + $0xae8] ss:$16 sps:$4 sm:$0xff]  }
 0x12c   : > { %3705 = vmatpush1.bf16.msra.mxu0 %v15177_v43  ;;  %3871 = vmatpush1.bf16.msra.mxu1 %v15180_v44  ;;  %v3005_v43 = vsel %vm2981_vm1, %v2996_v24, %v3004_v36  ;;  %v15239_v44 = vld [vmem:[%s21221_s1 + $0xa60] ss:$16 sps:$4 sm:$0xff]   ;;  %v15272_v24 = vld [vmem:[%s21221_s1 + $0xb08] ss:$16 sps:$4 sm:$0xff]  }
 0x12d   : > { %3706 = vmatprep.subr.bf16.mxu0 %v15185_v45  ;;  %3872 = vmatprep.subr.bf16.mxu1 %v15188_v47  ;;  %v15242_v45 = vld [vmem:[%s21221_s1 + $0xa68] ss:$16 sps:$4 sm:$0xff]   ;;  %v3002_v47 = vrot.slane %v17550_v4, 1  ;;  %v15245_v4 = vld [vmem:[%s21221_s1 + $0xa80] ss:$16 sps:$4 sm:$0xff]  }
 0x130   : > { %3707 = vmatpush1.bf16.msra.mxu0 %v15183_v48  ;;  %3873 = vmatpush1.bf16.msra.mxu1 %v15186_v51  ;;  %v15247_v48 = vld [vmem:[%s21221_s1 + $0xa84] ss:$16 sps:$4 sm:$0xff]   ;;  %v15250_v51 = vld [vmem:[%s21221_s1 + $0xa8c] ss:$16 sps:$4 sm:$0xff]  }
 0x131   : > { %3708 = vmatprep.subr.bf16.mxu0 %v15191_v52  ;;  %3874 = vmatprep.subr.bf16.mxu1 %v15194_v53  ;;  %v3012_v52 = vrot.slane %v17561_v6, 1  ;;  %v15248_v53 = vld [vmem:[%s21221_s1 + $0xa88] ss:$16 sps:$4 sm:$0xff]   ;;  %v15256_v6 = vld [vmem:[%s21221_s1 + $0xaac] ss:$16 sps:$4 sm:$0xff]  }
 0x134   : > { %3709 = vmatpush1.bf16.msra.mxu0 %v15189_v54  ;;  %3875 = vmatpush1.bf16.msra.mxu1 %v15192_v8  ;;  %v3003_v54 = vsel %vm2981_vm1, %v2994_v35, %v3002_v47  ;;  %v15253_v8 = vld [vmem:[%s21221_s1 + $0xaa4] ss:$16 sps:$4 sm:$0xff]   ;;  %v15281_v35 = vld [vmem:[%s21221_s1 + $0xb40] ss:$16 sps:$4 sm:$0xff]  }
 0x135   : > { %3710 = vmatprep.subr.bf16.mxu0 %v15197_v56  ;;  %3876 = vmatprep.subr.bf16.mxu1 %v15200_v58  ;;  %v3013_v56 = vsel %vm2981_vm1, %v3004_v36, %v3012_v52  ;;  %v15251_v58 = vld [vmem:[%s21221_s1 + $0xaa0] ss:$16 sps:$4 sm:$0xff]   ;;  %v15292_v36 = vld [vmem:[%s21221_s1 + $0xb6c] ss:$16 sps:$4 sm:$0xff]  }
 0x138   : > { %3711 = vmatpush1.bf16.msra.mxu0 %v15195_v59  ;;  %3877 = vmatpush1.bf16.msra.mxu1 %v15198_v61  ;;  %v15254_v59 = vld [vmem:[%s21221_s1 + $0xaa8] ss:$16 sps:$4 sm:$0xff]   ;;  %v3010_v61 = vrot.slane %v17581_v13, 1 }
 0x139   : > { %3712 = vmatprep.subr.bf16.mxu0 %v15203_v63  ;;  %3878 = vmatprep.subr.bf16.mxu1 %v15206_v1  ;;  %v15259_v63 = vld [vmem:[%s21221_s1 + $0xac4] ss:$16 sps:$4 sm:$0xff]   ;;  %v15262_v1 = vld [vmem:[%s21221_s1 + $0xacc] ss:$16 sps:$4 sm:$0xff]   ;;  %v15260_v13 = vld [vmem:[%s21221_s1 + $0xac8] ss:$16 sps:$4 sm:$0xff]  }
 0x13c   : > { %3713 = vmatpush1.bf16.msra.mxu0 %v15201_v2  ;;  %3879 = vmatpush1.bf16.msra.mxu1 %v15204_v3  ;;  %v15257_v2 = vld [vmem:[%s21221_s1 + $0xac0] ss:$16 sps:$4 sm:$0xff]   ;;  %v3020_v3 = vrot.slane %v17049_v22, 1  ;;  %v15268_v22 = vld [vmem:[%s21221_s1 + $0xaec] ss:$16 sps:$4 sm:$0xff]  }
 0x13d   : > { %3714 = vmatprep.subr.bf16.mxu0 %v15209_v50  ;;  %3880 = vmatprep.subr.bf16.mxu1 %v15212_v7  ;;  %v3011_v50 = vsel %vm2981_vm1, %v3002_v47, %v3010_v61  ;;  %v18012_v7 = vld [vmem:[%s16872_s12 + $0x8] sm:$0xee]  ;;  %v15299_v47 = vld [vmem:[%s21221_s1 + $0xba0] ss:$16 sps:$4 sm:$0xff]  }
 0x140   : > { %3715 = vmatpush1.bf16.msra.mxu0 %v15207_v9  ;;  %3881 = vmatpush1.bf16.msra.mxu1 %v15210_v10  ;;  %v15265_v9 = vld [vmem:[%s21221_s1 + $0xae4] ss:$16 sps:$4 sm:$0xff]   ;;  %v3021_v10 = vsel %vm2981_vm1, %v3012_v52, %v3020_v3  ;;  %v15310_v52 = vld [vmem:[%s21221_s1 + $0xbcc] ss:$16 sps:$4 sm:$0xff]   ;;  %v15322_v3 = vld [vmem:[%s21221_s1 + $0xc08] ss:$16 sps:$4 sm:$0xff]  }
 0x141   : > { %3716 = vmatprep.subr.bf16.mxu0 %v15215_v14  ;;  %3882 = vmatprep.subr.bf16.mxu1 %v15218_v15  ;;  %v12912_v14 = vcombine.high %v18012_v7, %v18022_v12  ;;  %v15263_v15 = vld [vmem:[%s21221_s1 + $0xae0] ss:$16 sps:$4 sm:$0xff]  }
 0x144   : > { %3717 = vmatpush1.bf16.msra.mxu0 %v15213_v18  ;;  %3883 = vmatpush1.bf16.msra.mxu1 %v15216_v19  ;;  %v3018_v18 = vrot.slane %v17051_v23, 1  ;;  %v15271_v19 = vld [vmem:[%s21221_s1 + $0xb04] ss:$16 sps:$4 sm:$0xff]   ;;  %v15269_v23 = vld [vmem:[%s21221_s1 + $0xb00] ss:$16 sps:$4 sm:$0xff]  }
 0x145   : > { %3769 = vmatprep.subr.bf16.mxu0 %v15223_v20  ;;  %3935 = vmatprep.subr.bf16.mxu1 %v15226_v46  ;;  %v2991_v20 = vrot.slane %v12912_v14, 1  ;;  %v2992_v46 = vrot.slane %v17695_v55, 1  ;;  %v15333_v55 = vld [vmem:[%s21221_s1 + $0xc44] ss:$16 sps:$4 sm:$0xff]   ;;  %v3008_v14 = vrot.slane %v17763_v17, 1 }
 0x146   : > { %v15342_v17 = vld [vmem:[%s21221_s1 + $0xc6c] ss:$16 sps:$4 sm:$0xff]  }
 0x147   : > { %3719 = vmatmul.mubr.bf16.vlgmr.msra.gmra.mrb[0].mxu0 %v2984_v28  ;;  %3885 = vmatmul.mubr.bf16.vlgmr.msra.gmra.mrb[0].mxu1 %v2984_v28  ;;  %v15280_v28 = vld [vmem:[%s21221_s1 + $0xb2c] ss:$16 sps:$4 sm:$0xff]  }
 0x148   : > { %3770 = vmatpush1.bf16.msra.mxu0 %v15221_v26  ;;  %3936 = vmatpush1.bf16.msra.mxu1 %v15224_v27  ;;  %v3019_v26 = vsel %vm2981_vm1, %v3010_v61, %v3018_v18  ;;  %v15277_v27 = vld [vmem:[%s21221_s1 + $0xb24] ss:$16 sps:$4 sm:$0xff]  }
 0x149   : > { %3771 = vmatprep.subr.bf16.mxu0 %v15229_v29  ;;  %3937 = vmatprep.subr.bf16.mxu1 %v15232_v49  ;;  %v2993_v29 = vsel %vm2981_vm1, %v2991_v20, %v2992_v46  ;;  %v15275_v49 = vld [vmem:[%s21221_s1 + $0xb20] ss:$16 sps:$4 sm:$0xff]   ;;  %v15339_v18 = vld [vmem:[%s21221_s1 + $0xc64] ss:$16 sps:$4 sm:$0xff]   ;;  %v15340_v20 = vld [vmem:[%s21221_s1 + $0xc68] ss:$16 sps:$4 sm:$0xff]  }
 0x14a   : > { %3728 = vmatprep.mubr.bf16.mxu0 %v2997_v30  ;;  %3894 = vmatprep.mubr.bf16.mxu1 %v2997_v30  ;;  %v15278_v30 = vld [vmem:[%s21221_s1 + $0xb28] ss:$16 sps:$4 sm:$0xff]  }
 0x14c   : > { %3772 = vmatpush1.bf16.msra.mxu0 %v15227_v31  ;;  %3938 = vmatpush1.bf16.msra.mxu1 %v15230_v33  ;;  %v15283_v31 = vld [vmem:[%s21221_s1 + $0xb44] ss:$16 sps:$4 sm:$0xff]   ;;  %v15286_v33 = vld [vmem:[%s21221_s1 + $0xb4c] ss:$16 sps:$4 sm:$0xff]  }
 0x14d   : > { %3773 = vmatprep.subr.bf16.mxu0 %v15235_v38  ;;  %3939 = vmatprep.subr.bf16.mxu1 %v15238_v34  ;;  %v15284_v38 = vld [vmem:[%s21221_s1 + $0xb48] ss:$16 sps:$4 sm:$0xff]   ;;  %v15289_v34 = vld [vmem:[%s21221_s1 + $0xb64] ss:$16 sps:$4 sm:$0xff]  }
 0x14f   : > { %3729 = vmatmul.mubr.bf16.gmra.mrb[4].mxu0 %v2995_v39  ;;  %3895 = vmatmul.mubr.bf16.gmra.mrb[4].mxu1 %v2995_v39  ;;  %v15295_v39 = vld [vmem:[%s21221_s1 + $0xb84] ss:$16 sps:$4 sm:$0xff]  }
 0x150   : > { %3774 = vmatpush1.bf16.msra.mxu0 %v15233_v57  ;;  %3940 = vmatpush1.bf16.msra.mxu1 %v15236_v62  ;;  %v15287_v57 = vld [vmem:[%s21221_s1 + $0xb60] ss:$16 sps:$4 sm:$0xff]   ;;  %v15290_v62 = vld [vmem:[%s21221_s1 + $0xb68] ss:$16 sps:$4 sm:$0xff]  }
 0x151   : > { %3775 = vmatprep.subr.bf16.mxu0 %v15241_v42  ;;  %3941 = vmatprep.subr.bf16.mxu1 %v15244_v60  ;;  %v15298_v42 = vld [vmem:[%s21221_s1 + $0xb8c] ss:$16 sps:$4 sm:$0xff]   ;;  %v15293_v60 = vld [vmem:[%s21221_s1 + $0xb80] ss:$16 sps:$4 sm:$0xff]  }
 0x152   : > { %3738 = vmatprep.mubr.bf16.mxu0 %v3005_v43  ;;  %3904 = vmatprep.mubr.bf16.mxu1 %v3005_v43  ;;  %v15296_v43 = vld [vmem:[%s21221_s1 + $0xb88] ss:$16 sps:$4 sm:$0xff]  }
 0x154   : > { %3776 = vmatpush1.bf16.msra.mxu0 %v15239_v44  ;;  %3942 = vmatpush1.bf16.msra.mxu1 %v15242_v45  ;;  %v15301_v44 = vld [vmem:[%s21221_s1 + $0xba4] ss:$16 sps:$4 sm:$0xff]   ;;  %v15304_v45 = vld [vmem:[%s21221_s1 + $0xbac] ss:$16 sps:$4 sm:$0xff]  }
 0x155   : > { %3777 = vmatprep.subr.bf16.mxu0 %v15247_v48  ;;  %3943 = vmatprep.subr.bf16.mxu1 %v15250_v51  ;;  %v15302_v48 = vld [vmem:[%s21221_s1 + $0xba8] ss:$16 sps:$4 sm:$0xff]   ;;  %v15307_v51 = vld [vmem:[%s21221_s1 + $0xbc4] ss:$16 sps:$4 sm:$0xff]  }
 0x157   : > { %3739 = vmatmul.mubr.bf16.gmra.mrb[8].mxu0 %v3003_v54  ;;  %3905 = vmatmul.mubr.bf16.gmra.mrb[8].mxu1 %v3003_v54  ;;  %v12911_v54 = vcombine.low %v18012_v7, %v18022_v12  ;;  %v15336_v12 = vld [vmem:[%s21221_s1 + $0xc4c] ss:$16 sps:$4 sm:$0xff]  }
 0x158   : > { %3778 = vmatpush1.bf16.msra.mxu0 %v15245_v4  ;;  %3944 = vmatpush1.bf16.msra.mxu1 %v15248_v53  ;;  %v15305_v4 = vld [vmem:[%s21221_s1 + $0xbc0] ss:$16 sps:$4 sm:$0xff]   ;;  %v15308_v53 = vld [vmem:[%s21221_s1 + $0xbc8] ss:$16 sps:$4 sm:$0xff]  }
 0x159   : > { %3779 = vmatprep.subr.bf16.mxu0 %v15253_v8  ;;  %3945 = vmatprep.subr.bf16.mxu1 %v15256_v6  ;;  %v15313_v8 = vld [vmem:[%s21221_s1 + $0xbe4] ss:$16 sps:$4 sm:$0xff]   ;;  %v15316_v6 = vld [vmem:[%s21221_s1 + $0xbec] ss:$16 sps:$4 sm:$0xff]   ;;  %v2988_v61 = vrot.slane %v12911_v54, 1 }
 0x15a   : > { %3748 = vmatprep.mubr.bf16.mxu0 %v3013_v56  ;;  %3914 = vmatprep.mubr.bf16.mxu1 %v3013_v56  ;;  %v2989_v56 = vrot.slane %v17715_v0, 1  ;;  %v15324_v0 = vld [vmem:[%s21221_s1 + $0xc0c] ss:$16 sps:$4 sm:$0xff]   ;;  %v15370_v54 = vld [vmem:[%s21221_s1 + $0xd08] ss:$16 sps:$4 sm:$0xff]  }
 0x15c   : > { %3780 = vmatpush1.bf16.msra.mxu0 %v15251_v58  ;;  %3946 = vmatpush1.bf16.msra.mxu1 %v15254_v59  ;;  %v15311_v58 = vld [vmem:[%s21221_s1 + $0xbe0] ss:$16 sps:$4 sm:$0xff]   ;;  %v15314_v59 = vld [vmem:[%s21221_s1 + $0xbe8] ss:$16 sps:$4 sm:$0xff]  }
 0x15d   : > { %3781 = vmatprep.subr.bf16.mxu0 %v15259_v63  ;;  %3947 = vmatprep.subr.bf16.mxu1 %v15262_v1  ;;  %v15321_v63 = vld [vmem:[%s21221_s1 + $0xc04] ss:$16 sps:$4 sm:$0xff]   ;;  %v3000_v1 = vrot.slane %v17729_v5, 1  ;;  %v15330_v5 = vld [vmem:[%s21221_s1 + $0xc2c] ss:$16 sps:$4 sm:$0xff]  }
 0x15f   : > { %3749 = vmatmul.mubr.bf16.gmra.mrb[12].mxu0 %v3011_v50  ;;  %3915 = vmatmul.mubr.bf16.gmra.mrb[12].mxu1 %v3011_v50  ;;  %v15327_v50 = vld [vmem:[%s21221_s1 + $0xc24] ss:$16 sps:$4 sm:$0xff]   ;;  %v3001_v7 = vsel %vm2981_vm1, %v2992_v46, %v3000_v1  ;;  %v3006_v46 = vrot.slane %v17783_v25, 1  ;;  %v15343_v25 = vld [vmem:[%s21221_s1 + $0xc80] ss:$16 sps:$4 sm:$0xff]  }
 0x160   : > { %3782 = vmatpush1.bf16.msra.mxu0 %v15257_v2  ;;  %3948 = vmatpush1.bf16.msra.mxu1 %v15260_v13  ;;  %v15319_v2 = vld [vmem:[%s21221_s1 + $0xc00] ss:$16 sps:$4 sm:$0xff]   ;;  %v2990_v13 = vsel %vm2981_vm1, %v2988_v61, %v2989_v56  ;;  %v15376_v61 = vld [vmem:[%s21221_s1 + $0xd28] ss:$16 sps:$4 sm:$0xff]  }
 0x161   : > { %3783 = vmatprep.subr.bf16.mxu0 %v15265_v9  ;;  %3949 = vmatprep.subr.bf16.mxu1 %v15268_v22  ;;  %v15325_v9 = vld [vmem:[%s21221_s1 + $0xc20] ss:$16 sps:$4 sm:$0xff]   ;;  %v15328_v22 = vld [vmem:[%s21221_s1 + $0xc28] ss:$16 sps:$4 sm:$0xff]  }
 0x162   : > { %3758 = vmatprep.mubr.bf16.mxu0 %v3021_v10  ;;  %3924 = vmatprep.mubr.bf16.mxu1 %v3021_v10  ;;  %v2998_v10 = vrot.slane %v17746_v11, 1  ;;  %v15331_v11 = vld [vmem:[%s21221_s1 + $0xc40] ss:$16 sps:$4 sm:$0xff]  }
 0x164   : > { %3784 = vmatpush1.bf16.msra.mxu0 %v15263_v15  ;;  %3950 = vmatpush1.bf16.msra.mxu1 %v15266_v16  ;;  %v15334_v15 = vld [vmem:[%s21221_s1 + $0xc48] ss:$16 sps:$4 sm:$0xff]   ;;  %v2999_v16 = vsel %vm2981_vm1, %v2989_v56, %v2998_v10  ;;  %v15378_v56 = vld [vmem:[%s21221_s1 + $0xd2c] ss:$16 sps:$4 sm:$0xff]  }
 0x165   : > { %3785 = vmatprep.subr.bf16.mxu0 %v15271_v19  ;;  %3951 = vmatprep.subr.bf16.mxu1 %v15274_v40  ;;  %v3009_v19 = vsel %vm2981_vm1, %v3000_v1, %v3008_v14  ;;  %v15337_v40 = vld [vmem:[%s21221_s1 + $0xc60] ss:$16 sps:$4 sm:$0xff]  }
 0x166   : > { %v15379_v1 = vld [vmem:[%s21221_s1 + $0xd40] ss:$16 sps:$4 sm:$0xff]  }
 0x167   : > { %3759 = vmatmul.mubr.bf16.gmra.mrb[16].mxu0 %v3019_v26  ;;  %3925 = vmatmul.mubr.bf16.gmra.mrb[16].mxu1 %v3019_v26  ;;  %v3016_v26 = vrot.slane %v17805_v32, 1  ;;  %v15354_v32 = vld [vmem:[%s21221_s1 + $0xcac] ss:$16 sps:$4 sm:$0xff]  }
 0x168   : > { %3786 = vmatpush1.bf16.msra.mxu0 %v15269_v23  ;;  %3952 = vmatpush1.bf16.msra.mxu1 %v15272_v24  ;;  %v15345_v23 = vld [vmem:[%s21221_s1 + $0xc84] ss:$16 sps:$4 sm:$0xff]   ;;  %v15348_v24 = vld [vmem:[%s21221_s1 + $0xc8c] ss:$16 sps:$4 sm:$0xff]  }
 0x169   : > { %3787 = vmatprep.subr.bf16.mxu0 %v15277_v27  ;;  %3953 = vmatprep.subr.bf16.mxu1 %v15280_v28  ;;  %v15346_v27 = vld [vmem:[%s21221_s1 + $0xc88] ss:$16 sps:$4 sm:$0xff]   ;;  %v3007_v28 = vsel %vm2981_vm1, %v2998_v10, %v3006_v46 }
 0x16a   : > { %3801 = vmatprep.mubr.bf16.mxu0 %v2993_v29  ;;  %3967 = vmatprep.mubr.bf16.mxu1 %v2993_v29  ;;  %v15351_v29 = vld [vmem:[%s21221_s1 + $0xca4] ss:$16 sps:$4 sm:$0xff]   ;;  %v15394_v10 = vld [vmem:[%s21221_s1 + $0xd88] ss:$16 sps:$4 sm:$0xff]  }
 0x16c   : > { %3788 = vmatpush1.bf16.msra.mxu0 %v15275_v49  ;;  %3954 = vmatpush1.bf16.msra.mxu1 %v15278_v30  ;;  %v3017_v49 = vsel %vm2981_vm1, %v3008_v14, %v3016_v26  ;;  %v15349_v30 = vld [vmem:[%s21221_s1 + $0xca0] ss:$16 sps:$4 sm:$0xff]  }
 0x16d   : > { %3789 = vmatprep.subr.bf16.mxu0 %v15283_v31  ;;  %3955 = vmatprep.subr.bf16.mxu1 %v15286_v33  ;;  %v15352_v31 = vld [vmem:[%s21221_s1 + $0xca8] ss:$16 sps:$4 sm:$0xff]   ;;  %v3014_v33 = vrot.slane %v17823_v41, 1  ;;  %v15363_v41 = vld [vmem:[%s21221_s1 + $0xce4] ss:$16 sps:$4 sm:$0xff]  }
 0x16e   : > { %v15397_v14 = vld [vmem:[%s21221_s1 + $0xda0] ss:$16 sps:$4 sm:$0xff]  }
 0x170   : > { %3790 = vmatpush1.bf16.msra.mxu0 %v15281_v35  ;;  %3956 = vmatpush1.bf16.msra.mxu1 %v15284_v38  ;;  %v15357_v35 = vld [vmem:[%s21221_s1 + $0xcc4] ss:$16 sps:$4 sm:$0xff]   ;;  %v15360_v38 = vld [vmem:[%s21221_s1 + $0xccc] ss:$16 sps:$4 sm:$0xff]  }
 0x171   : > { %3791 = vmatprep.subr.bf16.mxu0 %v15289_v34  ;;  %3957 = vmatprep.subr.bf16.mxu1 %v15292_v36  ;;  %v15355_v34 = vld [vmem:[%s21221_s1 + $0xcc0] ss:$16 sps:$4 sm:$0xff]   ;;  %v15358_v36 = vld [vmem:[%s21221_s1 + $0xcc8] ss:$16 sps:$4 sm:$0xff]  }
 0x174   : > { %3792 = vmatpush1.bf16.msra.mxu0 %v15287_v57  ;;  %3958 = vmatpush1.bf16.msra.mxu1 %v15290_v62  ;;  %v3024_v57 = vrot.slane %v17277_v21, 1  ;;  %v3015_v62 = vsel %vm2981_vm1, %v3006_v46, %v3014_v33  ;;  %v15414_v46 = vld [vmem:[%s21221_s1 + $0xdec] ss:$16 sps:$4 sm:$0xff]  }
 0x175   : > { %3793 = vmatprep.subr.bf16.mxu0 %v15295_v39  ;;  %3959 = vmatprep.subr.bf16.mxu1 %v15298_v42  ;;  %v18241_v39 = vld [vmem:[%s16872_s12 + $0x10] sm:$0xee]  ;;  %v18244_v42 = vld [vmem:[%s16872_s12 + $0x20] sm:$0xff] }
 0x176   : > { %v3025_v21 = vsel %vm2981_vm1, %v3016_v26, %v3024_v57  ;;  %v15412_v26 = vld [vmem:[%s21221_s1 + $0xde8] ss:$16 sps:$4 sm:$0xff]  }
 0x177   : > { %v15429_v57 = vld [vmem:[%s21221_s1 + $0xe28] ss:$16 sps:$4 sm:$0xff]  }
 0x178   : > { %3794 = vmatpush1.bf16.msra.mxu0 %v15293_v60  ;;  %3960 = vmatpush1.bf16.msra.mxu1 %v15296_v43  ;;  %v15366_v60 = vld [vmem:[%s21221_s1 + $0xcec] ss:$16 sps:$4 sm:$0xff]   ;;  %v18250_v43 = vld [vmem:[%s16872_s12 + $0x34] ss:$16 sps:$4 sm:$0xff]  }
 0x179   : > { %3795 = vmatprep.subr.bf16.mxu0 %v15301_v44  ;;  %3961 = vmatprep.subr.bf16.mxu1 %v15304_v45  ;;  %v18255_v44 = vcombine.high %v18241_v39, %v18244_v42  ;;  %v15361_v45 = vld [vmem:[%s21221_s1 + $0xce0] ss:$16 sps:$4 sm:$0xff]  }
 0x17c   : > { %3796 = vmatpush1.bf16.msra.mxu0 %v15299_v47  ;;  %3962 = vmatpush1.bf16.msra.mxu1 %v15302_v48  ;;  %v15364_v47 = vld [vmem:[%s21221_s1 + $0xce8] ss:$16 sps:$4 sm:$0xff]   ;;  %v3022_v48 = vrot.slane %v17300_v37, 1  ;;  %v15367_v37 = vld [vmem:[%s21221_s1 + $0xd00] ss:$16 sps:$4 sm:$0xff]  }
 0x17d   : > { %3797 = vmatprep.subr.bf16.mxu0 %v15307_v51  ;;  %3963 = vmatprep.subr.bf16.mxu1 %v15310_v52  ;;  %v15369_v51 = vld [vmem:[%s21221_s1 + $0xd04] ss:$16 sps:$4 sm:$0xff]   ;;  %v15372_v52 = vld [vmem:[%s21221_s1 + $0xd0c] ss:$16 sps:$4 sm:$0xff]  }
 0x180   : > { %3798 = vmatpush1.bf16.msra.mxu0 %v15305_v4  ;;  %3964 = vmatpush1.bf16.msra.mxu1 %v15308_v53  ;;  %v4301_v4 = vrot.slane %v18255_v44, 1  ;;  %v4302_v53 = vrot.slane %v18250_v43, 1  ;;  %v15435_v43 = vld [vmem:[%s21221_s1 + $0xe48] ss:$16 sps:$4 sm:$0xff]  }
 0x181   : > { %3799 = vmatprep.subr.bf16.mxu0 %v15313_v8  ;;  %3965 = vmatprep.subr.bf16.mxu1 %v15316_v6  ;;  %v3023_v8 = vsel %vm2981_vm1, %v3014_v33, %v3022_v48  ;;  %v15375_v6 = vld [vmem:[%s21221_s1 + $0xd24] ss:$16 sps:$4 sm:$0xff]   ;;  %v15476_v33 = vld [vmem:[%s16872_s12 + $0x50] ss:$16 sps:$4 sm:$0xff]  }
 0x182   : > { %v15491_v48 = vld [vmem:[%s16872_s12 + $0x70] ss:$16 sps:$4 sm:$0xff]  }
 0x184   : > { %3800 = vmatpush1.bf16.msra.mxu0 %v15311_v58  ;;  %3966 = vmatpush1.bf16.msra.mxu1 %v15314_v59  ;;  %v4303_v58 = vsel %vm2981_vm1, %v4301_v4, %v4302_v53  ;;  %v15373_v59 = vld [vmem:[%s21221_s1 + $0xd20] ss:$16 sps:$4 sm:$0xff]  }
 0x185   : > { %5002 = vmatprep.subr.bf16.mxu0 %v15321_v63  ;;  %5168 = vmatprep.subr.bf16.mxu1 %v15324_v0  ;;  %v15381_v63 = vld [vmem:[%s21221_s1 + $0xd44] ss:$16 sps:$4 sm:$0xff]   ;;  %v15384_v0 = vld [vmem:[%s21221_s1 + $0xd4c] ss:$16 sps:$4 sm:$0xff]  }
 0x187   : > { %3802 = vmatmul.mubr.bf16.vlgmr.msra.gmra.mrb[0].mxu0 %v2990_v13  ;;  %3968 = vmatmul.mubr.bf16.vlgmr.msra.gmra.mrb[0].mxu1 %v2990_v13  ;;  %v15390_v13 = vld [vmem:[%s21221_s1 + $0xd6c] ss:$16 sps:$4 sm:$0xff]  }
 0x188   : > { %5003 = vmatpush1.bf16.msra.mxu0 %v15319_v2  ;;  %5169 = vmatpush1.bf16.msra.mxu1 %v15322_v3  ;;  %v15382_v2 = vld [vmem:[%s21221_s1 + $0xd48] ss:$16 sps:$4 sm:$0xff]   ;;  %v15387_v3 = vld [vmem:[%s21221_s1 + $0xd64] ss:$16 sps:$4 sm:$0xff]  }
 0x189   : > { %5004 = vmatprep.subr.bf16.mxu0 %v15327_v50  ;;  %5170 = vmatprep.subr.bf16.mxu1 %v15330_v5  ;;  %v15385_v50 = vld [vmem:[%s21221_s1 + $0xd60] ss:$16 sps:$4 sm:$0xff]   ;;  %v15388_v5 = vld [vmem:[%s21221_s1 + $0xd68] ss:$16 sps:$4 sm:$0xff]  }
 0x18a   : > { %3811 = vmatprep.mubr.bf16.mxu0 %v3001_v7  ;;  %3977 = vmatprep.mubr.bf16.mxu1 %v3001_v7  ;;  %v15393_v7 = vld [vmem:[%s21221_s1 + $0xd84] ss:$16 sps:$4 sm:$0xff]  }
 0x18c   : > { %5005 = vmatpush1.bf16.msra.mxu0 %v15325_v9  ;;  %5171 = vmatpush1.bf16.msra.mxu1 %v15328_v22  ;;  %v15396_v9 = vld [vmem:[%s21221_s1 + $0xd8c] ss:$16 sps:$4 sm:$0xff]   ;;  %v15391_v22 = vld [vmem:[%s21221_s1 + $0xd80] ss:$16 sps:$4 sm:$0xff]  }
 0x18d   : > { %5006 = vmatprep.subr.bf16.mxu0 %v15333_v55  ;;  %5172 = vmatprep.subr.bf16.mxu1 %v15336_v12  ;;  %v15399_v55 = vld [vmem:[%s21221_s1 + $0xda4] ss:$16 sps:$4 sm:$0xff]   ;;  %v15402_v12 = vld [vmem:[%s21221_s1 + $0xdac] ss:$16 sps:$4 sm:$0xff]  }
 0x18f   : > { %3812 = vmatmul.mubr.bf16.gmra.mrb[4].mxu0 %v2999_v16  ;;  %3978 = vmatmul.mubr.bf16.gmra.mrb[4].mxu1 %v2999_v16  ;;  %v15408_v16 = vld [vmem:[%s21221_s1 + $0xdcc] ss:$16 sps:$4 sm:$0xff]  }
 0x190   : > { %5007 = vmatpush1.bf16.msra.mxu0 %v15331_v11  ;;  %5173 = vmatpush1.bf16.msra.mxu1 %v15334_v15  ;;  %v15400_v11 = vld [vmem:[%s21221_s1 + $0xda8] ss:$16 sps:$4 sm:$0xff]   ;;  %v15405_v15 = vld [vmem:[%s21221_s1 + $0xdc4] ss:$16 sps:$4 sm:$0xff]  }
 0x191   : > { %5008 = vmatprep.subr.bf16.mxu0 %v15339_v18  ;;  %5174 = vmatprep.subr.bf16.mxu1 %v15342_v17  ;;  %v15403_v18 = vld [vmem:[%s21221_s1 + $0xdc0] ss:$16 sps:$4 sm:$0xff]   ;;  %v15406_v17 = vld [vmem:[%s21221_s1 + $0xdc8] ss:$16 sps:$4 sm:$0xff]  }
 0x192   : > { %3821 = vmatprep.mubr.bf16.mxu0 %v3009_v19  ;;  %3987 = vmatprep.mubr.bf16.mxu1 %v3009_v19  ;;  %v15411_v19 = vld [vmem:[%s21221_s1 + $0xde4] ss:$16 sps:$4 sm:$0xff]  }
 0x194   : > { %5009 = vmatpush1.bf16.msra.mxu0 %v15337_v40  ;;  %5175 = vmatpush1.bf16.msra.mxu1 %v15340_v20  ;;  %v18359_v40 = vcombine.low %v18241_v39, %v18244_v42  ;;  %v15417_v20 = vld [vmem:[%s16872_s12 + $0x30] ss:$16 sps:$4 sm:$0xff]   ;;  %v15434_v39 = vld [vmem:[%s21221_s1 + $0xe44] ss:$16 sps:$4 sm:$0xff]   ;;  %v15437_v42 = vld [vmem:[%s21221_s1 + $0xe4c] ss:$16 sps:$4 sm:$0xff]  }
 0x195   : > { %5010 = vmatprep.subr.bf16.mxu0 %v15345_v23  ;;  %5176 = vmatprep.subr.bf16.mxu1 %v15348_v24  ;;  %v15468_v23 = vld [vmem:[%s16872_s12 + $0x54] ss:$16 sps:$4 sm:$0xff]   ;;  %v15409_v24 = vld [vmem:[%s21221_s1 + $0xde0] ss:$16 sps:$4 sm:$0xff]  }
 0x197   : > { %3822 = vmatmul.mubr.bf16.gmra.mrb[8].mxu0 %v3007_v28  ;;  %3988 = vmatmul.mubr.bf16.gmra.mrb[8].mxu1 %v3007_v28  ;;  %v15422_v28 = vld [vmem:[%s21221_s1 + $0xe04] ss:$16 sps:$4 sm:$0xff]  }
 0x198   : > { %5011 = vmatpush1.bf16.msra.mxu0 %v15343_v25  ;;  %5177 = vmatpush1.bf16.msra.mxu1 %v15346_v27  ;;  %v4298_v25 = vrot.slane %v18359_v40, 1  ;;  %v4299_v27 = vrot.slane %v15417_v20, 1 }
 0x199   : > { %5012 = vmatprep.subr.bf16.mxu0 %v15351_v29  ;;  %5178 = vmatprep.subr.bf16.mxu1 %v15354_v32  ;;  %v15425_v29 = vld [vmem:[%s21221_s1 + $0xe0c] ss:$16 sps:$4 sm:$0xff]   ;;  %v4312_v32 = vrot.slane %v15468_v23, 1  ;;  %v15462_v23 = vld [vmem:[%s21221_s1 + $0xee0] ss:$16 sps:$4 sm:$0xff]  }
 0x19a   : > { %3831 = vmatprep.mubr.bf16.mxu0 %v3017_v49  ;;  %3997 = vmatprep.mubr.bf16.mxu1 %v3017_v49  ;;  %v15420_v49 = vld [vmem:[%s21221_s1 + $0xe00] ss:$16 sps:$4 sm:$0xff]  }
 0x19c   : > { %5013 = vmatpush1.bf16.msra.mxu0 %v15349_v30  ;;  %5179 = vmatpush1.bf16.msra.mxu1 %v15352_v31  ;;  %v15423_v30 = vld [vmem:[%s21221_s1 + $0xe08] ss:$16 sps:$4 sm:$0xff]   ;;  %v4300_v31 = vsel %vm2981_vm1, %v4298_v25, %v4299_v27  ;;  %v15472_v25 = vld [vmem:[%s21221_s1 + $0xf04] ss:$16 sps:$4 sm:$0xff]  }
 0x19d   : > { %5014 = vmatprep.subr.bf16.mxu0 %v15357_v35  ;;  %5180 = vmatprep.subr.bf16.mxu1 %v15360_v38  ;;  %v15428_v35 = vld [vmem:[%s21221_s1 + $0xe24] ss:$16 sps:$4 sm:$0xff]   ;;  %v15431_v38 = vld [vmem:[%s21221_s1 + $0xe2c] ss:$16 sps:$4 sm:$0xff]  }
 0x19f   : > { %3832 = vmatmul.mubr.bf16.gmra.mrb[12].mxu0 %v3015_v62  ;;  %3998 = vmatmul.mubr.bf16.gmra.mrb[12].mxu1 %v3015_v62  ;;  %v4310_v62 = vrot.slane %v15476_v33, 1  ;;  %v15482_v33 = vld [vmem:[%s21221_s1 + $0xf2c] ss:$16 sps:$4 sm:$0xff]  }
 0x1a0   : > { %5015 = vmatpush1.bf16.msra.mxu0 %v15355_v34  ;;  %5181 = vmatpush1.bf16.msra.mxu1 %v15358_v36  ;;  %v15483_v34 = vld [vmem:[%s16872_s12 + $0x74] ss:$16 sps:$4 sm:$0xff]   ;;  %v4313_v36 = vsel %vm2981_vm1, %v4302_v53, %v4312_v32  ;;  %v15438_v53 = vld [vmem:[%s21221_s1 + $0xe60] ss:$16 sps:$4 sm:$0xff]  }
 0x1a1   : > { %5016 = vmatprep.subr.bf16.mxu0 %v15363_v41  ;;  %5182 = vmatprep.subr.bf16.mxu1 %v15366_v60  ;;  %v15426_v41 = vld [vmem:[%s21221_s1 + $0xe20] ss:$16 sps:$4 sm:$0xff]  }
 0x1a2   : > { %3841 = vmatprep.mubr.bf16.mxu0 %v3025_v21  ;;  %4007 = vmatprep.mubr.bf16.mxu1 %v3025_v21  ;;  %v15432_v60 = vld [vmem:[%s21221_s1 + $0xe40] ss:$16 sps:$4 sm:$0xff]   ;;  %v4320_v21 = vrot.slane %v15483_v34, 1  ;;  %v15480_v34 = vld [vmem:[%s21221_s1 + $0xf28] ss:$16 sps:$4 sm:$0xff]  }
 0x1a4   : > { %5017 = vmatpush1.bf16.msra.mxu0 %v15361_v45  ;;  %5183 = vmatpush1.bf16.msra.mxu1 %v15364_v47  ;;  %v15440_v45 = vld [vmem:[%s21221_s1 + $0xe64] ss:$16 sps:$4 sm:$0xff]   ;;  %v4311_v47 = vsel %vm2981_vm1, %v4299_v27, %v4310_v62  ;;  %v4321_v4 = vsel %vm2981_vm1, %v4312_v32, %v4320_v21  ;;  %v15475_v27 = vld [vmem:[%s21221_s1 + $0xf0c] ss:$16 sps:$4 sm:$0xff]   ;;  %v15470_v32 = vld [vmem:[%s21221_s1 + $0xf00] ss:$16 sps:$4 sm:$0xff]  }
 0x1a5   : > { %5018 = vmatprep.subr.bf16.mxu0 %v15369_v51  ;;  %5184 = vmatprep.subr.bf16.mxu1 %v15372_v52  ;;  %v15443_v51 = vld [vmem:[%s21221_s1 + $0xe6c] ss:$16 sps:$4 sm:$0xff]   ;;  %v15498_v52 = vld [vmem:[%s16872_s12 + $0x94] ss:$16 sps:$4 sm:$0xff]  }
 0x1a7   : > { %3842 = vmatmul.mubr.bf16.gmra.mrb[16].mxu0 %v3023_v8  ;;  %4008 = vmatmul.mubr.bf16.gmra.mrb[16].mxu1 %v3023_v8  ;;  %v15446_v8 = vld [vmem:[%s21221_s1 + $0xe84] ss:$16 sps:$4 sm:$0xff]  }
 0x1a8   : > { %5019 = vmatpush1.bf16.msra.mxu0 %v15367_v37  ;;  %5185 = vmatpush1.bf16.msra.mxu1 %v15370_v54  ;;  %v15441_v37 = vld [vmem:[%s21221_s1 + $0xe68] ss:$16 sps:$4 sm:$0xff]   ;;  %v4318_v54 = vrot.slane %v15491_v48, 1 }
 0x1a9   : > { %5020 = vmatprep.subr.bf16.mxu0 %v15375_v6  ;;  %5186 = vmatprep.subr.bf16.mxu1 %v15378_v56  ;;  %v15449_v6 = vld [vmem:[%s21221_s1 + $0xe8c] ss:$16 sps:$4 sm:$0xff]   ;;  %v15444_v56 = vld [vmem:[%s21221_s1 + $0xe80] ss:$16 sps:$4 sm:$0xff]   ;;  %v15503_v48 = vld [vmem:[%s21221_s1 + $0xf88] ss:$16 sps:$4 sm:$0xff]  }
 0x1aa   : > { %5034 = vmatprep.mubr.bf16.mxu0 %v4303_v58  ;;  %5200 = vmatprep.mubr.bf16.mxu1 %v4303_v58  ;;  %v15447_v58 = vld [vmem:[%s21221_s1 + $0xe88] ss:$16 sps:$4 sm:$0xff]  }
 0x1ac   : > { %5021 = vmatpush1.bf16.msra.mxu0 %v15373_v59  ;;  %5187 = vmatpush1.bf16.msra.mxu1 %v15376_v61  ;;  %v4328_v59 = vrot.slane %v15498_v52, 1  ;;  %v4319_v61 = vsel %vm2981_vm1, %v4310_v62, %v4318_v54  ;;  %v15488_v62 = vld [vmem:[%s21221_s1 + $0xf48] ss:$16 sps:$4 sm:$0xff]   ;;  %v15512_v52 = vld [vmem:[%s21221_s1 + $0xfac] ss:$16 sps:$4 sm:$0xff]  }
 0x1ad   : > { %5022 = vmatprep.subr.bf16.mxu0 %v15381_v63  ;;  %5188 = vmatprep.subr.bf16.mxu1 %v15384_v0  ;;  %v15506_v63 = vld [vmem:[%s16872_s12 + $0x90] ss:$16 sps:$4 sm:$0xff]  }
 0x1ae   : > { %v4078_v0 = vld [vmem:[%s16872_s12 + $0xb0] sm:$0x11] }
 0x1b0   : > { %5023 = vmatpush1.bf16.msra.mxu0 %v15379_v1  ;;  %5189 = vmatpush1.bf16.msra.mxu1 %v15382_v2  ;;  %v15452_v1 = vld [vmem:[%s21221_s1 + $0xea4] ss:$16 sps:$4 sm:$0xff]   ;;  %v15455_v2 = vld [vmem:[%s21221_s1 + $0xeac] ss:$16 sps:$4 sm:$0xff]  }
 0x1b1   : > { %5024 = vmatprep.subr.bf16.mxu0 %v15387_v3  ;;  %5190 = vmatprep.subr.bf16.mxu1 %v15390_v13  ;;  %v4329_v3 = vsel %vm2981_vm1, %v4320_v21, %v4328_v59  ;;  %v13062_v13 = vcombine.high %v4078_v0, %v4078_v0  ;;  %v15502_v21 = vld [vmem:[%s21221_s1 + $0xf84] ss:$16 sps:$4 sm:$0xff]  }
 0x1b4   : > { %5025 = vmatpush1.bf16.msra.mxu0 %v15385_v50  ;;  %5191 = vmatpush1.bf16.msra.mxu1 %v15388_v5  ;;  %v15450_v50 = vld [vmem:[%s21221_s1 + $0xea0] ss:$16 sps:$4 sm:$0xff]   ;;  %v15453_v5 = vld [vmem:[%s21221_s1 + $0xea8] ss:$16 sps:$4 sm:$0xff]  }
 0x1b5   : > { %5026 = vmatprep.subr.bf16.mxu0 %v15393_v7  ;;  %5192 = vmatprep.subr.bf16.mxu1 %v15396_v9  ;;  %v4326_v7 = vrot.slane %v15506_v63, 1  ;;  %v15458_v9 = vld [vmem:[%s21221_s1 + $0xec4] ss:$16 sps:$4 sm:$0xff]   ;;  %v15580_v63 = vld [vmem:[%s16872_s12 + $0x5c] ss:$16 sps:$4 sm:$0xff]  }
 0x1b8   : > { %5027 = vmatpush1.bf16.msra.mxu0 %v15391_v22  ;;  %5193 = vmatpush1.bf16.msra.mxu1 %v15394_v10  ;;  %v15461_v22 = vld [vmem:[%s21221_s1 + $0xecc] ss:$16 sps:$4 sm:$0xff]   ;;  %v15456_v10 = vld [vmem:[%s21221_s1 + $0xec0] ss:$16 sps:$4 sm:$0xff]  }
 0x1b9   : > { %5028 = vmatprep.subr.bf16.mxu0 %v15399_v55  ;;  %5194 = vmatprep.subr.bf16.mxu1 %v15402_v12  ;;  %v15459_v55 = vld [vmem:[%s21221_s1 + $0xec8] ss:$16 sps:$4 sm:$0xff]   ;;  %v15464_v12 = vld [vmem:[%s21221_s1 + $0xee4] ss:$16 sps:$4 sm:$0xff]  }
 0x1bc   : > { %5029 = vmatpush1.bf16.msra.mxu0 %v15397_v14  ;;  %5195 = vmatpush1.bf16.msra.mxu1 %v15400_v11  ;;  %v4336_v14 = vrot.slane %v13062_v13, 1  ;;  %v4327_v11 = vsel %vm2981_vm1, %v4318_v54, %v4326_v7  ;;  %v15519_v54 = vld [vmem:[%s21221_s1 + $0xfcc] ss:$16 sps:$4 sm:$0xff]   ;;  %v15534_v13 = vld [vmem:[%s21221_s1 + $0x1004] ss:$16 sps:$4 sm:$0xff]  }
 0x1bd   : > { %5030 = vmatprep.subr.bf16.mxu0 %v15405_v15  ;;  %5196 = vmatprep.subr.bf16.mxu1 %v15408_v16  ;;  %v13061_v15 = vcombine.low %v4078_v0, %v4078_v0  ;;  %v18476_v16 = vld [vmem:[%s16872_s12 + $0x18] sm:$0xee]  ;;  %v15521_v0 = vld [vmem:[%s21221_s1 + $0xfe0] ss:$16 sps:$4 sm:$0xff]  }
 0x1be   : > { %v4337_v20 = vsel %vm2981_vm1, %v4328_v59, %v4336_v14  ;;  %v15529_v59 = vld [vmem:[%s16872_s12 + $0x38] ss:$16 sps:$4 sm:$0xff]   ;;  %v15595_v14 = vld [vmem:[%s16872_s12 + $0x7c] ss:$16 sps:$4 sm:$0xff]  }
 0x1c0   : > { %5031 = vmatpush1.bf16.msra.mxu0 %v15403_v18  ;;  %5197 = vmatpush1.bf16.msra.mxu1 %v15406_v17  ;;  %v18479_v18 = vld [vmem:[%s16872_s12 + $0x28] sm:$0xff] }
 0x1c1   : > { %5032 = vmatprep.subr.bf16.mxu0 %v15411_v19  ;;  %5198 = vmatprep.subr.bf16.mxu1 %v15414_v46  ;;  %v15467_v17 = vld [vmem:[%s21221_s1 + $0xeec] ss:$16 sps:$4 sm:$0xff]   ;;  %v18490_v46 = vcombine.high %v18476_v16, %v18479_v18 }
 0x1c2   : > { %v18485_v19 = vld [vmem:[%s16872_s12 + $0x3c] ss:$16 sps:$4 sm:$0xff]  }
 0x1c4   : > { %5033 = vmatpush1.bf16.msra.mxu0 %v15409_v24  ;;  %5199 = vmatpush1.bf16.msra.mxu1 %v15412_v26  ;;  %v15465_v24 = vld [vmem:[%s21221_s1 + $0xee8] ss:$16 sps:$4 sm:$0xff]   ;;  %v4334_v26 = vrot.slane %v13061_v15, 1  ;;  %v15538_v15 = vld [vmem:[%s21221_s1 + $0x1020] ss:$16 sps:$4 sm:$0xff]  }
 0x1c5   : > { %5085 = vmatprep.subr.bf16.mxu0 %v15422_v28  ;;  %5251 = vmatprep.subr.bf16.mxu1 %v15425_v29  ;;  %v4307_v28 = vrot.slane %v18490_v46, 1  ;;  %v4308_v29 = vrot.slane %v18485_v19, 1  ;;  %v15549_v19 = vld [vmem:[%s21221_s1 + $0x104c] ss:$16 sps:$4 sm:$0xff]  }
 0x1c7   : > { %5035 = vmatmul.mubr.bf16.vlgmr.msra.gmra.mrb[0].mxu0 %v4300_v31  ;;  %5201 = vmatmul.mubr.bf16.vlgmr.msra.gmra.mrb[0].mxu1 %v4300_v31  ;;  %v15479_v31 = vld [vmem:[%s21221_s1 + $0xf24] ss:$16 sps:$4 sm:$0xff]  }
 0x1c8   : > { %5086 = vmatpush1.bf16.msra.mxu0 %v15420_v49  ;;  %5252 = vmatpush1.bf16.msra.mxu1 %v15423_v30  ;;  %v15473_v49 = vld [vmem:[%s21221_s1 + $0xf08] ss:$16 sps:$4 sm:$0xff]   ;;  %v4335_v30 = vsel %vm2981_vm1, %v4326_v7, %v4334_v26  ;;  %v15532_v7 = vld [vmem:[%s21221_s1 + $0x1000] ss:$16 sps:$4 sm:$0xff]   ;;  %v15552_v26 = vld [vmem:[%s21221_s1 + $0x1064] ss:$16 sps:$4 sm:$0xff]  }
 0x1c9   : > { %5087 = vmatprep.subr.bf16.mxu0 %v15428_v35  ;;  %5253 = vmatprep.subr.bf16.mxu1 %v15431_v38  ;;  %v4309_v35 = vsel %vm2981_vm1, %v4307_v28, %v4308_v29  ;;  %v15477_v38 = vld [vmem:[%s21221_s1 + $0xf20] ss:$16 sps:$4 sm:$0xff]   ;;  %v15555_v28 = vld [vmem:[%s21221_s1 + $0x106c] ss:$16 sps:$4 sm:$0xff]  }
 0x1ca   : > { %5044 = vmatprep.mubr.bf16.mxu0 %v4313_v36  ;;  %5210 = vmatprep.mubr.bf16.mxu1 %v4313_v36  ;;  %v15487_v36 = vld [vmem:[%s21221_s1 + $0xf44] ss:$16 sps:$4 sm:$0xff]  }
 0x1cc   : > { %5088 = vmatpush1.bf16.msra.mxu0 %v15426_v41  ;;  %5254 = vmatpush1.bf16.msra.mxu1 %v15429_v57  ;;  %v15490_v41 = vld [vmem:[%s21221_s1 + $0xf4c] ss:$16 sps:$4 sm:$0xff]   ;;  %v15485_v57 = vld [vmem:[%s21221_s1 + $0xf40] ss:$16 sps:$4 sm:$0xff]  }
 0x1cd   : > { %5089 = vmatprep.subr.bf16.mxu0 %v15434_v39  ;;  %5255 = vmatprep.subr.bf16.mxu1 %v15437_v42  ;;  %v15494_v39 = vld [vmem:[%s21221_s1 + $0xf64] ss:$16 sps:$4 sm:$0xff]   ;;  %v15497_v42 = vld [vmem:[%s21221_s1 + $0xf6c] ss:$16 sps:$4 sm:$0xff]  }
 0x1cf   : > { %5045 = vmatmul.mubr.bf16.gmra.mrb[4].mxu0 %v4311_v47  ;;  %5211 = vmatmul.mubr.bf16.gmra.mrb[4].mxu1 %v4311_v47  ;;  %v15500_v47 = vld [vmem:[%s21221_s1 + $0xf80] ss:$16 sps:$4 sm:$0xff]  }
 0x1d0   : > { %5090 = vmatpush1.bf16.msra.mxu0 %v15432_v60  ;;  %5256 = vmatpush1.bf16.msra.mxu1 %v15435_v43  ;;  %v15492_v60 = vld [vmem:[%s21221_s1 + $0xf60] ss:$16 sps:$4 sm:$0xff]   ;;  %v15495_v43 = vld [vmem:[%s21221_s1 + $0xf68] ss:$16 sps:$4 sm:$0xff]  }
 0x1d1   : > { %5091 = vmatprep.subr.bf16.mxu0 %v15440_v45  ;;  %5257 = vmatprep.subr.bf16.mxu1 %v15443_v51  ;;  %v15505_v45 = vld [vmem:[%s21221_s1 + $0xf8c] ss:$16 sps:$4 sm:$0xff]   ;;  %v15509_v51 = vld [vmem:[%s21221_s1 + $0xfa4] ss:$16 sps:$4 sm:$0xff]  }
 0x1d2   : > { %5054 = vmatprep.mubr.bf16.mxu0 %v4321_v4  ;;  %5220 = vmatprep.mubr.bf16.mxu1 %v4321_v4  ;;  %v15507_v4 = vld [vmem:[%s21221_s1 + $0xfa0] ss:$16 sps:$4 sm:$0xff]  }
 0x1d4   : > { %5092 = vmatpush1.bf16.msra.mxu0 %v15438_v53  ;;  %5258 = vmatpush1.bf16.msra.mxu1 %v15441_v37  ;;  %v15510_v53 = vld [vmem:[%s21221_s1 + $0xfa8] ss:$16 sps:$4 sm:$0xff]   ;;  %v15516_v37 = vld [vmem:[%s21221_s1 + $0xfc4] ss:$16 sps:$4 sm:$0xff]  }
 0x1d5   : > { %5093 = vmatprep.subr.bf16.mxu0 %v15446_v8  ;;  %5259 = vmatprep.subr.bf16.mxu1 %v15449_v6  ;;  %v15514_v8 = vld [vmem:[%s21221_s1 + $0xfc0] ss:$16 sps:$4 sm:$0xff]   ;;  %v15517_v6 = vld [vmem:[%s21221_s1 + $0xfc8] ss:$16 sps:$4 sm:$0xff]  }
 0x1d7   : > { %5055 = vmatmul.mubr.bf16.gmra.mrb[8].mxu0 %v4319_v61  ;;  %5221 = vmatmul.mubr.bf16.gmra.mrb[8].mxu1 %v4319_v61  ;;  %v15526_v61 = vld [vmem:[%s21221_s1 + $0xfec] ss:$16 sps:$4 sm:$0xff]  }
 0x1d8   : > { %5094 = vmatpush1.bf16.msra.mxu0 %v15444_v56  ;;  %5260 = vmatpush1.bf16.msra.mxu1 %v15447_v58  ;;  %v15523_v56 = vld [vmem:[%s21221_s1 + $0xfe4] ss:$16 sps:$4 sm:$0xff]   ;;  %v18593_v58 = vcombine.low %v18476_v16, %v18479_v18  ;;  %v15541_v16 = vld [vmem:[%s21221_s1 + $0x1028] ss:$16 sps:$4 sm:$0xff]  }
 0x1d9   : > { %5095 = vmatprep.subr.bf16.mxu0 %v15452_v1  ;;  %5261 = vmatprep.subr.bf16.mxu1 %v15455_v2  ;;  %v15524_v1 = vld [vmem:[%s21221_s1 + $0xfe8] ss:$16 sps:$4 sm:$0xff]  }
 0x1da   : > { %5064 = vmatprep.mubr.bf16.mxu0 %v4329_v3  ;;  %5230 = vmatprep.mubr.bf16.mxu1 %v4329_v3  ;;  %v4304_v2 = vrot.slane %v18593_v58, 1  ;;  %v4305_v3 = vrot.slane %v15529_v59, 1 }
 0x1dc   : > { %5096 = vmatpush1.bf16.msra.mxu0 %v15450_v50  ;;  %5262 = vmatpush1.bf16.msra.mxu1 %v15453_v5  ;;  %v15537_v50 = vld [vmem:[%s21221_s1 + $0x100c] ss:$16 sps:$4 sm:$0xff]   ;;  %v4316_v5 = vrot.slane %v15580_v63, 1 }
 0x1dd   : > { %5097 = vmatprep.subr.bf16.mxu0 %v15458_v9  ;;  %5263 = vmatprep.subr.bf16.mxu1 %v15461_v22  ;;  %v15535_v9 = vld [vmem:[%s21221_s1 + $0x1008] ss:$16 sps:$4 sm:$0xff]   ;;  %v4306_v22 = vsel %vm2981_vm1, %v4304_v2, %v4305_v3  ;;  %v15579_v63 = vld [vmem:[%s21221_s1 + $0x10ec] ss:$16 sps:$4 sm:$0xff]  }
 0x1df   : > { %5065 = vmatmul.mubr.bf16.gmra.mrb[12].mxu0 %v4327_v11  ;;  %5231 = vmatmul.mubr.bf16.gmra.mrb[12].mxu1 %v4327_v11  ;;  %v4317_v11 = vsel %vm2981_vm1, %v4308_v29, %v4316_v5  ;;  %v18658_v29 = vld [vmem:[%s16872_s12 + $0x9c] ss:$16 sps:$4 sm:$0xff]  }
 0x1e0   : > { %5098 = vmatpush1.bf16.msra.mxu0 %v15456_v10  ;;  %5264 = vmatpush1.bf16.msra.mxu1 %v15459_v55  ;;  %v15588_v10 = vld [vmem:[%s16872_s12 + $0x58] ss:$16 sps:$4 sm:$0xff]   ;;  %v15540_v55 = vld [vmem:[%s21221_s1 + $0x1024] ss:$16 sps:$4 sm:$0xff]  }
 0x1e1   : > { %5099 = vmatprep.subr.bf16.mxu0 %v15464_v12  ;;  %5265 = vmatprep.subr.bf16.mxu1 %v15467_v17  ;;  %v15543_v12 = vld [vmem:[%s21221_s1 + $0x102c] ss:$16 sps:$4 sm:$0xff]   ;;  %v4314_v18 = vrot.slane %v15588_v10, 1  ;;  %v15546_v17 = vld [vmem:[%s21221_s1 + $0x1044] ss:$16 sps:$4 sm:$0xff]  }
 0x1e2   : > { %5074 = vmatprep.mubr.bf16.mxu0 %v4337_v20  ;;  %5240 = vmatprep.mubr.bf16.mxu1 %v4337_v20  ;;  %v15544_v20 = vld [vmem:[%s21221_s1 + $0x1040] ss:$16 sps:$4 sm:$0xff]  }
 0x1e3   : > { %v15582_v10 = vld [vmem:[%s21221_s1 + $0x1100] ss:$16 sps:$4 sm:$0xff]  }
 0x1e4   : > { %5100 = vmatpush1.bf16.msra.mxu0 %v15462_v23  ;;  %5266 = vmatpush1.bf16.msra.mxu1 %v15465_v24  ;;  %v15547_v23 = vld [vmem:[%s21221_s1 + $0x1048] ss:$16 sps:$4 sm:$0xff]   ;;  %v4324_v24 = vrot.slane %v15595_v14, 1 }
 0x1e5   : > { %5101 = vmatprep.subr.bf16.mxu0 %v15472_v25  ;;  %5267 = vmatprep.subr.bf16.mxu1 %v15475_v27  ;;  %v4315_v25 = vsel %vm2981_vm1, %v4305_v3, %v4314_v18  ;;  %v15603_v27 = vld [vmem:[%s16872_s12 + $0x78] ss:$16 sps:$4 sm:$0xff]  }
 0x1e6   : > { %v15585_v14 = vld [vmem:[%s21221_s1 + $0x1108] ss:$16 sps:$4 sm:$0xff]  }
 0x1e7   : > { %5075 = vmatmul.mubr.bf16.gmra.mrb[16].mxu0 %v4335_v30  ;;  %5241 = vmatmul.mubr.bf16.gmra.mrb[16].mxu1 %v4335_v30  ;;  %v15553_v30 = vld [vmem:[%s21221_s1 + $0x1068] ss:$16 sps:$4 sm:$0xff]  }
 0x1e8   : > { %5102 = vmatpush1.bf16.msra.mxu0 %v15470_v32  ;;  %5268 = vmatpush1.bf16.msra.mxu1 %v15473_v49  ;;  %v15550_v32 = vld [vmem:[%s21221_s1 + $0x1060] ss:$16 sps:$4 sm:$0xff]   ;;  %v4325_v49 = vsel %vm2981_vm1, %v4316_v5, %v4324_v24  ;;  %v15577_v5 = vld [vmem:[%s21221_s1 + $0x10e8] ss:$16 sps:$4 sm:$0xff]  }
 0x1e9   : > { %5103 = vmatprep.subr.bf16.mxu0 %v15479_v31  ;;  %5269 = vmatprep.subr.bf16.mxu1 %v15482_v33  ;;  %v15558_v31 = vld [vmem:[%s21221_s1 + $0x1084] ss:$16 sps:$4 sm:$0xff]   ;;  %v4322_v33 = vrot.slane %v15603_v27, 1  ;;  %v15609_v27 = vld [vmem:[%s21221_s1 + $0x116c] ss:$16 sps:$4 sm:$0xff]  }
 0x1ea   : > { %5117 = vmatprep.mubr.bf16.mxu0 %v4309_v35  ;;  %5283 = vmatprep.mubr.bf16.mxu1 %v4309_v35  ;;  %v15561_v35 = vld [vmem:[%s21221_s1 + $0x108c] ss:$16 sps:$4 sm:$0xff]  }
 0x1ec   : > { %5104 = vmatpush1.bf16.msra.mxu0 %v15477_v38  ;;  %5270 = vmatpush1.bf16.msra.mxu1 %v15480_v34  ;;  %v4079_v38 = vld [vmem:[%s16872_s12 + $0xb8] sm:$0x11]  ;;  %v15556_v34 = vld [vmem:[%s21221_s1 + $0x1080] ss:$16 sps:$4 sm:$0xff]  }
 0x1ed   : > { %5105 = vmatprep.subr.bf16.mxu0 %v15487_v36  ;;  %5271 = vmatprep.subr.bf16.mxu1 %v15490_v41  ;;  %v4332_v36 = vrot.slane %v18658_v29, 1  ;;  %v15559_v41 = vld [vmem:[%s21221_s1 + $0x1088] ss:$16 sps:$4 sm:$0xff]  }
 0x1ee   : > { %v15607_v29 = vld [vmem:[%s21221_s1 + $0x1168] ss:$16 sps:$4 sm:$0xff]  }
 0x1f0   : > { %5106 = vmatpush1.bf16.msra.mxu0 %v15485_v57  ;;  %5272 = vmatpush1.bf16.msra.mxu1 %v15488_v62  ;;  %v4323_v57 = vsel %vm2981_vm1, %v4314_v18, %v4322_v33  ;;  %v15618_v62 = vld [vmem:[%s16872_s12 + $0x98] ss:$16 sps:$4 sm:$0xff]  }
 0x1f1   : > { %5107 = vmatprep.subr.bf16.mxu0 %v15494_v39  ;;  %5273 = vmatprep.subr.bf16.mxu1 %v15497_v42  ;;  %v15564_v39 = vld [vmem:[%s21221_s1 + $0x10a4] ss:$16 sps:$4 sm:$0xff]   ;;  %v15567_v42 = vld [vmem:[%s21221_s1 + $0x10ac] ss:$16 sps:$4 sm:$0xff]  }
 0x1f4   : > { %5108 = vmatpush1.bf16.msra.mxu0 %v15492_v60  ;;  %5274 = vmatpush1.bf16.msra.mxu1 %v15495_v43  ;;  %v13064_v60 = vcombine.high %v4079_v38, %v4079_v38  ;;  %v4333_v43 = vsel %vm2981_vm1, %v4324_v24, %v4332_v36  ;;  %v15597_v24 = vld [vmem:[%s21221_s1 + $0x1140] ss:$16 sps:$4 sm:$0xff]  }
 0x1f5   : > { %5109 = vmatprep.subr.bf16.mxu0 %v15502_v21  ;;  %5275 = vmatprep.subr.bf16.mxu1 %v15505_v45  ;;  %v15562_v21 = vld [vmem:[%s21221_s1 + $0x10a0] ss:$16 sps:$4 sm:$0xff]   ;;  %v15565_v45 = vld [vmem:[%s21221_s1 + $0x10a8] ss:$16 sps:$4 sm:$0xff]  }
 0x1f8   : > { %5110 = vmatpush1.bf16.msra.mxu0 %v15500_v47  ;;  %5276 = vmatpush1.bf16.msra.mxu1 %v15503_v48  ;;  %v4330_v47 = vrot.slane %v15618_v62, 1  ;;  %v15570_v48 = vld [vmem:[%s21221_s1 + $0x10c4] ss:$16 sps:$4 sm:$0xff]  }
 0x1f9   : > { %5111 = vmatprep.subr.bf16.mxu0 %v15509_v51  ;;  %5277 = vmatprep.subr.bf16.mxu1 %v15512_v52  ;;  %v15573_v51 = vld [vmem:[%s21221_s1 + $0x10cc] ss:$16 sps:$4 sm:$0xff]   ;;  %v4340_v52 = vrot.slane %v13064_v60, 1 }
 0x1fa   : > { %v4331_v59 = vsel %vm2981_vm1, %v4322_v33, %v4330_v47  ;;  %v15621_v33 = vld [vmem:[%s21221_s1 + $0x11a4] ss:$16 sps:$4 sm:$0xff]   ;;  %v15631_v60 = vld [vmem:[%s21221_s1 + $0x11cc] ss:$16 sps:$4 sm:$0xff]  }
 0x1fc   : > { %5112 = vmatpush1.bf16.msra.mxu0 %v15507_v4  ;;  %5278 = vmatpush1.bf16.msra.mxu1 %v15510_v53  ;;  %v5533_v4 = vshrl.u32 %v18255_v44, 16  ;;  %v5536_v53 = vshll.u32 %v18255_v44, 16  ;;  %v15576_v44 = vld [vmem:[%s21221_s1 + $0x10e4] ss:$16 sps:$4 sm:$0xff]  }
 0x1fd   : > { %5113 = vmatprep.subr.bf16.mxu0 %v15516_v37  ;;  %5279 = vmatprep.subr.bf16.mxu1 %v15519_v54  ;;  %v16601_v37 = vld [vmem:[%s16872_s12 + $0x34] ss:$16 sps:$4 sm:$0xff]  }
 0x1fe   : > { %v5541_v54 = vshrl.u32 %v16601_v37, 16  ;;  %v5538_v2 = vrot.slane %v5536_v53, 2  ;;  %v15635_v53 = vld [vmem:[%s21221_s1 + $0x11e4] ss:$16 sps:$4 sm:$0xff]  }
 0x200   : > { %5114 = vmatpush1.bf16.msra.mxu0 %v15514_v8  ;;  %5280 = vmatpush1.bf16.msra.mxu1 %v15517_v6  ;;  %v5544_v8 = vshll.u32 %v16601_v37, 16  ;;  %v15568_v6 = vld [vmem:[%s21221_s1 + $0x10c0] ss:$16 sps:$4 sm:$0xff]   ;;  %v5543_v3 = vrot.slane %v5541_v54, 1  ;;  %v15638_v37 = vld [vmem:[%s21221_s1 + $0x11ec] ss:$16 sps:$4 sm:$0xff]  }
 0x201   : > { %5115 = vmatprep.subr.bf16.mxu0 %v15523_v56  ;;  %5281 = vmatprep.subr.bf16.mxu1 %v15526_v61  ;;  %v15571_v56 = vld [vmem:[%s21221_s1 + $0x10c8] ss:$16 sps:$4 sm:$0xff]   ;;  %v13063_v61 = vcombine.low %v4079_v38, %v4079_v38  ;;  %v15619_v38 = vld [vmem:[%s21221_s1 + $0x11a0] ss:$16 sps:$4 sm:$0xff]  }
 0x202   : > { %v15633_v54 = vld [vmem:[%s21221_s1 + $0x11e0] ss:$16 sps:$4 sm:$0xff]  }
 0x204   : > { %5116 = vmatpush1.bf16.msra.mxu0 %v15521_v0  ;;  %5282 = vmatpush1.bf16.msra.mxu1 %v15524_v1  ;;  %v5535_v0 = vrot.slane %v5533_v4, 1  ;;  %v4341_v1 = vsel %vm2981_vm1, %v4332_v36, %v4340_v52  ;;  %v5516_v36 = vshrl.u32 %v18359_v40, 16 }
 0x205   : > { %6387 = vmatprep.subr.bf16.mxu0 %v15534_v13  ;;  %6553 = vmatprep.subr.bf16.mxu1 %v15537_v50  ;;  %v5546_v13 = vrot.slane %v5544_v8, 2  ;;  %v15574_v50 = vld [vmem:[%s21221_s1 + $0x10e0] ss:$16 sps:$4 sm:$0xff]  }
 0x207   : > { %5118 = vmatmul.mubr.bf16.vlgmr.msra.gmra.mrb[0].mxu0 %v4306_v22  ;;  %5284 = vmatmul.mubr.bf16.vlgmr.msra.gmra.mrb[0].mxu1 %v4306_v22  ;;  %v15587_v22 = vld [vmem:[%s21221_s1 + $0x110c] ss:$16 sps:$4 sm:$0xff]  }
 0x208   : > { %6388 = vmatpush1.bf16.msra.mxu0 %v15532_v7  ;;  %6554 = vmatpush1.bf16.msra.mxu1 %v15535_v9  ;;  %v4338_v7 = vrot.slane %v13063_v61, 1  ;;  %v15584_v9 = vld [vmem:[%s21221_s1 + $0x1104] ss:$16 sps:$4 sm:$0xff]  }
 0x209   : > { %6389 = vmatprep.subr.bf16.mxu0 %v15540_v55  ;;  %6555 = vmatprep.subr.bf16.mxu1 %v15543_v12  ;;  %v5539_v55 = vor.u32 %v5538_v2, %v5535_v0  ;;  %v18734_v12 = vor.u32 %v5546_v13, %v5543_v3  ;;  %v15644_v2 = vld [vmem:[%s21221_s1 + $0x120c] ss:$16 sps:$4 sm:$0xff]   ;;  %v15639_v3 = vld [vmem:[%s21221_s1 + $0x1200] ss:$16 sps:$4 sm:$0xff]  }
 0x20a   : > { %5127 = vmatprep.mubr.bf16.mxu0 %v4317_v11  ;;  %5293 = vmatprep.mubr.bf16.mxu1 %v4317_v11  ;;  %v4339_v11 = vsel %vm2981_vm1, %v4330_v47, %v4338_v7 }
 0x20b   : > { %v5548_v18 = vsel %vm5514_vm2, %v5539_v55, %v18734_v12 }
 0x20c   : > { %6390 = vmatpush1.bf16.msra.mxu0 %v15538_v15  ;;  %6556 = vmatpush1.bf16.msra.mxu1 %v15541_v16  ;;  %v15591_v15 = vld [vmem:[%s21221_s1 + $0x1124] ss:$16 sps:$4 sm:$0xff]   ;;  %v15594_v16 = vld [vmem:[%s21221_s1 + $0x112c] ss:$16 sps:$4 sm:$0xff]  }
 0x20d   : > { %6391 = vmatprep.subr.bf16.mxu0 %v15546_v17  ;;  %6557 = vmatprep.subr.bf16.mxu1 %v15549_v19  ;;  %v15589_v17 = vld [vmem:[%s21221_s1 + $0x1120] ss:$16 sps:$4 sm:$0xff]   ;;  %v15592_v19 = vld [vmem:[%s21221_s1 + $0x1128] ss:$16 sps:$4 sm:$0xff]  }
 0x20f   : > { %5128 = vmatmul.mubr.bf16.gmra.mrb[4].mxu0 %v4315_v25  ;;  %5294 = vmatmul.mubr.bf16.gmra.mrb[4].mxu1 %v4315_v25  ;;  %v15606_v25 = vld [vmem:[%s21221_s1 + $0x1164] ss:$16 sps:$4 sm:$0xff]  }
 0x210   : > { %6392 = vmatpush1.bf16.msra.mxu0 %v15544_v20  ;;  %6558 = vmatpush1.bf16.msra.mxu1 %v15547_v23  ;;  %v15599_v20 = vld [vmem:[%s21221_s1 + $0x1144] ss:$16 sps:$4 sm:$0xff]   ;;  %v15602_v23 = vld [vmem:[%s21221_s1 + $0x114c] ss:$16 sps:$4 sm:$0xff]  }
 0x211   : > { %6393 = vmatprep.subr.bf16.mxu0 %v15552_v26  ;;  %6559 = vmatprep.subr.bf16.mxu1 %v15555_v28  ;;  %v15600_v26 = vld [vmem:[%s21221_s1 + $0x1148] ss:$16 sps:$4 sm:$0xff]   ;;  %v15604_v28 = vld [vmem:[%s21221_s1 + $0x1160] ss:$16 sps:$4 sm:$0xff]  }
 0x212   : > { %5137 = vmatprep.mubr.bf16.mxu0 %v4325_v49  ;;  %5303 = vmatprep.mubr.bf16.mxu1 %v4325_v49  ;;  %v15617_v49 = vld [vmem:[%s21221_s1 + $0x118c] ss:$16 sps:$4 sm:$0xff]  }
 0x214   : > { %6394 = vmatpush1.bf16.msra.mxu0 %v15550_v32  ;;  %6560 = vmatpush1.bf16.msra.mxu1 %v15553_v30  ;;  %v15614_v32 = vld [vmem:[%s21221_s1 + $0x1184] ss:$16 sps:$4 sm:$0xff]   ;;  %v15612_v30 = vld [vmem:[%s21221_s1 + $0x1180] ss:$16 sps:$4 sm:$0xff]  }
 0x215   : > { %6395 = vmatprep.subr.bf16.mxu0 %v15558_v31  ;;  %6561 = vmatprep.subr.bf16.mxu1 %v15561_v35  ;;  %v15615_v31 = vld [vmem:[%s21221_s1 + $0x1188] ss:$16 sps:$4 sm:$0xff]   ;;  %v15624_v35 = vld [vmem:[%s21221_s1 + $0x11ac] ss:$16 sps:$4 sm:$0xff]  }
 0x217   : > { %5138 = vmatmul.mubr.bf16.gmra.mrb[8].mxu0 %v4323_v57  ;;  %5304 = vmatmul.mubr.bf16.gmra.mrb[8].mxu1 %v4323_v57  ;;  %v16602_v57 = vld [vmem:[%s16872_s12 + $0x30] ss:$16 sps:$4 sm:$0xff]  }
 0x218   : > { %6396 = vmatpush1.bf16.msra.mxu0 %v15556_v34  ;;  %6562 = vmatpush1.bf16.msra.mxu1 %v15559_v41  ;;  %v15622_v34 = vld [vmem:[%s21221_s1 + $0x11a8] ss:$16 sps:$4 sm:$0xff]   ;;  %v5519_v41 = vshll.u32 %v18359_v40, 16  ;;  %v5524_v62 = vshrl.u32 %v16602_v57, 16 }
 0x219   : > { %6397 = vmatprep.subr.bf16.mxu0 %v15564_v39  ;;  %6563 = vmatprep.subr.bf16.mxu1 %v15567_v42  ;;  %v5527_v39 = vshll.u32 %v16602_v57, 16  ;;  %v15628_v42 = vld [vmem:[%s21221_s1 + $0x11c4] ss:$16 sps:$4 sm:$0xff]   ;;  %v15629_v40 = vld [vmem:[%s21221_s1 + $0x11c8] ss:$16 sps:$4 sm:$0xff]  }
 0x21a   : > { %5147 = vmatprep.mubr.bf16.mxu0 %v4333_v43  ;;  %5313 = vmatprep.mubr.bf16.mxu1 %v4333_v43  ;;  %v15626_v43 = vld [vmem:[%s21221_s1 + $0x11c0] ss:$16 sps:$4 sm:$0xff]   ;;  %v5526_v52 = vrot.slane %v5524_v62, 1 }
 0x21b   : > { %v5529_v4 = vrot.slane %v5527_v39, 2 }
 0x21c   : > { %6398 = vmatpush1.bf16.msra.mxu0 %v15562_v21  ;;  %6564 = vmatpush1.bf16.msra.mxu1 %v15565_v45  ;;  %v16603_v21 = vld [vmem:[%s16872_s12 + $0x54] ss:$16 sps:$4 sm:$0xff]  }
 0x21d   : > { %6399 = vmatprep.subr.bf16.mxu0 %v15570_v48  ;;  %6565 = vmatprep.subr.bf16.mxu1 %v15573_v51  ;;  %v5593_v45 = vshrl.u32 %v16603_v21, 16  ;;  %v5596_v47 = vshll.u32 %v16603_v21, 16  ;;  %v5518_v48 = vrot.slane %v5516_v36, 1  ;;  %v5521_v51 = vrot.slane %v5519_v41, 2  ;;  %v15662_v36 = vld [vmem:[%s21221_s1 + $0x126c] ss:$16 sps:$4 sm:$0xff]  }
 0x21e   : > { %v5530_v61 = vor.u32 %v5529_v4, %v5526_v52  ;;  %v15657_v41 = vld [vmem:[%s21221_s1 + $0x1260] ss:$16 sps:$4 sm:$0xff]  }
 0x21f   : > { %5148 = vmatmul.mubr.bf16.gmra.mrb[12].mxu0 %v4331_v59  ;;  %5314 = vmatmul.mubr.bf16.gmra.mrb[12].mxu1 %v4331_v59  ;;  %v5595_v8 = vrot.slane %v5593_v45, 1  ;;  %v5522_v59 = vor.u32 %v5521_v51, %v5518_v48  ;;  %v15668_v48 = vld [vmem:[%s21221_s1 + $0x128c] ss:$16 sps:$4 sm:$0xff]   ;;  %v15663_v51 = vld [vmem:[%s21221_s1 + $0x1280] ss:$16 sps:$4 sm:$0xff]  }
 0x220   : > { %6400 = vmatpush1.bf16.msra.mxu0 %v15568_v6  ;;  %6566 = vmatpush1.bf16.msra.mxu1 %v15571_v56  ;;  %v5598_v6 = vrot.slane %v5596_v47, 2  ;;  %v15636_v56 = vld [vmem:[%s21221_s1 + $0x11e8] ss:$16 sps:$4 sm:$0xff]   ;;  %v15665_v47 = vld [vmem:[%s21221_s1 + $0x1284] ss:$16 sps:$4 sm:$0xff]  }
 0x221   : > { %6401 = vmatprep.subr.bf16.mxu0 %v15576_v44  ;;  %6567 = vmatprep.subr.bf16.mxu1 %v15579_v63  ;;  %v16604_v44 = vld [vmem:[%s16872_s12 + $0x50] ss:$16 sps:$4 sm:$0xff]  }
 0x222   : > { %5157 = vmatprep.mubr.bf16.mxu0 %v4341_v1  ;;  %5323 = vmatprep.mubr.bf16.mxu1 %v4341_v1  ;;  %v5584_v63 = vshrl.u32 %v16604_v44, 16  ;;  %v5587_v0 = vshll.u32 %v16604_v44, 16  ;;  %v15641_v1 = vld [vmem:[%s21221_s1 + $0x1204] ss:$16 sps:$4 sm:$0xff]   ;;  %v5599_v13 = vor.u32 %v5598_v6, %v5595_v8  ;;  %v15669_v44 = vld [vmem:[%s21221_s1 + $0x12a0] ss:$16 sps:$4 sm:$0xff]  }
 0x224   : > { %6402 = vmatpush1.bf16.msra.mxu0 %v15574_v50  ;;  %6568 = vmatpush1.bf16.msra.mxu1 %v15577_v5  ;;  %v16605_v50 = vld [vmem:[%s16872_s12 + $0x74] ss:$16 sps:$4 sm:$0xff]   ;;  %v5589_v55 = vrot.slane %v5587_v0, 2 }
 0x225   : > { %6403 = vmatprep.subr.bf16.mxu0 %v15584_v9  ;;  %6569 = vmatprep.subr.bf16.mxu1 %v15587_v22  ;;  %v5629_v5 = vshrl.u32 %v16605_v50, 16  ;;  %v5632_v7 = vshll.u32 %v16605_v50, 16  ;;  %v15642_v9 = vld [vmem:[%s21221_s1 + $0x1208] ss:$16 sps:$4 sm:$0xff]   ;;  %v5531_v22 = vsel %vm5514_vm2, %v5522_v59, %v5530_v61  ;;  %v15671_v59 = vld [vmem:[%s21221_s1 + $0x12a4] ss:$16 sps:$4 sm:$0xff]  }
 0x227   : > { %5158 = vmatmul.mubr.bf16.gmra.mrb[16].mxu0 %v4339_v11  ;;  %5324 = vmatmul.mubr.bf16.gmra.mrb[16].mxu1 %v4339_v11  ;;  %v15650_v11 = vld [vmem:[%s21221_s1 + $0x122c] ss:$16 sps:$4 sm:$0xff]  }
 0x228   : > { %6404 = vmatpush1.bf16.msra.mxu0 %v15582_v10  ;;  %6570 = vmatpush1.bf16.msra.mxu1 %v15585_v14  ;;  %v5586_v10 = vrot.slane %v5584_v63, 1  ;;  %v15647_v14 = vld [vmem:[%s21221_s1 + $0x1224] ss:$16 sps:$4 sm:$0xff]  }
 0x229   : > { %6405 = vmatprep.subr.bf16.mxu0 %v15591_v15  ;;  %6571 = vmatprep.subr.bf16.mxu1 %v15594_v16  ;;  %v15645_v15 = vld [vmem:[%s21221_s1 + $0x1220] ss:$16 sps:$4 sm:$0xff]   ;;  %v5600_v16 = vsel %vm5514_vm2, %v18734_v12, %v5599_v13  ;;  %v15653_v12 = vld [vmem:[%s21221_s1 + $0x1244] ss:$16 sps:$4 sm:$0xff]  }
 0x22a   : > { %6419 = vmatprep.mubr.bf16.mxu0 %v5548_v18  ;;  %6585 = vmatprep.mubr.bf16.mxu1 %v5548_v18  ;;  %v5631_v18 = vrot.slane %v5629_v5, 1  ;;  %v15677_v5 = vld [vmem:[%s21221_s1 + $0x12c4] ss:$16 sps:$4 sm:$0xff]  }
 0x22c   : > { %6406 = vmatpush1.bf16.msra.mxu0 %v15589_v17  ;;  %6572 = vmatpush1.bf16.msra.mxu1 %v15592_v19  ;;  %v5634_v17 = vrot.slane %v5632_v7, 2  ;;  %v15648_v19 = vld [vmem:[%s21221_s1 + $0x1228] ss:$16 sps:$4 sm:$0xff]   ;;  %v15680_v7 = vld [vmem:[%s21221_s1 + $0x12cc] ss:$16 sps:$4 sm:$0xff]  }
 0x22d   : > { %6407 = vmatprep.subr.bf16.mxu0 %v15599_v20  ;;  %6573 = vmatprep.subr.bf16.mxu1 %v15602_v23  ;;  %v5590_v20 = vor.u32 %v5589_v55, %v5586_v10  ;;  %v16606_v23 = vld [vmem:[%s16872_s12 + $0x70] ss:$16 sps:$4 sm:$0xff]   ;;  %v5570_v55 = vshll.u32 %v18490_v46, 16 }
 0x230   : > { %6408 = vmatpush1.bf16.msra.mxu0 %v15597_v24  ;;  %6574 = vmatpush1.bf16.msra.mxu1 %v15600_v26  ;;  %v5620_v24 = vshrl.u32 %v16606_v23, 16  ;;  %v5623_v26 = vshll.u32 %v16606_v23, 16 }
 0x231   : > { %6409 = vmatprep.subr.bf16.mxu0 %v15606_v25  ;;  %6575 = vmatprep.subr.bf16.mxu1 %v15609_v27  ;;  %v15656_v25 = vld [vmem:[%s21221_s1 + $0x124c] ss:$16 sps:$4 sm:$0xff]   ;;  %v15651_v27 = vld [vmem:[%s21221_s1 + $0x1240] ss:$16 sps:$4 sm:$0xff]  }
 0x234   : > { %6410 = vmatpush1.bf16.msra.mxu0 %v15604_v28  ;;  %6576 = vmatpush1.bf16.msra.mxu1 %v15607_v29  ;;  %v15654_v28 = vld [vmem:[%s21221_s1 + $0x1248] ss:$16 sps:$4 sm:$0xff]   ;;  %v5635_v29 = vor.u32 %v5634_v17, %v5631_v18 }
 0x235   : > { %6411 = vmatprep.subr.bf16.mxu0 %v15614_v32  ;;  %6577 = vmatprep.subr.bf16.mxu1 %v15617_v49  ;;  %v16607_v32 = vld [vmem:[%s16872_s12 + $0x94] ss:$16 sps:$4 sm:$0xff]  }
 0x236   : > { %v5665_v49 = vshrl.u32 %v16607_v32, 16  ;;  %v5636_v57 = vsel %vm5514_vm2, %v5599_v13, %v5635_v29 }
 0x238   : > { %6412 = vmatpush1.bf16.msra.mxu0 %v15612_v30  ;;  %6578 = vmatpush1.bf16.msra.mxu1 %v15615_v31  ;;  %v5668_v30 = vshll.u32 %v16607_v32, 16  ;;  %v5591_v31 = vsel %vm5514_vm2, %v5530_v61, %v5590_v20  ;;  %v5667_v62 = vrot.slane %v5665_v49, 1  ;;  %v15674_v61 = vld [vmem:[%s21221_s1 + $0x12ac] ss:$16 sps:$4 sm:$0xff]   ;;  %v15689_v32 = vld [vmem:[%s21221_s1 + $0x1304] ss:$16 sps:$4 sm:$0xff]  }
 0x239   : > { %6413 = vmatprep.subr.bf16.mxu0 %v15621_v33  ;;  %6579 = vmatprep.subr.bf16.mxu1 %v15624_v35  ;;  %v5622_v33 = vrot.slane %v5620_v24, 1  ;;  %v5625_v35 = vrot.slane %v5623_v26, 2  ;;  %v5572_v26 = vrot.slane %v5570_v55, 2  ;;  %v15692_v49 = vld [vmem:[%s21221_s1 + $0x130c] ss:$16 sps:$4 sm:$0xff]  }
 0x23a   : > { %v5670_v39 = vrot.slane %v5668_v30, 2  ;;  %v15733_v55 = vld [vmem:[%s21221_s1 + $0x13e4] ss:$16 sps:$4 sm:$0xff]  }
 0x23c   : > { %6414 = vmatpush1.bf16.msra.mxu0 %v15619_v38  ;;  %6580 = vmatpush1.bf16.msra.mxu1 %v15622_v34  ;;  %v5374_v38 = vld [vmem:[%s16872_s12 + $0xb0] sm:$0x33]  ;;  %v5671_v52 = vor.u32 %v5670_v39, %v5667_v62  ;;  %v15696_v62 = vld [vmem:[%s21221_s1 + $0x1328] ss:$16 sps:$4 sm:$0xff]  }
 0x23d   : > { %6415 = vmatprep.subr.bf16.mxu0 %v15628_v42  ;;  %6581 = vmatprep.subr.bf16.mxu1 %v15631_v60  ;;  %v15659_v34 = vld [vmem:[%s21221_s1 + $0x1264] ss:$16 sps:$4 sm:$0xff]   ;;  %v18885_v42 = vcombine.high %v5374_v38, %v5374_v38  ;;  %v15660_v60 = vld [vmem:[%s21221_s1 + $0x1268] ss:$16 sps:$4 sm:$0xff]  }
 0x23e   : > { %v5672_v63 = vsel %vm5514_vm2, %v5635_v29, %v5671_v52  ;;  %v15701_v39 = vld [vmem:[%s21221_s1 + $0x1344] ss:$16 sps:$4 sm:$0xff]  }
 0x23f   : > { %v5701_v4 = vshrl.u32 %v18885_v42, 16 }
 0x240   : > { %6416 = vmatpush1.bf16.msra.mxu0 %v15626_v43  ;;  %6582 = vmatpush1.bf16.msra.mxu1 %v15629_v40  ;;  %v5626_v43 = vor.u32 %v5625_v35, %v5622_v33  ;;  %v16608_v40 = vld [vmem:[%s16872_s12 + $0x90] ss:$16 sps:$4 sm:$0xff]   ;;  %v15690_v35 = vld [vmem:[%s21221_s1 + $0x1308] ss:$16 sps:$4 sm:$0xff]  }
 0x241   : > { %6417 = vmatprep.subr.bf16.mxu0 %v15635_v53  ;;  %6583 = vmatprep.subr.bf16.mxu1 %v15638_v37  ;;  %v5656_v21 = vshrl.u32 %v16608_v40, 16  ;;  %v5659_v45 = vshll.u32 %v16608_v40, 16  ;;  %v5704_v53 = vshll.u32 %v18885_v42, 16  ;;  %v15666_v37 = vld [vmem:[%s21221_s1 + $0x1288] ss:$16 sps:$4 sm:$0xff]   ;;  %v5703_v0 = vrot.slane %v5701_v4, 1 }
 0x242   : > { %v15687_v33 = vld [vmem:[%s21221_s1 + $0x1300] ss:$16 sps:$4 sm:$0xff]   ;;  %v15702_v40 = vld [vmem:[%s21221_s1 + $0x1348] ss:$16 sps:$4 sm:$0xff]  }
 0x243   : > { %v5658_v8 = vrot.slane %v5656_v21, 1  ;;  %v5661_v6 = vrot.slane %v5659_v45, 2  ;;  %v15707_v21 = vld [vmem:[%s21221_s1 + $0x1364] ss:$16 sps:$4 sm:$0xff]   ;;  %v15710_v45 = vld [vmem:[%s21221_s1 + $0x136c] ss:$16 sps:$4 sm:$0xff]  }
 0x244   : > { %6418 = vmatpush1.bf16.msra.mxu0 %v15633_v54  ;;  %6584 = vmatpush1.bf16.msra.mxu1 %v15636_v56  ;;  %v5627_v54 = vsel %vm5514_vm2, %v5590_v20, %v5626_v43  ;;  %v18906_v56 = vcombine.low %v5374_v38, %v5374_v38  ;;  %v15683_v20 = vld [vmem:[%s21221_s1 + $0x12e4] ss:$16 sps:$4 sm:$0xff]   ;;  %v15711_v4 = vld [vmem:[%s21221_s1 + $0x1380] ss:$16 sps:$4 sm:$0xff]  }
 0x245   : > { %6470 = vmatprep.subr.bf16.mxu0 %v15641_v1  ;;  %6636 = vmatprep.subr.bf16.mxu1 %v15644_v2  ;;  %v5706_v1 = vrot.slane %v5704_v53, 2  ;;  %v15672_v2 = vld [vmem:[%s21221_s1 + $0x12a8] ss:$16 sps:$4 sm:$0xff]  }
 0x246   : > { %v5692_v13 = vshrl.u32 %v18906_v56, 16  ;;  %v5695_v50 = vshll.u32 %v18906_v56, 16  ;;  %v15714_v53 = vld [vmem:[%s21221_s1 + $0x1388] ss:$16 sps:$4 sm:$0xff]  }
 0x247   : > { %6420 = vmatmul.mubr.bf16.vlgmr.msra.gmra.mrb[0].mxu0 %v5531_v22  ;;  %6586 = vmatmul.mubr.bf16.vlgmr.msra.gmra.mrb[0].mxu1 %v5531_v22  ;;  %v5567_v22 = vshrl.u32 %v18490_v46, 16  ;;  %v5707_v10 = vor.u32 %v5706_v1, %v5703_v0  ;;  %v15686_v46 = vld [vmem:[%s21221_s1 + $0x12ec] ss:$16 sps:$4 sm:$0xff]   ;;  %v15726_v1 = vld [vmem:[%s21221_s1 + $0x13c4] ss:$16 sps:$4 sm:$0xff]  }
 0x248   : > { %6471 = vmatpush1.bf16.msra.mxu0 %v15639_v3  ;;  %6637 = vmatpush1.bf16.msra.mxu1 %v15642_v9  ;;  %v5662_v3 = vor.u32 %v5661_v6, %v5658_v8  ;;  %v15675_v9 = vld [vmem:[%s21221_s1 + $0x12c0] ss:$16 sps:$4 sm:$0xff]   ;;  %v5694_v17 = vrot.slane %v5692_v13, 1  ;;  %v15720_v6 = vld [vmem:[%s21221_s1 + $0x13a8] ss:$16 sps:$4 sm:$0xff]  }
 0x249   : > { %6472 = vmatprep.subr.bf16.mxu0 %v15647_v14  ;;  %6638 = vmatprep.subr.bf16.mxu1 %v15650_v11  ;;  %v16609_v14 = vld [vmem:[%s16872_s12 + $0x3c] ss:$16 sps:$4 sm:$0xff]   ;;  %v5569_v23 = vrot.slane %v5567_v22, 1  ;;  %v5708_v24 = vsel %vm5514_vm2, %v5671_v52, %v5707_v10  ;;  %v15717_v8 = vld [vmem:[%s21221_s1 + $0x13a0] ss:$16 sps:$4 sm:$0xff]  }
 0x24a   : > { %6429 = vmatprep.mubr.bf16.mxu0 %v5600_v16  ;;  %6595 = vmatprep.mubr.bf16.mxu1 %v5600_v16  ;;  %v5575_v11 = vshrl.u32 %v16609_v14, 16  ;;  %v15678_v16 = vld [vmem:[%s21221_s1 + $0x12c8] ss:$16 sps:$4 sm:$0xff]   ;;  %v5663_v18 = vsel %vm5514_vm2, %v5626_v43, %v5662_v3  ;;  %v15699_v43 = vld [vmem:[%s21221_s1 + $0x1340] ss:$16 sps:$4 sm:$0xff]  }
 0x24b   : > { %v5573_v30 = vor.u32 %v5572_v26, %v5569_v23  ;;  %v15716_v52 = vld [vmem:[%s21221_s1 + $0x138c] ss:$16 sps:$4 sm:$0xff]  }
 0x24c   : > { %6473 = vmatpush1.bf16.msra.mxu0 %v15645_v15  ;;  %6639 = vmatpush1.bf16.msra.mxu1 %v15648_v19  ;;  %v5578_v15 = vshll.u32 %v16609_v14, 16  ;;  %v5697_v19 = vrot.slane %v5695_v50, 2  ;;  %v16611_v13 = vld [vmem:[%s16872_s12 + $0x5c] ss:$16 sps:$4 sm:$0xff]  }
 0x24d   : > { %6474 = vmatprep.subr.bf16.mxu0 %v15653_v12  ;;  %6640 = vmatprep.subr.bf16.mxu1 %v15656_v25  ;;  %v5577_v12 = vrot.slane %v5575_v11, 1  ;;  %v5611_v50 = vshrl.u32 %v16611_v13, 16  ;;  %v15736_v14 = vld [vmem:[%s21221_s1 + $0x13ec] ss:$16 sps:$4 sm:$0xff]   ;;  %v15731_v11 = vld [vmem:[%s21221_s1 + $0x13e0] ss:$16 sps:$4 sm:$0xff]  }
 0x24e   : > { %v5580_v25 = vrot.slane %v5578_v15, 2  ;;  %v5698_v29 = vor.u32 %v5697_v19, %v5694_v17  ;;  %v15742_v26 = vld [vmem:[%s21221_s1 + $0x140c] ss:$16 sps:$4 sm:$0xff]  }
 0x24f   : > { %6430 = vmatmul.mubr.bf16.gmra.mrb[4].mxu0 %v5591_v31  ;;  %6596 = vmatmul.mubr.bf16.gmra.mrb[4].mxu1 %v5591_v31  ;;  %v5613_v15 = vrot.slane %v5611_v50, 1 }
 0x250   : > { %6475 = vmatpush1.bf16.msra.mxu0 %v15651_v27  ;;  %6641 = vmatpush1.bf16.msra.mxu1 %v15654_v28  ;;  %v15681_v27 = vld [vmem:[%s21221_s1 + $0x12e0] ss:$16 sps:$4 sm:$0xff]   ;;  %v15684_v28 = vld [vmem:[%s21221_s1 + $0x12e8] ss:$16 sps:$4 sm:$0xff]   ;;  %v18958_v31 = vor.u32 %v5580_v25, %v5577_v12  ;;  %v5699_v38 = vsel %vm5514_vm2, %v5662_v3, %v5698_v29  ;;  %v16613_v25 = vld [vmem:[%s16872_s12 + $0x7c] ss:$16 sps:$4 sm:$0xff]  }
 0x251   : > { %6476 = vmatprep.subr.bf16.mxu0 %v15659_v34  ;;  %6642 = vmatprep.subr.bf16.mxu1 %v15662_v36  ;;  %v15695_v34 = vld [vmem:[%s21221_s1 + $0x1324] ss:$16 sps:$4 sm:$0xff]   ;;  %v15698_v36 = vld [vmem:[%s21221_s1 + $0x132c] ss:$16 sps:$4 sm:$0xff]   ;;  %v15724_v3 = vld [vmem:[%s21221_s1 + $0x13c0] ss:$16 sps:$4 sm:$0xff]  }
 0x252   : > { %6439 = vmatprep.mubr.bf16.mxu0 %v5636_v57  ;;  %6605 = vmatprep.mubr.bf16.mxu1 %v5636_v57  ;;  %v15693_v57 = vld [vmem:[%s21221_s1 + $0x1320] ss:$16 sps:$4 sm:$0xff]  }
 0x253   : > { %v15737_v29 = vld [vmem:[%s21221_s1 + $0x1400] ss:$16 sps:$4 sm:$0xff]  }
 0x254   : > { %6477 = vmatpush1.bf16.msra.mxu0 %v15657_v41  ;;  %6643 = vmatpush1.bf16.msra.mxu1 %v15660_v60  ;;  %v5582_v41 = vsel %vm5514_vm2, %v5573_v30, %v18958_v31  ;;  %v15704_v60 = vld [vmem:[%s21221_s1 + $0x134c] ss:$16 sps:$4 sm:$0xff]  }
 0x255   : > { %6478 = vmatprep.subr.bf16.mxu0 %v15665_v47  ;;  %6644 = vmatprep.subr.bf16.mxu1 %v15668_v48  ;;  %v15705_v47 = vld [vmem:[%s21221_s1 + $0x1360] ss:$16 sps:$4 sm:$0xff]   ;;  %v15708_v48 = vld [vmem:[%s21221_s1 + $0x1368] ss:$16 sps:$4 sm:$0xff]  }
 0x257   : > { %6440 = vmatmul.mubr.bf16.gmra.mrb[8].mxu0 %v5627_v54  ;;  %6606 = vmatmul.mubr.bf16.gmra.mrb[8].mxu1 %v5627_v54  ;;  %v15722_v54 = vld [vmem:[%s21221_s1 + $0x13ac] ss:$16 sps:$4 sm:$0xff]  }
 0x258   : > { %6479 = vmatpush1.bf16.msra.mxu0 %v15663_v51  ;;  %6645 = vmatpush1.bf16.msra.mxu1 %v15666_v37  ;;  %v15713_v51 = vld [vmem:[%s21221_s1 + $0x1384] ss:$16 sps:$4 sm:$0xff]  }
 0x259   : > { %6480 = vmatprep.subr.bf16.mxu0 %v15671_v59  ;;  %6646 = vmatprep.subr.bf16.mxu1 %v15674_v61  ;;  %v15719_v37 = vld [vmem:[%s21221_s1 + $0x13a4] ss:$16 sps:$4 sm:$0xff]   ;;  %v5550_v59 = vshrl.u32 %v18593_v58, 16  ;;  %v5553_v61 = vshll.u32 %v18593_v58, 16  ;;  %v15727_v58 = vld [vmem:[%s21221_s1 + $0x13c8] ss:$16 sps:$4 sm:$0xff]  }
 0x25a   : > { %6449 = vmatprep.mubr.bf16.mxu0 %v5672_v63  ;;  %6615 = vmatprep.mubr.bf16.mxu1 %v5672_v63 }
 0x25c   : > { %6481 = vmatpush1.bf16.msra.mxu0 %v15669_v44  ;;  %6647 = vmatpush1.bf16.msra.mxu1 %v15672_v2  ;;  %v16610_v44 = vld [vmem:[%s16872_s12 + $0x38] ss:$16 sps:$4 sm:$0xff]   ;;  %v15729_v2 = vld [vmem:[%s21221_s1 + $0x13cc] ss:$16 sps:$4 sm:$0xff]  }
 0x25d   : > { %6482 = vmatprep.subr.bf16.mxu0 %v15677_v5  ;;  %6648 = vmatprep.subr.bf16.mxu1 %v15680_v7  ;;  %v5558_v63 = vshrl.u32 %v16610_v44, 16  ;;  %v5561_v0 = vshll.u32 %v16610_v44, 16  ;;  %v5614_v5 = vshll.u32 %v16611_v13, 16  ;;  %v5552_v7 = vrot.slane %v5550_v59, 1  ;;  %v15760_v59 = vld [vmem:[%s21221_s1 + $0x146c] ss:$16 sps:$4 sm:$0xff]  }
 0x25f   : > { %6450 = vmatmul.mubr.bf16.gmra.mrb[12].mxu0 %v5663_v18  ;;  %6616 = vmatmul.mubr.bf16.gmra.mrb[12].mxu1 %v5663_v18  ;;  %v5560_v22 = vrot.slane %v5558_v63, 1  ;;  %v5563_v10 = vrot.slane %v5561_v0, 2  ;;  %v15734_v18 = vld [vmem:[%s21221_s1 + $0x13e8] ss:$16 sps:$4 sm:$0xff]  }
 0x260   : > { %6483 = vmatpush1.bf16.msra.mxu0 %v15675_v9  ;;  %6649 = vmatpush1.bf16.msra.mxu1 %v15678_v16  ;;  %v5555_v9 = vrot.slane %v5553_v61, 2  ;;  %v5616_v16 = vrot.slane %v5614_v5, 2  ;;  %v15755_v61 = vld [vmem:[%s21221_s1 + $0x1460] ss:$16 sps:$4 sm:$0xff]   ;;  %v15763_v5 = vld [vmem:[%s21221_s1 + $0x1484] ss:$16 sps:$4 sm:$0xff]  }
 0x261   : > { %6484 = vmatprep.subr.bf16.mxu0 %v15683_v20  ;;  %6650 = vmatprep.subr.bf16.mxu1 %v15686_v46  ;;  %v5564_v19 = vor.u32 %v5563_v10, %v5560_v22  ;;  %v16612_v20 = vld [vmem:[%s16872_s12 + $0x58] ss:$16 sps:$4 sm:$0xff]  }
 0x262   : > { %6459 = vmatprep.mubr.bf16.mxu0 %v5708_v24  ;;  %6625 = vmatprep.mubr.bf16.mxu1 %v5708_v24  ;;  %v5556_v17 = vor.u32 %v5555_v9, %v5552_v7  ;;  %v5602_v46 = vshrl.u32 %v16612_v20, 16  ;;  %v5605_v23 = vshll.u32 %v16612_v20, 16  ;;  %v15739_v24 = vld [vmem:[%s21221_s1 + $0x1404] ss:$16 sps:$4 sm:$0xff]   ;;  %v5617_v12 = vor.u32 %v5616_v16, %v5613_v15  ;;  %v15766_v7 = vld [vmem:[%s21221_s1 + $0x148c] ss:$16 sps:$4 sm:$0xff]  }
 0x263   : > { %v15761_v9 = vld [vmem:[%s21221_s1 + $0x1480] ss:$16 sps:$4 sm:$0xff]  }
 0x264   : > { %6485 = vmatpush1.bf16.msra.mxu0 %v15681_v27  ;;  %6651 = vmatpush1.bf16.msra.mxu1 %v15684_v28  ;;  %v5647_v27 = vshrl.u32 %v16613_v25, 16  ;;  %v5650_v28 = vshll.u32 %v16613_v25, 16  ;;  %v5604_v30 = vrot.slane %v5602_v46, 1  ;;  %v15767_v20 = vld [vmem:[%s21221_s1 + $0x14a0] ss:$16 sps:$4 sm:$0xff]  }
 0x265   : > { %6486 = vmatprep.subr.bf16.mxu0 %v15689_v32  ;;  %6652 = vmatprep.subr.bf16.mxu1 %v15692_v49  ;;  %v15740_v32 = vld [vmem:[%s21221_s1 + $0x1408] ss:$16 sps:$4 sm:$0xff]   ;;  %v5565_v49 = vsel %vm5514_vm2, %v5556_v17, %v5564_v19  ;;  %v15769_v17 = vld [vmem:[%s21221_s1 + $0x14a4] ss:$16 sps:$4 sm:$0xff]  }
 0x267   : > { %6460 = vmatmul.mubr.bf16.gmra.mrb[16].mxu0 %v5699_v38  ;;  %6626 = vmatmul.mubr.bf16.gmra.mrb[16].mxu1 %v5699_v38  ;;  %v15748_v38 = vld [vmem:[%s21221_s1 + $0x142c] ss:$16 sps:$4 sm:$0xff]  }
 0x268   : > { %6487 = vmatpush1.bf16.msra.mxu0 %v15687_v33  ;;  %6653 = vmatpush1.bf16.msra.mxu1 %v15690_v35  ;;  %v5607_v33 = vrot.slane %v5605_v23, 2  ;;  %v15745_v35 = vld [vmem:[%s21221_s1 + $0x1424] ss:$16 sps:$4 sm:$0xff]  }
 0x269   : > { %6488 = vmatprep.subr.bf16.mxu0 %v15695_v34  ;;  %6654 = vmatprep.subr.bf16.mxu1 %v15698_v36  ;;  %v15743_v34 = vld [vmem:[%s21221_s1 + $0x1420] ss:$16 sps:$4 sm:$0xff]   ;;  %v5618_v36 = vsel %vm5514_vm2, %v18958_v31, %v5617_v12  ;;  %v15751_v31 = vld [vmem:[%s21221_s1 + $0x1444] ss:$16 sps:$4 sm:$0xff]  }
 0x26a   : > { %6502 = vmatprep.mubr.bf16.mxu0 %v5582_v41  ;;  %6668 = vmatprep.mubr.bf16.mxu1 %v5582_v41  ;;  %v5649_v41 = vrot.slane %v5647_v27, 1 }
 0x26c   : > { %6489 = vmatpush1.bf16.msra.mxu0 %v15693_v57  ;;  %6655 = vmatpush1.bf16.msra.mxu1 %v15696_v62  ;;  %v5652_v57 = vrot.slane %v5650_v28, 2  ;;  %v15746_v62 = vld [vmem:[%s21221_s1 + $0x1428] ss:$16 sps:$4 sm:$0xff]   ;;  %v15775_v28 = vld [vmem:[%s21221_s1 + $0x14c4] ss:$16 sps:$4 sm:$0xff]  }
 0x26d   : > { %6490 = vmatprep.subr.bf16.mxu0 %v15701_v39  ;;  %6656 = vmatprep.subr.bf16.mxu1 %v15704_v60  ;;  %v5608_v39 = vor.u32 %v5607_v33, %v5604_v30  ;;  %v16614_v60 = vld [vmem:[%s16872_s12 + $0x78] ss:$16 sps:$4 sm:$0xff]  }
 0x270   : > { %6491 = vmatpush1.bf16.msra.mxu0 %v15699_v43  ;;  %6657 = vmatpush1.bf16.msra.mxu1 %v15702_v40  ;;  %v5638_v43 = vshrl.u32 %v16614_v60, 16  ;;  %v5641_v40 = vshll.u32 %v16614_v60, 16  ;;  %v15779_v60 = vld [vmem:[%s21221_s1 + $0x14e0] ss:$16 sps:$4 sm:$0xff]  }
 0x271   : > { %6492 = vmatprep.subr.bf16.mxu0 %v15707_v21  ;;  %6658 = vmatprep.subr.bf16.mxu1 %v15710_v45  ;;  %v15754_v21 = vld [vmem:[%s21221_s1 + $0x144c] ss:$16 sps:$4 sm:$0xff]   ;;  %v15749_v45 = vld [vmem:[%s21221_s1 + $0x1440] ss:$16 sps:$4 sm:$0xff]  }
 0x274   : > { %6493 = vmatpush1.bf16.msra.mxu0 %v15705_v47  ;;  %6659 = vmatpush1.bf16.msra.mxu1 %v15708_v48  ;;  %v15752_v47 = vld [vmem:[%s21221_s1 + $0x1448] ss:$16 sps:$4 sm:$0xff]   ;;  %v5653_v48 = vor.u32 %v5652_v57, %v5649_v41  ;;  %v15784_v41 = vld [vmem:[%s21221_s1 + $0x14ec] ss:$16 sps:$4 sm:$0xff]  }
 0x275   : > { %6494 = vmatprep.subr.bf16.mxu0 %v15713_v51  ;;  %6660 = vmatprep.subr.bf16.mxu1 %v15716_v52  ;;  %v16615_v51 = vld [vmem:[%s16872_s12 + $0x9c] ss:$16 sps:$4 sm:$0xff]  }
 0x276   : > { %v5683_v52 = vshrl.u32 %v16615_v51, 16  ;;  %v5654_v44 = vsel %vm5514_vm2, %v5617_v12, %v5653_v48 }
 0x278   : > { %6495 = vmatpush1.bf16.msra.mxu0 %v15711_v4  ;;  %6661 = vmatpush1.bf16.msra.mxu1 %v15714_v53  ;;  %v5686_v4 = vshll.u32 %v16615_v51, 16  ;;  %v5609_v53 = vsel %vm5514_vm2, %v5564_v19, %v5608_v39  ;;  %v5685_v63 = vrot.slane %v5683_v52, 1  ;;  %v15772_v19 = vld [vmem:[%s21221_s1 + $0x14ac] ss:$16 sps:$4 sm:$0xff]   ;;  %v15785_v51 = vld [vmem:[%s21221_s1 + $0x1500] ss:$16 sps:$4 sm:$0xff]  }
 0x279   : > { %6496 = vmatprep.subr.bf16.mxu0 %v15719_v37  ;;  %6662 = vmatprep.subr.bf16.mxu1 %v15722_v54  ;;  %v5640_v37 = vrot.slane %v5638_v43, 1  ;;  %v5643_v54 = vrot.slane %v5641_v40, 2  ;;  %v15782_v43 = vld [vmem:[%s21221_s1 + $0x14e8] ss:$16 sps:$4 sm:$0xff]  }
 0x27a   : > { %v5688_v0 = vrot.slane %v5686_v4, 2  ;;  %v15788_v52 = vld [vmem:[%s21221_s1 + $0x1508] ss:$16 sps:$4 sm:$0xff]  }
 0x27c   : > { %6497 = vmatpush1.bf16.msra.mxu0 %v15717_v8  ;;  %6663 = vmatpush1.bf16.msra.mxu1 %v15720_v6  ;;  %v5375_v8 = vld [vmem:[%s16872_s12 + $0xb8] sm:$0x33]  ;;  %v15757_v6 = vld [vmem:[%s21221_s1 + $0x1464] ss:$16 sps:$4 sm:$0xff]   ;;  %v5689_v22 = vor.u32 %v5688_v0, %v5685_v63 }
 0x27d   : > { %6498 = vmatprep.subr.bf16.mxu0 %v15726_v1  ;;  %6664 = vmatprep.subr.bf16.mxu1 %v15729_v2  ;;  %v19112_v1 = vcombine.high %v5375_v8, %v5375_v8  ;;  %v15758_v2 = vld [vmem:[%s21221_s1 + $0x1468] ss:$16 sps:$4 sm:$0xff]   ;;  %v15805_v0 = vld [vmem:[%s21221_s1 + $0x1564] ss:$16 sps:$4 sm:$0xff]  }
 0x27e   : > { %v5690_v46 = vsel %vm5514_vm2, %v5653_v48, %v5689_v22  ;;  %v15800_v63 = vld [vmem:[%s21221_s1 + $0x1548] ss:$16 sps:$4 sm:$0xff]  }
 0x27f   : > { %v5719_v10 = vshrl.u32 %v19112_v1, 16 }
 0x280   : > { %6499 = vmatpush1.bf16.msra.mxu0 %v15724_v3  ;;  %6665 = vmatpush1.bf16.msra.mxu1 %v15727_v58  ;;  %v5644_v3 = vor.u32 %v5643_v54, %v5640_v37  ;;  %v16616_v58 = vld [vmem:[%s16872_s12 + $0x98] ss:$16 sps:$4 sm:$0xff]   ;;  %v15796_v37 = vld [vmem:[%s21221_s1 + $0x152c] ss:$16 sps:$4 sm:$0xff]  }
 0x281   : > { %6500 = vmatprep.subr.bf16.mxu0 %v15733_v55  ;;  %6666 = vmatprep.subr.bf16.mxu1 %v15736_v14  ;;  %v5674_v13 = vshrl.u32 %v16616_v58, 16  ;;  %v5677_v50 = vshll.u32 %v16616_v58, 16  ;;  %v5722_v55 = vshll.u32 %v19112_v1, 16  ;;  %v15764_v14 = vld [vmem:[%s21221_s1 + $0x1488] ss:$16 sps:$4 sm:$0xff]   ;;  %v5721_v23 = vrot.slane %v5719_v10, 1 }
 0x282   : > { %v15806_v58 = vld [vmem:[%s21221_s1 + $0x1568] ss:$16 sps:$4 sm:$0xff]   ;;  %v15815_v10 = vld [vmem:[%s21221_s1 + $0x15a0] ss:$16 sps:$4 sm:$0xff]  }
 0x283   : > { %v5676_v15 = vrot.slane %v5674_v13, 1  ;;  %v5679_v16 = vrot.slane %v5677_v50, 2  ;;  %v15811_v13 = vld [vmem:[%s21221_s1 + $0x1584] ss:$16 sps:$4 sm:$0xff]   ;;  %v15814_v50 = vld [vmem:[%s21221_s1 + $0x158c] ss:$16 sps:$4 sm:$0xff]  }
 0x284   : > { %6501 = vmatpush1.bf16.msra.mxu0 %v15731_v11  ;;  %6667 = vmatpush1.bf16.msra.mxu1 %v15734_v18  ;;  %v5645_v11 = vsel %vm5514_vm2, %v5608_v39, %v5644_v3  ;;  %v19133_v18 = vcombine.low %v5375_v8, %v5375_v8  ;;  %v15791_v8 = vld [vmem:[%s21221_s1 + $0x1520] ss:$16 sps:$4 sm:$0xff]  }
 0x285   : > { %7604 = vmatprep.subr.bf16.mxu0 %v15739_v24  ;;  %7770 = vmatprep.subr.bf16.mxu1 %v15742_v26  ;;  %v5724_v24 = vrot.slane %v5722_v55, 2  ;;  %v15770_v26 = vld [vmem:[%s21221_s1 + $0x14a8] ss:$16 sps:$4 sm:$0xff]   ;;  %v5680_v12 = vor.u32 %v5679_v16, %v5676_v15  ;;  %v15822_v15 = vld [vmem:[%s21221_s1 + $0x15c0] ss:$16 sps:$4 sm:$0xff]  }
 0x286   : > { %v5710_v25 = vshrl.u32 %v19133_v18, 16  ;;  %v5713_v27 = vshll.u32 %v19133_v18, 16  ;;  %v15818_v55 = vld [vmem:[%s21221_s1 + $0x15a8] ss:$16 sps:$4 sm:$0xff]  }
 0x287   : > { %6503 = vmatmul.mubr.bf16.vlgmr.msra.gmra.mrb[0].mxu0 %v5565_v49  ;;  %6669 = vmatmul.mubr.bf16.vlgmr.msra.gmra.mrb[0].mxu1 %v5565_v49  ;;  %v15776_v49 = vld [vmem:[%s21221_s1 + $0x14c8] ss:$16 sps:$4 sm:$0xff]   ;;  %v5725_v30 = vor.u32 %v5724_v24, %v5721_v23  ;;  %v5681_v33 = vsel %vm5514_vm2, %v5644_v3, %v5680_v12  ;;  %v15803_v3 = vld [vmem:[%s21221_s1 + $0x1560] ss:$16 sps:$4 sm:$0xff]  }
 0x288   : > { %7605 = vmatpush1.bf16.msra.mxu0 %v15737_v29  ;;  %7771 = vmatpush1.bf16.msra.mxu1 %v15740_v32  ;;  %v15778_v29 = vld [vmem:[%s21221_s1 + $0x14cc] ss:$16 sps:$4 sm:$0xff]   ;;  %v15773_v32 = vld [vmem:[%s21221_s1 + $0x14c0] ss:$16 sps:$4 sm:$0xff]   ;;  %v15825_v16 = vld [vmem:[%s21221_s1 + $0x15c8] ss:$16 sps:$4 sm:$0xff]  }
 0x289   : > { %7606 = vmatprep.subr.bf16.mxu0 %v15745_v35  ;;  %7772 = vmatprep.subr.bf16.mxu1 %v15748_v38  ;;  %v5712_v35 = vrot.slane %v5710_v25, 1  ;;  %v5715_v38 = vrot.slane %v5713_v27, 2  ;;  %v5726_v57 = vsel %vm5514_vm2, %v5689_v22, %v5725_v30  ;;  %v15820_v22 = vld [vmem:[%s21221_s1 + $0x15ac] ss:$16 sps:$4 sm:$0xff]   ;;  %v15832_v23 = vld [vmem:[%s21221_s1 + $0x15e8] ss:$16 sps:$4 sm:$0xff]  }
 0x28a   : > { %6512 = vmatprep.mubr.bf16.mxu0 %v5618_v36  ;;  %6678 = vmatprep.mubr.bf16.mxu1 %v5618_v36  ;;  %v15781_v36 = vld [vmem:[%s21221_s1 + $0x14e4] ss:$16 sps:$4 sm:$0xff]   ;;  %v15842_v27 = vld [vmem:[%s21221_s1 + $0x160c] ss:$16 sps:$4 sm:$0xff]  }
 0x28b   : > { %v5716_v40 = vor.u32 %v5715_v38, %v5712_v35  ;;  %v15839_v25 = vld [vmem:[%s21221_s1 + $0x1604] ss:$16 sps:$4 sm:$0xff]   ;;  %v15848_v35 = vld [vmem:[%s21221_s1 + $0x162c] ss:$16 sps:$4 sm:$0xff]  }
 0x28c   : > { %7607 = vmatpush1.bf16.msra.mxu0 %v15743_v34  ;;  %7773 = vmatpush1.bf16.msra.mxu1 %v15746_v62  ;;  %v19164_v34 = vld [vmem:[%s16872_s12 + $0x10] sm:$0xcc]  ;;  %v19174_v62 = vld [vmem:[%s16872_s12 + $0x20] sm:$0xff] }
 0x28d   : > { %7608 = vmatprep.subr.bf16.mxu0 %v15751_v31  ;;  %7774 = vmatprep.subr.bf16.mxu1 %v15754_v21  ;;  %v13326_v39 = vcombine.high %v19164_v34, %v19174_v62  ;;  %v15787_v31 = vld [vmem:[%s21221_s1 + $0x1504] ss:$16 sps:$4 sm:$0xff]   ;;  %v15790_v21 = vld [vmem:[%s21221_s1 + $0x150c] ss:$16 sps:$4 sm:$0xff]   ;;  %v5717_v4 = vsel %vm5514_vm2, %v5680_v12, %v5716_v40  ;;  %v15849_v40 = vld [vmem:[%s21221_s1 + $0x1640] ss:$16 sps:$4 sm:$0xff]  }
 0x28f   : > { %6513 = vmatmul.mubr.bf16.gmra.mrb[4].mxu0 %v5609_v53  ;;  %6679 = vmatmul.mubr.bf16.gmra.mrb[4].mxu1 %v5609_v53  ;;  %v15793_v53 = vld [vmem:[%s21221_s1 + $0x1524] ss:$16 sps:$4 sm:$0xff]  }
 0x290   : > { %7609 = vmatpush1.bf16.msra.mxu0 %v15749_v45  ;;  %7775 = vmatpush1.bf16.msra.mxu1 %v15752_v47  ;;  %v6903_v45 = vrot.slane %v13326_v39, 2  ;;  %v19191_v47 = vld [vmem:[%s16872_s12 + $0x34] ss:$16 sps:$4 sm:$0xff]   ;;  %v15854_v39 = vld [vmem:[%s21221_s1 + $0x164c] ss:$16 sps:$4 sm:$0xff]  }
 0x291   : > { %7610 = vmatprep.subr.bf16.mxu0 %v15757_v6  ;;  %7776 = vmatprep.subr.bf16.mxu1 %v15760_v59  ;;  %v6904_v48 = vrot.slane %v19191_v47, 2  ;;  %v15794_v6 = vld [vmem:[%s21221_s1 + $0x1528] ss:$16 sps:$4 sm:$0xff]   ;;  %v15799_v59 = vld [vmem:[%s21221_s1 + $0x1544] ss:$16 sps:$4 sm:$0xff]  }
 0x292   : > { %6522 = vmatprep.mubr.bf16.mxu0 %v5654_v44  ;;  %6688 = vmatprep.mubr.bf16.mxu1 %v5654_v44  ;;  %v15797_v44 = vld [vmem:[%s21221_s1 + $0x1540] ss:$16 sps:$4 sm:$0xff]   ;;  %v15860_v47 = vld [vmem:[%s21221_s1 + $0x166c] ss:$16 sps:$4 sm:$0xff]  }
 0x293   : > { %v6905_v54 = vsel %vm6899_vm3, %v6903_v45, %v6904_v48  ;;  %v15857_v45 = vld [vmem:[%s21221_s1 + $0x1664] ss:$16 sps:$4 sm:$0xff]  }
 0x294   : > { %7611 = vmatpush1.bf16.msra.mxu0 %v15755_v61  ;;  %7777 = vmatpush1.bf16.msra.mxu1 %v15758_v2  ;;  %v15802_v61 = vld [vmem:[%s21221_s1 + $0x154c] ss:$16 sps:$4 sm:$0xff]  }
 0x295   : > { %7612 = vmatprep.subr.bf16.mxu0 %v15763_v5  ;;  %7778 = vmatprep.subr.bf16.mxu1 %v15766_v7  ;;  %v15808_v2 = vld [vmem:[%s21221_s1 + $0x156c] ss:$16 sps:$4 sm:$0xff]   ;;  %v15809_v5 = vld [vmem:[%s21221_s1 + $0x1580] ss:$16 sps:$4 sm:$0xff]   ;;  %v15812_v7 = vld [vmem:[%s21221_s1 + $0x1588] ss:$16 sps:$4 sm:$0xff]  }
 0x297   : > { %6523 = vmatmul.mubr.bf16.gmra.mrb[8].mxu0 %v5645_v11  ;;  %6689 = vmatmul.mubr.bf16.gmra.mrb[8].mxu1 %v5645_v11  ;;  %v15827_v11 = vld [vmem:[%s21221_s1 + $0x15cc] ss:$16 sps:$4 sm:$0xff]  }
 0x298   : > { %7613 = vmatpush1.bf16.msra.mxu0 %v15761_v9  ;;  %7779 = vmatpush1.bf16.msra.mxu1 %v15764_v14  ;;  %v15817_v9 = vld [vmem:[%s21221_s1 + $0x15a4] ss:$16 sps:$4 sm:$0xff]  }
 0x299   : > { %7614 = vmatprep.subr.bf16.mxu0 %v15769_v17  ;;  %7780 = vmatprep.subr.bf16.mxu1 %v15772_v19  ;;  %v15824_v14 = vld [vmem:[%s21221_s1 + $0x15c4] ss:$16 sps:$4 sm:$0xff]   ;;  %v13325_v17 = vcombine.low %v19164_v34, %v19174_v62  ;;  %v15843_v34 = vld [vmem:[%s21221_s1 + $0x1620] ss:$16 sps:$4 sm:$0xff]  }
 0x29a   : > { %6532 = vmatprep.mubr.bf16.mxu0 %v5690_v46  ;;  %6698 = vmatprep.mubr.bf16.mxu1 %v5690_v46  ;;  %v15831_v19 = vld [vmem:[%s21221_s1 + $0x15e4] ss:$16 sps:$4 sm:$0xff]   ;;  %v15829_v46 = vld [vmem:[%s21221_s1 + $0x15e0] ss:$16 sps:$4 sm:$0xff]  }
 0x29b   : > { %v6900_v24 = vrot.slane %v13325_v17, 2  ;;  %v15851_v62 = vld [vmem:[%s21221_s1 + $0x1644] ss:$16 sps:$4 sm:$0xff]   ;;  %v19405_v17 = vld [vmem:[%s16872_s12 + $0x28] sm:$0xff] }
 0x29c   : > { %7615 = vmatpush1.bf16.msra.mxu0 %v15767_v20  ;;  %7781 = vmatpush1.bf16.msra.mxu1 %v15770_v26  ;;  %v15834_v20 = vld [vmem:[%s21221_s1 + $0x15ec] ss:$16 sps:$4 sm:$0xff]   ;;  %v16619_v26 = vld [vmem:[%s16872_s12 + $0x30] ss:$16 sps:$4 sm:$0xff]  }
 0x29d   : > { %7616 = vmatprep.subr.bf16.mxu0 %v15775_v28  ;;  %7782 = vmatprep.subr.bf16.mxu1 %v15778_v29  ;;  %v6901_v12 = vrot.slane %v16619_v26, 2  ;;  %v16620_v28 = vld [vmem:[%s16872_s12 + $0x54] ss:$16 sps:$4 sm:$0xff]  }
 0x29e   : > { %v6914_v29 = vrot.slane %v16620_v28, 2 }
 0x29f   : > { %6533 = vmatmul.mubr.bf16.gmra.mrb[12].mxu0 %v5681_v33  ;;  %6699 = vmatmul.mubr.bf16.gmra.mrb[12].mxu1 %v5681_v33  ;;  %v6902_v30 = vsel %vm6899_vm3, %v6900_v24, %v6901_v12  ;;  %v15845_v33 = vld [vmem:[%s21221_s1 + $0x1624] ss:$16 sps:$4 sm:$0xff]   ;;  %v15890_v24 = vld [vmem:[%s21221_s1 + $0x170c] ss:$16 sps:$4 sm:$0xff]  }
 0x2a0   : > { %7617 = vmatpush1.bf16.msra.mxu0 %v15773_v32  ;;  %7783 = vmatpush1.bf16.msra.mxu1 %v15776_v49  ;;  %v15837_v32 = vld [vmem:[%s21221_s1 + $0x1600] ss:$16 sps:$4 sm:$0xff]   ;;  %v15840_v49 = vld [vmem:[%s21221_s1 + $0x1608] ss:$16 sps:$4 sm:$0xff]   ;;  %v6915_v38 = vsel %vm6899_vm3, %v6904_v48, %v6914_v29 }
 0x2a1   : > { %7618 = vmatprep.subr.bf16.mxu0 %v15781_v36  ;;  %7784 = vmatprep.subr.bf16.mxu1 %v15784_v41  ;;  %v15846_v36 = vld [vmem:[%s21221_s1 + $0x1628] ss:$16 sps:$4 sm:$0xff]   ;;  %v16621_v41 = vld [vmem:[%s16872_s12 + $0x50] ss:$16 sps:$4 sm:$0xff]  }
 0x2a2   : > { %6542 = vmatprep.mubr.bf16.mxu0 %v5726_v57  ;;  %6708 = vmatprep.mubr.bf16.mxu1 %v5726_v57  ;;  %v6912_v57 = vrot.slane %v16621_v41, 2  ;;  %v15855_v48 = vld [vmem:[%s21221_s1 + $0x1660] ss:$16 sps:$4 sm:$0xff]   ;;  %v15905_v41 = vld [vmem:[%s21221_s1 + $0x1764] ss:$16 sps:$4 sm:$0xff]  }
 0x2a4   : > { %7619 = vmatpush1.bf16.msra.mxu0 %v15779_v60  ;;  %7785 = vmatpush1.bf16.msra.mxu1 %v15782_v43  ;;  %v16622_v60 = vld [vmem:[%s16872_s12 + $0x74] ss:$16 sps:$4 sm:$0xff]  }
 0x2a5   : > { %7620 = vmatprep.subr.bf16.mxu0 %v15787_v31  ;;  %7786 = vmatprep.subr.bf16.mxu1 %v15790_v21  ;;  %v6922_v43 = vrot.slane %v16622_v60, 2  ;;  %v15852_v31 = vld [vmem:[%s21221_s1 + $0x1648] ss:$16 sps:$4 sm:$0xff]   ;;  %v6913_v21 = vsel %vm6899_vm3, %v6901_v12, %v6912_v57  ;;  %v19420_v12 = vld [vmem:[%s16872_s12 + $0x3c] ss:$16 sps:$4 sm:$0xff]  }
 0x2a6   : > { %v15911_v60 = vld [vmem:[%s21221_s1 + $0x1784] ss:$16 sps:$4 sm:$0xff]  }
 0x2a7   : > { %6543 = vmatmul.mubr.bf16.gmra.mrb[16].mxu0 %v5717_v4  ;;  %6709 = vmatmul.mubr.bf16.gmra.mrb[16].mxu1 %v5717_v4  ;;  %v15863_v4 = vld [vmem:[%s21221_s1 + $0x1684] ss:$16 sps:$4 sm:$0xff]  }
 0x2a8   : > { %7621 = vmatpush1.bf16.msra.mxu0 %v15785_v51  ;;  %7787 = vmatpush1.bf16.msra.mxu1 %v15788_v52  ;;  %v15858_v51 = vld [vmem:[%s21221_s1 + $0x1668] ss:$16 sps:$4 sm:$0xff]   ;;  %v6923_v52 = vsel %vm6899_vm3, %v6914_v29, %v6922_v43  ;;  %v15893_v29 = vld [vmem:[%s21221_s1 + $0x1724] ss:$16 sps:$4 sm:$0xff]  }
 0x2a9   : > { %7622 = vmatprep.subr.bf16.mxu0 %v15793_v53  ;;  %7788 = vmatprep.subr.bf16.mxu1 %v15796_v37  ;;  %v16623_v53 = vld [vmem:[%s16872_s12 + $0x70] ss:$16 sps:$4 sm:$0xff]  }
 0x2aa   : > { %7636 = vmatprep.mubr.bf16.mxu0 %v6905_v54  ;;  %7802 = vmatprep.mubr.bf16.mxu1 %v6905_v54  ;;  %v6920_v37 = vrot.slane %v16623_v53, 2  ;;  %v15866_v54 = vld [vmem:[%s21221_s1 + $0x168c] ss:$16 sps:$4 sm:$0xff]   ;;  %v15924_v53 = vld [vmem:[%s21221_s1 + $0x17c8] ss:$16 sps:$4 sm:$0xff]  }
 0x2ac   : > { %7623 = vmatpush1.bf16.msra.mxu0 %v15791_v8  ;;  %7789 = vmatpush1.bf16.msra.mxu1 %v15794_v6  ;;  %v16624_v8 = vld [vmem:[%s16872_s12 + $0x94] ss:$16 sps:$4 sm:$0xff]  }
 0x2ad   : > { %7624 = vmatprep.subr.bf16.mxu0 %v15799_v59  ;;  %7790 = vmatprep.subr.bf16.mxu1 %v15802_v61  ;;  %v6930_v6 = vrot.slane %v16624_v8, 2  ;;  %v15861_v59 = vld [vmem:[%s21221_s1 + $0x1680] ss:$16 sps:$4 sm:$0xff]   ;;  %v15864_v61 = vld [vmem:[%s21221_s1 + $0x1688] ss:$16 sps:$4 sm:$0xff]  }
 0x2ae   : > { %v15932_v8 = vld [vmem:[%s21221_s1 + $0x17ec] ss:$16 sps:$4 sm:$0xff]  }
 0x2b0   : > { %7625 = vmatpush1.bf16.msra.mxu0 %v15797_v44  ;;  %7791 = vmatpush1.bf16.msra.mxu1 %v15800_v63  ;;  %v6921_v44 = vsel %vm6899_vm3, %v6912_v57, %v6920_v37  ;;  %v15869_v63 = vld [vmem:[%s21221_s1 + $0x16a4] ss:$16 sps:$4 sm:$0xff]   ;;  %v15908_v57 = vld [vmem:[%s21221_s1 + $0x176c] ss:$16 sps:$4 sm:$0xff]  }
 0x2b1   : > { %7626 = vmatprep.subr.bf16.mxu0 %v15805_v0  ;;  %7792 = vmatprep.subr.bf16.mxu1 %v15808_v2  ;;  %v15872_v0 = vld [vmem:[%s21221_s1 + $0x16ac] ss:$16 sps:$4 sm:$0xff]   ;;  %v15867_v2 = vld [vmem:[%s21221_s1 + $0x16a0] ss:$16 sps:$4 sm:$0xff]  }
 0x2b4   : > { %7627 = vmatpush1.bf16.msra.mxu0 %v15803_v3  ;;  %7793 = vmatpush1.bf16.msra.mxu1 %v15806_v58  ;;  %v15870_v3 = vld [vmem:[%s21221_s1 + $0x16a8] ss:$16 sps:$4 sm:$0xff]   ;;  %v6931_v58 = vsel %vm6899_vm3, %v6922_v43, %v6930_v6  ;;  %v15914_v43 = vld [vmem:[%s21221_s1 + $0x178c] ss:$16 sps:$4 sm:$0xff]  }
 0x2b5   : > { %7628 = vmatprep.subr.bf16.mxu0 %v15811_v13  ;;  %7794 = vmatprep.subr.bf16.mxu1 %v15814_v50  ;;  %v15875_v13 = vld [vmem:[%s21221_s1 + $0x16c4] ss:$16 sps:$4 sm:$0xff]   ;;  %v16625_v50 = vld [vmem:[%s16872_s12 + $0x90] ss:$16 sps:$4 sm:$0xff]  }
 0x2b8   : > { %7629 = vmatpush1.bf16.msra.mxu0 %v15809_v5  ;;  %7795 = vmatpush1.bf16.msra.mxu1 %v15812_v7  ;;  %v6928_v5 = vrot.slane %v16625_v50, 2  ;;  %v15878_v7 = vld [vmem:[%s21221_s1 + $0x16cc] ss:$16 sps:$4 sm:$0xff]   ;;  %v15938_v50 = vld [vmem:[%s21221_s1 + $0x1808] ss:$16 sps:$4 sm:$0xff]  }
 0x2b9   : > { %7630 = vmatprep.subr.bf16.mxu0 %v15817_v9  ;;  %7796 = vmatprep.subr.bf16.mxu1 %v15820_v22  ;;  %v6938_v9 = vrot.slane %v18885_v42, 2  ;;  %v15873_v22 = vld [vmem:[%s21221_s1 + $0x16c0] ss:$16 sps:$4 sm:$0xff]   ;;  %v15881_v42 = vld [vmem:[%s21221_s1 + $0x16e4] ss:$16 sps:$4 sm:$0xff]  }
 0x2bc   : > { %7631 = vmatpush1.bf16.msra.mxu0 %v15815_v10  ;;  %7797 = vmatpush1.bf16.msra.mxu1 %v15818_v55  ;;  %v15876_v10 = vld [vmem:[%s21221_s1 + $0x16c8] ss:$16 sps:$4 sm:$0xff]   ;;  %v6929_v55 = vsel %vm6899_vm3, %v6920_v37, %v6928_v5 }
 0x2bd   : > { %7632 = vmatprep.subr.bf16.mxu0 %v15824_v14  ;;  %7798 = vmatprep.subr.bf16.mxu1 %v15827_v11  ;;  %v19392_v14 = vld [vmem:[%s16872_s12 + $0x18] sm:$0xcc] }
 0x2be   : > { %v15884_v11 = vld [vmem:[%s21221_s1 + $0x16ec] ss:$16 sps:$4 sm:$0xff]   ;;  %v13327_v37 = vcombine.low %v19392_v14, %v19405_v17 }
 0x2c0   : > { %7633 = vmatpush1.bf16.msra.mxu0 %v15822_v15  ;;  %7799 = vmatpush1.bf16.msra.mxu1 %v15825_v16  ;;  %v15879_v15 = vld [vmem:[%s21221_s1 + $0x16e0] ss:$16 sps:$4 sm:$0xff]   ;;  %v6939_v16 = vsel %vm6899_vm3, %v6930_v6, %v6938_v9  ;;  %v15946_v9 = vld [vmem:[%s21221_s1 + $0x182c] ss:$16 sps:$4 sm:$0xff]  }
 0x2c1   : > { %7634 = vmatprep.subr.bf16.mxu0 %v15831_v19  ;;  %7800 = vmatprep.subr.bf16.mxu1 %v15834_v20  ;;  %v13328_v19 = vcombine.high %v19392_v14, %v19405_v17  ;;  %v15882_v20 = vld [vmem:[%s21221_s1 + $0x16e8] ss:$16 sps:$4 sm:$0xff]   ;;  %v15927_v6 = vld [vmem:[%s21221_s1 + $0x17e0] ss:$16 sps:$4 sm:$0xff]  }
 0x2c2   : > { %v16630_v14 = vld [vmem:[%s16872_s12 + $0x58] ss:$16 sps:$4 sm:$0xff]  }
 0x2c3   : > { %v6909_v26 = vrot.slane %v13328_v19, 2  ;;  %v15947_v19 = vld [vmem:[%s21221_s1 + $0x1840] ss:$16 sps:$4 sm:$0xff]  }
 0x2c4   : > { %7635 = vmatpush1.bf16.msra.mxu0 %v15829_v46  ;;  %7801 = vmatpush1.bf16.msra.mxu1 %v15832_v23  ;;  %v6936_v46 = vrot.slane %v18906_v56, 2  ;;  %v15887_v23 = vld [vmem:[%s21221_s1 + $0x1704] ss:$16 sps:$4 sm:$0xff]   ;;  %v15885_v56 = vld [vmem:[%s21221_s1 + $0x1700] ss:$16 sps:$4 sm:$0xff]  }
 0x2c5   : > { %7687 = vmatprep.subr.bf16.mxu0 %v15839_v25  ;;  %7853 = vmatprep.subr.bf16.mxu1 %v15842_v27  ;;  %v6910_v25 = vrot.slane %v19420_v12, 2  ;;  %v15888_v27 = vld [vmem:[%s21221_s1 + $0x1708] ss:$16 sps:$4 sm:$0xff]   ;;  %v15953_v12 = vld [vmem:[%s21221_s1 + $0x1860] ss:$16 sps:$4 sm:$0xff]  }
 0x2c6   : > { %v6937_v28 = vsel %vm6899_vm3, %v6928_v5, %v6936_v46 }
 0x2c7   : > { %7637 = vmatmul.mubr.bf16.vlgmr.msra.gmra.mrb[0].mxu0 %v6902_v30  ;;  %7803 = vmatmul.mubr.bf16.vlgmr.msra.gmra.mrb[0].mxu1 %v6902_v30  ;;  %v15891_v30 = vld [vmem:[%s21221_s1 + $0x1720] ss:$16 sps:$4 sm:$0xff]  }
 0x2c8   : > { %7688 = vmatpush1.bf16.msra.mxu0 %v15837_v32  ;;  %7854 = vmatpush1.bf16.msra.mxu1 %v15840_v49  ;;  %v15896_v32 = vld [vmem:[%s21221_s1 + $0x172c] ss:$16 sps:$4 sm:$0xff]   ;;  %v6911_v49 = vsel %vm6899_vm3, %v6909_v26, %v6910_v25 }
 0x2c9   : > { %7689 = vmatprep.subr.bf16.mxu0 %v15845_v33  ;;  %7855 = vmatprep.subr.bf16.mxu1 %v15848_v35  ;;  %v15894_v33 = vld [vmem:[%s21221_s1 + $0x1728] ss:$16 sps:$4 sm:$0xff]   ;;  %v15899_v35 = vld [vmem:[%s21221_s1 + $0x1744] ss:$16 sps:$4 sm:$0xff]  }
 0x2ca   : > { %7646 = vmatprep.mubr.bf16.mxu0 %v6915_v38  ;;  %7812 = vmatprep.mubr.bf16.mxu1 %v6915_v38  ;;  %v15902_v38 = vld [vmem:[%s21221_s1 + $0x174c] ss:$16 sps:$4 sm:$0xff]  }
 0x2cc   : > { %7690 = vmatpush1.bf16.msra.mxu0 %v15843_v34  ;;  %7856 = vmatpush1.bf16.msra.mxu1 %v15846_v36  ;;  %v15897_v34 = vld [vmem:[%s21221_s1 + $0x1740] ss:$16 sps:$4 sm:$0xff]   ;;  %v15900_v36 = vld [vmem:[%s21221_s1 + $0x1748] ss:$16 sps:$4 sm:$0xff]  }
 0x2cd   : > { %7691 = vmatprep.subr.bf16.mxu0 %v15851_v62  ;;  %7857 = vmatprep.subr.bf16.mxu1 %v15854_v39  ;;  %v15903_v62 = vld [vmem:[%s21221_s1 + $0x1760] ss:$16 sps:$4 sm:$0xff]   ;;  %v15906_v39 = vld [vmem:[%s21221_s1 + $0x1768] ss:$16 sps:$4 sm:$0xff]  }
 0x2cf   : > { %7647 = vmatmul.mubr.bf16.gmra.mrb[4].mxu0 %v6913_v21  ;;  %7813 = vmatmul.mubr.bf16.gmra.mrb[4].mxu1 %v6913_v21  ;;  %v15917_v21 = vld [vmem:[%s21221_s1 + $0x17a4] ss:$16 sps:$4 sm:$0xff]  }
 0x2d0   : > { %7692 = vmatpush1.bf16.msra.mxu0 %v15849_v40  ;;  %7858 = vmatpush1.bf16.msra.mxu1 %v15852_v31  ;;  %v15909_v40 = vld [vmem:[%s21221_s1 + $0x1780] ss:$16 sps:$4 sm:$0xff]   ;;  %v15912_v31 = vld [vmem:[%s21221_s1 + $0x1788] ss:$16 sps:$4 sm:$0xff]  }
 0x2d1   : > { %7693 = vmatprep.subr.bf16.mxu0 %v15857_v45  ;;  %7859 = vmatprep.subr.bf16.mxu1 %v15860_v47  ;;  %v15920_v45 = vld [vmem:[%s21221_s1 + $0x17ac] ss:$16 sps:$4 sm:$0xff]   ;;  %v15915_v47 = vld [vmem:[%s21221_s1 + $0x17a0] ss:$16 sps:$4 sm:$0xff]  }
 0x2d2   : > { %7656 = vmatprep.mubr.bf16.mxu0 %v6923_v52  ;;  %7822 = vmatprep.mubr.bf16.mxu1 %v6923_v52  ;;  %v15926_v52 = vld [vmem:[%s21221_s1 + $0x17cc] ss:$16 sps:$4 sm:$0xff]  }
 0x2d4   : > { %7694 = vmatpush1.bf16.msra.mxu0 %v15855_v48  ;;  %7860 = vmatpush1.bf16.msra.mxu1 %v15858_v51  ;;  %v15918_v48 = vld [vmem:[%s21221_s1 + $0x17a8] ss:$16 sps:$4 sm:$0xff]   ;;  %v15923_v51 = vld [vmem:[%s21221_s1 + $0x17c4] ss:$16 sps:$4 sm:$0xff]  }
 0x2d5   : > { %7695 = vmatprep.subr.bf16.mxu0 %v15863_v4  ;;  %7861 = vmatprep.subr.bf16.mxu1 %v15866_v54  ;;  %v15921_v4 = vld [vmem:[%s21221_s1 + $0x17c0] ss:$16 sps:$4 sm:$0xff]   ;;  %v15929_v54 = vld [vmem:[%s21221_s1 + $0x17e4] ss:$16 sps:$4 sm:$0xff]  }
 0x2d7   : > { %7657 = vmatmul.mubr.bf16.gmra.mrb[8].mxu0 %v6921_v44  ;;  %7823 = vmatmul.mubr.bf16.gmra.mrb[8].mxu1 %v6921_v44  ;;  %v16628_v44 = vld [vmem:[%s16872_s12 + $0x38] ss:$16 sps:$4 sm:$0xff]  }
 0x2d8   : > { %7696 = vmatpush1.bf16.msra.mxu0 %v15861_v59  ;;  %7862 = vmatpush1.bf16.msra.mxu1 %v15864_v61  ;;  %v15930_v59 = vld [vmem:[%s21221_s1 + $0x17e8] ss:$16 sps:$4 sm:$0xff]   ;;  %v6906_v61 = vrot.slane %v13327_v37, 2  ;;  %v15977_v37 = vld [vmem:[%s21221_s1 + $0x18e0] ss:$16 sps:$4 sm:$0xff]  }
 0x2d9   : > { %7697 = vmatprep.subr.bf16.mxu0 %v15869_v63  ;;  %7863 = vmatprep.subr.bf16.mxu1 %v15872_v0  ;;  %v6907_v63 = vrot.slane %v16628_v44, 2  ;;  %v15937_v0 = vld [vmem:[%s21221_s1 + $0x1804] ss:$16 sps:$4 sm:$0xff]  }
 0x2da   : > { %7666 = vmatprep.mubr.bf16.mxu0 %v6931_v58  ;;  %7832 = vmatprep.mubr.bf16.mxu1 %v6931_v58 }
 0x2db   : > { %v6908_v5 = vsel %vm6899_vm3, %v6906_v61, %v6907_v63 }
 0x2dc   : > { %7698 = vmatpush1.bf16.msra.mxu0 %v15867_v2  ;;  %7864 = vmatpush1.bf16.msra.mxu1 %v15870_v3  ;;  %v15940_v2 = vld [vmem:[%s21221_s1 + $0x180c] ss:$16 sps:$4 sm:$0xff]  }
 0x2dd   : > { %7699 = vmatprep.subr.bf16.mxu0 %v15875_v13  ;;  %7865 = vmatprep.subr.bf16.mxu1 %v15878_v7  ;;  %v16629_v3 = vld [vmem:[%s16872_s12 + $0x5c] ss:$16 sps:$4 sm:$0xff]   ;;  %v15935_v13 = vld [vmem:[%s21221_s1 + $0x1800] ss:$16 sps:$4 sm:$0xff]   ;;  %v15943_v7 = vld [vmem:[%s21221_s1 + $0x1824] ss:$16 sps:$4 sm:$0xff]  }
 0x2de   : > { %v6918_v58 = vrot.slane %v16629_v3, 2  ;;  %v15994_v3 = vld [vmem:[%s21221_s1 + $0x192c] ss:$16 sps:$4 sm:$0xff]  }
 0x2df   : > { %7667 = vmatmul.mubr.bf16.gmra.mrb[12].mxu0 %v6929_v55  ;;  %7833 = vmatmul.mubr.bf16.gmra.mrb[12].mxu1 %v6929_v55  ;;  %v15944_v55 = vld [vmem:[%s21221_s1 + $0x1828] ss:$16 sps:$4 sm:$0xff]  }
 0x2e0   : > { %7700 = vmatpush1.bf16.msra.mxu0 %v15873_v22  ;;  %7866 = vmatpush1.bf16.msra.mxu1 %v15876_v10  ;;  %v6919_v22 = vsel %vm6899_vm3, %v6910_v25, %v6918_v58  ;;  %v15941_v10 = vld [vmem:[%s21221_s1 + $0x1820] ss:$16 sps:$4 sm:$0xff]   ;;  %v15956_v25 = vld [vmem:[%s21221_s1 + $0x1868] ss:$16 sps:$4 sm:$0xff]  }
 0x2e1   : > { %7701 = vmatprep.subr.bf16.mxu0 %v15881_v42  ;;  %7867 = vmatprep.subr.bf16.mxu1 %v15884_v11  ;;  %v6916_v42 = vrot.slane %v16630_v14, 2  ;;  %v15949_v11 = vld [vmem:[%s21221_s1 + $0x1844] ss:$16 sps:$4 sm:$0xff]   ;;  %v16001_v14 = vld [vmem:[%s21221_s1 + $0x1960] ss:$16 sps:$4 sm:$0xff]  }
 0x2e2   : > { %7676 = vmatprep.mubr.bf16.mxu0 %v6939_v16  ;;  %7842 = vmatprep.mubr.bf16.mxu1 %v6939_v16  ;;  %v16631_v16 = vld [vmem:[%s16872_s12 + $0x7c] ss:$16 sps:$4 sm:$0xff]  }
 0x2e3   : > { %v6926_v17 = vrot.slane %v16631_v16, 2  ;;  %v6917_v46 = vsel %vm6899_vm3, %v6907_v63, %v6916_v42  ;;  %v15986_v63 = vld [vmem:[%s21221_s1 + $0x1908] ss:$16 sps:$4 sm:$0xff]   ;;  %v16007_v16 = vld [vmem:[%s21221_s1 + $0x1980] ss:$16 sps:$4 sm:$0xff]  }
 0x2e4   : > { %7702 = vmatpush1.bf16.msra.mxu0 %v15879_v15  ;;  %7868 = vmatpush1.bf16.msra.mxu1 %v15882_v20  ;;  %v15952_v15 = vld [vmem:[%s21221_s1 + $0x184c] ss:$16 sps:$4 sm:$0xff]   ;;  %v15950_v20 = vld [vmem:[%s21221_s1 + $0x1848] ss:$16 sps:$4 sm:$0xff]  }
 0x2e5   : > { %7703 = vmatprep.subr.bf16.mxu0 %v15887_v23  ;;  %7869 = vmatprep.subr.bf16.mxu1 %v15890_v24  ;;  %v15955_v23 = vld [vmem:[%s21221_s1 + $0x1864] ss:$16 sps:$4 sm:$0xff]   ;;  %v15958_v24 = vld [vmem:[%s21221_s1 + $0x186c] ss:$16 sps:$4 sm:$0xff]   ;;  %v6927_v26 = vsel %vm6899_vm3, %v6918_v58, %v6926_v17 }
 0x2e7   : > { %7677 = vmatmul.mubr.bf16.gmra.mrb[16].mxu0 %v6937_v28  ;;  %7843 = vmatmul.mubr.bf16.gmra.mrb[16].mxu1 %v6937_v28  ;;  %v15961_v28 = vld [vmem:[%s21221_s1 + $0x1884] ss:$16 sps:$4 sm:$0xff]  }
 0x2e8   : > { %7704 = vmatpush1.bf16.msra.mxu0 %v15885_v56  ;;  %7870 = vmatpush1.bf16.msra.mxu1 %v15888_v27  ;;  %v16632_v56 = vld [vmem:[%s16872_s12 + $0x78] ss:$16 sps:$4 sm:$0xff]  }
 0x2e9   : > { %7705 = vmatprep.subr.bf16.mxu0 %v15893_v29  ;;  %7871 = vmatprep.subr.bf16.mxu1 %v15896_v32  ;;  %v6924_v27 = vrot.slane %v16632_v56, 2  ;;  %v15964_v29 = vld [vmem:[%s21221_s1 + $0x188c] ss:$16 sps:$4 sm:$0xff]  }
 0x2ea   : > { %7719 = vmatprep.mubr.bf16.mxu0 %v6911_v49  ;;  %7885 = vmatprep.mubr.bf16.mxu1 %v6911_v49  ;;  %v16633_v32 = vld [vmem:[%s16872_s12 + $0x9c] ss:$16 sps:$4 sm:$0xff]  }
 0x2eb   : > { %v6934_v49 = vrot.slane %v16633_v32, 2  ;;  %v19751_v32 = vld [vmem:[%s16872_s12 + $0x64] ss:$16 sps:$4 sm:$0xff]  }
 0x2ec   : > { %7706 = vmatpush1.bf16.msra.mxu0 %v15891_v30  ;;  %7872 = vmatpush1.bf16.msra.mxu1 %v15894_v33  ;;  %v15959_v30 = vld [vmem:[%s21221_s1 + $0x1880] ss:$16 sps:$4 sm:$0xff]   ;;  %v15962_v33 = vld [vmem:[%s21221_s1 + $0x1888] ss:$16 sps:$4 sm:$0xff]  }
 0x2ed   : > { %7707 = vmatprep.subr.bf16.mxu0 %v15899_v35  ;;  %7873 = vmatprep.subr.bf16.mxu1 %v15902_v38  ;;  %v6925_v35 = vsel %vm6899_vm3, %v6916_v42, %v6924_v27  ;;  %v15967_v38 = vld [vmem:[%s21221_s1 + $0x18a4] ss:$16 sps:$4 sm:$0xff]   ;;  %v16004_v42 = vld [vmem:[%s21221_s1 + $0x1968] ss:$16 sps:$4 sm:$0xff]  }
 0x2f0   : > { %7708 = vmatpush1.bf16.msra.mxu0 %v15897_v34  ;;  %7874 = vmatpush1.bf16.msra.mxu1 %v15900_v36  ;;  %v15970_v34 = vld [vmem:[%s21221_s1 + $0x18ac] ss:$16 sps:$4 sm:$0xff]   ;;  %v6935_v36 = vsel %vm6899_vm3, %v6926_v17, %v6934_v49  ;;  %v16010_v17 = vld [vmem:[%s21221_s1 + $0x1988] ss:$16 sps:$4 sm:$0xff]  }
 0x2f1   : > { %7709 = vmatprep.subr.bf16.mxu0 %v15905_v41  ;;  %7875 = vmatprep.subr.bf16.mxu1 %v15908_v57  ;;  %v15965_v41 = vld [vmem:[%s21221_s1 + $0x18a0] ss:$16 sps:$4 sm:$0xff]   ;;  %v15968_v57 = vld [vmem:[%s21221_s1 + $0x18a8] ss:$16 sps:$4 sm:$0xff]  }
 0x2f4   : > { %7710 = vmatpush1.bf16.msra.mxu0 %v15903_v62  ;;  %7876 = vmatpush1.bf16.msra.mxu1 %v15906_v39  ;;  %v16634_v62 = vld [vmem:[%s16872_s12 + $0x98] ss:$16 sps:$4 sm:$0xff]  }
 0x2f5   : > { %7711 = vmatprep.subr.bf16.mxu0 %v15911_v60  ;;  %7877 = vmatprep.subr.bf16.mxu1 %v15914_v43  ;;  %v6932_v39 = vrot.slane %v16634_v62, 2  ;;  %v15973_v60 = vld [vmem:[%s21221_s1 + $0x18c4] ss:$16 sps:$4 sm:$0xff]   ;;  %v15976_v43 = vld [vmem:[%s21221_s1 + $0x18cc] ss:$16 sps:$4 sm:$0xff]  }
 0x2f8   : > { %7712 = vmatpush1.bf16.msra.mxu0 %v15909_v40  ;;  %7878 = vmatpush1.bf16.msra.mxu1 %v15912_v31  ;;  %v15971_v40 = vld [vmem:[%s21221_s1 + $0x18c0] ss:$16 sps:$4 sm:$0xff]   ;;  %v6942_v31 = vrot.slane %v19112_v1, 2  ;;  %v15982_v1 = vld [vmem:[%s21221_s1 + $0x18ec] ss:$16 sps:$4 sm:$0xff]  }
 0x2f9   : > { %7713 = vmatprep.subr.bf16.mxu0 %v15917_v21  ;;  %7879 = vmatprep.subr.bf16.mxu1 %v15920_v45  ;;  %v15974_v21 = vld [vmem:[%s21221_s1 + $0x18c8] ss:$16 sps:$4 sm:$0xff]   ;;  %v6933_v45 = vsel %vm6899_vm3, %v6924_v27, %v6932_v39  ;;  %v19742_v27 = vld [vmem:[%s16872_s12 + $0x40] ss:$16 sps:$4 sm:$0xff]  }
 0x2fc   : > { %7714 = vmatpush1.bf16.msra.mxu0 %v15915_v47  ;;  %7880 = vmatpush1.bf16.msra.mxu1 %v15918_v48  ;;  %v19621_v47 = vld [vmem:[%s16872_s12 + $0x20] sm:$0xcc]  ;;  %v19624_v48 = vld [vmem:[%s16872_s12 + $0x30] sm:$0xff] }
 0x2fd   : > { %7715 = vmatprep.subr.bf16.mxu0 %v15923_v51  ;;  %7881 = vmatprep.subr.bf16.mxu1 %v15926_v52  ;;  %v15979_v51 = vld [vmem:[%s21221_s1 + $0x18e4] ss:$16 sps:$4 sm:$0xff]   ;;  %v6943_v52 = vsel %vm6899_vm3, %v6934_v49, %v6942_v31  ;;  %v19739_v56 = vcombine.low %v19621_v47, %v19624_v48  ;;  %v16025_v49 = vld [vmem:[%s21221_s1 + $0x19e0] ss:$16 sps:$4 sm:$0xff]  }
 0x2fe   : > { %v19788_v31 = vld [vmem:[%s16872_s12 + $0x84] ss:$16 sps:$4 sm:$0xff]  }
 0x300   : > { %7716 = vmatpush1.bf16.msra.mxu0 %v15921_v4  ;;  %7882 = vmatpush1.bf16.msra.mxu1 %v15924_v53  ;;  %v19635_v4 = vcombine.high %v19621_v47, %v19624_v48  ;;  %v19638_v53 = vld [vmem:[%s16872_s12 + $0x44] ss:$16 sps:$4 sm:$0xff]  }
 0x301   : > { %7717 = vmatprep.subr.bf16.mxu0 %v15929_v54  ;;  %7883 = vmatprep.subr.bf16.mxu1 %v15932_v8  ;;  %v15980_v54 = vld [vmem:[%s21221_s1 + $0x18e8] ss:$16 sps:$4 sm:$0xff]   ;;  %v6940_v8 = vrot.slane %v19133_v18, 2  ;;  %v8220_v44 = vrot.slane %v19638_v53, 2  ;;  %v15983_v18 = vld [vmem:[%s21221_s1 + $0x1900] ss:$16 sps:$4 sm:$0xff]  }
 0x302   : > { %v8219_v61 = vrot.slane %v19635_v4, 2  ;;  %v16050_v48 = vld [vmem:[%s21221_s1 + $0x1a44] ss:$16 sps:$4 sm:$0xff]  }
 0x304   : > { %7718 = vmatpush1.bf16.msra.mxu0 %v15927_v6  ;;  %7884 = vmatpush1.bf16.msra.mxu1 %v15930_v59  ;;  %v15985_v6 = vld [vmem:[%s21221_s1 + $0x1904] ss:$16 sps:$4 sm:$0xff]   ;;  %v15988_v59 = vld [vmem:[%s21221_s1 + $0x190c] ss:$16 sps:$4 sm:$0xff]   ;;  %v8221_v58 = vsel %vm6899_vm3, %v8219_v61, %v8220_v44 }
 0x305   : > { %8920 = vmatprep.subr.bf16.mxu0 %v15937_v0  ;;  %9086 = vmatprep.subr.bf16.mxu1 %v15940_v2  ;;  %v6941_v0 = vsel %vm6899_vm3, %v6932_v39, %v6940_v8  ;;  %v15991_v2 = vld [vmem:[%s21221_s1 + $0x1924] ss:$16 sps:$4 sm:$0xff]   ;;  %v19776_v39 = vld [vmem:[%s16872_s12 + $0x60] ss:$16 sps:$4 sm:$0xff]  }
 0x306   : > { %v8228_v47 = vrot.slane %v19776_v39, 2  ;;  %v19812_v8 = vld [vmem:[%s16872_s12 + $0x80] ss:$16 sps:$4 sm:$0xff]  }
 0x307   : > { %7720 = vmatmul.mubr.bf16.vlgmr.msra.gmra.mrb[0].mxu0 %v6908_v5  ;;  %7886 = vmatmul.mubr.bf16.vlgmr.msra.gmra.mrb[0].mxu1 %v6908_v5  ;;  %v15997_v5 = vld [vmem:[%s21221_s1 + $0x1944] ss:$16 sps:$4 sm:$0xff]  }
 0x308   : > { %8921 = vmatpush1.bf16.msra.mxu0 %v15935_v13  ;;  %9087 = vmatpush1.bf16.msra.mxu1 %v15938_v50  ;;  %v15989_v13 = vld [vmem:[%s21221_s1 + $0x1920] ss:$16 sps:$4 sm:$0xff]   ;;  %v15992_v50 = vld [vmem:[%s21221_s1 + $0x1928] ss:$16 sps:$4 sm:$0xff]  }
 0x309   : > { %8922 = vmatprep.subr.bf16.mxu0 %v15943_v7  ;;  %9088 = vmatprep.subr.bf16.mxu1 %v15946_v9  ;;  %v16000_v7 = vld [vmem:[%s21221_s1 + $0x194c] ss:$16 sps:$4 sm:$0xff]   ;;  %v15995_v9 = vld [vmem:[%s21221_s1 + $0x1940] ss:$16 sps:$4 sm:$0xff]  }
 0x30a   : > { %7729 = vmatprep.mubr.bf16.mxu0 %v6919_v22  ;;  %7895 = vmatprep.mubr.bf16.mxu1 %v6919_v22  ;;  %v15998_v22 = vld [vmem:[%s21221_s1 + $0x1948] ss:$16 sps:$4 sm:$0xff]  }
 0x30c   : > { %8923 = vmatpush1.bf16.msra.mxu0 %v15941_v10  ;;  %9089 = vmatpush1.bf16.msra.mxu1 %v15944_v55  ;;  %v16003_v10 = vld [vmem:[%s21221_s1 + $0x1964] ss:$16 sps:$4 sm:$0xff]   ;;  %v16006_v55 = vld [vmem:[%s21221_s1 + $0x196c] ss:$16 sps:$4 sm:$0xff]  }
 0x30d   : > { %8924 = vmatprep.subr.bf16.mxu0 %v15949_v11  ;;  %9090 = vmatprep.subr.bf16.mxu1 %v15952_v15  ;;  %v16009_v11 = vld [vmem:[%s21221_s1 + $0x1984] ss:$16 sps:$4 sm:$0xff]   ;;  %v16012_v15 = vld [vmem:[%s21221_s1 + $0x198c] ss:$16 sps:$4 sm:$0xff]  }
 0x30f   : > { %7730 = vmatmul.mubr.bf16.gmra.mrb[4].mxu0 %v6917_v46  ;;  %7896 = vmatmul.mubr.bf16.gmra.mrb[4].mxu1 %v6917_v46  ;;  %v16013_v46 = vld [vmem:[%s21221_s1 + $0x19a0] ss:$16 sps:$4 sm:$0xff]  }
 0x310   : > { %8925 = vmatpush1.bf16.msra.mxu0 %v15947_v19  ;;  %9091 = vmatpush1.bf16.msra.mxu1 %v15950_v20  ;;  %v16015_v19 = vld [vmem:[%s21221_s1 + $0x19a4] ss:$16 sps:$4 sm:$0xff]   ;;  %v16018_v20 = vld [vmem:[%s21221_s1 + $0x19ac] ss:$16 sps:$4 sm:$0xff]  }
 0x311   : > { %8926 = vmatprep.subr.bf16.mxu0 %v15955_v23  ;;  %9092 = vmatprep.subr.bf16.mxu1 %v15958_v24  ;;  %v16016_v23 = vld [vmem:[%s21221_s1 + $0x19a8] ss:$16 sps:$4 sm:$0xff]   ;;  %v16021_v24 = vld [vmem:[%s21221_s1 + $0x19c4] ss:$16 sps:$4 sm:$0xff]  }
 0x312   : > { %7739 = vmatprep.mubr.bf16.mxu0 %v6927_v26  ;;  %7905 = vmatprep.mubr.bf16.mxu1 %v6927_v26  ;;  %v16024_v26 = vld [vmem:[%s21221_s1 + $0x19cc] ss:$16 sps:$4 sm:$0xff]  }
 0x314   : > { %8927 = vmatpush1.bf16.msra.mxu0 %v15953_v12  ;;  %9093 = vmatpush1.bf16.msra.mxu1 %v15956_v25  ;;  %v16019_v12 = vld [vmem:[%s21221_s1 + $0x19c0] ss:$16 sps:$4 sm:$0xff]   ;;  %v16022_v25 = vld [vmem:[%s21221_s1 + $0x19c8] ss:$16 sps:$4 sm:$0xff]  }
 0x315   : > { %8928 = vmatprep.subr.bf16.mxu0 %v15961_v28  ;;  %9094 = vmatprep.subr.bf16.mxu1 %v15964_v29  ;;  %v16027_v28 = vld [vmem:[%s21221_s1 + $0x19e4] ss:$16 sps:$4 sm:$0xff]   ;;  %v16030_v29 = vld [vmem:[%s21221_s1 + $0x19ec] ss:$16 sps:$4 sm:$0xff]  }
 0x317   : > { %7740 = vmatmul.mubr.bf16.gmra.mrb[8].mxu0 %v6925_v35  ;;  %7906 = vmatmul.mubr.bf16.gmra.mrb[8].mxu1 %v6925_v35  ;;  %v8217_v35 = vrot.slane %v19742_v27, 2 }
 0x318   : > { %8929 = vmatpush1.bf16.msra.mxu0 %v15959_v30  ;;  %9095 = vmatpush1.bf16.msra.mxu1 %v15962_v33  ;;  %v16028_v30 = vld [vmem:[%s21221_s1 + $0x19e8] ss:$16 sps:$4 sm:$0xff]   ;;  %v8216_v33 = vrot.slane %v19739_v56, 2 }
 0x319   : > { %8930 = vmatprep.subr.bf16.mxu0 %v15967_v38  ;;  %9096 = vmatprep.subr.bf16.mxu1 %v15970_v34  ;;  %v16038_v38 = vld [vmem:[%s21221_s1 + $0x1a04] ss:$16 sps:$4 sm:$0xff]   ;;  %v16041_v34 = vld [vmem:[%s21221_s1 + $0x1a0c] ss:$16 sps:$4 sm:$0xff]  }
 0x31a   : > { %7749 = vmatprep.mubr.bf16.mxu0 %v6935_v36  ;;  %7915 = vmatprep.mubr.bf16.mxu1 %v6935_v36  ;;  %v8230_v36 = vrot.slane %v19751_v32, 2  ;;  %v8218_v62 = vsel %vm6899_vm3, %v8216_v33, %v8217_v35  ;;  %v16078_v33 = vld [vmem:[%s21221_s1 + $0x1ae0] ss:$16 sps:$4 sm:$0xff]  }
 0x31c   : > { %8931 = vmatpush1.bf16.msra.mxu0 %v15965_v41  ;;  %9097 = vmatpush1.bf16.msra.mxu1 %v15968_v57  ;;  %v16036_v41 = vld [vmem:[%s21221_s1 + $0x1a00] ss:$16 sps:$4 sm:$0xff]   ;;  %v16039_v57 = vld [vmem:[%s21221_s1 + $0x1a08] ss:$16 sps:$4 sm:$0xff]  }
 0x31d   : > { %8932 = vmatprep.subr.bf16.mxu0 %v15973_v60  ;;  %9098 = vmatprep.subr.bf16.mxu1 %v15976_v43  ;;  %v16044_v60 = vld [vmem:[%s21221_s1 + $0x1a24] ss:$16 sps:$4 sm:$0xff]   ;;  %v16047_v43 = vld [vmem:[%s21221_s1 + $0x1a2c] ss:$16 sps:$4 sm:$0xff]  }
 0x31f   : > { %7750 = vmatmul.mubr.bf16.gmra.mrb[12].mxu0 %v6933_v45  ;;  %7916 = vmatmul.mubr.bf16.gmra.mrb[12].mxu1 %v6933_v45  ;;  %v16045_v45 = vld [vmem:[%s21221_s1 + $0x1a28] ss:$16 sps:$4 sm:$0xff]  }
 0x320   : > { %8933 = vmatpush1.bf16.msra.mxu0 %v15971_v40  ;;  %9099 = vmatpush1.bf16.msra.mxu1 %v15974_v21  ;;  %v8231_v40 = vsel %vm6899_vm3, %v8220_v44, %v8230_v36  ;;  %v16042_v21 = vld [vmem:[%s21221_s1 + $0x1a20] ss:$16 sps:$4 sm:$0xff]   ;;  %v19822_v44 = vld [vmem:[%s16872_s12 + $0xa4] ss:$16 sps:$4 sm:$0xff]  }
 0x321   : > { %8934 = vmatprep.subr.bf16.mxu0 %v15979_v51  ;;  %9100 = vmatprep.subr.bf16.mxu1 %v15982_v1  ;;  %v16053_v51 = vld [vmem:[%s21221_s1 + $0x1a4c] ss:$16 sps:$4 sm:$0xff]   ;;  %v8238_v1 = vrot.slane %v19788_v31, 2 }
 0x322   : > { %7759 = vmatprep.mubr.bf16.mxu0 %v6943_v52  ;;  %7925 = vmatprep.mubr.bf16.mxu1 %v6943_v52  ;;  %v16048_v52 = vld [vmem:[%s21221_s1 + $0x1a40] ss:$16 sps:$4 sm:$0xff]  }
 0x323   : > { %v8239_v61 = vsel %vm6899_vm3, %v8230_v36, %v8238_v1  ;;  %v16091_v36 = vld [vmem:[%s21221_s1 + $0x1b0c] ss:$16 sps:$4 sm:$0xff]  }
 0x324   : > { %8935 = vmatpush1.bf16.msra.mxu0 %v15977_v37  ;;  %9101 = vmatpush1.bf16.msra.mxu1 %v15980_v54  ;;  %v16051_v37 = vld [vmem:[%s21221_s1 + $0x1a48] ss:$16 sps:$4 sm:$0xff]   ;;  %v8229_v54 = vsel %vm6899_vm3, %v8217_v35, %v8228_v47 }
 0x325   : > { %8936 = vmatprep.subr.bf16.mxu0 %v15985_v6  ;;  %9102 = vmatprep.subr.bf16.mxu1 %v15988_v59  ;;  %v16056_v6 = vld [vmem:[%s21221_s1 + $0x1a64] ss:$16 sps:$4 sm:$0xff]   ;;  %v16059_v59 = vld [vmem:[%s21221_s1 + $0x1a6c] ss:$16 sps:$4 sm:$0xff]   ;;  %v16081_v35 = vld [vmem:[%s21221_s1 + $0x1ae8] ss:$16 sps:$4 sm:$0xff]  }
 0x327   : > { %7760 = vmatmul.mubr.bf16.gmra.mrb[16].mxu0 %v6941_v0  ;;  %7926 = vmatmul.mubr.bf16.gmra.mrb[16].mxu1 %v6941_v0  ;;  %v8236_v0 = vrot.slane %v19812_v8, 2 }
 0x328   : > { %8937 = vmatpush1.bf16.msra.mxu0 %v15983_v18  ;;  %9103 = vmatpush1.bf16.msra.mxu1 %v15986_v63  ;;  %v16054_v18 = vld [vmem:[%s21221_s1 + $0x1a60] ss:$16 sps:$4 sm:$0xff]   ;;  %v16057_v63 = vld [vmem:[%s21221_s1 + $0x1a68] ss:$16 sps:$4 sm:$0xff]  }
 0x329   : > { %8938 = vmatprep.subr.bf16.mxu0 %v15991_v2  ;;  %9104 = vmatprep.subr.bf16.mxu1 %v15994_v3  ;;  %v16062_v2 = vld [vmem:[%s21221_s1 + $0x1a84] ss:$16 sps:$4 sm:$0xff]   ;;  %v16065_v3 = vld [vmem:[%s21221_s1 + $0x1a8c] ss:$16 sps:$4 sm:$0xff]  }
 0x32a   : > { %8952 = vmatprep.mubr.bf16.mxu0 %v8221_v58  ;;  %9118 = vmatprep.mubr.bf16.mxu1 %v8221_v58  ;;  %v16060_v58 = vld [vmem:[%s21221_s1 + $0x1a80] ss:$16 sps:$4 sm:$0xff]  }
 0x32c   : > { %8939 = vmatpush1.bf16.msra.mxu0 %v15989_v13  ;;  %9105 = vmatpush1.bf16.msra.mxu1 %v15992_v50  ;;  %v8246_v13 = vrot.slane %v19822_v44, 2  ;;  %v16063_v50 = vld [vmem:[%s21221_s1 + $0x1a88] ss:$16 sps:$4 sm:$0xff]  }
 0x32d   : > { %8940 = vmatprep.subr.bf16.mxu0 %v15997_v5  ;;  %9106 = vmatprep.subr.bf16.mxu1 %v16000_v7  ;;  %v8237_v5 = vsel %vm6899_vm3, %v8228_v47, %v8236_v0  ;;  %v19846_v7 = vld [vmem:[%s16872_s12 + $0xa0] ss:$16 sps:$4 sm:$0xff]  }
 0x32e   : > { %v16093_v47 = vld [vmem:[%s21221_s1 + $0x1b20] ss:$16 sps:$4 sm:$0xff]  }
 0x330   : > { %8941 = vmatpush1.bf16.msra.mxu0 %v15995_v9  ;;  %9107 = vmatpush1.bf16.msra.mxu1 %v15998_v22  ;;  %v7996_v9 = vld [vmem:[%s16872_s12 + $0xc0] sm:$0x33] }
 0x331   : > { %8942 = vmatprep.subr.bf16.mxu0 %v16003_v10  ;;  %9108 = vmatprep.subr.bf16.mxu1 %v16006_v55  ;;  %v16068_v22 = vld [vmem:[%s21221_s1 + $0x1aa4] ss:$16 sps:$4 sm:$0xff]   ;;  %v16071_v10 = vld [vmem:[%s21221_s1 + $0x1aac] ss:$16 sps:$4 sm:$0xff]   ;;  %v8247_v55 = vsel %vm6899_vm3, %v8238_v1, %v8246_v13 }
 0x332   : > { %v16106_v1 = vld [vmem:[%s21221_s1 + $0x1b4c] ss:$16 sps:$4 sm:$0xff]  }
 0x334   : > { %8943 = vmatpush1.bf16.msra.mxu0 %v16001_v14  ;;  %9109 = vmatpush1.bf16.msra.mxu1 %v16004_v42  ;;  %v13478_v14 = vcombine.high %v7996_v9, %v7996_v9  ;;  %v16066_v42 = vld [vmem:[%s21221_s1 + $0x1aa0] ss:$16 sps:$4 sm:$0xff]  }
 0x335   : > { %8944 = vmatprep.subr.bf16.mxu0 %v16009_v11  ;;  %9110 = vmatprep.subr.bf16.mxu1 %v16012_v15  ;;  %v16069_v11 = vld [vmem:[%s21221_s1 + $0x1aa8] ss:$16 sps:$4 sm:$0xff]   ;;  %v8244_v15 = vrot.slane %v19846_v7, 2 }
 0x338   : > { %8945 = vmatpush1.bf16.msra.mxu0 %v16007_v16  ;;  %9111 = vmatpush1.bf16.msra.mxu1 %v16010_v17  ;;  %v16074_v16 = vld [vmem:[%s21221_s1 + $0x1ac4] ss:$16 sps:$4 sm:$0xff]   ;;  %v16077_v17 = vld [vmem:[%s21221_s1 + $0x1acc] ss:$16 sps:$4 sm:$0xff]  }
 0x339   : > { %8946 = vmatprep.subr.bf16.mxu0 %v16015_v19  ;;  %9112 = vmatprep.subr.bf16.mxu1 %v16018_v20  ;;  %v16072_v19 = vld [vmem:[%s21221_s1 + $0x1ac0] ss:$16 sps:$4 sm:$0xff]   ;;  %v8254_v20 = vrot.slane %v13478_v14, 2  ;;  %v19997_v14 = vld [vmem:[%s16872_s12 + $0x48] ss:$16 sps:$4 sm:$0xff]  }
 0x33c   : > { %8947 = vmatpush1.bf16.msra.mxu0 %v16013_v46  ;;  %9113 = vmatpush1.bf16.msra.mxu1 %v16016_v23  ;;  %v16075_v46 = vld [vmem:[%s21221_s1 + $0x1ac8] ss:$16 sps:$4 sm:$0xff]   ;;  %v8245_v23 = vsel %vm6899_vm3, %v8236_v0, %v8244_v15  ;;  %v16116_v0 = vld [vmem:[%s21221_s1 + $0x1b80] ss:$16 sps:$4 sm:$0xff]  }
 0x33d   : > { %8948 = vmatprep.subr.bf16.mxu0 %v16021_v24  ;;  %9114 = vmatprep.subr.bf16.mxu1 %v16024_v26  ;;  %v13477_v24 = vcombine.low %v7996_v9, %v7996_v9  ;;  %v19877_v26 = vld [vmem:[%s16872_s12 + $0x28] sm:$0xcc] }
 0x33e   : > { %v16135_v9 = vld [vmem:[%s21221_s1 + $0x1bcc] ss:$16 sps:$4 sm:$0xff]  }
 0x340   : > { %8949 = vmatpush1.bf16.msra.mxu0 %v16019_v12  ;;  %9115 = vmatpush1.bf16.msra.mxu1 %v16022_v25  ;;  %v19880_v12 = vld [vmem:[%s16872_s12 + $0x38] sm:$0xff]  ;;  %v16080_v25 = vld [vmem:[%s21221_s1 + $0x1ae4] ss:$16 sps:$4 sm:$0xff]  }
 0x341   : > { %8950 = vmatprep.subr.bf16.mxu0 %v16027_v28  ;;  %9116 = vmatprep.subr.bf16.mxu1 %v16030_v29  ;;  %v16083_v28 = vld [vmem:[%s21221_s1 + $0x1aec] ss:$16 sps:$4 sm:$0xff]   ;;  %v8255_v29 = vsel %vm6899_vm3, %v8246_v13, %v8254_v20  ;;  %v16123_v13 = vld [vmem:[%s21221_s1 + $0x1ba0] ss:$16 sps:$4 sm:$0xff]   ;;  %v8223_v20 = vrot.slane %v19997_v14, 2 }
 0x344   : > { %8951 = vmatpush1.bf16.msra.mxu0 %v16025_v49  ;;  %9117 = vmatpush1.bf16.msra.mxu1 %v16028_v30  ;;  %v19891_v49 = vcombine.high %v19877_v26, %v19880_v12  ;;  %v19894_v30 = vld [vmem:[%s16872_s12 + $0x4c] ss:$16 sps:$4 sm:$0xff]  }
 0x345   : > { %9003 = vmatprep.subr.bf16.mxu0 %v16038_v38  ;;  %9169 = vmatprep.subr.bf16.mxu1 %v16041_v34  ;;  %v8252_v38 = vrot.slane %v13477_v24, 2  ;;  %v16088_v34 = vld [vmem:[%s21221_s1 + $0x1b04] ss:$16 sps:$4 sm:$0xff]  }
 0x347   : > { %8953 = vmatmul.mubr.bf16.vlgmr.msra.gmra.mrb[0].mxu0 %v8218_v62  ;;  %9119 = vmatmul.mubr.bf16.vlgmr.msra.gmra.mrb[0].mxu1 %v8218_v62  ;;  %v16086_v62 = vld [vmem:[%s21221_s1 + $0x1b00] ss:$16 sps:$4 sm:$0xff]  }
 0x348   : > { %9004 = vmatpush1.bf16.msra.mxu0 %v16036_v41  ;;  %9170 = vmatpush1.bf16.msra.mxu1 %v16039_v57  ;;  %v8225_v41 = vrot.slane %v19891_v49, 2  ;;  %v8226_v57 = vrot.slane %v19894_v30, 2 }
 0x349   : > { %9005 = vmatprep.subr.bf16.mxu0 %v16044_v60  ;;  %9171 = vmatprep.subr.bf16.mxu1 %v16047_v43  ;;  %v16089_v60 = vld [vmem:[%s21221_s1 + $0x1b08] ss:$16 sps:$4 sm:$0xff]   ;;  %v8253_v43 = vsel %vm6899_vm3, %v8244_v15, %v8252_v38  ;;  %v20006_v15 = vld [vmem:[%s16872_s12 + $0x6c] ss:$16 sps:$4 sm:$0xff]  }
 0x34a   : > { %8962 = vmatprep.mubr.bf16.mxu0 %v8231_v40  ;;  %9128 = vmatprep.mubr.bf16.mxu1 %v8231_v40  ;;  %v16095_v40 = vld [vmem:[%s21221_s1 + $0x1b24] ss:$16 sps:$4 sm:$0xff]   ;;  %v8234_v24 = vrot.slane %v20006_v15, 2  ;;  %v20043_v38 = vld [vmem:[%s16872_s12 + $0x8c] ss:$16 sps:$4 sm:$0xff]  }
 0x34c   : > { %9006 = vmatpush1.bf16.msra.mxu0 %v16042_v21  ;;  %9172 = vmatpush1.bf16.msra.mxu1 %v16045_v45  ;;  %v16098_v21 = vld [vmem:[%s21221_s1 + $0x1b2c] ss:$16 sps:$4 sm:$0xff]   ;;  %v8227_v45 = vsel %vm6899_vm3, %v8225_v41, %v8226_v57 }
 0x34d   : > { %9007 = vmatprep.subr.bf16.mxu0 %v16050_v48  ;;  %9173 = vmatprep.subr.bf16.mxu1 %v16053_v51  ;;  %v16096_v48 = vld [vmem:[%s21221_s1 + $0x1b28] ss:$16 sps:$4 sm:$0xff]   ;;  %v16103_v51 = vld [vmem:[%s21221_s1 + $0x1b44] ss:$16 sps:$4 sm:$0xff]  }
 0x34f   : > { %8963 = vmatmul.mubr.bf16.gmra.mrb[4].mxu0 %v8229_v54  ;;  %9129 = vmatmul.mubr.bf16.gmra.mrb[4].mxu1 %v8229_v54  ;;  %v16110_v54 = vld [vmem:[%s21221_s1 + $0x1b64] ss:$16 sps:$4 sm:$0xff]  }
 0x350   : > { %9008 = vmatpush1.bf16.msra.mxu0 %v16048_v52  ;;  %9174 = vmatpush1.bf16.msra.mxu1 %v16051_v37  ;;  %v16101_v52 = vld [vmem:[%s21221_s1 + $0x1b40] ss:$16 sps:$4 sm:$0xff]   ;;  %v16104_v37 = vld [vmem:[%s21221_s1 + $0x1b48] ss:$16 sps:$4 sm:$0xff]  }
 0x351   : > { %9009 = vmatprep.subr.bf16.mxu0 %v16056_v6  ;;  %9175 = vmatprep.subr.bf16.mxu1 %v16059_v59  ;;  %v16113_v6 = vld [vmem:[%s21221_s1 + $0x1b6c] ss:$16 sps:$4 sm:$0xff]   ;;  %v16108_v59 = vld [vmem:[%s21221_s1 + $0x1b60] ss:$16 sps:$4 sm:$0xff]  }
 0x352   : > { %8972 = vmatprep.mubr.bf16.mxu0 %v8239_v61  ;;  %9138 = vmatprep.mubr.bf16.mxu1 %v8239_v61  ;;  %v16111_v61 = vld [vmem:[%s21221_s1 + $0x1b68] ss:$16 sps:$4 sm:$0xff]  }
 0x354   : > { %9010 = vmatpush1.bf16.msra.mxu0 %v16054_v18  ;;  %9176 = vmatpush1.bf16.msra.mxu1 %v16057_v63  ;;  %v16118_v18 = vld [vmem:[%s21221_s1 + $0x1b84] ss:$16 sps:$4 sm:$0xff]   ;;  %v16121_v63 = vld [vmem:[%s21221_s1 + $0x1b8c] ss:$16 sps:$4 sm:$0xff]  }
 0x355   : > { %9011 = vmatprep.subr.bf16.mxu0 %v16062_v2  ;;  %9177 = vmatprep.subr.bf16.mxu1 %v16065_v3  ;;  %v16119_v2 = vld [vmem:[%s21221_s1 + $0x1b88] ss:$16 sps:$4 sm:$0xff]   ;;  %v16125_v3 = vld [vmem:[%s21221_s1 + $0x1ba4] ss:$16 sps:$4 sm:$0xff]  }
 0x357   : > { %8973 = vmatmul.mubr.bf16.gmra.mrb[8].mxu0 %v8237_v5  ;;  %9139 = vmatmul.mubr.bf16.gmra.mrb[8].mxu1 %v8237_v5  ;;  %v16132_v5 = vld [vmem:[%s21221_s1 + $0x1bc4] ss:$16 sps:$4 sm:$0xff]  }
 0x358   : > { %9012 = vmatpush1.bf16.msra.mxu0 %v16060_v58  ;;  %9178 = vmatpush1.bf16.msra.mxu1 %v16063_v50  ;;  %v16128_v58 = vld [vmem:[%s21221_s1 + $0x1bac] ss:$16 sps:$4 sm:$0xff]   ;;  %v16126_v50 = vld [vmem:[%s21221_s1 + $0x1ba8] ss:$16 sps:$4 sm:$0xff]  }
 0x359   : > { %9013 = vmatprep.subr.bf16.mxu0 %v16068_v22  ;;  %9179 = vmatprep.subr.bf16.mxu1 %v16071_v10  ;;  %v16130_v22 = vld [vmem:[%s21221_s1 + $0x1bc0] ss:$16 sps:$4 sm:$0xff]   ;;  %v16133_v10 = vld [vmem:[%s21221_s1 + $0x1bc8] ss:$16 sps:$4 sm:$0xff]  }
 0x35a   : > { %8982 = vmatprep.mubr.bf16.mxu0 %v8247_v55  ;;  %9148 = vmatprep.mubr.bf16.mxu1 %v8247_v55  ;;  %v19994_v55 = vcombine.low %v19877_v26, %v19880_v12  ;;  %v16148_v26 = vld [vmem:[%s21221_s1 + $0x1c00] ss:$16 sps:$4 sm:$0xff]   ;;  %v16151_v12 = vld [vmem:[%s21221_s1 + $0x1c08] ss:$16 sps:$4 sm:$0xff]  }
 0x35c   : > { %9014 = vmatpush1.bf16.msra.mxu0 %v16066_v42  ;;  %9180 = vmatpush1.bf16.msra.mxu1 %v16069_v11  ;;  %v16139_v42 = vld [vmem:[%s21221_s1 + $0x1be4] ss:$16 sps:$4 sm:$0xff]   ;;  %v16142_v11 = vld [vmem:[%s21221_s1 + $0x1bec] ss:$16 sps:$4 sm:$0xff]  }
 0x35d   : > { %9015 = vmatprep.subr.bf16.mxu0 %v16074_v16  ;;  %9181 = vmatprep.subr.bf16.mxu1 %v16077_v17  ;;  %v16137_v16 = vld [vmem:[%s21221_s1 + $0x1be0] ss:$16 sps:$4 sm:$0xff]   ;;  %v16140_v17 = vld [vmem:[%s21221_s1 + $0x1be8] ss:$16 sps:$4 sm:$0xff]  }
 0x35f   : > { %8983 = vmatmul.mubr.bf16.gmra.mrb[12].mxu0 %v8245_v23  ;;  %9149 = vmatmul.mubr.bf16.gmra.mrb[12].mxu1 %v8245_v23  ;;  %v16153_v23 = vld [vmem:[%s21221_s1 + $0x1c0c] ss:$16 sps:$4 sm:$0xff]  }
 0x360   : > { %9016 = vmatpush1.bf16.msra.mxu0 %v16072_v19  ;;  %9182 = vmatpush1.bf16.msra.mxu1 %v16075_v46  ;;  %v8222_v19 = vrot.slane %v19994_v55, 2  ;;  %v16150_v46 = vld [vmem:[%s21221_s1 + $0x1c04] ss:$16 sps:$4 sm:$0xff]  }
 0x361   : > { %9017 = vmatprep.subr.bf16.mxu0 %v16080_v25  ;;  %9183 = vmatprep.subr.bf16.mxu1 %v16083_v28  ;;  %v20031_v28 = vld [vmem:[%s16872_s12 + $0x68] ss:$16 sps:$4 sm:$0xff]  }
 0x362   : > { %8992 = vmatprep.mubr.bf16.mxu0 %v8255_v29  ;;  %9158 = vmatprep.mubr.bf16.mxu1 %v8255_v29  ;;  %v8224_v25 = vsel %vm6899_vm3, %v8222_v19, %v8223_v20  ;;  %v16156_v29 = vld [vmem:[%s21221_s1 + $0x1c24] ss:$16 sps:$4 sm:$0xff]   ;;  %v8232_v41 = vrot.slane %v20031_v28, 2  ;;  %v9454_v19 = vshll.u32 %v19635_v4, 16 }
 0x364   : > { %9018 = vmatpush1.bf16.msra.mxu0 %v16078_v33  ;;  %9184 = vmatpush1.bf16.msra.mxu1 %v16081_v35  ;;  %v16159_v33 = vld [vmem:[%s21221_s1 + $0x1c2c] ss:$16 sps:$4 sm:$0xff]   ;;  %v8235_v35 = vsel %vm6899_vm3, %v8226_v57, %v8234_v24  ;;  %v16162_v57 = vld [vmem:[%s21221_s1 + $0x1c44] ss:$16 sps:$4 sm:$0xff]  }
 0x365   : > { %9019 = vmatprep.subr.bf16.mxu0 %v16088_v34  ;;  %9185 = vmatprep.subr.bf16.mxu1 %v16091_v36  ;;  %v16154_v34 = vld [vmem:[%s21221_s1 + $0x1c20] ss:$16 sps:$4 sm:$0xff]   ;;  %v16157_v36 = vld [vmem:[%s21221_s1 + $0x1c28] ss:$16 sps:$4 sm:$0xff]  }
 0x367   : > { %8993 = vmatmul.mubr.bf16.gmra.mrb[16].mxu0 %v8253_v43  ;;  %9159 = vmatmul.mubr.bf16.gmra.mrb[16].mxu1 %v8253_v43  ;;  %v16160_v43 = vld [vmem:[%s21221_s1 + $0x1c40] ss:$16 sps:$4 sm:$0xff]  }
 0x368   : > { %9020 = vmatpush1.bf16.msra.mxu0 %v16086_v62  ;;  %9186 = vmatpush1.bf16.msra.mxu1 %v16089_v60  ;;  %v16165_v62 = vld [vmem:[%s21221_s1 + $0x1c4c] ss:$16 sps:$4 sm:$0xff]   ;;  %v8242_v60 = vrot.slane %v20043_v38, 2 }
 0x369   : > { %9021 = vmatprep.subr.bf16.mxu0 %v16095_v40  ;;  %9187 = vmatprep.subr.bf16.mxu1 %v16098_v21  ;;  %v16163_v40 = vld [vmem:[%s21221_s1 + $0x1c48] ss:$16 sps:$4 sm:$0xff]   ;;  %v8233_v21 = vsel %vm6899_vm3, %v8223_v20, %v8232_v41  ;;  %v9459_v20 = vshrl.u32 %v19638_v53, 16 }
 0x36a   : > { %9035 = vmatprep.mubr.bf16.mxu0 %v8227_v45  ;;  %9201 = vmatprep.mubr.bf16.mxu1 %v8227_v45  ;;  %v20067_v45 = vld [vmem:[%s16872_s12 + $0x88] ss:$16 sps:$4 sm:$0xff]  }
 0x36c   : > { %9022 = vmatpush1.bf16.msra.mxu0 %v16093_v47  ;;  %9188 = vmatpush1.bf16.msra.mxu1 %v16096_v48  ;;  %v16168_v47 = vld [vmem:[%s21221_s1 + $0x1c64] ss:$16 sps:$4 sm:$0xff]   ;;  %v16171_v48 = vld [vmem:[%s21221_s1 + $0x1c6c] ss:$16 sps:$4 sm:$0xff]  }
 0x36d   : > { %9023 = vmatprep.subr.bf16.mxu0 %v16103_v51  ;;  %9189 = vmatprep.subr.bf16.mxu1 %v16106_v1  ;;  %v8243_v51 = vsel %vm6899_vm3, %v8234_v24, %v8242_v60  ;;  %v20077_v1 = vld [vmem:[%s16872_s12 + $0xac] ss:$16 sps:$4 sm:$0xff]   ;;  %v16187_v24 = vld [vmem:[%s21221_s1 + $0x1cc8] ss:$16 sps:$4 sm:$0xff]  }
 0x370   : > { %9024 = vmatpush1.bf16.msra.mxu0 %v16101_v52  ;;  %9190 = vmatpush1.bf16.msra.mxu1 %v16104_v37  ;;  %v16166_v52 = vld [vmem:[%s21221_s1 + $0x1c60] ss:$16 sps:$4 sm:$0xff]   ;;  %v16169_v37 = vld [vmem:[%s21221_s1 + $0x1c68] ss:$16 sps:$4 sm:$0xff]  }
 0x371   : > { %9025 = vmatprep.subr.bf16.mxu0 %v16110_v54  ;;  %9191 = vmatprep.subr.bf16.mxu1 %v16113_v6  ;;  %v8240_v54 = vrot.slane %v20067_v45, 2  ;;  %v16174_v6 = vld [vmem:[%s21221_s1 + $0x1c84] ss:$16 sps:$4 sm:$0xff]  }
 0x374   : > { %9026 = vmatpush1.bf16.msra.mxu0 %v16108_v59  ;;  %9192 = vmatpush1.bf16.msra.mxu1 %v16111_v61  ;;  %v16177_v59 = vld [vmem:[%s21221_s1 + $0x1c8c] ss:$16 sps:$4 sm:$0xff]   ;;  %v8250_v61 = vrot.slane %v20077_v1, 2 }
 0x375   : > { %9027 = vmatprep.subr.bf16.mxu0 %v16118_v18  ;;  %9193 = vmatprep.subr.bf16.mxu1 %v16121_v63  ;;  %v7997_v18 = vld [vmem:[%s16872_s12 + $0xc8] sm:$0x33]  ;;  %v16172_v63 = vld [vmem:[%s21221_s1 + $0x1c80] ss:$16 sps:$4 sm:$0xff]  }
 0x378   : > { %9028 = vmatpush1.bf16.msra.mxu0 %v16116_v0  ;;  %9194 = vmatpush1.bf16.msra.mxu1 %v16119_v2  ;;  %v16175_v0 = vld [vmem:[%s21221_s1 + $0x1c88] ss:$16 sps:$4 sm:$0xff]   ;;  %v8241_v2 = vsel %vm6899_vm3, %v8232_v41, %v8240_v54 }
 0x379   : > { %9029 = vmatprep.subr.bf16.mxu0 %v16125_v3  ;;  %9195 = vmatprep.subr.bf16.mxu1 %v16128_v58  ;;  %v20102_v3 = vld [vmem:[%s16872_s12 + $0xa8] ss:$16 sps:$4 sm:$0xff]   ;;  %v16180_v58 = vld [vmem:[%s21221_s1 + $0x1ca4] ss:$16 sps:$4 sm:$0xff]  }
 0x37a   : > { %v16193_v41 = vld [vmem:[%s21221_s1 + $0x1ce8] ss:$16 sps:$4 sm:$0xff]  }
 0x37c   : > { %9030 = vmatpush1.bf16.msra.mxu0 %v16123_v13  ;;  %9196 = vmatpush1.bf16.msra.mxu1 %v16126_v50  ;;  %v16183_v13 = vld [vmem:[%s21221_s1 + $0x1cac] ss:$16 sps:$4 sm:$0xff]   ;;  %v13480_v50 = vcombine.high %v7997_v18, %v7997_v18 }
 0x37d   : > { %9031 = vmatprep.subr.bf16.mxu0 %v16132_v5  ;;  %9197 = vmatprep.subr.bf16.mxu1 %v16135_v9  ;;  %v8251_v5 = vsel %vm6899_vm3, %v8242_v60, %v8250_v61  ;;  %v16178_v9 = vld [vmem:[%s21221_s1 + $0x1ca0] ss:$16 sps:$4 sm:$0xff]   ;;  %v16203_v60 = vld [vmem:[%s21221_s1 + $0x1d0c] ss:$16 sps:$4 sm:$0xff]  }
 0x380   : > { %9032 = vmatpush1.bf16.msra.mxu0 %v16130_v22  ;;  %9198 = vmatpush1.bf16.msra.mxu1 %v16133_v10  ;;  %v16181_v22 = vld [vmem:[%s21221_s1 + $0x1ca8] ss:$16 sps:$4 sm:$0xff]   ;;  %v8248_v10 = vrot.slane %v20102_v3, 2 }
 0x381   : > { %9033 = vmatprep.subr.bf16.mxu0 %v16139_v42  ;;  %9199 = vmatprep.subr.bf16.mxu1 %v16142_v11  ;;  %v16186_v42 = vld [vmem:[%s21221_s1 + $0x1cc4] ss:$16 sps:$4 sm:$0xff]   ;;  %v16189_v11 = vld [vmem:[%s21221_s1 + $0x1ccc] ss:$16 sps:$4 sm:$0xff]  }
 0x384   : > { %9034 = vmatpush1.bf16.msra.mxu0 %v16137_v16  ;;  %9200 = vmatpush1.bf16.msra.mxu1 %v16140_v17  ;;  %v8258_v16 = vrot.slane %v13480_v50, 2  ;;  %v9451_v17 = vshrl.u32 %v19635_v4, 16  ;;  %v16192_v4 = vld [vmem:[%s21221_s1 + $0x1ce4] ss:$16 sps:$4 sm:$0xff]  }
 0x385   : > { %10305 = vmatprep.subr.bf16.mxu0 %v16150_v46  ;;  %10471 = vmatprep.subr.bf16.mxu1 %v16153_v23  ;;  %v9462_v46 = vshll.u32 %v19638_v53, 16  ;;  %v16184_v23 = vld [vmem:[%s21221_s1 + $0x1cc0] ss:$16 sps:$4 sm:$0xff]   ;;  %v16195_v53 = vld [vmem:[%s21221_s1 + $0x1cec] ss:$16 sps:$4 sm:$0xff]  }
 0x386   : > { %v16230_v50 = vld [vmem:[%s21221_s1 + $0x1d84] ss:$16 sps:$4 sm:$0xff]  }
 0x387   : > { %9036 = vmatmul.mubr.bf16.vlgmr.msra.gmra.mrb[0].mxu0 %v8224_v25  ;;  %9202 = vmatmul.mubr.bf16.vlgmr.msra.gmra.mrb[0].mxu1 %v8224_v25  ;;  %v8259_v25 = vsel %vm6899_vm3, %v8250_v61, %v8258_v16  ;;  %v16218_v61 = vld [vmem:[%s21221_s1 + $0x1d4c] ss:$16 sps:$4 sm:$0xff]   ;;  %v16238_v16 = vld [vmem:[%s21221_s1 + $0x1da8] ss:$16 sps:$4 sm:$0xff]  }
 0x388   : > { %10306 = vmatpush1.bf16.msra.mxu0 %v16148_v26  ;;  %10472 = vmatpush1.bf16.msra.mxu1 %v16151_v12  ;;  %v8249_v26 = vsel %vm6899_vm3, %v8240_v54, %v8248_v10  ;;  %v13479_v12 = vcombine.low %v7997_v18, %v7997_v18  ;;  %v16205_v54 = vld [vmem:[%s21221_s1 + $0x1d20] ss:$16 sps:$4 sm:$0xff]  }
 0x389   : > { %10307 = vmatprep.subr.bf16.mxu0 %v16156_v29  ;;  %10473 = vmatprep.subr.bf16.mxu1 %v16159_v33  ;;  %v9453_v29 = vrot.slane %v9451_v17, 2  ;;  %v9456_v33 = vrot.slane %v9454_v19, 3  ;;  %v16213_v18 = vld [vmem:[%s21221_s1 + $0x1d40] ss:$16 sps:$4 sm:$0xff]   ;;  %v9434_v17 = vshrl.u32 %v19739_v56, 16  ;;  %v9437_v19 = vshll.u32 %v19739_v56, 16 }
 0x38a   : > { %9045 = vmatprep.mubr.bf16.mxu0 %v8235_v35  ;;  %9211 = vmatprep.mubr.bf16.mxu1 %v8235_v35  ;;  %v9461_v35 = vrot.slane %v9459_v20, 2  ;;  %v9442_v20 = vshrl.u32 %v19742_v27, 16  ;;  %v9511_v56 = vshrl.u32 %v19751_v32, 16 }
 0x38c   : > { %10308 = vmatpush1.bf16.msra.mxu0 %v16154_v34  ;;  %10474 = vmatpush1.bf16.msra.mxu1 %v16157_v36  ;;  %v9464_v34 = vrot.slane %v9462_v46, 3  ;;  %v16190_v36 = vld [vmem:[%s21221_s1 + $0x1ce0] ss:$16 sps:$4 sm:$0xff]   ;;  %v9445_v46 = vshll.u32 %v19742_v27, 16  ;;  %v16245_v27 = vld [vmem:[%s21221_s1 + $0x1dc8] ss:$16 sps:$4 sm:$0xff]  }
 0x38d   : > { %10309 = vmatprep.subr.bf16.mxu0 %v16162_v57  ;;  %10475 = vmatprep.subr.bf16.mxu1 %v16165_v62  ;;  %v8256_v57 = vrot.slane %v13479_v12, 2  ;;  %v16200_v62 = vld [vmem:[%s21221_s1 + $0x1d04] ss:$16 sps:$4 sm:$0xff]   ;;  %v9514_v12 = vshll.u32 %v19751_v32, 16  ;;  %v16254_v32 = vld [vmem:[%s21221_s1 + $0x1dec] ss:$16 sps:$4 sm:$0xff]  }
 0x38f   : > { %9046 = vmatmul.mubr.bf16.gmra.mrb[4].mxu0 %v8233_v21  ;;  %9212 = vmatmul.mubr.bf16.gmra.mrb[4].mxu1 %v8233_v21  ;;  %v16198_v21 = vld [vmem:[%s21221_s1 + $0x1d00] ss:$16 sps:$4 sm:$0xff]  }
 0x390   : > { %10310 = vmatpush1.bf16.msra.mxu0 %v16160_v43  ;;  %10476 = vmatpush1.bf16.msra.mxu1 %v16163_v40  ;;  %v9457_v43 = vor.u32 %v9456_v33, %v9453_v29  ;;  %v20154_v40 = vor.u32 %v9464_v34, %v9461_v35  ;;  %v9447_v29 = vrot.slane %v9445_v46, 3  ;;  %v16251_v33 = vld [vmem:[%s21221_s1 + $0x1de4] ss:$16 sps:$4 sm:$0xff]   ;;  %v9513_v35 = vrot.slane %v9511_v56, 2  ;;  %v16278_v46 = vld [vmem:[%s21221_s1 + $0x1e6c] ss:$16 sps:$4 sm:$0xff]  }
 0x391   : > { %10311 = vmatprep.subr.bf16.mxu0 %v16168_v47  ;;  %10477 = vmatprep.subr.bf16.mxu1 %v16171_v48  ;;  %v16201_v47 = vld [vmem:[%s21221_s1 + $0x1d08] ss:$16 sps:$4 sm:$0xff]   ;;  %v8257_v48 = vsel %vm6899_vm3, %v8248_v10, %v8256_v57  ;;  %v16237_v10 = vld [vmem:[%s21221_s1 + $0x1da4] ss:$16 sps:$4 sm:$0xff]   ;;  %v9516_v34 = vrot.slane %v9514_v12, 3 }
 0x392   : > { %9055 = vmatprep.mubr.bf16.mxu0 %v8243_v51  ;;  %9221 = vmatprep.mubr.bf16.mxu1 %v8243_v51  ;;  %v16207_v51 = vld [vmem:[%s21221_s1 + $0x1d24] ss:$16 sps:$4 sm:$0xff]   ;;  %v16273_v12 = vld [vmem:[%s21221_s1 + $0x1e60] ss:$16 sps:$4 sm:$0xff]  }
 0x394   : > { %10312 = vmatpush1.bf16.msra.mxu0 %v16166_v52  ;;  %10478 = vmatpush1.bf16.msra.mxu1 %v16169_v37  ;;  %v16210_v52 = vld [vmem:[%s21221_s1 + $0x1d2c] ss:$16 sps:$4 sm:$0xff]   ;;  %v9466_v37 = vsel %vm9432_vm4, %v9457_v43, %v20154_v40  ;;  %v9505_v43 = vshll.u32 %v19776_v39, 16 }
 0x395   : > { %10313 = vmatprep.subr.bf16.mxu0 %v16174_v6  ;;  %10479 = vmatprep.subr.bf16.mxu1 %v16177_v59  ;;  %v16208_v6 = vld [vmem:[%s21221_s1 + $0x1d28] ss:$16 sps:$4 sm:$0xff]   ;;  %v16215_v59 = vld [vmem:[%s21221_s1 + $0x1d44] ss:$16 sps:$4 sm:$0xff]  }
 0x397   : > { %9056 = vmatmul.mubr.bf16.gmra.mrb[8].mxu0 %v8241_v2  ;;  %9222 = vmatmul.mubr.bf16.gmra.mrb[8].mxu1 %v8241_v2  ;;  %v16225_v2 = vld [vmem:[%s21221_s1 + $0x1d6c] ss:$16 sps:$4 sm:$0xff]  }
 0x398   : > { %10314 = vmatpush1.bf16.msra.mxu0 %v16172_v63  ;;  %10480 = vmatpush1.bf16.msra.mxu1 %v16175_v0  ;;  %v16216_v63 = vld [vmem:[%s21221_s1 + $0x1d48] ss:$16 sps:$4 sm:$0xff]   ;;  %v16222_v0 = vld [vmem:[%s21221_s1 + $0x1d64] ss:$16 sps:$4 sm:$0xff]  }
 0x399   : > { %10315 = vmatprep.subr.bf16.mxu0 %v16180_v58  ;;  %10481 = vmatprep.subr.bf16.mxu1 %v16183_v13  ;;  %v16220_v58 = vld [vmem:[%s21221_s1 + $0x1d60] ss:$16 sps:$4 sm:$0xff]   ;;  %v16223_v13 = vld [vmem:[%s21221_s1 + $0x1d68] ss:$16 sps:$4 sm:$0xff]  }
 0x39a   : > { %9065 = vmatprep.mubr.bf16.mxu0 %v8251_v5  ;;  %9231 = vmatprep.mubr.bf16.mxu1 %v8251_v5  ;;  %v16233_v5 = vld [vmem:[%s21221_s1 + $0x1d8c] ss:$16 sps:$4 sm:$0xff]  }
 0x39c   : > { %10316 = vmatpush1.bf16.msra.mxu0 %v16178_v9  ;;  %10482 = vmatpush1.bf16.msra.mxu1 %v16181_v22  ;;  %v16228_v9 = vld [vmem:[%s21221_s1 + $0x1d80] ss:$16 sps:$4 sm:$0xff]   ;;  %v16231_v22 = vld [vmem:[%s21221_s1 + $0x1d88] ss:$16 sps:$4 sm:$0xff]  }
 0x39d   : > { %10317 = vmatprep.subr.bf16.mxu0 %v16186_v42  ;;  %10483 = vmatprep.subr.bf16.mxu1 %v16189_v11  ;;  %v16240_v42 = vld [vmem:[%s21221_s1 + $0x1dac] ss:$16 sps:$4 sm:$0xff]   ;;  %v16235_v11 = vld [vmem:[%s21221_s1 + $0x1da0] ss:$16 sps:$4 sm:$0xff]  }
 0x39f   : > { %9066 = vmatmul.mubr.bf16.gmra.mrb[12].mxu0 %v8249_v26  ;;  %9232 = vmatmul.mubr.bf16.gmra.mrb[12].mxu1 %v8249_v26  ;;  %v16242_v26 = vld [vmem:[%s21221_s1 + $0x1dc0] ss:$16 sps:$4 sm:$0xff]  }
 0x3a0   : > { %10318 = vmatpush1.bf16.msra.mxu0 %v16184_v23  ;;  %10484 = vmatpush1.bf16.msra.mxu1 %v16187_v24  ;;  %v16244_v23 = vld [vmem:[%s21221_s1 + $0x1dc4] ss:$16 sps:$4 sm:$0xff]   ;;  %v16247_v24 = vld [vmem:[%s21221_s1 + $0x1dcc] ss:$16 sps:$4 sm:$0xff]  }
 0x3a1   : > { %10319 = vmatprep.subr.bf16.mxu0 %v16192_v4  ;;  %10485 = vmatprep.subr.bf16.mxu1 %v16195_v53  ;;  %v9436_v4 = vrot.slane %v9434_v17, 2  ;;  %v9439_v53 = vrot.slane %v9437_v19, 3 }
 0x3a2   : > { %9075 = vmatprep.mubr.bf16.mxu0 %v8259_v25  ;;  %9241 = vmatprep.mubr.bf16.mxu1 %v8259_v25  ;;  %v9444_v25 = vrot.slane %v9442_v20, 2 }
 0x3a3   : > { %v9440_v57 = vor.u32 %v9439_v53, %v9436_v4  ;;  %v9574_v53 = vshrl.u32 %v19846_v7, 16 }
 0x3a4   : > { %10320 = vmatpush1.bf16.msra.mxu0 %v16190_v36  ;;  %10486 = vmatpush1.bf16.msra.mxu1 %v16193_v41  ;;  %v16249_v36 = vld [vmem:[%s21221_s1 + $0x1de0] ss:$16 sps:$4 sm:$0xff]   ;;  %v16252_v41 = vld [vmem:[%s21221_s1 + $0x1de8] ss:$16 sps:$4 sm:$0xff]  }
 0x3a5   : > { %10321 = vmatprep.subr.bf16.mxu0 %v16200_v62  ;;  %10487 = vmatprep.subr.bf16.mxu1 %v16203_v60  ;;  %v9448_v62 = vor.u32 %v9447_v29, %v9444_v25  ;;  %v9502_v60 = vshrl.u32 %v19776_v39, 16  ;;  %v16255_v39 = vld [vmem:[%s21221_s1 + $0x1e00] ss:$16 sps:$4 sm:$0xff]   ;;  %v9577_v25 = vshll.u32 %v19846_v7, 16  ;;  %v16281_v29 = vld [vmem:[%s21221_s1 + $0x1e84] ss:$16 sps:$4 sm:$0xff]  }
 0x3a6   : > { %v16279_v7 = vld [vmem:[%s21221_s1 + $0x1e80] ss:$16 sps:$4 sm:$0xff]  }
 0x3a7   : > { %9076 = vmatmul.mubr.bf16.gmra.mrb[16].mxu0 %v8257_v48  ;;  %9242 = vmatmul.mubr.bf16.gmra.mrb[16].mxu1 %v8257_v48  ;;  %v9517_v48 = vor.u32 %v9516_v34, %v9513_v35 }
 0x3a8   : > { %10322 = vmatpush1.bf16.msra.mxu0 %v16198_v21  ;;  %10488 = vmatpush1.bf16.msra.mxu1 %v16201_v47  ;;  %v16257_v21 = vld [vmem:[%s21221_s1 + $0x1e04] ss:$16 sps:$4 sm:$0xff]   ;;  %v16260_v47 = vld [vmem:[%s21221_s1 + $0x1e0c] ss:$16 sps:$4 sm:$0xff]  }
 0x3a9   : > { %10323 = vmatprep.subr.bf16.mxu0 %v16207_v51  ;;  %10489 = vmatprep.subr.bf16.mxu1 %v16210_v52  ;;  %v9547_v51 = vshrl.u32 %v19788_v31, 16  ;;  %v9550_v52 = vshll.u32 %v19788_v31, 16  ;;  %v16263_v31 = vld [vmem:[%s21221_s1 + $0x1e24] ss:$16 sps:$4 sm:$0xff]  }
 0x3aa   : > { %10337 = vmatprep.mubr.bf16.mxu0 %v9466_v37  ;;  %10503 = vmatprep.mubr.bf16.mxu1 %v9466_v37  ;;  %v16258_v37 = vld [vmem:[%s21221_s1 + $0x1e08] ss:$16 sps:$4 sm:$0xff]  }
 0x3ac   : > { %10324 = vmatpush1.bf16.msra.mxu0 %v16205_v54  ;;  %10490 = vmatpush1.bf16.msra.mxu1 %v16208_v6  ;;  %v9449_v54 = vsel %vm9432_vm4, %v9440_v57, %v9448_v62  ;;  %v9504_v6 = vrot.slane %v9502_v60, 2  ;;  %v9576_v57 = vrot.slane %v9574_v53, 2  ;;  %v16309_v53 = vld [vmem:[%s21221_s1 + $0x1f20] ss:$16 sps:$4 sm:$0xff]  }
 0x3ad   : > { %10325 = vmatprep.subr.bf16.mxu0 %v16215_v59  ;;  %10491 = vmatprep.subr.bf16.mxu1 %v16218_v61  ;;  %v9507_v59 = vrot.slane %v9505_v43, 3  ;;  %v16266_v61 = vld [vmem:[%s21221_s1 + $0x1e2c] ss:$16 sps:$4 sm:$0xff]   ;;  %v16287_v43 = vld [vmem:[%s21221_s1 + $0x1ea4] ss:$16 sps:$4 sm:$0xff]  }
 0x3b0   : > { %10326 = vmatpush1.bf16.msra.mxu0 %v16213_v18  ;;  %10492 = vmatpush1.bf16.msra.mxu1 %v16216_v63  ;;  %v9518_v18 = vsel %vm9432_vm4, %v20154_v40, %v9517_v48  ;;  %v9549_v63 = vrot.slane %v9547_v51, 2  ;;  %v16269_v40 = vld [vmem:[%s21221_s1 + $0x1e44] ss:$16 sps:$4 sm:$0xff]  }
 0x3b1   : > { %10327 = vmatprep.subr.bf16.mxu0 %v16222_v0  ;;  %10493 = vmatprep.subr.bf16.mxu1 %v16225_v2  ;;  %v9552_v0 = vrot.slane %v9550_v52, 3  ;;  %v16261_v2 = vld [vmem:[%s21221_s1 + $0x1e20] ss:$16 sps:$4 sm:$0xff]  }
 0x3b2   : > { %v16285_v52 = vld [vmem:[%s21221_s1 + $0x1ea0] ss:$16 sps:$4 sm:$0xff]  }
 0x3b4   : > { %10328 = vmatpush1.bf16.msra.mxu0 %v16220_v58  ;;  %10494 = vmatpush1.bf16.msra.mxu1 %v16223_v13  ;;  %v16264_v58 = vld [vmem:[%s21221_s1 + $0x1e28] ss:$16 sps:$4 sm:$0xff]   ;;  %v9508_v13 = vor.u32 %v9507_v59, %v9504_v6  ;;  %v16293_v59 = vld [vmem:[%s21221_s1 + $0x1ec4] ss:$16 sps:$4 sm:$0xff]  }
 0x3b5   : > { %10329 = vmatprep.subr.bf16.mxu0 %v16230_v50  ;;  %10495 = vmatprep.subr.bf16.mxu1 %v16233_v5  ;;  %v9538_v50 = vshrl.u32 %v19812_v8, 16  ;;  %v9541_v5 = vshll.u32 %v19812_v8, 16  ;;  %v16267_v8 = vld [vmem:[%s21221_s1 + $0x1e40] ss:$16 sps:$4 sm:$0xff]  }
 0x3b6   : > { %v9509_v17 = vsel %vm9432_vm4, %v9448_v62, %v9508_v13  ;;  %v9579_v62 = vrot.slane %v9577_v25, 3  ;;  %v16312_v25 = vld [vmem:[%s21221_s1 + $0x1f28] ss:$16 sps:$4 sm:$0xff]  }
 0x3b7   : > { %v9540_v19 = vrot.slane %v9538_v50, 2  ;;  %v9543_v20 = vrot.slane %v9541_v5, 3 }
 0x3b8   : > { %10330 = vmatpush1.bf16.msra.mxu0 %v16228_v9  ;;  %10496 = vmatpush1.bf16.msra.mxu1 %v16231_v22  ;;  %v16272_v9 = vld [vmem:[%s21221_s1 + $0x1e4c] ss:$16 sps:$4 sm:$0xff]   ;;  %v9553_v22 = vor.u32 %v9552_v0, %v9549_v63  ;;  %v9488_v63 = vshll.u32 %v19891_v49, 16  ;;  %v9493_v0 = vshrl.u32 %v19894_v30, 16 }
 0x3b9   : > { %10331 = vmatprep.subr.bf16.mxu0 %v16237_v10  ;;  %10497 = vmatprep.subr.bf16.mxu1 %v16240_v42  ;;  %v9583_v10 = vshrl.u32 %v19822_v44, 16  ;;  %v9586_v42 = vshll.u32 %v19822_v44, 16  ;;  %v16275_v44 = vld [vmem:[%s21221_s1 + $0x1e64] ss:$16 sps:$4 sm:$0xff]   ;;  %v9544_v4 = vor.u32 %v9543_v20, %v9540_v19  ;;  %v16308_v20 = vld [vmem:[%s21221_s1 + $0x1f0c] ss:$16 sps:$4 sm:$0xff]  }
 0x3ba   : > { %v16305_v19 = vld [vmem:[%s21221_s1 + $0x1f04] ss:$16 sps:$4 sm:$0xff]  }
 0x3bb   : > { %v9588_v56 = vrot.slane %v9586_v42, 3  ;;  %v9495_v42 = vrot.slane %v9493_v0, 2 }
 0x3bc   : > { %10332 = vmatpush1.bf16.msra.mxu0 %v16235_v11  ;;  %10498 = vmatpush1.bf16.msra.mxu1 %v16238_v16  ;;  %v9292_v11 = vld [vmem:[%s16872_s12 + $0xc0] sm:$0x77]  ;;  %v16270_v16 = vld [vmem:[%s21221_s1 + $0x1e48] ss:$16 sps:$4 sm:$0xff]  }
 0x3bd   : > { %10333 = vmatprep.subr.bf16.mxu0 %v16244_v23  ;;  %10499 = vmatprep.subr.bf16.mxu1 %v16247_v24  ;;  %v20310_v23 = vcombine.high %v9292_v11, %v9292_v11  ;;  %v9554_v24 = vsel %vm9432_vm4, %v9517_v48, %v9553_v22  ;;  %v20336_v60 = vcombine.low %v9292_v11, %v9292_v11 }
 0x3bf   : > { %v9622_v35 = vshll.u32 %v20310_v23, 16  ;;  %v9613_v6 = vshll.u32 %v20336_v60, 16 }
 0x3c0   : > { %10334 = vmatpush1.bf16.msra.mxu0 %v16242_v26  ;;  %10500 = vmatpush1.bf16.msra.mxu1 %v16245_v27  ;;  %v9585_v26 = vrot.slane %v9583_v10, 2  ;;  %v16276_v27 = vld [vmem:[%s21221_s1 + $0x1e68] ss:$16 sps:$4 sm:$0xff]   ;;  %v9490_v10 = vrot.slane %v9488_v63, 3 }
 0x3c1   : > { %10335 = vmatprep.subr.bf16.mxu0 %v16251_v33  ;;  %10501 = vmatprep.subr.bf16.mxu1 %v16254_v32  ;;  %v16284_v33 = vld [vmem:[%s21221_s1 + $0x1e8c] ss:$16 sps:$4 sm:$0xff]   ;;  %v9619_v32 = vshrl.u32 %v20310_v23, 16  ;;  %v9624_v48 = vrot.slane %v9622_v35, 3  ;;  %v16318_v35 = vld [vmem:[%s21221_s1 + $0x1f48] ss:$16 sps:$4 sm:$0xff]  }
 0x3c2   : > { %v9589_v34 = vor.u32 %v9588_v56, %v9585_v26  ;;  %v16306_v26 = vld [vmem:[%s21221_s1 + $0x1f08] ss:$16 sps:$4 sm:$0xff]  }
 0x3c4   : > { %10336 = vmatpush1.bf16.msra.mxu0 %v16249_v36  ;;  %10502 = vmatpush1.bf16.msra.mxu1 %v16252_v41  ;;  %v16282_v36 = vld [vmem:[%s21221_s1 + $0x1e88] ss:$16 sps:$4 sm:$0xff]   ;;  %v9545_v41 = vsel %vm9432_vm4, %v9508_v13, %v9544_v4  ;;  %v9590_v51 = vsel %vm9432_vm4, %v9553_v22, %v9589_v34 }
 0x3c5   : > { %10388 = vmatprep.subr.bf16.mxu0 %v16257_v21  ;;  %10554 = vmatprep.subr.bf16.mxu1 %v16260_v47  ;;  %v16290_v21 = vld [vmem:[%s21221_s1 + $0x1eac] ss:$16 sps:$4 sm:$0xff]   ;;  %v9621_v47 = vrot.slane %v9619_v32, 2  ;;  %v16294_v13 = vld [vmem:[%s21221_s1 + $0x1ec8] ss:$16 sps:$4 sm:$0xff]  }
 0x3c6   : > { %v16315_v32 = vld [vmem:[%s21221_s1 + $0x1f40] ss:$16 sps:$4 sm:$0xff]  }
 0x3c7   : > { %10338 = vmatmul.mubr.bf16.vlgmr.msra.gmra.mrb[0].mxu0 %v9449_v54  ;;  %10504 = vmatmul.mubr.bf16.vlgmr.msra.gmra.mrb[0].mxu1 %v9449_v54  ;;  %v9610_v54 = vshrl.u32 %v20336_v60, 16 }
 0x3c8   : > { %10389 = vmatpush1.bf16.msra.mxu0 %v16255_v39  ;;  %10555 = vmatpush1.bf16.msra.mxu1 %v16258_v37  ;;  %v16288_v39 = vld [vmem:[%s21221_s1 + $0x1ea8] ss:$16 sps:$4 sm:$0xff]   ;;  %v9580_v37 = vor.u32 %v9579_v62, %v9576_v57  ;;  %v16329_v57 = vld [vmem:[%s21221_s1 + $0x1f84] ss:$16 sps:$4 sm:$0xff]   ;;  %v16332_v62 = vld [vmem:[%s21221_s1 + $0x1f8c] ss:$16 sps:$4 sm:$0xff]  }
 0x3c9   : > { %10390 = vmatprep.subr.bf16.mxu0 %v16263_v31  ;;  %10556 = vmatprep.subr.bf16.mxu1 %v16266_v61  ;;  %v16296_v31 = vld [vmem:[%s21221_s1 + $0x1ecc] ss:$16 sps:$4 sm:$0xff]   ;;  %v9625_v61 = vor.u32 %v9624_v48, %v9621_v47  ;;  %v9612_v5 = vrot.slane %v9610_v54, 2  ;;  %v16335_v47 = vld [vmem:[%s21221_s1 + $0x1fa4] ss:$16 sps:$4 sm:$0xff]   ;;  %v9476_v54 = vshrl.u32 %v19997_v14, 16 }
 0x3ca   : > { %10347 = vmatprep.mubr.bf16.mxu0 %v9518_v18  ;;  %10513 = vmatprep.mubr.bf16.mxu1 %v9518_v18  ;;  %v9485_v18 = vshrl.u32 %v19891_v49, 16  ;;  %v9581_v50 = vsel %vm9432_vm4, %v9544_v4, %v9580_v37  ;;  %v16299_v49 = vld [vmem:[%s21221_s1 + $0x1ee4] ss:$16 sps:$4 sm:$0xff]   ;;  %v16338_v48 = vld [vmem:[%s21221_s1 + $0x1fac] ss:$16 sps:$4 sm:$0xff]  }
 0x3cc   : > { %10391 = vmatpush1.bf16.msra.mxu0 %v16261_v2  ;;  %10557 = vmatpush1.bf16.msra.mxu1 %v16264_v58  ;;  %v9496_v2 = vshll.u32 %v19894_v30, 16  ;;  %v16291_v58 = vld [vmem:[%s21221_s1 + $0x1ec0] ss:$16 sps:$4 sm:$0xff]   ;;  %v16302_v30 = vld [vmem:[%s21221_s1 + $0x1eec] ss:$16 sps:$4 sm:$0xff]   ;;  %v9487_v22 = vrot.slane %v9485_v18, 2 }
 0x3cd   : > { %10392 = vmatprep.subr.bf16.mxu0 %v16269_v40  ;;  %10558 = vmatprep.subr.bf16.mxu1 %v16272_v9  ;;  %v9615_v40 = vrot.slane %v9613_v6, 3  ;;  %v9626_v9 = vsel %vm9432_vm4, %v9589_v34, %v9625_v61  ;;  %v16323_v34 = vld [vmem:[%s21221_s1 + $0x1f64] ss:$16 sps:$4 sm:$0xff]   ;;  %v9479_v6 = vshll.u32 %v19997_v14, 16  ;;  %v16340_v61 = vld [vmem:[%s21221_s1 + $0x1fc0] ss:$16 sps:$4 sm:$0xff]  }
 0x3ce   : > { %v9498_v11 = vrot.slane %v9496_v2, 3  ;;  %v9532_v18 = vshll.u32 %v20006_v15, 16  ;;  %v16343_v14 = vld [vmem:[%s21221_s1 + $0x1fc8] ss:$16 sps:$4 sm:$0xff]   ;;  %v9478_v2 = vrot.slane %v9476_v54, 2 }
 0x3cf   : > { %10348 = vmatmul.mubr.bf16.gmra.mrb[4].mxu0 %v9509_v17  ;;  %10514 = vmatmul.mubr.bf16.gmra.mrb[4].mxu1 %v9509_v17  ;;  %v9616_v17 = vor.u32 %v9615_v40, %v9612_v5  ;;  %v16347_v40 = vld [vmem:[%s21221_s1 + $0x1fe0] ss:$16 sps:$4 sm:$0xff]  }
 0x3d0   : > { %10393 = vmatpush1.bf16.msra.mxu0 %v16267_v8  ;;  %10559 = vmatpush1.bf16.msra.mxu1 %v16270_v16  ;;  %v16297_v8 = vld [vmem:[%s21221_s1 + $0x1ee0] ss:$16 sps:$4 sm:$0xff]   ;;  %v16300_v16 = vld [vmem:[%s21221_s1 + $0x1ee8] ss:$16 sps:$4 sm:$0xff]   ;;  %v9534_v5 = vrot.slane %v9532_v18, 3 }
 0x3d1   : > { %10394 = vmatprep.subr.bf16.mxu0 %v16275_v44  ;;  %10560 = vmatprep.subr.bf16.mxu1 %v16278_v46  ;;  %v9491_v44 = vor.u32 %v9490_v10, %v9487_v22  ;;  %v20389_v46 = vor.u32 %v9498_v11, %v9495_v42  ;;  %v9617_v56 = vsel %vm9432_vm4, %v9580_v37, %v9616_v17  ;;  %v9471_v37 = vshll.u32 %v19994_v55, 16  ;;  %v16355_v42 = vld [vmem:[%s21221_s1 + $0x2004] ss:$16 sps:$4 sm:$0xff]   ;;  %v16358_v11 = vld [vmem:[%s21221_s1 + $0x200c] ss:$16 sps:$4 sm:$0xff]  }
 0x3d2   : > { %10357 = vmatprep.mubr.bf16.mxu0 %v9554_v24  ;;  %10523 = vmatprep.mubr.bf16.mxu1 %v9554_v24  ;;  %v16303_v24 = vld [vmem:[%s21221_s1 + $0x1f00] ss:$16 sps:$4 sm:$0xff]   ;;  %v9520_v22 = vshrl.u32 %v20031_v28, 16  ;;  %v9523_v10 = vshll.u32 %v20031_v28, 16  ;;  %v9568_v17 = vshll.u32 %v20043_v38, 16 }
 0x3d3   : > { %v9500_v4 = vsel %vm9432_vm4, %v9491_v44, %v20389_v46  ;;  %v9473_v0 = vrot.slane %v9471_v37, 3  ;;  %v16353_v28 = vld [vmem:[%s21221_s1 + $0x2000] ss:$16 sps:$4 sm:$0xff]   ;;  %v16374_v37 = vld [vmem:[%s21221_s1 + $0x2068] ss:$16 sps:$4 sm:$0xff]  }
 0x3d4   : > { %10395 = vmatpush1.bf16.msra.mxu0 %v16273_v12  ;;  %10561 = vmatpush1.bf16.msra.mxu1 %v16276_v27  ;;  %v16311_v12 = vld [vmem:[%s21221_s1 + $0x1f24] ss:$16 sps:$4 sm:$0xff]   ;;  %v16314_v27 = vld [vmem:[%s21221_s1 + $0x1f2c] ss:$16 sps:$4 sm:$0xff]   ;;  %v9522_v44 = vrot.slane %v9520_v22, 2 }
 0x3d5   : > { %10396 = vmatprep.subr.bf16.mxu0 %v16281_v29  ;;  %10562 = vmatprep.subr.bf16.mxu1 %v16284_v33  ;;  %v16317_v29 = vld [vmem:[%s21221_s1 + $0x1f44] ss:$16 sps:$4 sm:$0xff]   ;;  %v16320_v33 = vld [vmem:[%s21221_s1 + $0x1f4c] ss:$16 sps:$4 sm:$0xff]  }
 0x3d7   : > { %10358 = vmatmul.mubr.bf16.gmra.mrb[8].mxu0 %v9545_v41  ;;  %10524 = vmatmul.mubr.bf16.gmra.mrb[8].mxu1 %v9545_v41  ;;  %v16324_v41 = vld [vmem:[%s21221_s1 + $0x1f68] ss:$16 sps:$4 sm:$0xff]  }
 0x3d8   : > { %10397 = vmatpush1.bf16.msra.mxu0 %v16279_v7  ;;  %10563 = vmatpush1.bf16.msra.mxu1 %v16282_v36  ;;  %v16326_v7 = vld [vmem:[%s21221_s1 + $0x1f6c] ss:$16 sps:$4 sm:$0xff]   ;;  %v16321_v36 = vld [vmem:[%s21221_s1 + $0x1f60] ss:$16 sps:$4 sm:$0xff]  }
 0x3d9   : > { %10398 = vmatprep.subr.bf16.mxu0 %v16287_v43  ;;  %10564 = vmatprep.subr.bf16.mxu1 %v16290_v21  ;;  %v16327_v43 = vld [vmem:[%s21221_s1 + $0x1f80] ss:$16 sps:$4 sm:$0xff]   ;;  %v16330_v21 = vld [vmem:[%s21221_s1 + $0x1f88] ss:$16 sps:$4 sm:$0xff]  }
 0x3da   : > { %10367 = vmatprep.mubr.bf16.mxu0 %v9590_v51  ;;  %10533 = vmatprep.mubr.bf16.mxu1 %v9590_v51  ;;  %v16333_v51 = vld [vmem:[%s21221_s1 + $0x1fa0] ss:$16 sps:$4 sm:$0xff]  }
 0x3dc   : > { %10399 = vmatpush1.bf16.msra.mxu0 %v16285_v52  ;;  %10565 = vmatpush1.bf16.msra.mxu1 %v16288_v39  ;;  %v16336_v52 = vld [vmem:[%s21221_s1 + $0x1fa8] ss:$16 sps:$4 sm:$0xff]   ;;  %v9468_v39 = vshrl.u32 %v19994_v55, 16  ;;  %v9529_v55 = vshrl.u32 %v20006_v15, 16  ;;  %v16352_v15 = vld [vmem:[%s21221_s1 + $0x1fec] ss:$16 sps:$4 sm:$0xff]  }
 0x3dd   : > { %10400 = vmatprep.subr.bf16.mxu0 %v16293_v59  ;;  %10566 = vmatprep.subr.bf16.mxu1 %v16296_v31  ;;  %v16342_v59 = vld [vmem:[%s21221_s1 + $0x1fc4] ss:$16 sps:$4 sm:$0xff]   ;;  %v16345_v31 = vld [vmem:[%s21221_s1 + $0x1fcc] ss:$16 sps:$4 sm:$0xff]  }
 0x3de   : > { %v9470_v63 = vrot.slane %v9468_v39, 2  ;;  %v16371_v39 = vld [vmem:[%s21221_s1 + $0x2060] ss:$16 sps:$4 sm:$0xff]  }
 0x3df   : > { %10368 = vmatmul.mubr.bf16.gmra.mrb[12].mxu0 %v9581_v50  ;;  %10534 = vmatmul.mubr.bf16.gmra.mrb[12].mxu1 %v9581_v50  ;;  %v9531_v50 = vrot.slane %v9529_v55, 2 }
 0x3e0   : > { %10401 = vmatpush1.bf16.msra.mxu0 %v16291_v58  ;;  %10567 = vmatpush1.bf16.msra.mxu1 %v16294_v13  ;;  %v9481_v58 = vrot.slane %v9479_v6, 3  ;;  %v16349_v13 = vld [vmem:[%s21221_s1 + $0x1fe4] ss:$16 sps:$4 sm:$0xff]   ;;  %v9592_v6 = vshrl.u32 %v20102_v3, 16 }
 0x3e1   : > { %10402 = vmatprep.subr.bf16.mxu0 %v16299_v49  ;;  %10568 = vmatprep.subr.bf16.mxu1 %v16302_v30  ;;  %v16350_v49 = vld [vmem:[%s21221_s1 + $0x1fe8] ss:$16 sps:$4 sm:$0xff]   ;;  %v9474_v30 = vor.u32 %v9473_v0, %v9470_v63 }
 0x3e2   : > { %10377 = vmatprep.mubr.bf16.mxu0 %v9626_v9  ;;  %10543 = vmatprep.mubr.bf16.mxu1 %v9626_v9  ;;  %v9482_v9 = vor.u32 %v9481_v58, %v9478_v2  ;;  %v16380_v63 = vld [vmem:[%s21221_s1 + $0x2088] ss:$16 sps:$4 sm:$0xff]   ;;  %v9594_v2 = vrot.slane %v9592_v6, 2  ;;  %v16427_v6 = vld [vmem:[%s21221_s1 + $0x2184] ss:$16 sps:$4 sm:$0xff]  }
 0x3e4   : > { %10403 = vmatpush1.bf16.msra.mxu0 %v16297_v8  ;;  %10569 = vmatpush1.bf16.msra.mxu1 %v16300_v16  ;;  %v9535_v8 = vor.u32 %v9534_v5, %v9531_v50  ;;  %v9565_v16 = vshrl.u32 %v20043_v38, 16  ;;  %v16361_v38 = vld [vmem:[%s21221_s1 + $0x2024] ss:$16 sps:$4 sm:$0xff]   ;;  %v16388_v50 = vld [vmem:[%s21221_s1 + $0x20ac] ss:$16 sps:$4 sm:$0xff]  }
 0x3e5   : > { %10404 = vmatprep.subr.bf16.mxu0 %v16305_v19  ;;  %10570 = vmatprep.subr.bf16.mxu1 %v16308_v20  ;;  %v16356_v19 = vld [vmem:[%s21221_s1 + $0x2008] ss:$16 sps:$4 sm:$0xff]   ;;  %v9483_v20 = vsel %vm9432_vm4, %v9474_v30, %v9482_v9  ;;  %v16383_v30 = vld [vmem:[%s21221_s1 + $0x20a0] ss:$16 sps:$4 sm:$0xff]  }
 0x3e7   : > { %10378 = vmatmul.mubr.bf16.gmra.mrb[16].mxu0 %v9617_v56  ;;  %10544 = vmatmul.mubr.bf16.gmra.mrb[16].mxu1 %v9617_v56  ;;  %v9536_v56 = vsel %vm9432_vm4, %v20389_v46, %v9535_v8  ;;  %v16367_v46 = vld [vmem:[%s21221_s1 + $0x2044] ss:$16 sps:$4 sm:$0xff]  }
 0x3e8   : > { %10405 = vmatpush1.bf16.msra.mxu0 %v16303_v24  ;;  %10571 = vmatpush1.bf16.msra.mxu1 %v16306_v26  ;;  %v9525_v24 = vrot.slane %v9523_v10, 3  ;;  %v16364_v26 = vld [vmem:[%s21221_s1 + $0x202c] ss:$16 sps:$4 sm:$0xff]  }
 0x3e9   : > { %10406 = vmatprep.subr.bf16.mxu0 %v16311_v12  ;;  %10572 = vmatprep.subr.bf16.mxu1 %v16314_v27  ;;  %v9567_v12 = vrot.slane %v9565_v16, 2  ;;  %v9570_v27 = vrot.slane %v9568_v17, 3  ;;  %v16389_v16 = vld [vmem:[%s21221_s1 + $0x20c0] ss:$16 sps:$4 sm:$0xff]  }
 0x3ea   : > { %10420 = vmatprep.mubr.bf16.mxu0 %v9500_v4  ;;  %10586 = vmatprep.mubr.bf16.mxu1 %v9500_v4  ;;  %v16359_v4 = vld [vmem:[%s21221_s1 + $0x2020] ss:$16 sps:$4 sm:$0xff]  }
 0x3ec   : > { %10407 = vmatpush1.bf16.msra.mxu0 %v16309_v53  ;;  %10573 = vmatpush1.bf16.msra.mxu1 %v16312_v25  ;;  %v16362_v53 = vld [vmem:[%s21221_s1 + $0x2028] ss:$16 sps:$4 sm:$0xff]   ;;  %v9526_v25 = vor.u32 %v9525_v24, %v9522_v44  ;;  %v20602_v24 = vld [vmem:[%s16872_s12 + $0x20] sm:$0x88] }
 0x3ed   : > { %10408 = vmatprep.subr.bf16.mxu0 %v16317_v29  ;;  %10574 = vmatprep.subr.bf16.mxu1 %v16320_v33  ;;  %v9556_v29 = vshrl.u32 %v20067_v45, 16  ;;  %v9559_v33 = vshll.u32 %v20067_v45, 16  ;;  %v9601_v45 = vshrl.u32 %v20077_v1, 16 }
 0x3f0   : > { %10409 = vmatpush1.bf16.msra.mxu0 %v16315_v32  ;;  %10575 = vmatpush1.bf16.msra.mxu1 %v16318_v35  ;;  %v16370_v32 = vld [vmem:[%s21221_s1 + $0x204c] ss:$16 sps:$4 sm:$0xff]   ;;  %v16365_v35 = vld [vmem:[%s21221_s1 + $0x2040] ss:$16 sps:$4 sm:$0xff]  }
 0x3f1   : > { %10410 = vmatprep.subr.bf16.mxu0 %v16323_v34  ;;  %10576 = vmatprep.subr.bf16.mxu1 %v16326_v7  ;;  %v9571_v34 = vor.u32 %v9570_v27, %v9567_v12  ;;  %v9604_v7 = vshll.u32 %v20077_v1, 16  ;;  %v16376_v1 = vld [vmem:[%s21221_s1 + $0x206c] ss:$16 sps:$4 sm:$0xff]   ;;  %v20612_v12 = vld [vmem:[%s16872_s12 + $0x30] sm:$0xff] }
 0x3f2   : > { %v13742_v27 = vcombine.high %v20602_v24, %v20612_v12 }
 0x3f4   : > { %10411 = vmatpush1.bf16.msra.mxu0 %v16321_v36  ;;  %10577 = vmatpush1.bf16.msra.mxu1 %v16324_v41  ;;  %v16368_v36 = vld [vmem:[%s21221_s1 + $0x2048] ss:$16 sps:$4 sm:$0xff]   ;;  %v9527_v41 = vsel %vm9432_vm4, %v9482_v9, %v9526_v25 }
 0x3f5   : > { %10412 = vmatprep.subr.bf16.mxu0 %v16329_v57  ;;  %10578 = vmatprep.subr.bf16.mxu1 %v16332_v62  ;;  %v9558_v57 = vrot.slane %v9556_v29, 2  ;;  %v9561_v62 = vrot.slane %v9559_v33, 3  ;;  %v16386_v9 = vld [vmem:[%s21221_s1 + $0x20a8] ss:$16 sps:$4 sm:$0xff]   ;;  %v16403_v29 = vld [vmem:[%s21221_s1 + $0x2104] ss:$16 sps:$4 sm:$0xff]  }
 0x3f6   : > { %v16406_v33 = vld [vmem:[%s21221_s1 + $0x210c] ss:$16 sps:$4 sm:$0xff]  }
 0x3f7   : > { %v9562_v54 = vor.u32 %v9561_v62, %v9558_v57  ;;  %v16407_v62 = vld [vmem:[%s21221_s1 + $0x2120] ss:$16 sps:$4 sm:$0xff]  }
 0x3f8   : > { %10413 = vmatpush1.bf16.msra.mxu0 %v16327_v43  ;;  %10579 = vmatpush1.bf16.msra.mxu1 %v16330_v21  ;;  %v9293_v43 = vld [vmem:[%s16872_s12 + $0xc8] sm:$0x77]  ;;  %v16373_v21 = vld [vmem:[%s21221_s1 + $0x2064] ss:$16 sps:$4 sm:$0xff]  }
 0x3f9   : > { %10414 = vmatprep.subr.bf16.mxu0 %v16335_v47  ;;  %10580 = vmatprep.subr.bf16.mxu1 %v16338_v48  ;;  %v9572_v47 = vsel %vm9432_vm4, %v9535_v8, %v9571_v34  ;;  %v9603_v48 = vrot.slane %v9601_v45, 2  ;;  %v9563_v0 = vsel %vm9432_vm4, %v9526_v25, %v9562_v54  ;;  %v16394_v8 = vld [vmem:[%s21221_s1 + $0x20cc] ss:$16 sps:$4 sm:$0xff]   ;;  %v16404_v45 = vld [vmem:[%s21221_s1 + $0x2108] ss:$16 sps:$4 sm:$0xff]  }
 0x3fc   : > { %10415 = vmatpush1.bf16.msra.mxu0 %v16333_v51  ;;  %10581 = vmatpush1.bf16.msra.mxu1 %v16336_v52  ;;  %v9606_v51 = vrot.slane %v9604_v7, 3  ;;  %v20546_v52 = vcombine.high %v9293_v43, %v9293_v43 }
 0x3fd   : > { %10416 = vmatprep.subr.bf16.mxu0 %v16342_v59  ;;  %10582 = vmatprep.subr.bf16.mxu1 %v16345_v31  ;;  %v9595_v59 = vshll.u32 %v20102_v3, 16  ;;  %v16379_v31 = vld [vmem:[%s21221_s1 + $0x2084] ss:$16 sps:$4 sm:$0xff]   ;;  %v16377_v3 = vld [vmem:[%s21221_s1 + $0x2080] ss:$16 sps:$4 sm:$0xff]  }
 0x3fe   : > { %v9607_v55 = vor.u32 %v9606_v51, %v9603_v48  ;;  %v9637_v18 = vshrl.u32 %v20546_v52, 16  ;;  %v16416_v48 = vld [vmem:[%s21221_s1 + $0x2148] ss:$16 sps:$4 sm:$0xff]   ;;  %v16421_v51 = vld [vmem:[%s21221_s1 + $0x2164] ss:$16 sps:$4 sm:$0xff]  }
 0x3ff   : > { %v9597_v58 = vrot.slane %v9595_v59, 3  ;;  %v16430_v59 = vld [vmem:[%s21221_s1 + $0x218c] ss:$16 sps:$4 sm:$0xff]  }
 0x400   : > { %10417 = vmatpush1.bf16.msra.mxu0 %v16340_v61  ;;  %10583 = vmatpush1.bf16.msra.mxu1 %v16343_v14  ;;  %v16382_v61 = vld [vmem:[%s21221_s1 + $0x208c] ss:$16 sps:$4 sm:$0xff]   ;;  %v9640_v14 = vshll.u32 %v20546_v52, 16  ;;  %v9608_v5 = vsel %vm9432_vm4, %v9571_v34, %v9607_v55  ;;  %v16401_v34 = vld [vmem:[%s21221_s1 + $0x2100] ss:$16 sps:$4 sm:$0xff]  }
 0x401   : > { %10418 = vmatprep.subr.bf16.mxu0 %v16349_v13  ;;  %10584 = vmatprep.subr.bf16.mxu1 %v16352_v15  ;;  %v20571_v13 = vcombine.low %v9293_v43, %v9293_v43  ;;  %v16385_v15 = vld [vmem:[%s21221_s1 + $0x20a4] ss:$16 sps:$4 sm:$0xff]   ;;  %v9598_v22 = vor.u32 %v9597_v58, %v9594_v2  ;;  %v16410_v43 = vld [vmem:[%s21221_s1 + $0x2128] ss:$16 sps:$4 sm:$0xff]   ;;  %v16438_v2 = vld [vmem:[%s21221_s1 + $0x21c0] ss:$16 sps:$4 sm:$0xff]  }
 0x402   : > { %v16441_v58 = vld [vmem:[%s21221_s1 + $0x21c8] ss:$16 sps:$4 sm:$0xff]  }
 0x403   : > { %v9628_v10 = vshrl.u32 %v20571_v13, 16 }
 0x404   : > { %10419 = vmatpush1.bf16.msra.mxu0 %v16347_v40  ;;  %10585 = vmatpush1.bf16.msra.mxu1 %v16350_v49  ;;  %v9639_v40 = vrot.slane %v9637_v18, 2  ;;  %v9642_v49 = vrot.slane %v9640_v14, 3  ;;  %v16436_v18 = vld [vmem:[%s21221_s1 + $0x21ac] ss:$16 sps:$4 sm:$0xff]   ;;  %v16431_v14 = vld [vmem:[%s21221_s1 + $0x21a0] ss:$16 sps:$4 sm:$0xff]  }
 0x405   : > { %11522 = vmatprep.subr.bf16.mxu0 %v16355_v42  ;;  %11688 = vmatprep.subr.bf16.mxu1 %v16358_v11  ;;  %v9631_v42 = vshll.u32 %v20571_v13, 16  ;;  %v16391_v11 = vld [vmem:[%s21221_s1 + $0x20c4] ss:$16 sps:$4 sm:$0xff]  }
 0x406   : > { %v9643_v17 = vor.u32 %v9642_v49, %v9639_v40  ;;  %v16445_v40 = vld [vmem:[%s21221_s1 + $0x21e0] ss:$16 sps:$4 sm:$0xff]   ;;  %v16448_v49 = vld [vmem:[%s21221_s1 + $0x21e8] ss:$16 sps:$4 sm:$0xff]  }
 0x407   : > { %10421 = vmatmul.mubr.bf16.vlgmr.msra.gmra.mrb[0].mxu0 %v9483_v20  ;;  %10587 = vmatmul.mubr.bf16.vlgmr.msra.gmra.mrb[0].mxu1 %v9483_v20  ;;  %v9630_v20 = vrot.slane %v9628_v10, 2  ;;  %v9633_v44 = vrot.slane %v9631_v42, 3  ;;  %v16455_v10 = vld [vmem:[%s21221_s1 + $0x2204] ss:$16 sps:$4 sm:$0xff]   ;;  %v16458_v42 = vld [vmem:[%s21221_s1 + $0x220c] ss:$16 sps:$4 sm:$0xff]  }
 0x408   : > { %11523 = vmatpush1.bf16.msra.mxu0 %v16353_v28  ;;  %11689 = vmatpush1.bf16.msra.mxu1 %v16356_v19  ;;  %v16392_v28 = vld [vmem:[%s21221_s1 + $0x20c8] ss:$16 sps:$4 sm:$0xff]   ;;  %v9599_v19 = vsel %vm9432_vm4, %v9562_v54, %v9598_v22 }
 0x409   : > { %11524 = vmatprep.subr.bf16.mxu0 %v16361_v38  ;;  %11690 = vmatprep.subr.bf16.mxu1 %v16364_v26  ;;  %v16397_v38 = vld [vmem:[%s21221_s1 + $0x20e4] ss:$16 sps:$4 sm:$0xff]   ;;  %v16400_v26 = vld [vmem:[%s21221_s1 + $0x20ec] ss:$16 sps:$4 sm:$0xff]   ;;  %v9634_v25 = vor.u32 %v9633_v44, %v9630_v20  ;;  %v16422_v54 = vld [vmem:[%s21221_s1 + $0x2168] ss:$16 sps:$4 sm:$0xff]  }
 0x40a   : > { %10430 = vmatprep.mubr.bf16.mxu0 %v9536_v56  ;;  %10596 = vmatprep.mubr.bf16.mxu1 %v9536_v56  ;;  %v9644_v56 = vsel %vm9432_vm4, %v9607_v55, %v9643_v17  ;;  %v16433_v55 = vld [vmem:[%s21221_s1 + $0x21a4] ss:$16 sps:$4 sm:$0xff]   ;;  %v16456_v17 = vld [vmem:[%s21221_s1 + $0x2208] ss:$16 sps:$4 sm:$0xff]   ;;  %v16464_v20 = vld [vmem:[%s21221_s1 + $0x222c] ss:$16 sps:$4 sm:$0xff]  }
 0x40b   : > { %v9635_v7 = vsel %vm9432_vm4, %v9598_v22, %v9634_v25  ;;  %v16465_v25 = vld [vmem:[%s21221_s1 + $0x2240] ss:$16 sps:$4 sm:$0xff]  }
 0x40c   : > { %11525 = vmatpush1.bf16.msra.mxu0 %v16359_v4  ;;  %11691 = vmatpush1.bf16.msra.mxu1 %v16362_v53  ;;  %v16395_v4 = vld [vmem:[%s21221_s1 + $0x20e0] ss:$16 sps:$4 sm:$0xff]   ;;  %v16398_v53 = vld [vmem:[%s21221_s1 + $0x20e8] ss:$16 sps:$4 sm:$0xff]  }
 0x40d   : > { %11526 = vmatprep.subr.bf16.mxu0 %v16367_v46  ;;  %11692 = vmatprep.subr.bf16.mxu1 %v16370_v32  ;;  %v10821_v46 = vrot.slane %v13742_v27, 3  ;;  %v20629_v32 = vld [vmem:[%s16872_s12 + $0x44] ss:$16 sps:$4 sm:$0xff]   ;;  %v16470_v27 = vld [vmem:[%s21221_s1 + $0x224c] ss:$16 sps:$4 sm:$0xff]  }
 0x40f   : > { %10431 = vmatmul.mubr.bf16.gmra.mrb[4].mxu0 %v9527_v41  ;;  %10597 = vmatmul.mubr.bf16.gmra.mrb[4].mxu1 %v9527_v41  ;;  %v16412_v41 = vld [vmem:[%s21221_s1 + $0x212c] ss:$16 sps:$4 sm:$0xff]  }
 0x410   : > { %11527 = vmatpush1.bf16.msra.mxu0 %v16365_v35  ;;  %11693 = vmatpush1.bf16.msra.mxu1 %v16368_v36  ;;  %v10822_v35 = vrot.slane %v20629_v32, 3  ;;  %v16409_v36 = vld [vmem:[%s21221_s1 + $0x2124] ss:$16 sps:$4 sm:$0xff]   ;;  %v16476_v32 = vld [vmem:[%s21221_s1 + $0x226c] ss:$16 sps:$4 sm:$0xff]  }
 0x411   : > { %11528 = vmatprep.subr.bf16.mxu0 %v16373_v21  ;;  %11694 = vmatprep.subr.bf16.mxu1 %v16376_v1  ;;  %v16415_v21 = vld [vmem:[%s21221_s1 + $0x2144] ss:$16 sps:$4 sm:$0xff]   ;;  %v16418_v1 = vld [vmem:[%s21221_s1 + $0x214c] ss:$16 sps:$4 sm:$0xff]  }
 0x412   : > { %10440 = vmatprep.mubr.bf16.mxu0 %v9572_v47  ;;  %10606 = vmatprep.mubr.bf16.mxu1 %v9572_v47  ;;  %v10823_v57 = vsel %vm10817_vm5, %v10821_v46, %v10822_v35  ;;  %v16413_v47 = vld [vmem:[%s21221_s1 + $0x2140] ss:$16 sps:$4 sm:$0xff]   ;;  %v16473_v46 = vld [vmem:[%s21221_s1 + $0x2264] ss:$16 sps:$4 sm:$0xff]  }
 0x414   : > { %11529 = vmatpush1.bf16.msra.mxu0 %v16371_v39  ;;  %11695 = vmatpush1.bf16.msra.mxu1 %v16374_v37  ;;  %v16424_v39 = vld [vmem:[%s21221_s1 + $0x216c] ss:$16 sps:$4 sm:$0xff]   ;;  %v16419_v37 = vld [vmem:[%s21221_s1 + $0x2160] ss:$16 sps:$4 sm:$0xff]  }
 0x415   : > { %11530 = vmatprep.subr.bf16.mxu0 %v16379_v31  ;;  %11696 = vmatprep.subr.bf16.mxu1 %v16382_v61  ;;  %v16425_v31 = vld [vmem:[%s21221_s1 + $0x2180] ss:$16 sps:$4 sm:$0xff]   ;;  %v16428_v61 = vld [vmem:[%s21221_s1 + $0x2188] ss:$16 sps:$4 sm:$0xff]  }
 0x417   : > { %10441 = vmatmul.mubr.bf16.gmra.mrb[8].mxu0 %v9563_v0  ;;  %10607 = vmatmul.mubr.bf16.gmra.mrb[8].mxu1 %v9563_v0  ;;  %v16443_v0 = vld [vmem:[%s21221_s1 + $0x21cc] ss:$16 sps:$4 sm:$0xff]  }
 0x418   : > { %11531 = vmatpush1.bf16.msra.mxu0 %v16377_v3  ;;  %11697 = vmatpush1.bf16.msra.mxu1 %v16380_v63  ;;  %v16434_v3 = vld [vmem:[%s21221_s1 + $0x21a8] ss:$16 sps:$4 sm:$0xff]   ;;  %v16440_v63 = vld [vmem:[%s21221_s1 + $0x21c4] ss:$16 sps:$4 sm:$0xff]  }
 0x419   : > { %11532 = vmatprep.subr.bf16.mxu0 %v16385_v15  ;;  %11698 = vmatprep.subr.bf16.mxu1 %v16388_v50  ;;  %v13741_v15 = vcombine.low %v20602_v24, %v20612_v12  ;;  %v16447_v50 = vld [vmem:[%s21221_s1 + $0x21e4] ss:$16 sps:$4 sm:$0xff]   ;;  %v16459_v24 = vld [vmem:[%s21221_s1 + $0x2220] ss:$16 sps:$4 sm:$0xff]  }
 0x41a   : > { %10450 = vmatprep.mubr.bf16.mxu0 %v9608_v5  ;;  %10616 = vmatprep.mubr.bf16.mxu1 %v9608_v5  ;;  %v16450_v5 = vld [vmem:[%s21221_s1 + $0x21ec] ss:$16 sps:$4 sm:$0xff]   ;;  %v16467_v12 = vld [vmem:[%s21221_s1 + $0x2244] ss:$16 sps:$4 sm:$0xff]  }
 0x41c   : > { %11533 = vmatpush1.bf16.msra.mxu0 %v16383_v30  ;;  %11699 = vmatpush1.bf16.msra.mxu1 %v16386_v9  ;;  %v10818_v30 = vrot.slane %v13741_v15, 3  ;;  %v16637_v9 = vld [vmem:[%s16872_s12 + $0x40] ss:$16 sps:$4 sm:$0xff]  }
 0x41d   : > { %11534 = vmatprep.subr.bf16.mxu0 %v16391_v11  ;;  %11700 = vmatprep.subr.bf16.mxu1 %v16394_v8  ;;  %v10819_v22 = vrot.slane %v16637_v9, 3  ;;  %v16638_v11 = vld [vmem:[%s16872_s12 + $0x64] ss:$16 sps:$4 sm:$0xff]  }
 0x41e   : > { %v10832_v8 = vrot.slane %v16638_v11, 3 }
 0x41f   : > { %10451 = vmatmul.mubr.bf16.gmra.mrb[12].mxu0 %v9599_v19  ;;  %10617 = vmatmul.mubr.bf16.gmra.mrb[12].mxu1 %v9599_v19  ;;  %v16461_v19 = vld [vmem:[%s21221_s1 + $0x2224] ss:$16 sps:$4 sm:$0xff]  }
 0x420   : > { %11535 = vmatpush1.bf16.msra.mxu0 %v16389_v16  ;;  %11701 = vmatpush1.bf16.msra.mxu1 %v16392_v28  ;;  %v16453_v16 = vld [vmem:[%s21221_s1 + $0x2200] ss:$16 sps:$4 sm:$0xff]   ;;  %v10820_v28 = vsel %vm10817_vm5, %v10818_v30, %v10819_v22  ;;  %v10833_v44 = vsel %vm10817_vm5, %v10822_v35, %v10832_v8  ;;  %v16506_v30 = vld [vmem:[%s21221_s1 + $0x230c] ss:$16 sps:$4 sm:$0xff]  }
 0x421   : > { %11536 = vmatprep.subr.bf16.mxu0 %v16397_v38  ;;  %11702 = vmatprep.subr.bf16.mxu1 %v16400_v26  ;;  %v16462_v38 = vld [vmem:[%s21221_s1 + $0x2228] ss:$16 sps:$4 sm:$0xff]   ;;  %v16639_v26 = vld [vmem:[%s16872_s12 + $0x60] ss:$16 sps:$4 sm:$0xff]  }
 0x422   : > { %10460 = vmatprep.mubr.bf16.mxu0 %v9644_v56  ;;  %10626 = vmatprep.mubr.bf16.mxu1 %v9644_v56  ;;  %v10830_v56 = vrot.slane %v16639_v26, 3  ;;  %v16521_v26 = vld [vmem:[%s21221_s1 + $0x2364] ss:$16 sps:$4 sm:$0xff]  }
 0x424   : > { %11537 = vmatpush1.bf16.msra.mxu0 %v16395_v4  ;;  %11703 = vmatpush1.bf16.msra.mxu1 %v16398_v53  ;;  %v16640_v4 = vld [vmem:[%s16872_s12 + $0x84] ss:$16 sps:$4 sm:$0xff]  }
 0x425   : > { %11538 = vmatprep.subr.bf16.mxu0 %v16403_v29  ;;  %11704 = vmatprep.subr.bf16.mxu1 %v16406_v33  ;;  %v10840_v53 = vrot.slane %v16640_v4, 3  ;;  %v16468_v29 = vld [vmem:[%s21221_s1 + $0x2248] ss:$16 sps:$4 sm:$0xff]   ;;  %v10831_v33 = vsel %vm10817_vm5, %v10819_v22, %v10830_v56  ;;  %v20858_v22 = vld [vmem:[%s16872_s12 + $0x4c] ss:$16 sps:$4 sm:$0xff]  }
 0x426   : > { %v16527_v4 = vld [vmem:[%s21221_s1 + $0x2384] ss:$16 sps:$4 sm:$0xff]  }
 0x427   : > { %10461 = vmatmul.mubr.bf16.gmra.mrb[16].mxu0 %v9635_v7  ;;  %10627 = vmatmul.mubr.bf16.gmra.mrb[16].mxu1 %v9635_v7  ;;  %v10841_v35 = vsel %vm10817_vm5, %v10832_v8, %v10840_v53  ;;  %v16641_v7 = vld [vmem:[%s16872_s12 + $0x80] ss:$16 sps:$4 sm:$0xff]   ;;  %v16509_v8 = vld [vmem:[%s21221_s1 + $0x2324] ss:$16 sps:$4 sm:$0xff]  }
 0x428   : > { %11539 = vmatpush1.bf16.msra.mxu0 %v16401_v34  ;;  %11705 = vmatpush1.bf16.msra.mxu1 %v16404_v45  ;;  %v16471_v34 = vld [vmem:[%s21221_s1 + $0x2260] ss:$16 sps:$4 sm:$0xff]   ;;  %v16474_v45 = vld [vmem:[%s21221_s1 + $0x2268] ss:$16 sps:$4 sm:$0xff]  }
 0x429   : > { %11540 = vmatprep.subr.bf16.mxu0 %v16409_v36  ;;  %11706 = vmatprep.subr.bf16.mxu1 %v16412_v41  ;;  %v10838_v36 = vrot.slane %v16641_v7, 3  ;;  %v16479_v41 = vld [vmem:[%s21221_s1 + $0x2284] ss:$16 sps:$4 sm:$0xff]   ;;  %v16537_v7 = vld [vmem:[%s21221_s1 + $0x23c0] ss:$16 sps:$4 sm:$0xff]  }
 0x42a   : > { %11554 = vmatprep.mubr.bf16.mxu0 %v10823_v57  ;;  %11720 = vmatprep.mubr.bf16.mxu1 %v10823_v57  ;;  %v16482_v57 = vld [vmem:[%s21221_s1 + $0x228c] ss:$16 sps:$4 sm:$0xff]  }
 0x42c   : > { %11541 = vmatpush1.bf16.msra.mxu0 %v16407_v62  ;;  %11707 = vmatpush1.bf16.msra.mxu1 %v16410_v43  ;;  %v16642_v62 = vld [vmem:[%s16872_s12 + $0xa4] ss:$16 sps:$4 sm:$0xff]  }
 0x42d   : > { %11542 = vmatprep.subr.bf16.mxu0 %v16415_v21  ;;  %11708 = vmatprep.subr.bf16.mxu1 %v16418_v1  ;;  %v10848_v43 = vrot.slane %v16642_v62, 3  ;;  %v16477_v21 = vld [vmem:[%s21221_s1 + $0x2280] ss:$16 sps:$4 sm:$0xff]   ;;  %v16480_v1 = vld [vmem:[%s21221_s1 + $0x2288] ss:$16 sps:$4 sm:$0xff]  }
 0x42e   : > { %v16548_v62 = vld [vmem:[%s21221_s1 + $0x23ec] ss:$16 sps:$4 sm:$0xff]  }
 0x430   : > { %11543 = vmatpush1.bf16.msra.mxu0 %v16413_v47  ;;  %11709 = vmatpush1.bf16.msra.mxu1 %v16416_v48  ;;  %v10839_v47 = vsel %vm10817_vm5, %v10830_v56, %v10838_v36  ;;  %v16485_v48 = vld [vmem:[%s21221_s1 + $0x22a4] ss:$16 sps:$4 sm:$0xff]   ;;  %v16524_v56 = vld [vmem:[%s21221_s1 + $0x236c] ss:$16 sps:$4 sm:$0xff]  }
 0x431   : > { %11544 = vmatprep.subr.bf16.mxu0 %v16421_v51  ;;  %11710 = vmatprep.subr.bf16.mxu1 %v16424_v39  ;;  %v16488_v51 = vld [vmem:[%s21221_s1 + $0x22ac] ss:$16 sps:$4 sm:$0xff]   ;;  %v10849_v39 = vsel %vm10817_vm5, %v10840_v53, %v10848_v43 }
 0x432   : > { %v16530_v53 = vld [vmem:[%s21221_s1 + $0x238c] ss:$16 sps:$4 sm:$0xff]  }
 0x434   : > { %11545 = vmatpush1.bf16.msra.mxu0 %v16419_v37  ;;  %11711 = vmatpush1.bf16.msra.mxu1 %v16422_v54  ;;  %v16483_v37 = vld [vmem:[%s21221_s1 + $0x22a0] ss:$16 sps:$4 sm:$0xff]   ;;  %v16486_v54 = vld [vmem:[%s21221_s1 + $0x22a8] ss:$16 sps:$4 sm:$0xff]  }
 0x435   : > { %11546 = vmatprep.subr.bf16.mxu0 %v16427_v6  ;;  %11712 = vmatprep.subr.bf16.mxu1 %v16430_v59  ;;  %v16643_v6 = vld [vmem:[%s16872_s12 + $0xa0] ss:$16 sps:$4 sm:$0xff]  }
 0x436   : > { %v10846_v59 = vrot.slane %v16643_v6, 3 }
 0x438   : > { %11547 = vmatpush1.bf16.msra.mxu0 %v16425_v31  ;;  %11713 = vmatpush1.bf16.msra.mxu1 %v16428_v61  ;;  %v16491_v31 = vld [vmem:[%s21221_s1 + $0x22c4] ss:$16 sps:$4 sm:$0xff]   ;;  %v16494_v61 = vld [vmem:[%s21221_s1 + $0x22cc] ss:$16 sps:$4 sm:$0xff]  }
 0x439   : > { %11548 = vmatprep.subr.bf16.mxu0 %v16433_v55  ;;  %11714 = vmatprep.subr.bf16.mxu1 %v16436_v18  ;;  %v10856_v55 = vrot.slane %v20310_v23, 3  ;;  %v16489_v18 = vld [vmem:[%s21221_s1 + $0x22c0] ss:$16 sps:$4 sm:$0xff]   ;;  %v16497_v23 = vld [vmem:[%s21221_s1 + $0x22e4] ss:$16 sps:$4 sm:$0xff]  }
 0x43c   : > { %11549 = vmatpush1.bf16.msra.mxu0 %v16431_v14  ;;  %11715 = vmatpush1.bf16.msra.mxu1 %v16434_v3  ;;  %v16492_v14 = vld [vmem:[%s21221_s1 + $0x22c8] ss:$16 sps:$4 sm:$0xff]   ;;  %v10847_v3 = vsel %vm10817_vm5, %v10838_v36, %v10846_v59 }
 0x43d   : > { %11550 = vmatprep.subr.bf16.mxu0 %v16440_v63  ;;  %11716 = vmatprep.subr.bf16.mxu1 %v16443_v0  ;;  %v20830_v63 = vld [vmem:[%s16872_s12 + $0x28] sm:$0x88] }
 0x43e   : > { %v16500_v0 = vld [vmem:[%s21221_s1 + $0x22ec] ss:$16 sps:$4 sm:$0xff]   ;;  %v16540_v36 = vld [vmem:[%s21221_s1 + $0x23c8] ss:$16 sps:$4 sm:$0xff]  }
 0x440   : > { %11551 = vmatpush1.bf16.msra.mxu0 %v16438_v2  ;;  %11717 = vmatpush1.bf16.msra.mxu1 %v16441_v58  ;;  %v10857_v2 = vsel %vm10817_vm5, %v10848_v43, %v10856_v55  ;;  %v20840_v58 = vld [vmem:[%s16872_s12 + $0x38] sm:$0xff]  ;;  %v16543_v43 = vld [vmem:[%s21221_s1 + $0x23e0] ss:$16 sps:$4 sm:$0xff]   ;;  %v16555_v55 = vld [vmem:[%s21223_s3 + $0x48] sm:$0xff]  }
 0x441   : > { %11552 = vmatprep.subr.bf16.mxu0 %v16447_v50  ;;  %11718 = vmatprep.subr.bf16.mxu1 %v16450_v5  ;;  %v13744_v15 = vcombine.high %v20830_v63, %v20840_v58  ;;  %v16495_v50 = vld [vmem:[%s21221_s1 + $0x22e0] ss:$16 sps:$4 sm:$0xff]   ;;  %v16498_v5 = vld [vmem:[%s21221_s1 + $0x22e8] ss:$16 sps:$4 sm:$0xff]  }
 0x443   : > { %v10827_v9 = vrot.slane %v13744_v15, 3  ;;  %v16561_v15 = vld [vmem:[%s21223_s3 + $0xd0] sm:$0xff]  }
 0x444   : > { %11553 = vmatpush1.bf16.msra.mxu0 %v16445_v40  ;;  %11719 = vmatpush1.bf16.msra.mxu1 %v16448_v49  ;;  %v10854_v40 = vrot.slane %v20336_v60, 3  ;;  %v16503_v49 = vld [vmem:[%s21221_s1 + $0x2304] ss:$16 sps:$4 sm:$0xff]   ;;  %v16501_v60 = vld [vmem:[%s21221_s1 + $0x2300] ss:$16 sps:$4 sm:$0xff]  }
 0x445   : > { %11605 = vmatprep.subr.bf16.mxu0 %v16455_v10  ;;  %11771 = vmatprep.subr.bf16.mxu1 %v16458_v42  ;;  %v10828_v10 = vrot.slane %v20858_v22, 3  ;;  %v16504_v42 = vld [vmem:[%s21221_s1 + $0x2308] ss:$16 sps:$4 sm:$0xff]  }
 0x446   : > { %v10855_v11 = vsel %vm10817_vm5, %v10846_v59, %v10854_v40  ;;  %v16560_v40 = vld [vmem:[%s21223_s3 + $0x10] sm:$0xff]   ;;  %v16650_v22 = vld [vmem:[%s16872_s12 + $0x88] ss:$16 sps:$4 sm:$0xff]  }
 0x447   : > { %11555 = vmatmul.mubr.bf16.vlgmr.msra.gmra.mrb[0].mxu0 %v10820_v28  ;;  %11721 = vmatmul.mubr.bf16.vlgmr.msra.gmra.mrb[0].mxu1 %v10820_v28  ;;  %v16507_v28 = vld [vmem:[%s21221_s1 + $0x2320] ss:$16 sps:$4 sm:$0xff]  }
 0x448   : > { %11606 = vmatpush1.bf16.msra.mxu0 %v16453_v16  ;;  %11772 = vmatpush1.bf16.msra.mxu1 %v16456_v17  ;;  %v16512_v16 = vld [vmem:[%s21221_s1 + $0x232c] ss:$16 sps:$4 sm:$0xff]   ;;  %v10829_v17 = vsel %vm10817_vm5, %v10827_v9, %v10828_v10 }
 0x449   : > { %11607 = vmatprep.subr.bf16.mxu0 %v16461_v19  ;;  %11773 = vmatprep.subr.bf16.mxu1 %v16464_v20  ;;  %v16510_v19 = vld [vmem:[%s21221_s1 + $0x2328] ss:$16 sps:$4 sm:$0xff]   ;;  %v16515_v20 = vld [vmem:[%s21221_s1 + $0x2344] ss:$16 sps:$4 sm:$0xff]  }
 0x44a   : > { %11564 = vmatprep.mubr.bf16.mxu0 %v10833_v44  ;;  %11730 = vmatprep.mubr.bf16.mxu1 %v10833_v44  ;;  %v16518_v44 = vld [vmem:[%s21221_s1 + $0x234c] ss:$16 sps:$4 sm:$0xff]  }
 0x44b   : > { %v16565_v9 = vld [vmem:[%s21223_s3 + $0xd8] sm:$0xff]  }
 0x44c   : > { %11608 = vmatpush1.bf16.msra.mxu0 %v16459_v24  ;;  %11774 = vmatpush1.bf16.msra.mxu1 %v16462_v38  ;;  %v16513_v24 = vld [vmem:[%s21221_s1 + $0x2340] ss:$16 sps:$4 sm:$0xff]   ;;  %v16516_v38 = vld [vmem:[%s21221_s1 + $0x2348] ss:$16 sps:$4 sm:$0xff]  }
 0x44d   : > { %11609 = vmatprep.subr.bf16.mxu0 %v16467_v12  ;;  %11775 = vmatprep.subr.bf16.mxu1 %v16470_v27  ;;  %v16519_v12 = vld [vmem:[%s21221_s1 + $0x2360] ss:$16 sps:$4 sm:$0xff]   ;;  %v16522_v27 = vld [vmem:[%s21221_s1 + $0x2368] ss:$16 sps:$4 sm:$0xff]  }
 0x44f   : > { %11565 = vmatmul.mubr.bf16.gmra.mrb[4].mxu0 %v10831_v33  ;;  %11731 = vmatmul.mubr.bf16.gmra.mrb[4].mxu1 %v10831_v33  ;;  %v16533_v33 = vld [vmem:[%s21221_s1 + $0x23a4] ss:$16 sps:$4 sm:$0xff]  }
 0x450   : > { %11610 = vmatpush1.bf16.msra.mxu0 %v16465_v25  ;;  %11776 = vmatpush1.bf16.msra.mxu1 %v16468_v29  ;;  %v16525_v25 = vld [vmem:[%s21221_s1 + $0x2380] ss:$16 sps:$4 sm:$0xff]   ;;  %v16528_v29 = vld [vmem:[%s21221_s1 + $0x2388] ss:$16 sps:$4 sm:$0xff]  }
 0x451   : > { %11611 = vmatprep.subr.bf16.mxu0 %v16473_v46  ;;  %11777 = vmatprep.subr.bf16.mxu1 %v16476_v32  ;;  %v16536_v46 = vld [vmem:[%s21221_s1 + $0x23ac] ss:$16 sps:$4 sm:$0xff]   ;;  %v16531_v32 = vld [vmem:[%s21221_s1 + $0x23a0] ss:$16 sps:$4 sm:$0xff]  }
 0x452   : > { %11574 = vmatprep.mubr.bf16.mxu0 %v10841_v35  ;;  %11740 = vmatprep.mubr.bf16.mxu1 %v10841_v35  ;;  %v16534_v35 = vld [vmem:[%s21221_s1 + $0x23a8] ss:$16 sps:$4 sm:$0xff]  }
 0x454   : > { %11612 = vmatpush1.bf16.msra.mxu0 %v16471_v34  ;;  %11778 = vmatpush1.bf16.msra.mxu1 %v16474_v45  ;;  %v16539_v34 = vld [vmem:[%s21221_s1 + $0x23c4] ss:$16 sps:$4 sm:$0xff]   ;;  %v16542_v45 = vld [vmem:[%s21221_s1 + $0x23cc] ss:$16 sps:$4 sm:$0xff]  }
 0x455   : > { %11613 = vmatprep.subr.bf16.mxu0 %v16479_v41  ;;  %11779 = vmatprep.subr.bf16.mxu1 %v16482_v57  ;;  %v13743_v41 = vcombine.low %v20830_v63, %v20840_v58  ;;  %v16545_v57 = vld [vmem:[%s21221_s1 + $0x23e4] ss:$16 sps:$4 sm:$0xff]   ;;  %v16649_v63 = vld [vmem:[%s16872_s12 + $0x8c] ss:$16 sps:$4 sm:$0xff]  }
 0x456   : > { %v16559_v58 = vld [vmem:[%s21223_s3 + $0x50] sm:$0xff]  }
 0x457   : > { %11575 = vmatmul.mubr.bf16.gmra.mrb[8].mxu0 %v10839_v47  ;;  %11741 = vmatmul.mubr.bf16.gmra.mrb[8].mxu1 %v10839_v47  ;;  %v16646_v47 = vld [vmem:[%s16872_s12 + $0x48] ss:$16 sps:$4 sm:$0xff]  }
 0x458   : > { %11614 = vmatpush1.bf16.msra.mxu0 %v16477_v21  ;;  %11780 = vmatpush1.bf16.msra.mxu1 %v16480_v1  ;;  %v16546_v21 = vld [vmem:[%s21221_s1 + $0x23e8] ss:$16 sps:$4 sm:$0xff]   ;;  %v10824_v1 = vrot.slane %v13743_v41, 3 }
 0x459   : > { %11615 = vmatprep.subr.bf16.mxu0 %v16485_v48  ;;  %11781 = vmatprep.subr.bf16.mxu1 %v16488_v51  ;;  %v10825_v48 = vrot.slane %v16646_v47, 3  ;;  %v16647_v51 = vld [vmem:[%s16872_s12 + $0x6c] ss:$16 sps:$4 sm:$0xff]  }
 0x45a   : > { %11584 = vmatprep.mubr.bf16.mxu0 %v10849_v39  ;;  %11750 = vmatprep.mubr.bf16.mxu1 %v10849_v39  ;;  %v10836_v39 = vrot.slane %v16647_v51, 3 }
 0x45b   : > { %v10826_v6 = vsel %vm10817_vm5, %v10824_v1, %v10825_v48 }
 0x45c   : > { %11616 = vmatpush1.bf16.msra.mxu0 %v16483_v37  ;;  %11782 = vmatpush1.bf16.msra.mxu1 %v16486_v54  ;;  %v16551_v37 = vld [vmem:[%s21223_s3 + $0x40] sm:$0xff]   ;;  %v10837_v59 = vsel %vm10817_vm5, %v10828_v10, %v10836_v39  ;;  %v10842_v10 = vrot.slane %v16650_v22, 3 }
 0x45d   : > { %11617 = vmatprep.subr.bf16.mxu0 %v16491_v31  ;;  %11783 = vmatprep.subr.bf16.mxu1 %v16494_v61  ;;  %v16553_v54 = vld [vmem:[%s21223_s3 + $0xc0] sm:$0xff]  }
 0x45e   : > { %v16552_v31 = vld [vmem:[%s21223_s3] sm:$0xff]  }
 0x45f   : > { %11585 = vmatmul.mubr.bf16.gmra.mrb[12].mxu0 %v10847_v3  ;;  %11751 = vmatmul.mubr.bf16.gmra.mrb[12].mxu1 %v10847_v3  ;;  %v16554_v61 = vld [vmem:[%s21223_s3 + $0x80] sm:$0xff]  }
 0x460   : > { %11618 = vmatpush1.bf16.msra.mxu0 %v16489_v18  ;;  %11784 = vmatpush1.bf16.msra.mxu1 %v16492_v14  ;;  %v16557_v18 = vld [vmem:[%s21223_s3 + $0xc8] sm:$0xff]  }
 0x461   : > { %11619 = vmatprep.subr.bf16.mxu0 %v16497_v23  ;;  %11785 = vmatprep.subr.bf16.mxu1 %v16500_v0  ;;  %v16648_v14 = vld [vmem:[%s16872_s12 + $0x68] ss:$16 sps:$4 sm:$0xff]   ;;  %v10844_v23 = vrot.slane %v16649_v63, 3 }
 0x462   : > { %11594 = vmatprep.mubr.bf16.mxu0 %v10857_v2  ;;  %11760 = vmatprep.mubr.bf16.mxu1 %v10857_v2  ;;  %v10834_v3 = vrot.slane %v16648_v14, 3  ;;  %v16556_v0 = vld [vmem:[%s21223_s3 + $0x8] sm:$0xff]  }
 0x463   : > { %v16558_v2 = vld [vmem:[%s21223_s3 + $0x88] sm:$0xff]  }
 0x464   : > { %11620 = vmatpush1.bf16.msra.mxu0 %v16495_v50  ;;  %11786 = vmatpush1.bf16.msra.mxu1 %v16498_v5  ;;  %v10835_v50 = vsel %vm10817_vm5, %v10825_v48, %v10834_v3  ;;  %v10845_v5 = vsel %vm10817_vm5, %v10836_v39, %v10844_v23 }
 0x465   : > { %11621 = vmatprep.subr.bf16.mxu0 %v16503_v49  ;;  %11787 = vmatprep.subr.bf16.mxu1 %v16506_v30  ;;  %v16562_v49 = vld [vmem:[%s21223_s3 + $0x90] sm:$0xff]   ;;  %v16563_v30 = vld [vmem:[%s21223_s3 + $0x58] sm:$0xff]  }
 0x467   : > { %11595 = vmatmul.mubr.bf16.gmra.mrb[16].mxu0 %v10855_v11  ;;  %11761 = vmatmul.mubr.bf16.gmra.mrb[16].mxu1 %v10855_v11  ;;  %v16564_v11 = vld [vmem:[%s21223_s3 + $0x18] sm:$0xff]  }
 0x468   : > { %11622 = vmatpush1.bf16.msra.mxu0 %v16501_v60  ;;  %11788 = vmatpush1.bf16.msra.mxu1 %v16504_v42  ;;  %v16651_v60 = vld [vmem:[%s16872_s12 + $0xac] ss:$16 sps:$4 sm:$0xff]  }
 0x469   : > { %11623 = vmatprep.subr.bf16.mxu0 %v16509_v8  ;;  %11789 = vmatprep.subr.bf16.mxu1 %v16512_v16  ;;  %v10852_v42 = vrot.slane %v16651_v60, 3  ;;  %v16566_v8 = vld [vmem:[%s21223_s3 + $0x98] sm:$0xff]   ;;  %v16567_v16 = vld [vmem:[%s21223_s3 + $0x60] sm:$0xff]  }
 0x46a   : > { %11637 = vmatprep.mubr.bf16.mxu0 %v10829_v17  ;;  %11803 = vmatprep.mubr.bf16.mxu1 %v10829_v17  ;;  %v16569_v17 = vld [vmem:[%s21223_s3 + $0xe0] sm:$0xff]  }
 0x46c   : > { %11624 = vmatpush1.bf16.msra.mxu0 %v16507_v28  ;;  %11790 = vmatpush1.bf16.msra.mxu1 %v16510_v19  ;;  %v10843_v28 = vsel %vm10817_vm5, %v10834_v3, %v10842_v10  ;;  %v10853_v19 = vsel %vm10817_vm5, %v10844_v23, %v10852_v42 }
 0x46d   : > { %11625 = vmatprep.subr.bf16.mxu0 %v16515_v20  ;;  %11791 = vmatprep.subr.bf16.mxu1 %v16518_v44  ;;  %v16568_v20 = vld [vmem:[%s21223_s3 + $0x20] sm:$0xff]  }
 0x46e   : > { %v16570_v44 = vld [vmem:[%s21223_s3 + $0xa0] sm:$0xff]  }
 0x470   : > { %11626 = vmatpush1.bf16.msra.mxu0 %v16513_v24  ;;  %11792 = vmatpush1.bf16.msra.mxu1 %v16516_v38  ;;  %v16571_v24 = vld [vmem:[%s21223_s3 + $0x68] sm:$0xff]  }
 0x471   : > { %11627 = vmatprep.subr.bf16.mxu0 %v16521_v26  ;;  %11793 = vmatprep.subr.bf16.mxu1 %v16524_v56  ;;  %v16573_v38 = vld [vmem:[%s21223_s3 + $0xe8] sm:$0xff]  }
 0x472   : > { %v16652_v26 = vld [vmem:[%s16872_s12 + $0xa8] ss:$16 sps:$4 sm:$0xff]  }
 0x473   : > { %v10850_v56 = vrot.slane %v16652_v26, 3 }
 0x474   : > { %11628 = vmatpush1.bf16.msra.mxu0 %v16519_v12  ;;  %11794 = vmatpush1.bf16.msra.mxu1 %v16522_v27  ;;  %v10860_v12 = vrot.slane %v20546_v52, 3  ;;  %v16572_v27 = vld [vmem:[%s21223_s3 + $0x28] sm:$0xff]   ;;  %v10858_v52 = vrot.slane %v20571_v13, 3  ;;  %v16578_v13 = vld [vmem:[%s21223_s3 + $0xb0] sm:$0xff]  }
 0x475   : > { %11629 = vmatprep.subr.bf16.mxu0 %v16527_v4  ;;  %11795 = vmatprep.subr.bf16.mxu1 %v16530_v53  ;;  %v16574_v4 = vld [vmem:[%s21223_s3 + $0xa8] sm:$0xff]   ;;  %v10851_v53 = vsel %vm10817_vm5, %v10842_v10, %v10850_v56 }
 0x478   : > { %11630 = vmatpush1.bf16.msra.mxu0 %v16525_v25  ;;  %11796 = vmatpush1.bf16.msra.mxu1 %v16528_v29  ;;  %v10861_v25 = vsel %vm10817_vm5, %v10852_v42, %v10860_v12  ;;  %v10859_v29 = vsel %vm10817_vm5, %v10850_v56, %v10858_v52 }
 0x479   : > { %11631 = vmatprep.subr.bf16.mxu0 %v16533_v33  ;;  %11797 = vmatprep.subr.bf16.mxu1 %v16536_v46  ;;  %v16575_v33 = vld [vmem:[%s21223_s3 + $0x70] sm:$0xff]  }
 0x47a   : > { %v16577_v46 = vld [vmem:[%s21223_s3 + $0xf0] sm:$0xff]  }
 0x47c   : > { %11632 = vmatpush1.bf16.msra.mxu0 %v16531_v32  ;;  %11798 = vmatpush1.bf16.msra.mxu1 %v16534_v35  ;;  %v16576_v32 = vld [vmem:[%s21223_s3 + $0x30] sm:$0xff]   ;;  %v16579_v35 = vld [vmem:[%s21223_s3 + $0x78] sm:$0xff]  }
 0x47d   : > { %11633 = vmatprep.subr.bf16.mxu0 %v16539_v34  ;;  %11799 = vmatprep.subr.bf16.mxu1 %v16542_v45  ;;  %v16581_v34 = vld [vmem:[%s21223_s3 + $0xf8] sm:$0xff]  }
 0x47e   : > { %v16580_v45 = vld [vmem:[%s21223_s3 + $0x38] sm:$0xff]  }
 0x480   : > { %11634 = vmatpush1.bf16.msra.mxu0 %v16537_v7  ;;  %11800 = vmatpush1.bf16.msra.mxu1 %v16540_v36  ;;  %v16582_v7 = vld [vmem:[%s21223_s3 + $0xb8] sm:$0xff]   ;;  %v11896_v36 = vlaneseq }
 0x481   : > { %11635 = vmatprep.subr.bf16.mxu0 %v16545_v57  ;;  %11801 = vmatprep.subr.bf16.mxu1 %v16548_v62 }
 0x482   : > { %v11897_v41 = vshrl.u32 %v11896_v36, 7 }
 0x484   : > { %11636 = vmatpush1.bf16.msra.mxu0 %v16543_v43  ;;  %11802 = vmatpush1.bf16.msra.mxu1 %v16546_v21  ;;  %v11898_v57 = vsub.s32 0, %v11897_v41  ;;  %v11906_v62 = vsub.s32 2, %v11897_v41  ;;  %v11894_v43 = vld [vmem:[%s21222_s2] sm:$0xf]  ;;  %v11902_v21 = vsub.s32 1, %v11897_v41  ;;  %v11910_v1 = vsub.s32 3, %v11897_v41 }
 0x485   : > { %13908 = vmatprep.subr.bf16.mxu0 %v16551_v37  ;;  %13954 = vmatprep.subr.bf16.mxu1 %v16553_v54 }
 0x486   : > { %v21076_v47 = vrot.slane %v11894_v43, %v11898_v57  ;;  %v21078_v48 = vrot.slane %v11894_v43, %v11906_v62  ;;  %v21081_v51 = vrot.slane %v11894_v43, %v11902_v21  ;;  %v21083_v39 = vrot.slane %v11894_v43, %v11910_v1 }
 0x487   : > { %11638 = vmatmul.mubr.bf16.vlgmr.msra.gmra.mrb[0].mxu0 %v10826_v6  ;;  %11804 = vmatmul.mubr.bf16.vlgmr.msra.gmra.mrb[0].mxu1 %v10826_v6 }
 0x488   : > { %11647 = vmatprep.mubr.bf16.mxu0 %v10837_v59  ;;  %11813 = vmatprep.mubr.bf16.mxu1 %v10837_v59 }
 0x489   : > { %13909 = vmatpush3.bf16.msra.mxu0 %v16552_v31  ;;  %13955 = vmatpush3.bf16.msra.mxu1 %v16554_v61 }
 0x48a   : > { %13910 = vmatprep.subr.bf16.mxu0 %v16555_v55  ;;  %13956 = vmatprep.subr.bf16.mxu1 %v16557_v18 }
 0x48d   : > { %13911 = vmatpush3.bf16.msra.mxu0 %v16556_v0  ;;  %13957 = vmatpush3.bf16.msra.mxu1 %v16558_v2 }
 0x48e   : > { %13912 = vmatprep.subr.bf16.mxu0 %v16559_v58  ;;  %13958 = vmatprep.subr.bf16.mxu1 %v16561_v15 }
 0x48f   : > { %11648 = vmatmul.mubr.bf16.gmra.mrb[4].mxu0 %v10835_v50  ;;  %11814 = vmatmul.mubr.bf16.gmra.mrb[4].mxu1 %v10835_v50 }
 0x490   : > { %11657 = vmatprep.mubr.bf16.mxu0 %v10845_v5  ;;  %11823 = vmatprep.mubr.bf16.mxu1 %v10845_v5 }
 0x491   : > { %13913 = vmatpush3.bf16.msra.mxu0 %v16560_v40  ;;  %13959 = vmatpush3.bf16.msra.mxu1 %v16562_v49 }
 0x492   : > { %13914 = vmatprep.subr.bf16.mxu0 %v16563_v30  ;;  %13960 = vmatprep.subr.bf16.mxu1 %v16565_v9 }
 0x495   : > { %13915 = vmatpush3.bf16.msra.mxu0 %v16564_v11  ;;  %13961 = vmatpush3.bf16.msra.mxu1 %v16566_v8 }
 0x496   : > { %13916 = vmatprep.subr.bf16.mxu0 %v16567_v16  ;;  %13962 = vmatprep.subr.bf16.mxu1 %v16569_v17 }
 0x497   : > { %11658 = vmatmul.mubr.bf16.gmra.mrb[8].mxu0 %v10843_v28  ;;  %11824 = vmatmul.mubr.bf16.gmra.mrb[8].mxu1 %v10843_v28 }
 0x498   : > { %11667 = vmatprep.mubr.bf16.mxu0 %v10853_v19  ;;  %11833 = vmatprep.mubr.bf16.mxu1 %v10853_v19 }
 0x499   : > { %13917 = vmatpush3.bf16.msra.mxu0 %v16568_v20  ;;  %13963 = vmatpush3.bf16.msra.mxu1 %v16570_v44 }
 0x49a   : > { %13918 = vmatprep.subr.bf16.mxu0 %v16571_v24  ;;  %13964 = vmatprep.subr.bf16.mxu1 %v16573_v38 }
 0x49d   : > { %13919 = vmatpush3.bf16.msra.mxu0 %v16572_v27  ;;  %13965 = vmatpush3.bf16.msra.mxu1 %v16574_v4 }
 0x49e   : > { %13920 = vmatprep.subr.bf16.mxu0 %v16575_v33  ;;  %13966 = vmatprep.subr.bf16.mxu1 %v16577_v46 }
 0x49f   : > { %11668 = vmatmul.mubr.bf16.gmra.mrb[12].mxu0 %v10851_v53  ;;  %11834 = vmatmul.mubr.bf16.gmra.mrb[12].mxu1 %v10851_v53 }
 0x4a0   : > { %11677 = vmatprep.mubr.bf16.mxu0 %v10861_v25  ;;  %11843 = vmatprep.mubr.bf16.mxu1 %v10861_v25 }
 0x4a1   : > { %13921 = vmatpush3.bf16.msra.mxu0 %v16576_v32  ;;  %13967 = vmatpush3.bf16.msra.mxu1 %v16578_v13 }
 0x4a2   : > { %13922 = vmatprep.subr.bf16.mxu0 %v16579_v35  ;;  %13968 = vmatprep.subr.bf16.mxu1 %v16581_v34 }
 0x4a5   : > { %13923 = vmatpush3.bf16.msra.mxu0 %v16580_v45  ;;  %13969 = vmatpush3.bf16.msra.mxu1 %v16582_v7 }
 0x4a7   : > { %11678 = vmatmul.mubr.bf16.gmra.mrb[16].mxu0 %v10859_v29  ;;  %11844 = vmatmul.mubr.bf16.gmra.mrb[16].mxu1 %v10859_v29 }
 0x55a   : > { %v11639_v37 = vpop.f32.mrb[0].mxu0  ;;  %v11805_v54 = vpop.f32.mrb[0].mxu1 }
 0x55b   : > { %v11916_v6 = vadd.f32 %v21076_v47, %v11639_v37  ;;  %v11918_v59 = vadd.f32 %v21078_v48, %v11805_v54  ;;  %v11641_v31 = vpop.f32.mrb[1].mxu0  ;;  %v11807_v61 = vpop.f32.mrb[1].mxu1 }
 0x55c   : > { %v11917_v55 = vadd.f32 %v21081_v51, %v11641_v31  ;;  %v11919_v18 = vadd.f32 %v21083_v39, %v11807_v61  ;;  %v11643_v14 = vpop.f32.mrb[2].mxu0  ;;  %v11809_v3 = vpop.f32.mrb[2].mxu1 }
 0x55d   : > { %v11956_v63 = vmax.f32 %v11916_v6, 0.0  ;;  %v11958_v23 = vmax.f32 %v11918_v59, 0.0  ;;  %v11920_v0 = vadd.f32 %v21076_v47, %v11643_v14  ;;  %v11922_v2 = vadd.f32 %v21078_v48, %v11809_v3  ;;  %v11645_v58 = vpop.f32.mrb[3].mxu0  ;;  %v11811_v15 = vpop.f32.mrb[3].mxu1 }
 0x55e   : > { %v11957_v50 = vmax.f32 %v11917_v55, 0.0  ;;  %v11959_v5 = vmax.f32 %v11919_v18, 0.0  ;;  %v11921_v40 = vadd.f32 %v21081_v51, %v11645_v58  ;;  %v11923_v49 = vadd.f32 %v21083_v39, %v11811_v15 }
 0x55f   : > { %11996 = vst [vmem:[%s21090_s16] sm:$0xff] %v11956_v63  ;;  %11998 = vst [vmem:[%s21090_s16 + $0x10] sm:$0xff] %v11958_v23  ;;  %v11960_v30 = vmax.f32 %v11920_v0, 0.0  ;;  %v11962_v9 = vmax.f32 %v11922_v2, 0.0 }
 0x560   : > { %11997 = vst [vmem:[%s21090_s16 + $0x8] sm:$0xff] %v11957_v50  ;;  %11999 = vst [vmem:[%s21090_s16 + $0x18] sm:$0xff] %v11959_v5  ;;  %v11961_v22 = vmax.f32 %v11921_v40, 0.0  ;;  %v11963_v10 = vmax.f32 %v11923_v49, 0.0 }
 0x561   : > { %12000 = vst [vmem:[%s21090_s16 + $0x20] sm:$0xff] %v11960_v30  ;;  %v12036_v60 = vpack.c.bf16 %v11960_v30, %v11956_v63  ;;  %12002 = vst [vmem:[%s21090_s16 + $0x30] sm:$0xff] %v11962_v9  ;;  %v12038_v42 = vpack.c.bf16 %v11962_v9, %v11958_v23 }
 0x562   : > { %12001 = vst [vmem:[%s21090_s16 + $0x28] sm:$0xff] %v11961_v22  ;;  %v12037_v11 = vpack.c.bf16 %v11961_v22, %v11957_v50  ;;  %12003 = vst [vmem:[%s21090_s16 + $0x38] sm:$0xff] %v11963_v10  ;;  %v12039_v8 = vpack.c.bf16 %v11963_v10, %v11959_v5  ;;  %v11649_v16 = vpop.f32.mrb[4].mxu0  ;;  %v11815_v17 = vpop.f32.mrb[4].mxu1 }
 0x563   : > { %v11924_v28 = vadd.f32 %v21076_v47, %v11649_v16  ;;  %v11926_v19 = vadd.f32 %v21078_v48, %v11815_v17  ;;  %v11651_v20 = vpop.f32.mrb[5].mxu0  ;;  %v11817_v44 = vpop.f32.mrb[5].mxu1 }
 0x564   : > { %v11925_v24 = vadd.f32 %v21081_v51, %v11651_v20  ;;  %v11927_v38 = vadd.f32 %v21083_v39, %v11817_v44  ;;  %v11653_v26 = vpop.f32.mrb[6].mxu0  ;;  %v11819_v56 = vpop.f32.mrb[6].mxu1  ;;  %12351 = vmatprep.mubr.bf16.mxu0 %v12037_v11  ;;  %12424 = vmatprep.mubr.bf16.mxu1 %v12039_v8 }
 0x565   : > { %v11964_v12 = vmax.f32 %v11924_v28, 0.0  ;;  %v11966_v27 = vmax.f32 %v11926_v19, 0.0  ;;  %v11928_v4 = vadd.f32 %v21076_v47, %v11653_v26  ;;  %v11930_v53 = vadd.f32 %v21078_v48, %v11819_v56  ;;  %v11655_v25 = vpop.f32.mrb[7].mxu0  ;;  %v11821_v52 = vpop.f32.mrb[7].mxu1  ;;  %12352 = vmatmul.mubr.bf16.vlgmr.msra.gmra.mrb[20].mxu0 %v12036_v60  ;;  %12425 = vmatmul.mubr.bf16.vlgmr.msra.gmra.mrb[20].mxu1 %v12038_v42 }
 0x566   : > { %v11965_v29 = vmax.f32 %v11925_v24, 0.0  ;;  %v11967_v33 = vmax.f32 %v11927_v38, 0.0  ;;  %v11929_v46 = vadd.f32 %v21081_v51, %v11655_v25  ;;  %v11931_v32 = vadd.f32 %v21083_v39, %v11821_v52 }
 0x567   : > { %12004 = vst [vmem:[%s21090_s16 + $0x40] sm:$0xff] %v11964_v12  ;;  %12006 = vst [vmem:[%s21090_s16 + $0x50] sm:$0xff] %v11966_v27  ;;  %v11968_v13 = vmax.f32 %v11928_v4, 0.0  ;;  %v11970_v35 = vmax.f32 %v11930_v53, 0.0 }
 0x568   : > { %12005 = vst [vmem:[%s21090_s16 + $0x48] sm:$0xff] %v11965_v29  ;;  %12007 = vst [vmem:[%s21090_s16 + $0x58] sm:$0xff] %v11967_v33  ;;  %v11969_v34 = vmax.f32 %v11929_v46, 0.0  ;;  %v11971_v45 = vmax.f32 %v11931_v32, 0.0 }
 0x569   : > { %12008 = vst [vmem:[%s21090_s16 + $0x60] sm:$0xff] %v11968_v13  ;;  %v12040_v7 = vpack.c.bf16 %v11968_v13, %v11964_v12  ;;  %12010 = vst [vmem:[%s21090_s16 + $0x70] sm:$0xff] %v11970_v35  ;;  %v12042_v36 = vpack.c.bf16 %v11970_v35, %v11966_v27 }
 0x56a   : > { %12009 = vst [vmem:[%s21090_s16 + $0x68] sm:$0xff] %v11969_v34  ;;  %v12041_v41 = vpack.c.bf16 %v11969_v34, %v11965_v29  ;;  %12011 = vst [vmem:[%s21090_s16 + $0x78] sm:$0xff] %v11971_v45  ;;  %v12043_v57 = vpack.c.bf16 %v11971_v45, %v11967_v33  ;;  %v11659_v62 = vpop.f32.mrb[8].mxu0  ;;  %v11825_v43 = vpop.f32.mrb[8].mxu1 }
 0x56b   : > { %v11932_v21 = vadd.f32 %v21076_v47, %v11659_v62  ;;  %v11934_v1 = vadd.f32 %v21078_v48, %v11825_v43  ;;  %v11661_v37 = vpop.f32.mrb[9].mxu0  ;;  %v11827_v54 = vpop.f32.mrb[9].mxu1 }
 0x56c   : > { %v11933_v6 = vadd.f32 %v21081_v51, %v11661_v37  ;;  %v11935_v59 = vadd.f32 %v21083_v39, %v11827_v54  ;;  %v11663_v31 = vpop.f32.mrb[10].mxu0  ;;  %v11829_v61 = vpop.f32.mrb[10].mxu1  ;;  %12359 = vmatprep.mubr.bf16.mxu0 %v12041_v41  ;;  %12432 = vmatprep.mubr.bf16.mxu1 %v12043_v57 }
 0x56d   : > { %v11972_v55 = vmax.f32 %v11932_v21, 0.0  ;;  %v11974_v18 = vmax.f32 %v11934_v1, 0.0  ;;  %v11936_v14 = vadd.f32 %v21076_v47, %v11663_v31  ;;  %v11938_v3 = vadd.f32 %v21078_v48, %v11829_v61  ;;  %v11665_v63 = vpop.f32.mrb[11].mxu0  ;;  %v11831_v23 = vpop.f32.mrb[11].mxu1  ;;  %12360 = vmatmul.mubr.bf16.gmra.mrb[24].mxu0 %v12040_v7  ;;  %12433 = vmatmul.mubr.bf16.gmra.mrb[24].mxu1 %v12042_v36 }
 0x56e   : > { %v11973_v0 = vmax.f32 %v11933_v6, 0.0  ;;  %v11975_v2 = vmax.f32 %v11935_v59, 0.0  ;;  %v11937_v58 = vadd.f32 %v21081_v51, %v11665_v63  ;;  %v11939_v15 = vadd.f32 %v21083_v39, %v11831_v23 }
 0x56f   : > { %12012 = vst [vmem:[%s21090_s16 + $0x80] sm:$0xff] %v11972_v55  ;;  %12014 = vst [vmem:[%s21090_s16 + $0x90] sm:$0xff] %v11974_v18  ;;  %v11976_v50 = vmax.f32 %v11936_v14, 0.0  ;;  %v11978_v5 = vmax.f32 %v11938_v3, 0.0 }
 0x570   : > { %12013 = vst [vmem:[%s21090_s16 + $0x88] sm:$0xff] %v11973_v0  ;;  %12015 = vst [vmem:[%s21090_s16 + $0x98] sm:$0xff] %v11975_v2  ;;  %v11977_v40 = vmax.f32 %v11937_v58, 0.0  ;;  %v11979_v49 = vmax.f32 %v11939_v15, 0.0 }
 0x571   : > { %12016 = vst [vmem:[%s21090_s16 + $0xa0] sm:$0xff] %v11976_v50  ;;  %v12044_v30 = vpack.c.bf16 %v11976_v50, %v11972_v55  ;;  %12018 = vst [vmem:[%s21090_s16 + $0xb0] sm:$0xff] %v11978_v5  ;;  %v12046_v9 = vpack.c.bf16 %v11978_v5, %v11974_v18 }
 0x572   : > { %12017 = vst [vmem:[%s21090_s16 + $0xa8] sm:$0xff] %v11977_v40  ;;  %v12045_v22 = vpack.c.bf16 %v11977_v40, %v11973_v0  ;;  %12019 = vst [vmem:[%s21090_s16 + $0xb8] sm:$0xff] %v11979_v49  ;;  %v12047_v10 = vpack.c.bf16 %v11979_v49, %v11975_v2  ;;  %v11669_v60 = vpop.f32.mrb[12].mxu0  ;;  %v11835_v42 = vpop.f32.mrb[12].mxu1  ;;  %v21173_v40 = vld [vmem:[%s21224_s4] ss:$0 sm:$0xff] }
 0x573   : > { %v11940_v11 = vadd.f32 %v21076_v47, %v11669_v60  ;;  %v11942_v8 = vadd.f32 %v21078_v48, %v11835_v42  ;;  %v11671_v16 = vpop.f32.mrb[13].mxu0  ;;  %v11837_v17 = vpop.f32.mrb[13].mxu1 }
 0x574   : > { %v11941_v28 = vadd.f32 %v21081_v51, %v11671_v16  ;;  %v11943_v19 = vadd.f32 %v21083_v39, %v11837_v17  ;;  %v11673_v20 = vpop.f32.mrb[14].mxu0  ;;  %v11839_v44 = vpop.f32.mrb[14].mxu1  ;;  %12367 = vmatprep.mubr.bf16.mxu0 %v12045_v22  ;;  %12440 = vmatprep.mubr.bf16.mxu1 %v12047_v10 }
 0x575   : > { %v11980_v24 = vmax.f32 %v11940_v11, 0.0  ;;  %v11982_v38 = vmax.f32 %v11942_v8, 0.0  ;;  %v11944_v26 = vadd.f32 %v21076_v47, %v11673_v20  ;;  %v11946_v56 = vadd.f32 %v21078_v48, %v11839_v44  ;;  %v11675_v12 = vpop.f32.mrb[15].mxu0  ;;  %v11841_v27 = vpop.f32.mrb[15].mxu1  ;;  %12368 = vmatmul.mubr.bf16.gmra.mrb[28].mxu0 %v12044_v30  ;;  %12441 = vmatmul.mubr.bf16.gmra.mrb[28].mxu1 %v12046_v9 }
 0x576   : > { %v11981_v4 = vmax.f32 %v11941_v28, 0.0  ;;  %v11983_v53 = vmax.f32 %v11943_v19, 0.0  ;;  %v11945_v25 = vadd.f32 %v21081_v51, %v11675_v12  ;;  %v11947_v52 = vadd.f32 %v21083_v39, %v11841_v27 }
 0x577   : > { %12020 = vst [vmem:[%s21090_s16 + $0xc0] sm:$0xff] %v11980_v24  ;;  %12022 = vst [vmem:[%s21090_s16 + $0xd0] sm:$0xff] %v11982_v38  ;;  %v11984_v29 = vmax.f32 %v11944_v26, 0.0  ;;  %v11986_v33 = vmax.f32 %v11946_v56, 0.0 }
 0x578   : > { %12021 = vst [vmem:[%s21090_s16 + $0xc8] sm:$0xff] %v11981_v4  ;;  %12023 = vst [vmem:[%s21090_s16 + $0xd8] sm:$0xff] %v11983_v53  ;;  %v11985_v46 = vmax.f32 %v11945_v25, 0.0  ;;  %v11987_v32 = vmax.f32 %v11947_v52, 0.0 }
 0x579   : > { %12024 = vst [vmem:[%s21090_s16 + $0xe0] sm:$0xff] %v11984_v29  ;;  %v12048_v13 = vpack.c.bf16 %v11984_v29, %v11980_v24  ;;  %12026 = vst [vmem:[%s21090_s16 + $0xf0] sm:$0xff] %v11986_v33  ;;  %v12050_v35 = vpack.c.bf16 %v11986_v33, %v11982_v38 }
 0x57a   : > { %12025 = vst [vmem:[%s21090_s16 + $0xe8] sm:$0xff] %v11985_v46  ;;  %v12049_v34 = vpack.c.bf16 %v11985_v46, %v11981_v4  ;;  %12027 = vst [vmem:[%s21090_s16 + $0xf8] sm:$0xff] %v11987_v32  ;;  %v12051_v45 = vpack.c.bf16 %v11987_v32, %v11983_v53  ;;  %v11679_v7 = vpop.f32.mrb[16].mxu0  ;;  %v11845_v36 = vpop.f32.mrb[16].mxu1 }
 0x57b   : > { %v11948_v41 = vadd.f32 %v21076_v47, %v11679_v7  ;;  %v11950_v57 = vadd.f32 %v21078_v48, %v11845_v36  ;;  %v11681_v62 = vpop.f32.mrb[17].mxu0  ;;  %v11847_v43 = vpop.f32.mrb[17].mxu1 }
 0x57c   : > { %v11949_v21 = vadd.f32 %v21081_v51, %v11681_v62  ;;  %v11951_v1 = vadd.f32 %v21083_v39, %v11847_v43  ;;  %v11683_v37 = vpop.f32.mrb[18].mxu0  ;;  %v11849_v54 = vpop.f32.mrb[18].mxu1  ;;  %12375 = vmatprep.mubr.bf16.mxu0 %v12049_v34  ;;  %12448 = vmatprep.mubr.bf16.mxu1 %v12051_v45 }
 0x57d   : > { %v11988_v6 = vmax.f32 %v11948_v41, 0.0  ;;  %v11990_v59 = vmax.f32 %v11950_v57, 0.0  ;;  %v11952_v31 = vadd.f32 %v21076_v47, %v11683_v37  ;;  %v11954_v61 = vadd.f32 %v21078_v48, %v11849_v54  ;;  %v11685_v55 = vpop.f32.mrb[19].mxu0  ;;  %v11851_v18 = vpop.f32.mrb[19].mxu1  ;;  %12376 = vmatmul.mubr.bf16.gmra.mrb[32].mxu0 %v12048_v13  ;;  %12449 = vmatmul.mubr.bf16.gmra.mrb[32].mxu1 %v12050_v35 }
 0x57e   : > { %v11989_v14 = vmax.f32 %v11949_v21, 0.0  ;;  %v11991_v3 = vmax.f32 %v11951_v1, 0.0  ;;  %v11953_v63 = vadd.f32 %v21081_v51, %v11685_v55  ;;  %v11955_v23 = vadd.f32 %v21083_v39, %v11851_v18 }
 0x57f   : > { %12028 = vst [vmem:[%s21090_s16 + $0x100] sm:$0xff] %v11988_v6  ;;  %12030 = vst [vmem:[%s21090_s16 + $0x110] sm:$0xff] %v11990_v59  ;;  %v11992_v0 = vmax.f32 %v11952_v31, 0.0  ;;  %v11994_v47 = vmax.f32 %v11954_v61, 0.0 }
 0x580   : > { %12029 = vst [vmem:[%s21090_s16 + $0x108] sm:$0xff] %v11989_v14  ;;  %12031 = vst [vmem:[%s21090_s16 + $0x118] sm:$0xff] %v11991_v3  ;;  %v11993_v48 = vmax.f32 %v11953_v63, 0.0  ;;  %v11995_v2 = vmax.f32 %v11955_v23, 0.0 }
 0x581   : > { %12032 = vst [vmem:[%s21090_s16 + $0x120] sm:$0xff] %v11992_v0  ;;  %v12052_v58 = vpack.c.bf16 %v11992_v0, %v11988_v6  ;;  %12034 = vst [vmem:[%s21090_s16 + $0x130] sm:$0xff] %v11994_v47  ;;  %v12054_v15 = vpack.c.bf16 %v11994_v47, %v11990_v59 }
 0x582   : > { %12033 = vst [vmem:[%s21090_s16 + $0x128] sm:$0xff] %v11993_v48  ;;  %v12053_v50 = vpack.c.bf16 %v11993_v48, %v11989_v14  ;;  %12035 = vst [vmem:[%s21090_s16 + $0x138] sm:$0xff] %v11995_v2  ;;  %v12055_v51 = vpack.c.bf16 %v11995_v2, %v11991_v3 }
 0x584   : > { %12383 = vmatprep.mubr.bf16.mxu0 %v12053_v50  ;;  %12456 = vmatprep.mubr.bf16.mxu1 %v12055_v51 }
 0x585   : > { %12384 = vmatmul.mubr.bf16.gmra.mrb[36].mxu0 %v12052_v58  ;;  %12457 = vmatmul.mubr.bf16.gmra.mrb[36].mxu1 %v12054_v15 }
 0x638   : > { %v13924_v39 = vpop.f32.mrb[20].mxu0  ;;  %v13970_v5 = vpop.f32.mrb[20].mxu1 }
 0x639   : > { %v13925_v49 = vpop.f32.mrb[21].mxu0  ;;  %v13971_v30 = vpop.f32.mrb[21].mxu1 }
 0x63a   : > { %v13926_v9 = vadd.f32 %v13925_v49, %v13924_v39  ;;  %v13972_v22 = vadd.f32 %v13971_v30, %v13970_v5  ;;  %v13927_v10 = vpop.f32.mrb[22].mxu0  ;;  %v13973_v60 = vpop.f32.mrb[22].mxu1 }
 0x63b   : > { %v13928_v42 = vpop.f32.mrb[23].mxu0  ;;  %v13974_v11 = vpop.f32.mrb[23].mxu1 }
 0x63c   : > { %v12354_v8 = vadd.f32 %v13926_v9, %v21173_v40  ;;  %v13929_v16 = vadd.f32 %v13928_v42, %v13927_v10  ;;  %v13975_v17 = vadd.f32 %v13974_v11, %v13973_v60 }
 0x63e   : > { %v12427_v28 = vadd.f32 %v13972_v22, %v12354_v8  ;;  %v12357_v19 = vadd.f32 %v13929_v16, %v21173_v40 }
 0x640   : > { %12466 = vst.msk [vmem:[%s21180_s26] sm:$0xff] %vm12465_vm6, %v12427_v28  ;;  %v12430_v20 = vadd.f32 %v13975_v17, %v12357_v19  ;;  %v13930_v44 = vpop.f32.mrb[24].mxu0  ;;  %v13976_v24 = vpop.f32.mrb[24].mxu1 }
 0x641   : > { %v13931_v38 = vpop.f32.mrb[25].mxu0  ;;  %v13977_v26 = vpop.f32.mrb[25].mxu1 }
 0x642   : > { %12467 = vst.msk [vmem:[%s21180_s26 + $0x8] sm:$0xff] %vm12465_vm6, %v12430_v20  ;;  %v13932_v56 = vadd.f32 %v13931_v38, %v13930_v44  ;;  %v13978_v12 = vadd.f32 %v13977_v26, %v13976_v24  ;;  %v13933_v27 = vpop.f32.mrb[26].mxu0  ;;  %v13979_v4 = vpop.f32.mrb[26].mxu1 }
 0x643   : > { %v13934_v53 = vpop.f32.mrb[27].mxu0  ;;  %v13980_v25 = vpop.f32.mrb[27].mxu1 }
 0x644   : > { %v12362_v52 = vadd.f32 %v13932_v56, %v21173_v40  ;;  %v13935_v29 = vadd.f32 %v13934_v53, %v13933_v27  ;;  %v13981_v33 = vadd.f32 %v13980_v25, %v13979_v4 }
 0x646   : > { %v12435_v46 = vadd.f32 %v13978_v12, %v12362_v52  ;;  %v12365_v32 = vadd.f32 %v13935_v29, %v21173_v40 }
 0x648   : > { %12468 = vst.msk [vmem:[%s21180_s26 + $0x10] sm:$0xff] %vm12465_vm6, %v12435_v46  ;;  %v12438_v13 = vadd.f32 %v13981_v33, %v12365_v32  ;;  %v13936_v35 = vpop.f32.mrb[28].mxu0  ;;  %v13982_v34 = vpop.f32.mrb[28].mxu1 }
 0x649   : > { %v13937_v45 = vpop.f32.mrb[29].mxu0  ;;  %v13983_v7 = vpop.f32.mrb[29].mxu1 }
 0x64a   : > { %12469 = vst.msk [vmem:[%s21180_s26 + $0x18] sm:$0xff] %vm12465_vm6, %v12438_v13  ;;  %v13938_v36 = vadd.f32 %v13937_v45, %v13936_v35  ;;  %v13984_v41 = vadd.f32 %v13983_v7, %v13982_v34  ;;  %v13939_v57 = vpop.f32.mrb[30].mxu0  ;;  %v13985_v62 = vpop.f32.mrb[30].mxu1 }
 0x64b   : > { %v13940_v43 = vpop.f32.mrb[31].mxu0  ;;  %v13986_v21 = vpop.f32.mrb[31].mxu1 }
 0x64c   : > { %v12370_v1 = vadd.f32 %v13938_v36, %v21173_v40  ;;  %v13941_v37 = vadd.f32 %v13940_v43, %v13939_v57  ;;  %v13987_v54 = vadd.f32 %v13986_v21, %v13985_v62 }
 0x64e   : > { %v12443_v6 = vadd.f32 %v13984_v41, %v12370_v1  ;;  %v12373_v59 = vadd.f32 %v13941_v37, %v21173_v40 }
 0x650   : > { %12470 = vst.msk [vmem:[%s21180_s26 + $0x20] sm:$0xff] %vm12465_vm6, %v12443_v6  ;;  %v12446_v31 = vadd.f32 %v13987_v54, %v12373_v59  ;;  %v13942_v61 = vpop.f32.mrb[32].mxu0  ;;  %v13988_v55 = vpop.f32.mrb[32].mxu1 }
 0x651   : > { %v13943_v18 = vpop.f32.mrb[33].mxu0  ;;  %v13989_v14 = vpop.f32.mrb[33].mxu1 }
 0x652   : > { %12471 = vst.msk [vmem:[%s21180_s26 + $0x28] sm:$0xff] %vm12465_vm6, %v12446_v31  ;;  %v13944_v3 = vadd.f32 %v13943_v18, %v13942_v61  ;;  %v13990_v63 = vadd.f32 %v13989_v14, %v13988_v55  ;;  %v13945_v23 = vpop.f32.mrb[34].mxu0  ;;  %v13991_v0 = vpop.f32.mrb[34].mxu1 }
 0x653   : > { %v13946_v47 = vpop.f32.mrb[35].mxu0  ;;  %v13992_v48 = vpop.f32.mrb[35].mxu1 }
 0x654   : > { %v12378_v2 = vadd.f32 %v13944_v3, %v21173_v40  ;;  %v13947_v58 = vadd.f32 %v13946_v47, %v13945_v23  ;;  %v13993_v15 = vadd.f32 %v13992_v48, %v13991_v0 }
 0x656   : > { %v12451_v50 = vadd.f32 %v13990_v63, %v12378_v2  ;;  %v12381_v51 = vadd.f32 %v13947_v58, %v21173_v40 }
 0x658   : > { %12472 = vst.msk [vmem:[%s21180_s26 + $0x30] sm:$0xff] %vm12465_vm6, %v12451_v50  ;;  %v12454_v39 = vadd.f32 %v13993_v15, %v12381_v51  ;;  %v13948_v5 = vpop.f32.mrb[36].mxu0  ;;  %v13994_v49 = vpop.f32.mrb[36].mxu1 }
 0x659   : > { %v13949_v30 = vpop.f32.mrb[37].mxu0  ;;  %v13995_v9 = vpop.f32.mrb[37].mxu1 }
 0x65a   : > { %12473 = vst.msk [vmem:[%s21180_s26 + $0x38] sm:$0xff] %vm12465_vm6, %v12454_v39  ;;  %v13950_v22 = vadd.f32 %v13949_v30, %v13948_v5  ;;  %v13996_v10 = vadd.f32 %v13995_v9, %v13994_v49  ;;  %v13951_v60 = vpop.f32.mrb[38].mxu0  ;;  %v13997_v42 = vpop.f32.mrb[38].mxu1 }
 0x65b   : > { %v13952_v11 = vpop.f32.mrb[39].mxu0  ;;  %v13998_v8 = vpop.f32.mrb[39].mxu1 }
 0x65c   : > { %v12386_v16 = vadd.f32 %v13950_v22, %v21173_v40  ;;  %v13953_v17 = vadd.f32 %v13952_v11, %v13951_v60  ;;  %v13999_v28 = vadd.f32 %v13998_v8, %v13997_v42 }
 0x65e   : > { %v12459_v19 = vadd.f32 %v13996_v10, %v12386_v16  ;;  %v12389_v20 = vadd.f32 %v13953_v17, %v21173_v40 }
 0x660   : > { %12474 = vst.msk [vmem:[%s21180_s26 + $0x40] sm:$0xff] %vm12465_vm6, %v12459_v19  ;;  %v12462_v44 = vadd.f32 %v13999_v28, %v12389_v20 }
 0x662   : > { %12475 = vst.msk [vmem:[%s21180_s26 + $0x48] sm:$0xff] %vm12465_vm6, %v12462_v44 }
 0x663 PF: > { %s17_s23 = sadd.s32 1, %s16675_s23   ;;  %s21227_s21 = smov %s16671_s22 }
 0x664   : > { %p14_p5 = scmp.ge.s32.totalorder %s17_s23, 4   ;;  %s21228_s22 = smov %s21230_s24 }
 0x666   :  { %16 = sbr.rel (!%p14_p5) target bundleno = 2 (0x2), region = 82 }

</bundles_post_ra>
